<compile_context>
chip_gen: v7x
topology: tpu7x:2x2x1
jax: 0.10.0
libtpu: 0.0.40
codegen_flags: <defaults>
</compile_context>

<pallas_src>
import functools

import jax
import jax.numpy as jnp
from jax.experimental import pallas as pl
from jax.experimental.pallas import tpu as pltpu


# ---------------------------------------------------------------------------
# helpers
# ---------------------------------------------------------------------------

def _round_up(a, b):
    return (a + b - 1) // b * b


def _vmem_limit(*byte_counts):
    """Explicit scoped-VMEM limit sized from the kernel's blocks (+ headroom),
    clamped so it fits every TPU generation (v7x physical VMEM = 64 MiB)."""
    est = 2 * int(sum(byte_counts)) + (2 << 20)
    return int(min(max(est, 16 << 20), 56 << 20))


# ---------------------------------------------------------------------------
# Kernel 1: PoolerNeighbor as a per-ROI interpolation matmul (scalar prefetch)
# ---------------------------------------------------------------------------

def _roi_interp_kernel(bidx_ref, w_ref, f_ref, o_ref):
    # w_ref: (1, P, HW) precomputed bilinear/average weights for one ROI
    # f_ref: (1, HW, C) feature slab of that ROI's image (data-dependent fetch)
    # o_ref: (1, P, C)  pooled features
    o_ref[0] = jnp.dot(w_ref[0], f_ref[0], preferred_element_type=jnp.float32)


def roi_interp_pool(w_interp, feat_hwc, bidx):
    r2, p, hw = w_interp.shape
    _, _, c = feat_hwc.shape
    grid_spec = pltpu.PrefetchScalarGridSpec(
        num_scalar_prefetch=1,
        grid=(r2,),
        in_specs=[
            pl.BlockSpec((1, p, hw), lambda r, b: (r, 0, 0)),
            # only the needed image's (HW, C) slab is DMA'd, selected by the
            # scalar-prefetched per-ROI batch index (no feat[bidx] gather).
            pl.BlockSpec((1, hw, c), lambda r, b: (b[r], 0, 0)),
        ],
        out_specs=pl.BlockSpec((1, p, c), lambda r, b: (r, 0, 0)),
    )
    return pl.pallas_call(
        _roi_interp_kernel,
        out_shape=jax.ShapeDtypeStruct((r2, p, c), jnp.float32),
        grid_spec=grid_spec,
        compiler_params=pltpu.CompilerParams(
            dimension_semantics=("arbitrary",),
            vmem_limit_bytes=_vmem_limit(p * hw * 4, hw * c * 4, p * c * 4),
        ),
    )(bidx, w_interp, feat_hwc)


def _build_interp_weights(rois, h, w, res, spatial_scale, sampling_ratio, expand):
    """(R, res*res, H*W) weights s.t. pooled[r] = W[r] @ feat[b_r]  (HW, C).

    TODO(synk): PoolerNeighbor source unavailable; reconstructed as a box expansion
    (expand = neighbor_expand * roi_expand around the box center) followed by
    standard bilinear RoIAlign (samples outside the map contribute zero, no
    aligned=-0.5 offset), factorized per axis.
    """
    ratio = sampling_ratio
    x1b, y1b, x2b, y2b = rois[:, 1], rois[:, 2], rois[:, 3], rois[:, 4]
    cx, cy = (x1b + x2b) * 0.5, (y1b + y2b) * 0.5
    bw, bh = (x2b - x1b) * expand, (y2b - y1b) * expand
    x0 = (cx - 0.5 * bw) * spatial_scale
    y0 = (cy - 0.5 * bh) * spatial_scale
    bin_w = jnp.maximum(bw * spatial_scale, 1.0) / res
    bin_h = jnp.maximum(bh * spatial_scale, 1.0) / res

    def axis_weights(start, bin_sz, size):
        s = (start[:, None, None]
             + (jnp.arange(res, dtype=jnp.float32)[None, :, None]
                + (jnp.arange(ratio, dtype=jnp.float32)[None, None, :] + 0.5) / ratio)
             * bin_sz[:, None, None])                         # (R, res, ratio)
        valid = (s >= -1.0) & (s <= size)
        sc = jnp.clip(s, 0.0, size - 1.0)
        i0 = jnp.floor(sc).astype(jnp.int32)
        i1 = jnp.minimum(i0 + 1, size - 1)
        w1 = sc - i0.astype(jnp.float32)
        w0 = 1.0 - w1
        grid = jnp.arange(size)
        oh0 = (grid[None, None, None, :] == i0[..., None]).astype(jnp.float32)
        oh1 = (grid[None, None, None, :] == i1[..., None]).astype(jnp.float32)
        wmat = (oh0 * w0[..., None] + oh1 * w1[..., None]) * valid[..., None]
        return wmat.mean(axis=2)                              # (R, res, size)

    ay = axis_weights(y0, bin_h, h)                           # (R, res, H)
    ax = axis_weights(x0, bin_w, w)                           # (R, res, W)
    full = jnp.einsum("rph,rqw->rpqhw", ay, ax)
    return full.reshape(rois.shape[0], res * res, h * w)


# ---------------------------------------------------------------------------
# Kernel 2: fused FPNUpChannels (top 1x1+BN || 3x3+BN+ReLU -> 1x1+BN ; add ; ReLU)
#           + AvgPool2d(res, res) epilogue.
#
# Each ROI's zero-padded (res+2)x(res+2) NHWC patch is flattened row-major into
# `rpr` rows (rows beyond (res+2)^2 are zero).  The 3x3 conv is 9 accumulated
# 2-D MXU dots over statically shifted row-slices of that layout (no im2col);
# a conv output for position (y, x) lands at row y*(res+2)+x.  A masked-mean
# matmul (pool_ref) then selects each ROI's res*res valid rows and averages
# them -> a lane-dense (TR, Cp) output block.
# ---------------------------------------------------------------------------

def _fpn_up_pool_kernel(x_ref, w3_ref, wt_ref, wb_ref, s3_ref, b3_ref,
                        st_ref, bt_ref, sb_ref, bb_ref, pool_ref, o_ref,
                        *, pr, L):
    cin = x_ref.shape[1]
    # 3x3 conv, padding=1, no bias: 9 shifted slices accumulated in f32.
    acc3 = jnp.zeros((L, cin), jnp.float32)
    for ky in range(3):
        for kx in range(3):
            off = ky * pr + kx
            acc3 = acc3 + jnp.dot(x_ref[off:off + L, :], w3_ref[ky * 3 + kx],
                                  preferred_element_type=jnp.float32)
    mid = jnp.maximum(acc3 * s3_ref[...] + b3_ref[...], 0.0)            # BN + ReLU
    bot = (jnp.dot(mid.astype(wb_ref.dtype), wb_ref[...],
                   preferred_element_type=jnp.float32)
           * sb_ref[...] + bb_ref[...])                                  # 1x1 + BN
    top = (jnp.dot(x_ref[pr + 1:pr + 1 + L, :], wt_ref[...],
                   preferred_element_type=jnp.float32)
           * st_ref[...] + bt_ref[...])                                  # 1x1 + BN
    out1 = jnp.maximum(top + bot, 0.0)                                   # add + ReLU
    # fused AvgPool2d(res, res): masked mean over each ROI's res*res valid rows
    o_ref[...] = jnp.dot(pool_ref[...], out1, preferred_element_type=jnp.float32)


def fpn_up_channels_avgpool(pooled_conv, params, res, tr=8,
                            compute_dtype=jnp.bfloat16):
    r, p, cin = pooled_conv.shape
    assert p == res * res
    pr = res + 2                                   # zero-padded spatial width
    rpr = _round_up(pr * pr, 8)                    # rows per ROI (sublane aligned)
    r_pad = _round_up(r, tr)
    max_off = 2 * pr + 2
    l_low = (tr - 1) * rpr + (res - 1) * pr + res  # last valid row + 1
    l_high = tr * rpr - max_off
    L = (l_high // 8) * 8
    assert l_low <= L <= l_high

    cout = params["w_top"].shape[1]
    cp = _round_up(cout, 128)                      # lane-dense output width

    img = pooled_conv.reshape(r, res, res, cin)
    img = jnp.pad(img, ((0, r_pad - r), (1, 1), (1, 1), (0, 0)))
    flat = img.reshape(r_pad, pr * pr, cin)
    flat = jnp.pad(flat, ((0, 0), (0, rpr - pr * pr), (0, 0)))
    xflat = flat.reshape(r_pad * rpr, cin).astype(compute_dtype)

    w3 = params["w_3x3"].astype(compute_dtype)                               # (9,Ci,Ci)
    wt = jnp.pad(params["w_top"], ((0, 0), (0, cp - cout))).astype(compute_dtype)
    wb = jnp.pad(params["w_bot"], ((0, 0), (0, cp - cout))).astype(compute_dtype)
    s3 = params["s_3x3"].reshape(1, cin).astype(jnp.float32)
    b3 = params["b_3x3"].reshape(1, cin).astype(jnp.float32)

    def padv(v):
        return jnp.pad(v.reshape(1, cout),
                       ((0, 0), (0, cp - cout))).astype(jnp.float32)

    st, bt = padv(params["s_top"]), padv(params["b_top"])
    sb, bb = padv(params["s_bot"]), padv(params["b_bot"])

    # (TR, L) masked-mean matrix selecting each ROI's res*res valid rows.
    q = jnp.arange(L)
    roi_q, p_q = q // rpr, q % rpr
    yq, xq = p_q // pr, p_q % pr
    valid = (p_q < pr * pr) & (yq < res) & (xq < res)
    pool = jnp.where(
        (roi_q[None, :] == jnp.arange(tr)[:, None]) & valid[None, :],
        1.0 / (res * res), 0.0).astype(jnp.float32)

    nblk = tr * rpr
    kernel = functools.partial(_fpn_up_pool_kernel, pr=pr, L=L)
    out = pl.pallas_call(
        kernel,
        out_shape=jax.ShapeDtypeStruct((r_pad, cp), jnp.float32),
        grid=(r_pad // tr,),
        in_specs=[
            pl.BlockSpec((nblk, cin), lambda i: (i, 0)),
            pl.BlockSpec((9, cin, cin), lambda i: (0, 0, 0)),
            pl.BlockSpec((cin, cp), lambda i: (0, 0)),
            pl.BlockSpec((cin, cp), lambda i: (0, 0)),
            pl.BlockSpec((1, cin), lambda i: (0, 0)),
            pl.BlockSpec((1, cin), lambda i: (0, 0)),
            pl.BlockSpec((1, cp), lambda i: (0, 0)),
            pl.BlockSpec((1, cp), lambda i: (0, 0)),
            pl.BlockSpec((1, cp), lambda i: (0, 0)),
            pl.BlockSpec((1, cp), lambda i: (0, 0)),
            pl.BlockSpec((tr, L), lambda i: (0, 0)),
        ],
        out_specs=pl.BlockSpec((tr, cp), lambda i: (i, 0)),
        compiler_params=pltpu.CompilerParams(
            dimension_semantics=("parallel",),
            vmem_limit_bytes=_vmem_limit(
                nblk * cin * 2, 9 * cin * cin * 2, 2 * cin * cp * 2,
                6 * cp * 4, tr * L * 4, tr * cp * 4,
                5 * L * max(cin, cp) * 4),      # in-kernel f32 temporaries
        ),
    )(xflat, w3, wt, wb, s3, b3, st, bt, sb, bb, pool)
    return out[:r, :cout]


# ---------------------------------------------------------------------------
# Kernel 3: tiled, pipelined matmul + bias (+ReLU) for the fc6/fc7 head.
# ---------------------------------------------------------------------------

def _mm_bias_kernel(x_ref, w_ref, b_ref, o_ref, acc_ref, *, relu):
    @pl.when(pl.program_id(2) == 0)
    def _():
        acc_ref[...] = jnp.zeros_like(acc_ref)

    acc_ref[...] += jnp.dot(x_ref[...], w_ref[...],
                            preferred_element_type=jnp.float32)

    @pl.when(pl.program_id(2) == pl.num_programs(2) - 1)
    def _():
        res = acc_ref[...] + b_ref[...]
        if relu:
            res = jnp.maximum(res, 0.0)
        o_ref[...] = res.astype(o_ref.dtype)


def matmul_bias_act(x, w, b, relu=False, tm=256, tn=256, tk=512,
                    compute_dtype=jnp.bfloat16):
    """relu?(x @ w + b): (M, N, K) grid, f32 VMEM accumulator, bf16 MXU inputs.
    Default 256-wide tiles suit v6e/v7x; tiles clamp for small problems
    (v5e users can pass tm=tn=128)."""
    m, k = x.shape
    _, n = w.shape
    tm = min(tm, _round_up(m, 8))
    tn = min(tn, _round_up(n, 128))
    tk = min(tk, _round_up(k, 128))
    mp, np_, kp = _round_up(m, tm), _round_up(n, tn), _round_up(k, tk)

    xp = jnp.pad(x.astype(compute_dtype), ((0, mp - m), (0, kp - k)))
    wp = jnp.pad(w.astype(compute_dtype), ((0, kp - k), (0, np_ - n)))
    bp = jnp.pad(b.reshape(1, n).astype(jnp.float32), ((0, 0), (0, np_ - n)))

    out = pl.pallas_call(
        functools.partial(_mm_bias_kernel, relu=relu),
        out_shape=jax.ShapeDtypeStruct((mp, np_), jnp.float32),
        grid=(mp // tm, np_ // tn, kp // tk),
        in_specs=[
            pl.BlockSpec((tm, tk), lambda i, j, kk: (i, kk)),
            pl.BlockSpec((tk, tn), lambda i, j, kk: (kk, j)),
            pl.BlockSpec((1, tn), lambda i, j, kk: (0, j)),
        ],
        out_specs=pl.BlockSpec((tm, tn), lambda i, j, kk: (i, j)),
        scratch_shapes=[pltpu.VMEM((tm, tn), jnp.float32)],
        compiler_params=pltpu.CompilerParams(
            dimension_semantics=("parallel", "parallel", "arbitrary"),
            vmem_limit_bytes=_vmem_limit(
                tm * tk * 2, tk * tn * 2, tn * 4, 2 * tm * tn * 4),
        ),
    )(xp, wp, bp)
    return out[:m, :n]


# ---------------------------------------------------------------------------
# Full FPN2MLPFeatureExtractorNeighbor forward
# ---------------------------------------------------------------------------

def fpn2mlp_feature_extractor_neighbor(feat, rois, params, cfg):
    res = cfg["resolution"]
    assert res == 7, "module hardcodes AvgPool2d(kernel_size=7, stride=7)"
    b, cin, h, w = feat.shape
    r = rois.shape[0]
    bidx = rois[:, 0].astype(jnp.int32)

    # both poolers (conv / fc neighbor expands) batched into ONE Pallas call
    w_conv = _build_interp_weights(rois, h, w, res, cfg["scale"],
                                   cfg["sampling_ratio"],
                                   cfg["conv_neighbor_expand"] * cfg["roi_expand"])
    w_fc = _build_interp_weights(rois, h, w, res, cfg["scale"],
                                 cfg["sampling_ratio"],
                                 cfg["fc_neighbor_expand"] * cfg["roi_expand"])
    feat_hwc = jnp.transpose(feat, (0, 2, 3, 1)).reshape(b, h * w, cin)
    pooled = roi_interp_pool(jnp.concatenate([w_conv, w_fc], axis=0),
                             feat_hwc,
                             jnp.concatenate([bidx, bidx], axis=0))
    pooled_conv, pooled_fc = pooled[:r], pooled[r:]        # (R, res*res, Cin)

    # conv branch: FPNUpChannels + AvgPool2d(7,7) fused; nonlocal stacks are 0
    # so x_cls and x_reg are the same tensor (computed once, aliased).
    # TODO(synk): NONLocalBlock2D_Group definition not provided; config uses 0 stacks.
    x_pool = fpn_up_channels_avgpool(pooled_conv, params, res)   # (R, Cout)
    x_cls = x_pool
    x_reg = x_pool

    # identity branch: torch x.view(N, -1) flattens NCHW (channel-major); pooled
    # layout is (p, c)-major, so permute the fc6 weight rows once instead of
    # transposing the activations.
    rep = params["w_fc6"].shape[1]
    w_fc6_pmajor = (params["w_fc6"]
                    .reshape(cin, res * res, rep)
                    .transpose(1, 0, 2)
                    .reshape(res * res * cin, rep))
    identity = pooled_fc.reshape(r, res * res * cin)
    identity = matmul_bias_act(identity, w_fc6_pmajor, params["b_fc6"], relu=True)
    identity = matmul_bias_act(identity, params["w_fc7"], params["b_fc7"], relu=True)
    return x_cls, x_reg, identity


# ---------------------------------------------------------------------------
# Deterministic synthetic parameters (BatchNorm folded to scale/bias, eval mode)
# ---------------------------------------------------------------------------

def make_params(key, cin, cout, res, rep):
    ks = jax.random.split(key, 16)

    def bn_fold(kg, kb, km, kv, c):
        gamma = 1.0 + 0.1 * jax.random.normal(kg, (c,), jnp.float32)
        beta = 0.1 * jax.random.normal(kb, (c,), jnp.float32)
        mean = 0.1 * jax.random.normal(km, (c,), jnp.float32)
        var = jnp.abs(jax.random.normal(kv, (c,), jnp.float32)) + 0.5
        scale = gamma / jnp.sqrt(var + 1e-5)
        bias = beta - mean * scale
        return scale, bias

    p = {}
    p["w_top"] = 0.1 * jax.random.normal(ks[0], (cin, cout), jnp.float32)
    p["s_top"], p["b_top"] = bn_fold(ks[1], ks[2], ks[3], ks[4], cout)

    # 3x3 conv weights stored as (ky*3+kx, cin_in, cin_out)
    p["w_3x3"] = 0.1 * jax.random.normal(ks[5], (9, cin, cin), jnp.float32)
    p["s_3x3"], p["b_3x3"] = bn_fold(ks[6], ks[7], ks[8], ks[9], cin)

    p["w_bot"] = 0.1 * jax.random.normal(ks[10], (cin, cout), jnp.float32)
    p["s_bot"], p["b_bot"] = bn_fold(ks[11], ks[12], ks[13], ks[14], cout)

    k6, k6b, k7, k7b = jax.random.split(ks[15], 4)
    in_size = cin * res * res
    p["w_fc6"] = 0.05 * jax.random.normal(k6, (in_size, rep), jnp.float32)
    p["b_fc6"] = 0.01 * jax.random.normal(k6b, (rep,), jnp.float32)
    p["w_fc7"] = 0.05 * jax.random.normal(k7, (rep, rep), jnp.float32)
    p["b_fc7"] = 0.01 * jax.random.normal(k7b, (rep,), jnp.float32)
    return p


if __name__ == "__main__":
    key = jax.random.PRNGKey(0)
    kf, kp = jax.random.split(key, 2)

    # small synthetic config
    B, Cin, H, W = 2, 8, 16, 16          # backbone feature map (NCHW), OUT_CHANNELS=8
    res = 7                              # POOLER_RESOLUTION
    Cout = 16                            # NONLOCAL_OUT_CHANNELS
    rep = 32                             # MLP_HEAD_DIM
    cfg = dict(resolution=res, scale=0.25, sampling_ratio=2,
               conv_neighbor_expand=1.2, fc_neighbor_expand=1.0, roi_expand=1.0)

    feat = jax.random.normal(kf, (B, Cin, H, W), jnp.float32)
    # proposals flattened to (R, 5): [batch_idx, x1, y1, x2, y2] in image coords
    rois = jnp.array([
        [0.0, 4.0, 4.0, 40.0, 36.0],
        [0.0, 10.0, 8.0, 50.0, 60.0],
        [1.0, 0.0, 0.0, 32.0, 32.0],
        [1.0, 20.0, 12.0, 60.0, 56.0],
    ], jnp.float32)

    params = make_params(kp, Cin, Cout, res, rep)

    fwd = jax.jit(functools.partial(fpn2mlp_feature_extractor_neighbor, cfg=cfg))
    x_cls, x_reg, identity = fwd(feat, rois, params)
    jax.block_until_ready((x_cls, x_reg, identity))

    assert x_cls.shape == (rois.shape[0], Cout)
    assert x_reg.shape == (rois.shape[0], Cout)
    assert identity.shape == (rois.shape[0], rep)
    assert bool(jnp.all(jnp.isfinite(x_cls)))
    assert bool(jnp.all(jnp.isfinite(identity)))
    print("KERNEL_OK")
</pallas_src>

<mosaic_0001>
module attributes {stable_mosaic.version = 11 : i64} {
  func.func @_roi_interp_kernel(%arg0: i32, %arg1: memref<8xi32, #tpu.memory_space<smem>>, %arg2: memref<1x49x256xf32, #tpu.memory_space<vmem>>, %arg3: memref<1x256x8xf32, #tpu.memory_space<vmem>>, %arg4: memref<1x49x8xf32, #tpu.memory_space<vmem>>) attributes {dimension_semantics = [#tpu.dimension_semantics<arbitrary>], iteration_bounds = array<i64: 8>, scalar_prefetch = 1 : i64, scratch_operands = 0 : i64, tpu.core_type = #tpu.core_type<tc>, window_params = [{transform_indices = @transform_0, window_bounds = array<i64: 1, 49, 256>}, {transform_indices = @transform_1, window_bounds = array<i64: 1, 256, 8>}, {transform_indices = @transform_2, window_bounds = array<i64: 1, 49, 8>}]} {
    %c0 = arith.constant 0 : index
    %c0_0 = arith.constant 0 : index
    %c0_1 = arith.constant 0 : index
    %0 = vector.load %arg2[%c0, %c0_0, %c0_1] : memref<1x49x256xf32, #tpu.memory_space<vmem>>, vector<1x49x256xf32>
    %1 = vector.shape_cast %0 : vector<1x49x256xf32> to vector<49x256xf32>
    %c0_2 = arith.constant 0 : index
    %c0_3 = arith.constant 0 : index
    %c0_4 = arith.constant 0 : index
    %2 = vector.load %arg3[%c0_2, %c0_3, %c0_4] : memref<1x256x8xf32, #tpu.memory_space<vmem>>, vector<1x256x8xf32>
    %3 = vector.shape_cast %2 : vector<1x256x8xf32> to vector<256x8xf32>
    %cst = arith.constant dense<0.000000e+00> : vector<49x8xf32>
    %4 = tpu.matmul %1, %3, %cst {dimension_numbers = #tpu.dot_dimension_numbers<[1], [0], [0], [1], [0, 0, 1, 1], [], []>} : vector<49x256xf32>, vector<256x8xf32>, vector<49x8xf32> -> vector<49x8xf32>
    %c0_5 = arith.constant 0 : index
    %c0_6 = arith.constant 0 : index
    %c0_7 = arith.constant 0 : index
    %5 = vector.load %arg4[%c0_5, %c0_6, %c0_7] : memref<1x49x8xf32, #tpu.memory_space<vmem>>, vector<1x49x8xf32>
    %6 = vector.shape_cast %5 : vector<1x49x8xf32> to vector<49x8xf32>
    %7 = vector.shape_cast %4 : vector<49x8xf32> to vector<1x49x8xf32>
    tpu.vector_store %arg4[%c0_5, %c0_6, %c0_7], %7 {strides = array<i32>} : memref<1x49x8xf32, #tpu.memory_space<vmem>>, vector<1x49x8xf32>,
    return
  }
  func.func @transform_0(%arg0: i32, %arg1: memref<8xi32, #tpu.memory_space<smem>>) -> (i32, i32, i32) {
    %c0_i32 = arith.constant 0 : i32
    %c0_i32_0 = arith.constant 0 : i32
    %c0_i32_1 = arith.constant 0 : i32
    return %arg0, %c0_i32, %c0_i32_0 : i32, i32, i32
  }
  func.func @transform_1(%arg0: i32, %arg1: memref<8xi32, #tpu.memory_space<smem>>) -> (i32, i32, i32) {
    %0 = arith.index_cast %arg0 : i32 to index
    %1 = memref.load %arg1[%0] : memref<8xi32, #tpu.memory_space<smem>>
    %c0_i32 = arith.constant 0 : i32
    %c0_i32_0 = arith.constant 0 : i32
    %c0_i32_1 = arith.constant 0 : i32
    return %1, %c0_i32, %c0_i32_0 : i32, i32, i32
  }
  func.func @transform_2(%arg0: i32, %arg1: memref<8xi32, #tpu.memory_space<smem>>) -> (i32, i32, i32) {
    %c0_i32 = arith.constant 0 : i32
    %c0_i32_0 = arith.constant 0 : i32
    %c0_i32_1 = arith.constant 0 : i32
    return %arg0, %c0_i32, %c0_i32_0 : i32, i32, i32
  }
}

module attributes {stable_mosaic.version = 11 : i64} {
  func.func @_fpn_up_pool_kernel(%arg0: i32, %arg1: memref<704x8xbf16, #tpu.memory_space<vmem>>, %arg2: memref<9x8x8xbf16, #tpu.memory_space<vmem>>, %arg3: memref<8x128xbf16, #tpu.memory_space<vmem>>, %arg4: memref<8x128xbf16, #tpu.memory_space<vmem>>, %arg5: memref<1x8xf32, #tpu.memory_space<vmem>>, %arg6: memref<1x8xf32, #tpu.memory_space<vmem>>, %arg7: memref<1x128xf32, #tpu.memory_space<vmem>>, %arg8: memref<1x128xf32, #tpu.memory_space<vmem>>, %arg9: memref<1x128xf32, #tpu.memory_space<vmem>>, %arg10: memref<1x128xf32, #tpu.memory_space<vmem>>, %arg11: memref<8x680xf32, #tpu.memory_space<vmem>>, %arg12: memref<8x128xf32, #tpu.memory_space<vmem>>) attributes {dimension_semantics = [#tpu.dimension_semantics<parallel>], iteration_bounds = array<i64: 1>, scalar_prefetch = 0 : i64, scratch_operands = 0 : i64, tpu.core_type = #tpu.core_type<tc>, window_params = [{transform_indices = @transform_0, window_bounds = array<i64: 704, 8>}, {pipeline_mode = #tpu.pipeline_mode<synchronous>, transform_indices = @transform_1, window_bounds = array<i64: 9, 8, 8>}, {pipeline_mode = #tpu.pipeline_mode<synchronous>, transform_indices = @transform_2, window_bounds = array<i64: 8, 128>}, {pipeline_mode = #tpu.pipeline_mode<synchronous>, transform_indices = @transform_3, window_bounds = array<i64: 8, 128>}, {pipeline_mode = #tpu.pipeline_mode<synchronous>, transform_indices = @transform_4, window_bounds = array<i64: 1, 8>}, {pipeline_mode = #tpu.pipeline_mode<synchronous>, transform_indices = @transform_5, window_bounds = array<i64: 1, 8>}, {pipeline_mode = #tpu.pipeline_mode<synchronous>, transform_indices = @transform_6, window_bounds = array<i64: 1, 128>}, {pipeline_mode = #tpu.pipeline_mode<synchronous>, transform_indices = @transform_7, window_bounds = array<i64: 1, 128>}, {pipeline_mode = #tpu.pipeline_mode<synchronous>, transform_indices = @transform_8, window_bounds = array<i64: 1, 128>}, {pipeline_mode = #tpu.pipeline_mode<synchronous>, transform_indices = @transform_9, window_bounds = array<i64: 1, 128>}, {pipeline_mode = #tpu.pipeline_mode<synchronous>, transform_indices = @transform_10, window_bounds = array<i64: 8, 680>}, {transform_indices = @transform_11, window_bounds = array<i64: 8, 128>}]} {
    %cst = arith.constant 0.000000e+00 : f32
    %0 = vector.broadcast %cst : f32 to vector<680x8xf32>
    %c0 = arith.constant 0 : index
    %c0_0 = arith.constant 0 : index
    %1 = vector.load %arg1[%c0, %c0_0] : memref<704x8xbf16, #tpu.memory_space<vmem>>, vector<680x8xbf16>
    %c0_1 = arith.constant 0 : index
    %c0_2 = arith.constant 0 : index
    %c0_3 = arith.constant 0 : index
    %2 = vector.load %arg2[%c0_1, %c0_2, %c0_3] : memref<9x8x8xbf16, #tpu.memory_space<vmem>>, vector<1x8x8xbf16>
    %3 = vector.shape_cast %2 : vector<1x8x8xbf16> to vector<8x8xbf16>
    %cst_4 = arith.constant dense<0.000000e+00> : vector<680x8xf32>
    %4 = tpu.matmul %1, %3, %cst_4 {dimension_numbers = #tpu.dot_dimension_numbers<[1], [0], [0], [1], [0, 0, 1, 1], [], []>} : vector<680x8xbf16>, vector<8x8xbf16>, vector<680x8xf32> -> vector<680x8xf32>
    %5 = arith.addf %0, %4 : vector<680x8xf32>
    %c1 = arith.constant 1 : index
    %c0_5 = arith.constant 0 : index
    %6 = vector.load %arg1[%c1, %c0_5] : memref<704x8xbf16, #tpu.memory_space<vmem>>, vector<680x8xbf16>
    %c1_6 = arith.constant 1 : index
    %c0_7 = arith.constant 0 : index
    %c0_8 = arith.constant 0 : index
    %7 = vector.load %arg2[%c1_6, %c0_7, %c0_8] : memref<9x8x8xbf16, #tpu.memory_space<vmem>>, vector<1x8x8xbf16>
    %8 = vector.shape_cast %7 : vector<1x8x8xbf16> to vector<8x8xbf16>
    %cst_9 = arith.constant dense<0.000000e+00> : vector<680x8xf32>
    %9 = tpu.matmul %6, %8, %cst_9 {dimension_numbers = #tpu.dot_dimension_numbers<[1], [0], [0], [1], [0, 0, 1, 1], [], []>} : vector<680x8xbf16>, vector<8x8xbf16>, vector<680x8xf32> -> vector<680x8xf32>
    %10 = arith.addf %5, %9 : vector<680x8xf32>
    %c2 = arith.constant 2 : index
    %c0_10 = arith.constant 0 : index
    %11 = vector.load %arg1[%c2, %c0_10] : memref<704x8xbf16, #tpu.memory_space<vmem>>, vector<680x8xbf16>
    %c2_11 = arith.constant 2 : index
    %c0_12 = arith.constant 0 : index
    %c0_13 = arith.constant 0 : index
    %12 = vector.load %arg2[%c2_11, %c0_12, %c0_13] : memref<9x8x8xbf16, #tpu.memory_space<vmem>>, vector<1x8x8xbf16>
    %13 = vector.shape_cast %12 : vector<1x8x8xbf16> to vector<8x8xbf16>
    %cst_14 = arith.constant dense<0.000000e+00> : vector<680x8xf32>
    %14 = tpu.matmul %11, %13, %cst_14 {dimension_numbers = #tpu.dot_dimension_numbers<[1], [0], [0], [1], [0, 0, 1, 1], [], []>} : vector<680x8xbf16>, vector<8x8xbf16>, vector<680x8xf32> -> vector<680x8xf32>
    %15 = arith.addf %10, %14 : vector<680x8xf32>
    %c9 = arith.constant 9 : index
    %c0_15 = arith.constant 0 : index
    %16 = vector.load %arg1[%c9, %c0_15] : memref<704x8xbf16, #tpu.memory_space<vmem>>, vector<680x8xbf16>
    %c3 = arith.constant 3 : index
    %c0_16 = arith.constant 0 : index
    %c0_17 = arith.constant 0 : index
    %17 = vector.load %arg2[%c3, %c0_16, %c0_17] : memref<9x8x8xbf16, #tpu.memory_space<vmem>>, vector<1x8x8xbf16>
    %18 = vector.shape_cast %17 : vector<1x8x8xbf16> to vector<8x8xbf16>
    %cst_18 = arith.constant dense<0.000000e+00> : vector<680x8xf32>
    %19 = tpu.matmul %16, %18, %cst_18 {dimension_numbers = #tpu.dot_dimension_numbers<[1], [0], [0], [1], [0, 0, 1, 1], [], []>} : vector<680x8xbf16>, vector<8x8xbf16>, vector<680x8xf32> -> vector<680x8xf32>
    %20 = arith.addf %15, %19 : vector<680x8xf32>
    %c10 = arith.constant 10 : index
    %c0_19 = arith.constant 0 : index
    %21 = vector.load %arg1[%c10, %c0_19] : memref<704x8xbf16, #tpu.memory_space<vmem>>, vector<680x8xbf16>
    %c4 = arith.constant 4 : index
    %c0_20 = arith.constant 0 : index
    %c0_21 = arith.constant 0 : index
    %22 = vector.load %arg2[%c4, %c0_20, %c0_21] : memref<9x8x8xbf16, #tpu.memory_space<vmem>>, vector<1x8x8xbf16>
    %23 = vector.shape_cast %22 : vector<1x8x8xbf16> to vector<8x8xbf16>
    %cst_22 = arith.constant dense<0.000000e+00> : vector<680x8xf32>
    %24 = tpu.matmul %21, %23, %cst_22 {dimension_numbers = #tpu.dot_dimension_numbers<[1], [0], [0], [1], [0, 0, 1, 1], [], []>} : vector<680x8xbf16>, vector<8x8xbf16>, vector<680x8xf32> -> vector<680x8xf32>
    %25 = arith.addf %20, %24 : vector<680x8xf32>
    %c11 = arith.constant 11 : index
    %c0_23 = arith.constant 0 : index
    %26 = vector.load %arg1[%c11, %c0_23] : memref<704x8xbf16, #tpu.memory_space<vmem>>, vector<680x8xbf16>
    %c5 = arith.constant 5 : index
    %c0_24 = arith.constant 0 : index
    %c0_25 = arith.constant 0 : index
    %27 = vector.load %arg2[%c5, %c0_24, %c0_25] : memref<9x8x8xbf16, #tpu.memory_space<vmem>>, vector<1x8x8xbf16>
    %28 = vector.shape_cast %27 : vector<1x8x8xbf16> to vector<8x8xbf16>
    %cst_26 = arith.constant dense<0.000000e+00> : vector<680x8xf32>
    %29 = tpu.matmul %26, %28, %cst_26 {dimension_numbers = #tpu.dot_dimension_numbers<[1], [0], [0], [1], [0, 0, 1, 1], [], []>} : vector<680x8xbf16>, vector<8x8xbf16>, vector<680x8xf32> -> vector<680x8xf32>
    %30 = arith.addf %25, %29 : vector<680x8xf32>
    %c18 = arith.constant 18 : index
    %c0_27 = arith.constant 0 : index
    %31 = vector.load %arg1[%c18, %c0_27] : memref<704x8xbf16, #tpu.memory_space<vmem>>, vector<680x8xbf16>
    %c6 = arith.constant 6 : index
    %c0_28 = arith.constant 0 : index
    %c0_29 = arith.constant 0 : index
    %32 = vector.load %arg2[%c6, %c0_28, %c0_29] : memref<9x8x8xbf16, #tpu.memory_space<vmem>>, vector<1x8x8xbf16>
    %33 = vector.shape_cast %32 : vector<1x8x8xbf16> to vector<8x8xbf16>
    %cst_30 = arith.constant dense<0.000000e+00> : vector<680x8xf32>
    %34 = tpu.matmul %31, %33, %cst_30 {dimension_numbers = #tpu.dot_dimension_numbers<[1], [0], [0], [1], [0, 0, 1, 1], [], []>} : vector<680x8xbf16>, vector<8x8xbf16>, vector<680x8xf32> -> vector<680x8xf32>
    %35 = arith.addf %30, %34 : vector<680x8xf32>
    %c19 = arith.constant 19 : index
    %c0_31 = arith.constant 0 : index
    %36 = vector.load %arg1[%c19, %c0_31] : memref<704x8xbf16, #tpu.memory_space<vmem>>, vector<680x8xbf16>
    %c7 = arith.constant 7 : index
    %c0_32 = arith.constant 0 : index
    %c0_33 = arith.constant 0 : index
    %37 = vector.load %arg2[%c7, %c0_32, %c0_33] : memref<9x8x8xbf16, #tpu.memory_space<vmem>>, vector<1x8x8xbf16>
    %38 = vector.shape_cast %37 : vector<1x8x8xbf16> to vector<8x8xbf16>
    %cst_34 = arith.constant dense<0.000000e+00> : vector<680x8xf32>
    %39 = tpu.matmul %36, %38, %cst_34 {dimension_numbers = #tpu.dot_dimension_numbers<[1], [0], [0], [1], [0, 0, 1, 1], [], []>} : vector<680x8xbf16>, vector<8x8xbf16>, vector<680x8xf32> -> vector<680x8xf32>
    %40 = arith.addf %35, %39 : vector<680x8xf32>
    %c20 = arith.constant 20 : index
    %c0_35 = arith.constant 0 : index
    %41 = vector.load %arg1[%c20, %c0_35] : memref<704x8xbf16, #tpu.memory_space<vmem>>, vector<680x8xbf16>
    %c8 = arith.constant 8 : index
    %c0_36 = arith.constant 0 : index
    %c0_37 = arith.constant 0 : index
    %42 = vector.load %arg2[%c8, %c0_36, %c0_37] : memref<9x8x8xbf16, #tpu.memory_space<vmem>>, vector<1x8x8xbf16>
    %43 = vector.shape_cast %42 : vector<1x8x8xbf16> to vector<8x8xbf16>
    %cst_38 = arith.constant dense<0.000000e+00> : vector<680x8xf32>
    %44 = tpu.matmul %41, %43, %cst_38 {dimension_numbers = #tpu.dot_dimension_numbers<[1], [0], [0], [1], [0, 0, 1, 1], [], []>} : vector<680x8xbf16>, vector<8x8xbf16>, vector<680x8xf32> -> vector<680x8xf32>
    %45 = arith.addf %40, %44 : vector<680x8xf32>
    %c0_39 = arith.constant 0 : index
    %c0_40 = arith.constant 0 : index
    %46 = vector.load %arg5[%c0_39, %c0_40] : memref<1x8xf32, #tpu.memory_space<vmem>>, vector<1x8xf32>
    %47 = vector.broadcast %46 : vector<1x8xf32> to vector<680x8xf32>
    %48 = arith.mulf %45, %47 : vector<680x8xf32>
    %c0_41 = arith.constant 0 : index
    %c0_42 = arith.constant 0 : index
    %49 = vector.load %arg6[%c0_41, %c0_42] : memref<1x8xf32, #tpu.memory_space<vmem>>, vector<1x8xf32>
    %50 = vector.broadcast %49 : vector<1x8xf32> to vector<680x8xf32>
    %51 = arith.addf %48, %50 : vector<680x8xf32>
    %cst_43 = arith.constant 0.000000e+00 : f32
    %52 = vector.broadcast %cst_43 : f32 to vector<680x8xf32>
    %53 = arith.maximumf %51, %52 : vector<680x8xf32>
    %54 = arith.truncf %53 : vector<680x8xf32> to vector<680x8xbf16>
    %c0_44 = arith.constant 0 : index
    %c0_45 = arith.constant 0 : index
    %55 = vector.load %arg4[%c0_44, %c0_45] : memref<8x128xbf16, #tpu.memory_space<vmem>>, vector<8x128xbf16>
    %cst_46 = arith.constant dense<0.000000e+00> : vector<680x128xf32>
    %56 = tpu.matmul %54, %55, %cst_46 {dimension_numbers = #tpu.dot_dimension_numbers<[1], [0], [0], [1], [0, 0, 1, 1], [], []>} : vector<680x8xbf16>, vector<8x128xbf16>, vector<680x128xf32> -> vector<680x128xf32>
    %c0_47 = arith.constant 0 : index
    %c0_48 = arith.constant 0 : index
    %57 = vector.load %arg9[%c0_47, %c0_48] : memref<1x128xf32, #tpu.memory_space<vmem>>, vector<1x128xf32>
    %58 = vector.broadcast %57 : vector<1x128xf32> to vector<680x128xf32>
    %59 = arith.mulf %56, %58 : vector<680x128xf32>
    %c0_49 = arith.constant 0 : index
    %c0_50 = arith.constant 0 : index
    %60 = vector.load %arg10[%c0_49, %c0_50] : memref<1x128xf32, #tpu.memory_space<vmem>>, vector<1x128xf32>
    %61 = vector.broadcast %60 : vector<1x128xf32> to vector<680x128xf32>
    %62 = arith.addf %59, %61 : vector<680x128xf32>
    %c10_51 = arith.constant 10 : index
    %c0_52 = arith.constant 0 : index
    %63 = vector.load %arg1[%c10_51, %c0_52] : memref<704x8xbf16, #tpu.memory_space<vmem>>, vector<680x8xbf16>
    %c0_53 = arith.constant 0 : index
    %c0_54 = arith.constant 0 : index
    %64 = vector.load %arg3[%c0_53, %c0_54] : memref<8x128xbf16, #tpu.memory_space<vmem>>, vector<8x128xbf16>
    %cst_55 = arith.constant dense<0.000000e+00> : vector<680x128xf32>
    %65 = tpu.matmul %63, %64, %cst_55 {dimension_numbers = #tpu.dot_dimension_numbers<[1], [0], [0], [1], [0, 0, 1, 1], [], []>} : vector<680x8xbf16>, vector<8x128xbf16>, vector<680x128xf32> -> vector<680x128xf32>
    %c0_56 = arith.constant 0 : index
    %c0_57 = arith.constant 0 : index
    %66 = vector.load %arg7[%c0_56, %c0_57] : memref<1x128xf32, #tpu.memory_space<vmem>>, vector<1x128xf32>
    %67 = vector.broadcast %66 : vector<1x128xf32> to vector<680x128xf32>
    %68 = arith.mulf %65, %67 : vector<680x128xf32>
    %c0_58 = arith.constant 0 : index
    %c0_59 = arith.constant 0 : index
    %69 = vector.load %arg8[%c0_58, %c0_59] : memref<1x128xf32, #tpu.memory_space<vmem>>, vector<1x128xf32>
    %70 = vector.broadcast %69 : vector<1x128xf32> to vector<680x128xf32>
    %71 = arith.addf %68, %70 : vector<680x128xf32>
    %72 = arith.addf %71, %62 : vector<680x128xf32>
    %cst_60 = arith.constant 0.000000e+00 : f32
    %73 = vector.broadcast %cst_60 : f32 to vector<680x128xf32>
    %74 = arith.maximumf %72, %73 : vector<680x128xf32>
    %c0_61 = arith.constant 0 : index
    %c0_62 = arith.constant 0 : index
    %75 = vector.load %arg11[%c0_61, %c0_62] : memref<8x680xf32, #tpu.memory_space<vmem>>, vector<8x680xf32>
    %cst_63 = arith.constant dense<0.000000e+00> : vector<8x128xf32>
    %76 = tpu.matmul %75, %74, %cst_63 {dimension_numbers = #tpu.dot_dimension_numbers<[1], [0], [0], [1], [0, 0, 1, 1], [], []>} : vector<8x680xf32>, vector<680x128xf32>, vector<8x128xf32> -> vector<8x128xf32>
    %c0_64 = arith.constant 0 : index
    %c0_65 = arith.constant 0 : index
    %77 = vector.load %arg12[%c0_64, %c0_65] : memref<8x128xf32, #tpu.memory_space<vmem>>, vector<8x128xf32>
    tpu.vector_store %arg12[%c0_64, %c0_65], %76 {strides = array<i32>} : memref<8x128xf32, #tpu.memory_space<vmem>>, vector<8x128xf32>,
    return
  }
  func.func @transform_0(%arg0: i32) -> (i32, i32) {
    %c0_i32 = arith.constant 0 : i32
    %c0_i32_0 = arith.constant 0 : i32
    return %arg0, %c0_i32 : i32, i32
  }
  func.func @transform_1(%arg0: i32) -> (i32, i32, i32) {
    %c0_i32 = arith.constant 0 : i32
    %c0_i32_0 = arith.constant 0 : i32
    %c0_i32_1 = arith.constant 0 : i32
    %c0_i32_2 = arith.constant 0 : i32
    return %c0_i32, %c0_i32_0, %c0_i32_1 : i32, i32, i32
  }
  func.func @transform_2(%arg0: i32) -> (i32, i32) {
    %c0_i32 = arith.constant 0 : i32
    %c0_i32_0 = arith.constant 0 : i32
    %c0_i32_1 = arith.constant 0 : i32
    return %c0_i32, %c0_i32_0 : i32, i32
  }
  func.func @transform_3(%arg0: i32) -> (i32, i32) {
    %c0_i32 = arith.constant 0 : i32
    %c0_i32_0 = arith.constant 0 : i32
    %c0_i32_1 = arith.constant 0 : i32
    return %c0_i32, %c0_i32_0 : i32, i32
  }
  func.func @transform_4(%arg0: i32) -> (i32, i32) {
    %c0_i32 = arith.constant 0 : i32
    %c0_i32_0 = arith.constant 0 : i32
    %c0_i32_1 = arith.constant 0 : i32
    return %c0_i32, %c0_i32_0 : i32, i32
  }
  func.func @transform_5(%arg0: i32) -> (i32, i32) {
    %c0_i32 = arith.constant 0 : i32
    %c0_i32_0 = arith.constant 0 : i32
    %c0_i32_1 = arith.constant 0 : i32
    return %c0_i32, %c0_i32_0 : i32, i32
  }
  func.func @transform_6(%arg0: i32) -> (i32, i32) {
    %c0_i32 = arith.constant 0 : i32
    %c0_i32_0 = arith.constant 0 : i32
    %c0_i32_1 = arith.constant 0 : i32
    return %c0_i32, %c0_i32_0 : i32, i32
  }
  func.func @transform_7(%arg0: i32) -> (i32, i32) {
    %c0_i32 = arith.constant 0 : i32
    %c0_i32_0 = arith.constant 0 : i32
    %c0_i32_1 = arith.constant 0 : i32
    return %c0_i32, %c0_i32_0 : i32, i32
  }
  func.func @transform_8(%arg0: i32) -> (i32, i32) {
    %c0_i32 = arith.constant 0 : i32
    %c0_i32_0 = arith.constant 0 : i32
    %c0_i32_1 = arith.constant 0 : i32
    return %c0_i32, %c0_i32_0 : i32, i32
  }
  func.func @transform_9(%arg0: i32) -> (i32, i32) {
    %c0_i32 = arith.constant 0 : i32
    %c0_i32_0 = arith.constant 0 : i32
    %c0_i32_1 = arith.constant 0 : i32
    return %c0_i32, %c0_i32_0 : i32, i32
  }
  func.func @transform_10(%arg0: i32) -> (i32, i32) {
    %c0_i32 = arith.constant 0 : i32
    %c0_i32_0 = arith.constant 0 : i32
    %c0_i32_1 = arith.constant 0 : i32
    return %c0_i32, %c0_i32_0 : i32, i32
  }
  func.func @transform_11(%arg0: i32) -> (i32, i32) {
    %c0_i32 = arith.constant 0 : i32
    %c0_i32_0 = arith.constant 0 : i32
    return %arg0, %c0_i32 : i32, i32
  }
}

module attributes {stable_mosaic.version = 11 : i64} {
  func.func @_mm_bias_kernel(%arg0: i32, %arg1: i32, %arg2: i32, %arg3: memref<8x512xbf16, #tpu.memory_space<vmem>>, %arg4: memref<512x128xbf16, #tpu.memory_space<vmem>>, %arg5: memref<1x128xf32, #tpu.memory_space<vmem>>, %arg6: memref<8x128xf32, #tpu.memory_space<vmem>>, %arg7: memref<8x128xf32, #tpu.memory_space<vmem>>) attributes {dimension_semantics = [#tpu.dimension_semantics<parallel>, #tpu.dimension_semantics<parallel>, #tpu.dimension_semantics<arbitrary>], iteration_bounds = array<i64: 1, 1, 1>, scalar_prefetch = 0 : i64, scratch_operands = 1 : i64, tpu.core_type = #tpu.core_type<tc>, window_params = [{transform_indices = @transform_0, window_bounds = array<i64: 8, 512>}, {transform_indices = @transform_1, window_bounds = array<i64: 512, 128>}, {transform_indices = @transform_2, window_bounds = array<i64: 1, 128>}, {transform_indices = @transform_3, window_bounds = array<i64: 8, 128>}]} {
    %c0_i32 = arith.constant 0 : i32
    %0 = arith.cmpi eq, %arg2, %c0_i32 : i32
    %1 = arith.extui %0 : i1 to i32
    %c0_i32_0 = arith.constant 0 : i32
    %2 = arith.cmpi ne, %1, %c0_i32_0 : i32
    scf.if %2 {
      %cst_10 = arith.constant 0.000000e+00 : f32
      %12 = vector.broadcast %cst_10 : f32 to vector<8x128xf32>
      %c0_11 = arith.constant 0 : index
      %c0_12 = arith.constant 0 : index
      %13 = vector.load %arg7[%c0_11, %c0_12] : memref<8x128xf32, #tpu.memory_space<vmem>>, vector<8x128xf32>
      tpu.vector_store %arg7[%c0_11, %c0_12], %12 {strides = array<i32>} : memref<8x128xf32, #tpu.memory_space<vmem>>, vector<8x128xf32>,
    } else {
    }
    %c0 = arith.constant 0 : index
    %c0_1 = arith.constant 0 : index
    %3 = vector.load %arg7[%c0, %c0_1] : memref<8x128xf32, #tpu.memory_space<vmem>>, vector<8x128xf32>
    %c0_2 = arith.constant 0 : index
    %c0_3 = arith.constant 0 : index
    %4 = vector.load %arg3[%c0_2, %c0_3] : memref<8x512xbf16, #tpu.memory_space<vmem>>, vector<8x512xbf16>
    %c0_4 = arith.constant 0 : index
    %c0_5 = arith.constant 0 : index
    %5 = vector.load %arg4[%c0_4, %c0_5] : memref<512x128xbf16, #tpu.memory_space<vmem>>, vector<512x128xbf16>
    %cst = arith.constant dense<0.000000e+00> : vector<8x128xf32>
    %6 = tpu.matmul %4, %5, %cst {dimension_numbers = #tpu.dot_dimension_numbers<[1], [0], [0], [1], [0, 0, 1, 1], [], []>} : vector<8x512xbf16>, vector<512x128xbf16>, vector<8x128xf32> -> vector<8x128xf32>
    %7 = arith.addf %3, %6 : vector<8x128xf32>
    %c0_6 = arith.constant 0 : index
    %c0_7 = arith.constant 0 : index
    %8 = vector.load %arg7[%c0_6, %c0_7] : memref<8x128xf32, #tpu.memory_space<vmem>>, vector<8x128xf32>
    tpu.vector_store %arg7[%c0_6, %c0_7], %7 {strides = array<i32>} : memref<8x128xf32, #tpu.memory_space<vmem>>, vector<8x128xf32>,
    %c0_i32_8 = arith.constant 0 : i32
    %9 = arith.cmpi eq, %arg2, %c0_i32_8 : i32
    %10 = arith.extui %9 : i1 to i32
    %c0_i32_9 = arith.constant 0 : i32
    %11 = arith.cmpi ne, %10, %c0_i32_9 : i32
    scf.if %11 {
      %c0_10 = arith.constant 0 : index
      %c0_11 = arith.constant 0 : index
      %12 = vector.load %arg7[%c0_10, %c0_11] : memref<8x128xf32, #tpu.memory_space<vmem>>, vector<8x128xf32>
      %c0_12 = arith.constant 0 : index
      %c0_13 = arith.constant 0 : index
      %13 = vector.load %arg5[%c0_12, %c0_13] : memref<1x128xf32, #tpu.memory_space<vmem>>, vector<1x128xf32>
      %14 = vector.broadcast %13 : vector<1x128xf32> to vector<8x128xf32>
      %15 = arith.addf %12, %14 : vector<8x128xf32>
      %cst_14 = arith.constant 0.000000e+00 : f32
      %16 = vector.broadcast %cst_14 : f32 to vector<8x128xf32>
      %17 = arith.maximumf %15, %16 : vector<8x128xf32>
      %c0_15 = arith.constant 0 : index
      %c0_16 = arith.constant 0 : index
      %18 = vector.load %arg6[%c0_15, %c0_16] : memref<8x128xf32, #tpu.memory_space<vmem>>, vector<8x128xf32>
      tpu.vector_store %arg6[%c0_15, %c0_16], %17 {strides = array<i32>} : memref<8x128xf32, #tpu.memory_space<vmem>>, vector<8x128xf32>,
    } else {
    }
    return
  }
  func.func @transform_0(%arg0: i32, %arg1: i32, %arg2: i32) -> (i32, i32) {
    %c0_i32 = arith.constant 0 : i32
    return %arg0, %arg2 : i32, i32
  }
  func.func @transform_1(%arg0: i32, %arg1: i32, %arg2: i32) -> (i32, i32) {
    %c0_i32 = arith.constant 0 : i32
    return %arg2, %arg1 : i32, i32
  }
  func.func @transform_2(%arg0: i32, %arg1: i32, %arg2: i32) -> (i32, i32) {
    %c0_i32 = arith.constant 0 : i32
    %c0_i32_0 = arith.constant 0 : i32
    return %c0_i32, %arg1 : i32, i32
  }
  func.func @transform_3(%arg0: i32, %arg1: i32, %arg2: i32) -> (i32, i32) {
    %c0_i32 = arith.constant 0 : i32
    return %arg0, %arg1 : i32, i32
  }
}

module attributes {stable_mosaic.version = 11 : i64} {
  func.func @_mm_bias_kernel(%arg0: i32, %arg1: i32, %arg2: i32, %arg3: memref<8x128xbf16, #tpu.memory_space<vmem>>, %arg4: memref<128x128xbf16, #tpu.memory_space<vmem>>, %arg5: memref<1x128xf32, #tpu.memory_space<vmem>>, %arg6: memref<8x128xf32, #tpu.memory_space<vmem>>, %arg7: memref<8x128xf32, #tpu.memory_space<vmem>>) attributes {dimension_semantics = [#tpu.dimension_semantics<parallel>, #tpu.dimension_semantics<parallel>, #tpu.dimension_semantics<arbitrary>], iteration_bounds = array<i64: 1, 1, 1>, scalar_prefetch = 0 : i64, scratch_operands = 1 : i64, tpu.core_type = #tpu.core_type<tc>, window_params = [{transform_indices = @transform_0, window_bounds = array<i64: 8, 128>}, {transform_indices = @transform_1, window_bounds = array<i64: 128, 128>}, {transform_indices = @transform_2, window_bounds = array<i64: 1, 128>}, {transform_indices = @transform_3, window_bounds = array<i64: 8, 128>}]} {
    %c0_i32 = arith.constant 0 : i32
    %0 = arith.cmpi eq, %arg2, %c0_i32 : i32
    %1 = arith.extui %0 : i1 to i32
    %c0_i32_0 = arith.constant 0 : i32
    %2 = arith.cmpi ne, %1, %c0_i32_0 : i32
    scf.if %2 {
      %cst_10 = arith.constant 0.000000e+00 : f32
      %12 = vector.broadcast %cst_10 : f32 to vector<8x128xf32>
      %c0_11 = arith.constant 0 : index
      %c0_12 = arith.constant 0 : index
      %13 = vector.load %arg7[%c0_11, %c0_12] : memref<8x128xf32, #tpu.memory_space<vmem>>, vector<8x128xf32>
      tpu.vector_store %arg7[%c0_11, %c0_12], %12 {strides = array<i32>} : memref<8x128xf32, #tpu.memory_space<vmem>>, vector<8x128xf32>,
    } else {
    }
    %c0 = arith.constant 0 : index
    %c0_1 = arith.constant 0 : index
    %3 = vector.load %arg7[%c0, %c0_1] : memref<8x128xf32, #tpu.memory_space<vmem>>, vector<8x128xf32>
    %c0_2 = arith.constant 0 : index
    %c0_3 = arith.constant 0 : index
    %4 = vector.load %arg3[%c0_2, %c0_3] : memref<8x128xbf16, #tpu.memory_space<vmem>>, vector<8x128xbf16>
    %c0_4 = arith.constant 0 : index
    %c0_5 = arith.constant 0 : index
    %5 = vector.load %arg4[%c0_4, %c0_5] : memref<128x128xbf16, #tpu.memory_space<vmem>>, vector<128x128xbf16>
    %cst = arith.constant dense<0.000000e+00> : vector<8x128xf32>
    %6 = tpu.matmul %4, %5, %cst {dimension_numbers = #tpu.dot_dimension_numbers<[1], [0], [0], [1], [0, 0, 1, 1], [], []>} : vector<8x128xbf16>, vector<128x128xbf16>, vector<8x128xf32> -> vector<8x128xf32>
    %7 = arith.addf %3, %6 : vector<8x128xf32>
    %c0_6 = arith.constant 0 : index
    %c0_7 = arith.constant 0 : index
    %8 = vector.load %arg7[%c0_6, %c0_7] : memref<8x128xf32, #tpu.memory_space<vmem>>, vector<8x128xf32>
    tpu.vector_store %arg7[%c0_6, %c0_7], %7 {strides = array<i32>} : memref<8x128xf32, #tpu.memory_space<vmem>>, vector<8x128xf32>,
    %c0_i32_8 = arith.constant 0 : i32
    %9 = arith.cmpi eq, %arg2, %c0_i32_8 : i32
    %10 = arith.extui %9 : i1 to i32
    %c0_i32_9 = arith.constant 0 : i32
    %11 = arith.cmpi ne, %10, %c0_i32_9 : i32
    scf.if %11 {
      %c0_10 = arith.constant 0 : index
      %c0_11 = arith.constant 0 : index
      %12 = vector.load %arg7[%c0_10, %c0_11] : memref<8x128xf32, #tpu.memory_space<vmem>>, vector<8x128xf32>
      %c0_12 = arith.constant 0 : index
      %c0_13 = arith.constant 0 : index
      %13 = vector.load %arg5[%c0_12, %c0_13] : memref<1x128xf32, #tpu.memory_space<vmem>>, vector<1x128xf32>
      %14 = vector.broadcast %13 : vector<1x128xf32> to vector<8x128xf32>
      %15 = arith.addf %12, %14 : vector<8x128xf32>
      %cst_14 = arith.constant 0.000000e+00 : f32
      %16 = vector.broadcast %cst_14 : f32 to vector<8x128xf32>
      %17 = arith.maximumf %15, %16 : vector<8x128xf32>
      %c0_15 = arith.constant 0 : index
      %c0_16 = arith.constant 0 : index
      %18 = vector.load %arg6[%c0_15, %c0_16] : memref<8x128xf32, #tpu.memory_space<vmem>>, vector<8x128xf32>
      tpu.vector_store %arg6[%c0_15, %c0_16], %17 {strides = array<i32>} : memref<8x128xf32, #tpu.memory_space<vmem>>, vector<8x128xf32>,
    } else {
    }
    return
  }
  func.func @transform_0(%arg0: i32, %arg1: i32, %arg2: i32) -> (i32, i32) {
    %c0_i32 = arith.constant 0 : i32
    return %arg0, %arg2 : i32, i32
  }
  func.func @transform_1(%arg0: i32, %arg1: i32, %arg2: i32) -> (i32, i32) {
    %c0_i32 = arith.constant 0 : i32
    return %arg2, %arg1 : i32, i32
  }
  func.func @transform_2(%arg0: i32, %arg1: i32, %arg2: i32) -> (i32, i32) {
    %c0_i32 = arith.constant 0 : i32
    %c0_i32_0 = arith.constant 0 : i32
    return %c0_i32, %arg1 : i32, i32
  }
  func.func @transform_3(%arg0: i32, %arg1: i32, %arg2: i32) -> (i32, i32) {
    %c0_i32 = arith.constant 0 : i32
    return %arg0, %arg1 : i32, i32
  }
}

</mosaic_0001>

<bundles_post_ra>
// kernel: fpn2mlp_feature_extractor_neighbor.4
= control target key start
LH: loop header
LB: loop body
LE: loop exit
PB: predicated region body
PF: predicated region fallthrough
CT: control target
= control target key end

     0   :  { %s650_s0 = inlined_call_operand.vmem [shape: s32[8], index: 0, kind: input, shape index: {}]   ;;  %s651_s1 = inlined_call_operand.vmem [shape: f32[8,49,256], index: 1, kind: input, shape index: {}]   ;;  %s652_s2 = inlined_call_operand.vmem [shape: f32[2,256,8], index: 2, kind: input, shape index: {}]   ;;  %s653_s3 = inlined_call_operand.vmem [shape: f32[8,49,8], index: 3, kind: output, shape index: {}]  }
   0x1   :  { %s8_s14 = sshll.u32 %s650_s0, 4  ;;  %s9_s14 = int_to_ptr.vmem [resolvable:$true] %s8_s14 }
   0x2   :  { %s524_s15 = scalar_lea.vmem %s9_s14, 16  ;;  %p529_p1 = scmp.lt.s32.totalorder %s9_s14, %s9_s14 }
   0x3   :  { %p525_p0 = scmp.ne.s32.totalorder %s9_s14, %s524_s15  ;;  %p530_p2 = scmp.lt.s32.totalorder %s524_s15, %s524_s15 }
   0x5   :  { %p531_p3 = por %p530_p2, %p529_p1 }
   0x7   :  { %p532_p4 = pnand %p531_p3, %p525_p0 }
   0x9   :  { %535 = shalt.err (!%p532_p4)  }
   0xa   :  { %s546_s16 = smov [#allocation3]  }
   0xb   :  { %11 = dma.vmem_to_smem %s9_s14, 16, %s546_s16, [#allocation2] }
   0xc   :  { %540 = dma.done.wait [#allocation2], 16 }
   0xd   :  { %541 = vsyncadd [#allocation2], 4294967280 }
   0xe   :  { %13 = sfence }
   0xf   :  { %s570_s17 = smov 0  }
  0x10 LB: > { %s400_s0 = sadd.s32 4294967295, %s544_s17   ;;  %p404_p5 = scmp.ge.s32.totalorder %s544_s17, 1  ;;  %s544_s17 = sphi %s570_s17, %s19_s17  }
  0x11   : > { %p133_p6 = scmp.lt.s32.totalorder %s544_s17, 9 }
  0x13   : > { %p134_p7 = pnand %p404_p5, %p133_p6 }
  0x14   : > { %s166_s18 = sld [smem:[#allocation3 + %s400_s0]] (!%p134_p7)  ;;  %p161_p8 = scmp.lt.s32.totalorder (!%p134_p7), %s400_s0, 7  ;;  %vm324_vm0 = vcmask (!%p134_p7), 64512   ;;  %vm331_vm1 = vcmask (!%p134_p7), 57344  }
  0x15   : > { %137 = sbr.rel (%p134_p7) target bundleno = 296 (0x128), region = 28 }
  0x1a   : > { %p167_p9 = scmp.lt.s32.totalorder (!%p134_p7), %s166_s18, 1 }
  0x1c   : > { %s655_s0 = smov (!%p161_p8, %s400_s0), 7  ;;  %s657_s18 = smov (!%p167_p9, %s166_s18), 1 }
  0x1d   : > { %s513_s19 = smul.u32 112, %s655_s0  ;;  %s411_s23 = sshll.u32 %s657_s18, 8 }
  0x1e   : > { %s591_s26 = scalar_lea.vmem %s652_s2, %s411_s23  ;;  %s514_s27 = smul.u32 56, %s655_s0 }
  0x1f   : > { %s584_s22 = scalar_lea.vmem %s651_s1, %s513_s19  ;;  %v208_v2 = vld [vmem:[%s591_s26 + $0x80] sm:$0xff]  ;;  %v209_v3 = vld [vmem:[%s591_s26 + $0x88] sm:$0xff]  ;;  %v210_v7 = vld [vmem:[%s591_s26 + $0x90] sm:$0xff] }
  0x20   : > { %v179_v0 = vld [vmem:[%s584_s22 + $0x8] sm:$0xff]  ;;  %v192_v4 = vld [vmem:[%s591_s26] sm:$0xff]  ;;  %v465_v5 = vpack.c.bf16 %v209_v3, %v208_v2  ;;  %v211_v8 = vld [vmem:[%s591_s26 + $0x98] sm:$0xff]  ;;  %s177_s30 = scalar_lea.vmem %s653_s3, %s514_s27 }
  0x21   : > { %v187_v1 = vld [vmem:[%s584_s22 + $0x48] sm:$0xff]  ;;  %288 = vmatprep.mubr.f32.mxu0 %v179_v0  ;;  %v469_v10 = vpack.c.bf16 %v211_v8, %v210_v7  ;;  %v194_v11 = vld [vmem:[%s591_s26 + $0x10] sm:$0xff]  ;;  %v195_v12 = vld [vmem:[%s591_s26 + $0x18] sm:$0xff] }
  0x22   : > { %308 = vmatprep.mubr.f32.mxu1 %v187_v1  ;;  %v193_v6 = vld [vmem:[%s591_s26 + $0x8] sm:$0xff]  ;;  %v212_v13 = vld [vmem:[%s591_s26 + $0xa0] sm:$0xff]  ;;  %466 = vmatprep.subr.bf16.mxu0 %v465_v5  ;;  %v471_v15 = vpack.c.bf16 %v195_v12, %v194_v11  ;;  %v214_v19 = vld [vmem:[%s591_s26 + $0xb0] sm:$0xff] }
  0x23   : > { %v467_v9 = vpack.c.bf16 %v193_v6, %v192_v4  ;;  %497 = vmatprep.subr.bf16.mxu1 %v465_v5  ;;  %v213_v14 = vld [vmem:[%s591_s26 + $0xa8] sm:$0xff]  ;;  %v196_v17 = vld [vmem:[%s591_s26 + $0x20] sm:$0xff]  ;;  %v215_v20 = vld [vmem:[%s591_s26 + $0xb8] sm:$0xff] }
  0x24   : > { %v473_v16 = vpack.c.bf16 %v213_v14, %v212_v13  ;;  %v197_v18 = vld [vmem:[%s591_s26 + $0x28] sm:$0xff]  ;;  %v477_v22 = vpack.c.bf16 %v215_v20, %v214_v19  ;;  %v198_v23 = vld [vmem:[%s591_s26 + $0x30] sm:$0xff]  ;;  %v199_v24 = vld [vmem:[%s591_s26 + $0x38] sm:$0xff] }
  0x25   : > { %468 = vmatpush3.bf16.msra.mxu0 %v467_v9  ;;  %505 = vmatpush3.bf16.msra.mxu1 %v467_v9  ;;  %v475_v21 = vpack.c.bf16 %v197_v18, %v196_v17  ;;  %v216_v25 = vld [vmem:[%s591_s26 + $0xc0] sm:$0xff]  ;;  %v217_v26 = vld [vmem:[%s591_s26 + $0xc8] sm:$0xff]  ;;  %v479_v27 = vpack.c.bf16 %v199_v24, %v198_v23  ;;  %v218_v31 = vld [vmem:[%s591_s26 + $0xd0] sm:$0xff] }
  0x26   : > { %470 = vmatprep.subr.bf16.mxu0 %v469_v10  ;;  %498 = vmatprep.subr.bf16.mxu1 %v469_v10  ;;  %v481_v28 = vpack.c.bf16 %v217_v26, %v216_v25  ;;  %v200_v29 = vld [vmem:[%s591_s26 + $0x40] sm:$0xff]  ;;  %v201_v30 = vld [vmem:[%s591_s26 + $0x48] sm:$0xff]  ;;  %v219_v32 = vld [vmem:[%s591_s26 + $0xd8] sm:$0xff] }
  0x27   : > { %v483_v33 = vpack.c.bf16 %v201_v30, %v200_v29  ;;  %v485_v34 = vpack.c.bf16 %v219_v32, %v218_v31  ;;  %v202_v35 = vld [vmem:[%s591_s26 + $0x50] sm:$0xff]  ;;  %v203_v36 = vld [vmem:[%s591_s26 + $0x58] sm:$0xff]  ;;  %v220_v37 = vld [vmem:[%s591_s26 + $0xe0] sm:$0xff] }
  0x28   : > { %v221_v38 = vld [vmem:[%s591_s26 + $0xe8] sm:$0xff]  ;;  %v487_v39 = vpack.c.bf16 %v203_v36, %v202_v35  ;;  %v204_v41 = vld [vmem:[%s591_s26 + $0x60] sm:$0xff]  ;;  %v222_v43 = vld [vmem:[%s591_s26 + $0xf0] sm:$0xff] }
  0x29   : > { %472 = vmatpush3.bf16.msra.mxu0 %v471_v15  ;;  %506 = vmatpush3.bf16.msra.mxu1 %v471_v15  ;;  %v489_v40 = vpack.c.bf16 %v221_v38, %v220_v37  ;;  %v205_v42 = vld [vmem:[%s591_s26 + $0x68] sm:$0xff]  ;;  %v223_v44 = vld [vmem:[%s591_s26 + $0xf8] sm:$0xff]  ;;  %v206_v47 = vld [vmem:[%s591_s26 + $0x70] sm:$0xff] }
  0x2a   : > { %474 = vmatprep.subr.bf16.mxu0 %v473_v16  ;;  %499 = vmatprep.subr.bf16.mxu1 %v473_v16  ;;  %v491_v45 = vpack.c.bf16 %v205_v42, %v204_v41  ;;  %v493_v46 = vpack.c.bf16 %v223_v44, %v222_v43  ;;  %v207_v48 = vld [vmem:[%s591_s26 + $0x78] sm:$0xff]  ;;  %v178_v50 = vld [vmem:[%s584_s22] sm:$0xff]  ;;  %v180_v54 = vld [vmem:[%s584_s22 + $0x10] sm:$0xff] }
  0x2b   : > { %v495_v49 = vpack.c.bf16 %v207_v48, %v206_v47  ;;  %v186_v51 = vld [vmem:[%s584_s22 + $0x40] sm:$0xff]  ;;  %v181_v52 = vld [vmem:[%s584_s22 + $0x18] sm:$0xff]  ;;  %v188_v55 = vld [vmem:[%s584_s22 + $0x50] sm:$0xff] }
  0x2c   : > { %v189_v53 = vld [vmem:[%s584_s22 + $0x58] sm:$0xff]  ;;  %v183_v56 = vld [vmem:[%s584_s22 + $0x28] sm:$0xff]  ;;  %v182_v58 = vld [vmem:[%s584_s22 + $0x20] sm:$0xff] }
  0x2d   : > { %476 = vmatpush3.bf16.msra.mxu0 %v475_v21  ;;  %507 = vmatpush3.bf16.msra.mxu1 %v475_v21  ;;  %v191_v57 = vld [vmem:[%s584_s22 + $0x68] sm:$0x1]  ;;  %v190_v59 = vld [vmem:[%s584_s22 + $0x60] sm:$0x1]  ;;  %v185_v60 = vld [vmem:[%s584_s22 + $0x38] sm:$0xff] }
  0x2e   : > { %478 = vmatprep.subr.bf16.mxu0 %v477_v22  ;;  %500 = vmatprep.subr.bf16.mxu1 %v477_v22  ;;  %v184_v61 = vld [vmem:[%s584_s22 + $0x30] sm:$0xff] }
  0x31   : > { %480 = vmatpush3.bf16.msra.mxu0 %v479_v27  ;;  %508 = vmatpush3.bf16.msra.mxu1 %v479_v27 }
  0x32   : > { %482 = vmatprep.subr.bf16.mxu0 %v481_v28  ;;  %501 = vmatprep.subr.bf16.mxu1 %v481_v28 }
  0x35   : > { %484 = vmatpush3.bf16.msra.mxu0 %v483_v33  ;;  %509 = vmatpush3.bf16.msra.mxu1 %v483_v33 }
  0x36   : > { %486 = vmatprep.subr.bf16.mxu0 %v485_v34  ;;  %502 = vmatprep.subr.bf16.mxu1 %v485_v34 }
  0x39   : > { %488 = vmatpush3.bf16.msra.mxu0 %v487_v39  ;;  %510 = vmatpush3.bf16.msra.mxu1 %v487_v39 }
  0x3a   : > { %490 = vmatprep.subr.bf16.mxu0 %v489_v40  ;;  %503 = vmatprep.subr.bf16.mxu1 %v489_v40 }
  0x3d   : > { %492 = vmatpush3.bf16.msra.mxu0 %v491_v45  ;;  %511 = vmatpush3.bf16.msra.mxu1 %v491_v45 }
  0x3e   : > { %494 = vmatprep.subr.bf16.mxu0 %v493_v46  ;;  %504 = vmatprep.subr.bf16.mxu1 %v493_v46 }
  0x41   : > { %496 = vmatpush3.bf16.msra.mxu0 %v495_v49  ;;  %512 = vmatpush3.bf16.msra.mxu1 %v495_v49 }
  0x44   : > { %289 = vmatmul.mubr.f32.vlgmr.msra.gmra.mrb[0].mxu0 %v178_v50  ;;  %309 = vmatmul.mubr.f32.vlgmr.msra.gmra.mrb[0].mxu1 %v186_v51 }
  0x45   : > { %293 = vmatprep.mubr.f32.mxu0 %v181_v52  ;;  %313 = vmatprep.mubr.f32.mxu1 %v189_v53 }
  0x48   : > { %294 = vmatmul.mubr.f32.gmra.mrb[2].mxu0 %v180_v54  ;;  %314 = vmatmul.mubr.f32.gmra.mrb[2].mxu1 %v188_v55 }
  0x49   : > { %298 = vmatprep.mubr.f32.mxu0 %v183_v56  ;;  %318 = vmatprep.mubr.f32.mxu1 %v191_v57 }
  0x4c   : > { %299 = vmatmul.mubr.f32.gmra.mrb[4].mxu0 %v182_v58  ;;  %319 = vmatmul.mubr.f32.gmra.mrb[4].mxu1 %v190_v59 }
  0x4d   : > { %303 = vmatprep.mubr.f32.mxu0 %v185_v60 }
  0x50   : > { %304 = vmatmul.mubr.f32.gmra.mrb[6].mxu0 %v184_v61 }
 0x117   : > { %v444_v62 = vpop.f32.mrb[0].mxu0  ;;  %v456_v63 = vpop.f32.mrb[0].mxu1 }
 0x118   : > { %v445_v0 = vpop.f32.mrb[1].mxu0  ;;  %v457_v1 = vpop.f32.mrb[1].mxu1 }
 0x119   : > { %v446_v2 = vadd.f32 %v445_v0, %v444_v62  ;;  %v458_v3 = vadd.f32 %v457_v1, %v456_v63 }
 0x11b   : > { %325 = vst.msk [vmem:[%s177_s30] sm:$0xff] %vm324_vm0, %v446_v2  ;;  %v447_v4 = vpop.f32.mrb[2].mxu0  ;;  %329 = vst.msk [vmem:[%s177_s30 + $0x20] sm:$0xff] %vm324_vm0, %v458_v3  ;;  %v459_v5 = vpop.f32.mrb[2].mxu1 }
 0x11c   : > { %v448_v6 = vpop.f32.mrb[3].mxu0  ;;  %v460_v7 = vpop.f32.mrb[3].mxu1 }
 0x11d   : > { %v449_v8 = vadd.f32 %v448_v6, %v447_v4  ;;  %v461_v9 = vadd.f32 %v460_v7, %v459_v5 }
 0x11f   : > { %326 = vst.msk [vmem:[%s177_s30 + $0x8] sm:$0xff] %vm324_vm0, %v449_v8  ;;  %v450_v10 = vpop.f32.mrb[4].mxu0  ;;  %330 = vst.msk [vmem:[%s177_s30 + $0x28] sm:$0xff] %vm324_vm0, %v461_v9  ;;  %v462_v11 = vpop.f32.mrb[4].mxu1 }
 0x120   : > { %v451_v12 = vpop.f32.mrb[5].mxu0  ;;  %v463_v13 = vpop.f32.mrb[5].mxu1 }
 0x121   : > { %v452_v14 = vadd.f32 %v451_v12, %v450_v10  ;;  %v464_v15 = vadd.f32 %v463_v13, %v462_v11 }
 0x123   : > { %327 = vst.msk [vmem:[%s177_s30 + $0x10] sm:$0xff] %vm324_vm0, %v452_v14  ;;  %v453_v16 = vpop.f32.mrb[6].mxu0 }
 0x124   : > { %332 = vst.msk [vmem:[%s177_s30 + $0x30] sm:$0x1] %vm331_vm1, %v464_v15  ;;  %v454_v17 = vpop.f32.mrb[7].mxu0 }
 0x125   : > { %v455_v18 = vadd.f32 %v454_v17, %v453_v16 }
 0x127   : > { %328 = vst.msk [vmem:[%s177_s30 + $0x18] sm:$0xff] %vm324_vm0, %v455_v18 }
 0x128 PF: > { %s19_s17 = sadd.s32 1, %s544_s17  }
 0x129   : > { %p16_p10 = scmp.ge.s32.totalorder %s19_s17, 10  }
 0x12b   :  { %18 = sbr.rel (!%p16_p10) target bundleno = 16 (0x10), region = 61 }

// kernel: fpn2mlp_feature_extractor_neighbor.6
= control target key start
LH: loop header
LB: loop body
LE: loop exit
PB: predicated region body
PF: predicated region fallthrough
CT: control target
= control target key end

     0   :  { %s638_s1 = inlined_call_operand.vmem [shape: bf16[512,128], index: 1, kind: input, shape index: {}]   ;;  %s639_s0 = inlined_call_operand.vmem [shape: bf16[8,512], index: 0, kind: input, shape index: {}]   ;;  %s640_s2 = inlined_call_operand.vmem [shape: f32[1,128], index: 2, kind: input, shape index: {}]   ;;  %s641_s3 = inlined_call_operand.vmem [shape: f32[8,128], index: 3, kind: output, shape index: {}]  }
   0x1   :  { %v474_v0 = vld [vmem:[%s638_s1 + $0x40] sm:$0xff]   ;;  %v478_v4 = vld [vmem:[%s638_s1 + $0x48] sm:$0xff]   ;;  %v482_v8 = vld [vmem:[%s638_s1 + $0x50] sm:$0xff]  }
   0x2   :  { %v475_v1 = vld [vmem:[%s638_s1 + $0xc0] sm:$0xff]   ;;  %430 = vmatprep.subr.bf16.mxu0 %v474_v0  ;;  %v479_v5 = vld [vmem:[%s638_s1 + $0xc8] sm:$0xff]   ;;  %v483_v9 = vld [vmem:[%s638_s1 + $0xd0] sm:$0xff]  }
   0x3   :  { %v476_v2 = vld [vmem:[%s638_s1] sm:$0xff]   ;;  %452 = vmatprep.subr.bf16.mxu1 %v475_v1  ;;  %v480_v6 = vld [vmem:[%s638_s1 + $0x8] sm:$0xff]   ;;  %v484_v10 = vld [vmem:[%s638_s1 + $0x10] sm:$0xff]  }
   0x4   :  { %v477_v3 = vld [vmem:[%s638_s1 + $0x80] sm:$0xff]   ;;  %431 = vmatpush3.bf16.msra.mxu0 %v476_v2  ;;  %v481_v7 = vld [vmem:[%s638_s1 + $0x88] sm:$0xff]   ;;  %v485_v11 = vld [vmem:[%s638_s1 + $0x90] sm:$0xff]  }
   0x5   :  { %453 = vmatpush3.bf16.msra.mxu1 %v477_v3  ;;  %432 = vmatprep.subr.bf16.mxu0 %v478_v4  ;;  %v486_v12 = vld [vmem:[%s638_s1 + $0x58] sm:$0xff]   ;;  %v490_v16 = vld [vmem:[%s638_s1 + $0x60] sm:$0xff]   ;;  %v494_v20 = vld [vmem:[%s638_s1 + $0x68] sm:$0xff]  }
   0x6   :  { %454 = vmatprep.subr.bf16.mxu1 %v479_v5  ;;  %v487_v13 = vld [vmem:[%s638_s1 + $0xd8] sm:$0xff]   ;;  %v491_v17 = vld [vmem:[%s638_s1 + $0xe0] sm:$0xff]   ;;  %v495_v21 = vld [vmem:[%s638_s1 + $0xe8] sm:$0xff]  }
   0x7   :  { %v488_v14 = vld [vmem:[%s638_s1 + $0x18] sm:$0xff]   ;;  %v492_v18 = vld [vmem:[%s638_s1 + $0x20] sm:$0xff]   ;;  %v496_v22 = vld [vmem:[%s638_s1 + $0x28] sm:$0xff]  }
   0x8   :  { %433 = vmatpush3.bf16.msra.mxu0 %v480_v6  ;;  %v489_v15 = vld [vmem:[%s638_s1 + $0x98] sm:$0xff]   ;;  %v493_v19 = vld [vmem:[%s638_s1 + $0xa0] sm:$0xff]   ;;  %v497_v23 = vld [vmem:[%s638_s1 + $0xa8] sm:$0xff]  }
   0x9   :  { %455 = vmatpush3.bf16.msra.mxu1 %v481_v7  ;;  %434 = vmatprep.subr.bf16.mxu0 %v482_v8  ;;  %v498_v24 = vld [vmem:[%s638_s1 + $0x70] sm:$0xff]   ;;  %v502_v28 = vld [vmem:[%s638_s1 + $0x78] sm:$0xff]   ;;  %v21_v32 = vld [vmem:[%s639_s0] sm:$0xff] }
   0xa   :  { %456 = vmatprep.subr.bf16.mxu1 %v483_v9  ;;  %v499_v25 = vld [vmem:[%s638_s1 + $0xf0] sm:$0xff]   ;;  %v503_v29 = vld [vmem:[%s638_s1 + $0xf8] sm:$0xff]   ;;  %v22_v33 = vld [vmem:[%s639_s0 + $0x8] sm:$0xff]  ;;  %v393_v34 = vcombine.low %v21_v32, %v21_v32  ;;  %v394_v35 = vcombine.high %v21_v32, %v21_v32 }
   0xb   :  { %v500_v26 = vld [vmem:[%s638_s1 + $0x30] sm:$0xff]   ;;  %v504_v30 = vld [vmem:[%s638_s1 + $0x38] sm:$0xff]   ;;  %v395_v36 = vcombine.low %v22_v33, %v22_v33  ;;  %v396_v37 = vcombine.high %v22_v33, %v22_v33  ;;  %v429_v46 = vld [vmem:[%s640_s2] ss:$0 sm:$0xff] }
   0xc   :  { %435 = vmatpush3.bf16.msra.mxu0 %v484_v10  ;;  %v501_v27 = vld [vmem:[%s638_s1 + $0xb0] sm:$0xff]   ;;  %v505_v31 = vld [vmem:[%s638_s1 + $0xb8] sm:$0xff]   ;;  %325 = vmatprep.mubr.bf16.mxu0 %v394_v35 }
   0xd   :  { %457 = vmatpush3.bf16.msra.mxu1 %v485_v11  ;;  %436 = vmatprep.subr.bf16.mxu0 %v486_v12 }
   0xe   :  { %458 = vmatprep.subr.bf16.mxu1 %v487_v13  ;;  %365 = vmatprep.mubr.bf16.mxu1 %v396_v37 }
  0x10   :  { %437 = vmatpush3.bf16.msra.mxu0 %v488_v14 }
  0x11   :  { %459 = vmatpush3.bf16.msra.mxu1 %v489_v15  ;;  %438 = vmatprep.subr.bf16.mxu0 %v490_v16 }
  0x12   :  { %460 = vmatprep.subr.bf16.mxu1 %v491_v17 }
  0x14   :  { %439 = vmatpush3.bf16.msra.mxu0 %v492_v18 }
  0x15   :  { %461 = vmatpush3.bf16.msra.mxu1 %v493_v19  ;;  %440 = vmatprep.subr.bf16.mxu0 %v494_v20 }
  0x16   :  { %462 = vmatprep.subr.bf16.mxu1 %v495_v21 }
  0x18   :  { %441 = vmatpush3.bf16.msra.mxu0 %v496_v22 }
  0x19   :  { %463 = vmatpush3.bf16.msra.mxu1 %v497_v23  ;;  %442 = vmatprep.subr.bf16.mxu0 %v498_v24 }
  0x1a   :  { %464 = vmatprep.subr.bf16.mxu1 %v499_v25 }
  0x1c   :  { %443 = vmatpush3.bf16.msra.mxu0 %v500_v26 }
  0x1d   :  { %465 = vmatpush3.bf16.msra.mxu1 %v501_v27  ;;  %444 = vmatprep.subr.bf16.mxu0 %v502_v28 }
  0x1e   :  { %466 = vmatprep.subr.bf16.mxu1 %v503_v29 }
  0x20   :  { %445 = vmatpush3.bf16.msra.mxu0 %v504_v30 }
  0x21   :  { %467 = vmatpush3.bf16.msra.mxu1 %v505_v31 }
  0x23   :  { %326 = vmatmul.mubr.bf16.vlgmr.msra.gmra.mrb[0].mxu0 %v393_v34 }
  0x24   :  { %366 = vmatmul.mubr.bf16.vlgmr.msra.gmra.mrb[0].mxu1 %v395_v36 }
  0xf6   :  { %v446_v38 = vpop.f32.mrb[0].mxu0 }
  0xf7   :  { %v468_v39 = vpop.f32.mrb[0].mxu1  ;;  %v447_v40 = vpop.f32.mrb[1].mxu0 }
  0xf8   :  { %v469_v41 = vpop.f32.mrb[1].mxu1  ;;  %v448_v42 = vadd.f32 %v447_v40, %v446_v38  ;;  %v449_v44 = vpop.f32.mrb[2].mxu0 }
  0xf9   :  { %v470_v43 = vadd.f32 %v469_v41, %v468_v39  ;;  %v471_v45 = vpop.f32.mrb[2].mxu1  ;;  %v450_v47 = vpop.f32.mrb[3].mxu0 }
  0xfa   :  { %v472_v48 = vpop.f32.mrb[3].mxu1 }
  0xfb   :  { %v368_v49 = vadd.f32 %v470_v43, %v448_v42 }
  0xfd   :  { %v386_v50 = vadd.f32 %v429_v46, %v368_v49 }
  0xff   :  { %v387_v51 = vmax.f32 %v386_v50, 0.0 }
 0x101   :  { %388 = vst [vmem:[%s641_s3] sm:$0xff] %v387_v51 }

// kernel: fpn2mlp_feature_extractor_neighbor.7
= control target key start
LH: loop header
LB: loop body
LE: loop exit
PB: predicated region body
PF: predicated region fallthrough
CT: control target
= control target key end

     0   :  { %v194_v0 = vmov 0.0   ;;  %vm195_vm0 = vmmov 0   ;;  %s249_s1 = inlined_call_operand.vmem [shape: bf16[128,128], index: 1, kind: input, shape index: {}]   ;;  %s250_s0 = inlined_call_operand.vmem [shape: bf16[8,128], index: 0, kind: input, shape index: {}]   ;;  %s251_s2 = inlined_call_operand.vmem [shape: f32[1,128], index: 2, kind: input, shape index: {}]   ;;  %s252_s3 = inlined_call_operand.vmem [shape: f32[8,128], index: 3, kind: output, shape index: {}]  }
   0x1   :  { %164 = vmatprep.subr.bf16.mxu0 %v194_v0  ;;  %v186_v1 = vld [vmem:[%s249_s1] sm:$0xff]   ;;  %180 = vmatprep.mubr.msk.bf16.mxu0 %vm195_vm0, %v194_v0  ;;  %v187_v2 = vld [vmem:[%s249_s1 + $0x8] sm:$0xff]   ;;  %v188_v3 = vld [vmem:[%s249_s1 + $0x10] sm:$0xff]  }
   0x2   :  { %165 = vmatpush3.bf16.msra.mxu0 %v186_v1  ;;  %v189_v4 = vld [vmem:[%s249_s1 + $0x18] sm:$0xff]   ;;  %v190_v5 = vld [vmem:[%s249_s1 + $0x20] sm:$0xff]   ;;  %v191_v6 = vld [vmem:[%s249_s1 + $0x28] sm:$0xff]  }
   0x3   :  { %166 = vmatprep.subr.bf16.mxu0 %v194_v0  ;;  %v192_v7 = vld [vmem:[%s249_s1 + $0x30] sm:$0xff]   ;;  %v193_v8 = vld [vmem:[%s249_s1 + $0x38] sm:$0xff]   ;;  %v21_v9 = vld [vmem:[%s250_s0] sm:$0xf] }
   0x4   :  { %v154_v10 = vld [vmem:[%s251_s2] ss:$0 sm:$0xff] }
   0x6   :  { %167 = vmatpush3.bf16.msra.mxu0 %v187_v2 }
   0x7   :  { %168 = vmatprep.subr.bf16.mxu0 %v194_v0 }
   0xa   :  { %169 = vmatpush3.bf16.msra.mxu0 %v188_v3 }
   0xb   :  { %170 = vmatprep.subr.bf16.mxu0 %v194_v0 }
   0xe   :  { %171 = vmatpush3.bf16.msra.mxu0 %v189_v4 }
   0xf   :  { %172 = vmatprep.subr.bf16.mxu0 %v194_v0 }
  0x12   :  { %173 = vmatpush3.bf16.msra.mxu0 %v190_v5 }
  0x13   :  { %174 = vmatprep.subr.bf16.mxu0 %v194_v0 }
  0x16   :  { %175 = vmatpush3.bf16.msra.mxu0 %v191_v6 }
  0x17   :  { %176 = vmatprep.subr.bf16.mxu0 %v194_v0 }
  0x1a   :  { %177 = vmatpush3.bf16.msra.mxu0 %v192_v7 }
  0x1b   :  { %178 = vmatprep.subr.bf16.mxu0 %v194_v0 }
  0x1e   :  { %179 = vmatpush3.bf16.msra.mxu0 %v193_v8 }
  0x21   :  { %181 = vmatmul.mubr.bf16.vlgmr.msra.gmra.mrb[0].mxu0 %v21_v9 }
  0xf4   :  { %v120_v11 = vpop.f32.mrb[0].mxu0 }
  0xf5   :  { %v139_v12 = vadd.f32 %v154_v10, %v120_v11  ;;  %v182_v13 = vpop.f32.mrb[1].mxu0 }
  0xf6   :  { %v123_v14 = vpop.f32.mrb[2].mxu0 }
  0xf7   :  { %v140_v15 = vmax.f32 %v139_v12, 0.0  ;;  %v183_v16 = vpop.f32.mrb[3].mxu0 }
  0xf9   :  { %141 = vst [vmem:[%s252_s3] sm:$0xff] %v140_v15 }

// kernel: fpn2mlp_feature_extractor_neighbor.5
= control target key start
LH: loop header
LB: loop body
LE: loop exit
PB: predicated region body
PF: predicated region fallthrough
CT: control target
= control target key end

     0   :  { %vm817_vm0 = vcmask 1043456   ;;  %vm343_vm1 = vsmask.f32 7424  ;;  %v19359_v0 = vmov 0.0   ;;  %vm14388_vm2 = vmmov 0   ;;  %s19281_s1 = inlined_call_operand.vmem [shape: bf16[9,8,8], index: 1, kind: input, shape index: {}]   ;;  %s19282_s0 = inlined_call_operand.vmem [shape: bf16[704,8], index: 0, kind: input, shape index: {}]   ;;  %s19283_s3 = inlined_call_operand.vmem [shape: bf16[8,128], index: 3, kind: input, shape index: {}]   ;;  %s19284_s4 = inlined_call_operand.vmem [shape: f32[1,8], index: 4, kind: input, shape index: {}]   ;;  %s19285_s5 = inlined_call_operand.vmem [shape: f32[1,8], index: 5, kind: input, shape index: {}]   ;;  %s19286_s2 = inlined_call_operand.vmem [shape: bf16[8,128], index: 2, kind: input, shape index: {}]   ;;  %s19287_s8 = inlined_call_operand.vmem [shape: f32[1,128], index: 8, kind: input, shape index: {}]   ;;  %s19288_s6 = inlined_call_operand.vmem [shape: f32[1,128], index: 6, kind: input, shape index: {}]   ;;  %s19289_s9 = inlined_call_operand.vmem [shape: f32[1,128], index: 9, kind: input, shape index: {}]   ;;  %s19290_s7 = inlined_call_operand.vmem [shape: f32[1,128], index: 7, kind: input, shape index: {}]   ;;  %s19291_s10 = inlined_call_operand.vmem [shape: f32[8,680], index: 10, kind: input, shape index: {}]   ;;  %s19292_s11 = inlined_call_operand.vmem [shape: f32[8,128], index: 11, kind: output, shape index: {}]  }
   0x1   :  { %10845 = vmatprep.subr.bf16.mxu1 %v19359_v0  ;;  %11367 = vmatprep.subr.bf16.mxu0 %v19359_v0  ;;  %v9668_v1 = vld [vmem:[%s19281_s1 + $0x4] sm:$0xf]  ;;  %v9844_v2 = vld [vmem:[%s19281_s1 + $0xc] sm:$0xf]  ;;  %v39_v3 = vld [vmem:[%s19282_s0] sm:$0xf] }
   0x2   :  { %v819_v4 = vsel %vm817_vm0, %v9668_v1, 0  ;;  %v14463_v5 = vsel %vm817_vm0, %v9844_v2, 0  ;;  %10847 = vmatprep.mubr.msk.bf16.mxu1 %vm14388_vm2, %v19359_v0  ;;  %11369 = vmatprep.mubr.msk.bf16.mxu0 %vm14388_vm2, %v19359_v0  ;;  %v40_v6 = vld [vmem:[%s19282_s0 + $0x4] sm:$0xf]  ;;  %v14148_v8 = vld [vmem:[%s19282_s0 + $0x8] sm:$0xff]   ;;  %v14152_v16 = vld [vmem:[%s19282_s0 + $0x10] sm:$0xff]  }
   0x3   :  { %19458 = vst [vmem:[#allocation2_spill] sm:$0xff] %v14463_v5  ;;  %10846 = vmatpush3.bf16.msra.mxu1 %v819_v4  ;;  %11368 = vmatpush3.bf16.msra.mxu0 %v14463_v5  ;;  %v14473_v7 = vcombine.low %v39_v3, %v40_v6  ;;  %v2349_v9 = vld [vmem:[%s19282_s0 + $0x4] sm:$0xf]  ;;  %v2350_v10 = vld [vmem:[%s19282_s0 + $0x8] sm:$0xf]  ;;  %v352_v13 = vshll.u32 %v14148_v8, 16 }
   0x4   :  { %11541 = vmatprep.subr.bf16.mxu0 %v19359_v0  ;;  %11019 = vmatprep.subr.bf16.mxu1 %v19359_v0  ;;  %v9845_v14 = vcombine.low %v2349_v9, %v2350_v10  ;;  %v14491_v15 = vld [vmem:[%s19282_s0 + $0xc] sm:$0xff]   ;;  %vm687_vm3 = vcmask 64512   ;;  %v356_v22 = vshrl.u32 %v14148_v8, 16  ;;  %v14500_v23 = vld [vmem:[%s19282_s0 + $0x14] sm:$0xff]   ;;  %v360_v26 = vshll.u32 %v14152_v16, 16  ;;  %v14524_v38 = vld [vmem:[%s19282_s0 + $0x1c] sm:$0xff]  }
   0x5   :  { %v345_v11 = vshrl.u32 %v14473_v7, 16  ;;  %v347_v12 = vshll.u32 %v14473_v7, 16  ;;  %v354_v18 = vrot.slane %v352_v13, 1  ;;  %v19345_v21 = vshll.u32 %v14491_v15, 16  ;;  %v14154_v35 = vld [vmem:[%s19282_s0 + $0x18] sm:$0xff]   ;;  %v14156_v47 = vld [vmem:[%s19282_s0 + $0x20] sm:$0xff]  }
   0x6   :  { %v2653_v19 = vshrl.u32 %v9845_v14, 16  ;;  %v2655_v20 = vshll.u32 %v9845_v14, 16  ;;  %v19344_v30 = vshrl.u32 %v14491_v15, 16  ;;  %v19342_v31 = vshll.u32 %v14500_v23, 16  ;;  %v14546_v50 = vld [vmem:[%s19282_s0 + $0x24] sm:$0xff]   ;;  %v14568_v62 = vld [vmem:[%s19282_s0 + $0x2c] sm:$0xff]  }
   0x7   :  { %v349_v17 = vrot.slane %v347_v12, 1  ;;  %v2662_v27 = vrot.slane %v19345_v21, 1  ;;  %v358_v33 = vor.u32 %v356_v22, %v354_v18  ;;  %v362_v34 = vrot.slane %v360_v26, 1  ;;  %v14158_v59 = vld [vmem:[%s19282_s0 + $0x28] sm:$0xff]   ;;  %v14160_v10 = vld [vmem:[%s19282_s0 + $0x30] sm:$0xff]  }
   0x8   :  { %v2657_v25 = vrot.slane %v2655_v20, 1  ;;  %v2670_v37 = vrot.slane %v19342_v31, 1  ;;  %v364_v40 = vshrl.u32 %v14152_v16, 16  ;;  %v368_v41 = vshll.u32 %v14154_v35, 16  ;;  %v14590_v13 = vld [vmem:[%s19282_s0 + $0x34] sm:$0xff]  }
   0x9   :  { %v350_v24 = vor.u32 %v349_v17, %v345_v11  ;;  %v2666_v36 = vor.u32 %v19344_v30, %v2662_v27  ;;  %v363_v39 = vsel %vm343_vm1, %v358_v33, %v362_v34  ;;  %v19343_v43 = vshrl.u32 %v14500_v23, 16 }
   0xa   :  { %v2658_v29 = vor.u32 %v2657_v25, %v2653_v19  ;;  %v19340_v44 = vshll.u32 %v14524_v38, 16  ;;  %v366_v45 = vor.u32 %v364_v40, %v362_v34  ;;  %v370_v46 = vrot.slane %v368_v41, 1  ;;  %v14162_v25 = vld [vmem:[%s19282_s0 + $0x38] sm:$0xff]   ;;  %v14164_v40 = vld [vmem:[%s19282_s0 + $0x40] sm:$0xff]  }
   0xb   :  { %v355_v28 = vsel %vm343_vm1, %v350_v24, %v354_v18  ;;  %v2671_v42 = vsel %vm343_vm1, %v2666_v36, %v2670_v37  ;;  %v2674_v48 = vor.u32 %v19343_v43, %v2670_v37  ;;  %v372_v52 = vshrl.u32 %v14154_v35, 16 }
   0xc   :  { %10848 = vmatmul.mubr.msk.bf16.vlgmr.msra.gmra.mrb[0].mxu1 %vm687_vm3, %v355_v28  ;;  %v2663_v32 = vsel %vm343_vm1, %v2658_v29, %v2662_v27  ;;  %v2678_v49 = vrot.slane %v19340_v44, 1  ;;  %v371_v51 = vsel %vm343_vm1, %v366_v45, %v370_v46  ;;  %v376_v53 = vshll.u32 %v14156_v47, 16  ;;  %v14612_v28 = vld [vmem:[%s19282_s0 + $0x3c] sm:$0xff]   ;;  %v14634_v45 = vld [vmem:[%s19282_s0 + $0x44] sm:$0xff]  }
   0xd   :  { %10851 = vmatprep.mubr.msk.bf16.mxu1 %vm14388_vm2, %v19359_v0  ;;  %11370 = vmatmul.mubr.msk.bf16.vlgmr.msra.gmra.mrb[0].mxu0 %vm687_vm3, %v2663_v32  ;;  %v19341_v55 = vshrl.u32 %v14524_v38, 16  ;;  %v19338_v56 = vshll.u32 %v14546_v50, 16  ;;  %v374_v57 = vor.u32 %v372_v52, %v370_v46  ;;  %v380_v1 = vshrl.u32 %v14156_v47, 16  ;;  %v9931_v46 = vld [vmem:[%s19281_s1 + $0x10] sm:$0xf] }
   0xe   :  { %11373 = vmatprep.mubr.msk.bf16.mxu0 %vm14388_vm2, %v19359_v0  ;;  %v2679_v54 = vsel %vm343_vm1, %v2674_v48, %v2678_v49  ;;  %v378_v58 = vrot.slane %v376_v53, 1  ;;  %v384_v2 = vshll.u32 %v14158_v59, 16  ;;  %v19339_v4 = vshrl.u32 %v14546_v50, 16 }
   0xf   :  { %v2682_v60 = vor.u32 %v19341_v55, %v2678_v49  ;;  %v2686_v61 = vrot.slane %v19338_v56, 1  ;;  %v19336_v6 = vshll.u32 %v14568_v62, 16  ;;  %v388_v16 = vshrl.u32 %v14158_v59, 16  ;;  %v14166_v59 = vld [vmem:[%s19282_s0 + $0x48] sm:$0xff]  }
  0x10   :  { %v379_v63 = vsel %vm343_vm1, %v374_v57, %v378_v58  ;;  %v382_v8 = vor.u32 %v380_v1, %v378_v58  ;;  %v386_v9 = vrot.slane %v384_v2, 1  ;;  %v392_v17 = vshll.u32 %v14160_v10, 16 }
  0x11   :  { %v2687_v3 = vsel %vm343_vm1, %v2682_v60, %v2686_v61  ;;  %v2690_v11 = vor.u32 %v19339_v4, %v2686_v61  ;;  %v2694_v12 = vrot.slane %v19336_v6, 1  ;;  %v19337_v19 = vshrl.u32 %v14568_v62, 16 }
  0x12   :  { %v387_v14 = vsel %vm343_vm1, %v382_v8, %v386_v9  ;;  %v19332_v20 = vshll.u32 %v14590_v13, 16  ;;  %v390_v22 = vor.u32 %v388_v16, %v386_v9  ;;  %v394_v24 = vrot.slane %v392_v17, 1  ;;  %v14168_v8 = vld [vmem:[%s19282_s0 + $0x50] sm:$0xff]  }
  0x13   :  { %v2695_v18 = vsel %vm343_vm1, %v2690_v11, %v2694_v12  ;;  %v2698_v26 = vor.u32 %v19337_v19, %v2694_v12  ;;  %v396_v32 = vshrl.u32 %v14160_v10, 16  ;;  %v400_v33 = vshll.u32 %v14162_v25, 16 }
  0x14   :  { %10852 = vmatmul.mubr.msk.bf16.gmra.mrb[4].mxu1 %vm687_vm3, %v363_v39  ;;  %v2702_v27 = vrot.slane %v19332_v20, 1  ;;  %v395_v29 = vsel %vm343_vm1, %v390_v22, %v394_v24  ;;  %v19333_v35 = vshrl.u32 %v14590_v13, 16  ;;  %v19328_v36 = vshll.u32 %v14612_v28, 16  ;;  %v14683_v22 = vld [vmem:[%s19282_s0 + $0x54] sm:$0xff]   ;;  %v14282_v20 = vld [vmem:[%s19282_s0 + $0x8] sm:$0xf] }
  0x15   :  { %10855 = vmatprep.mubr.msk.bf16.mxu1 %vm14388_vm2, %v19359_v0  ;;  %11374 = vmatmul.mubr.msk.bf16.gmra.mrb[4].mxu0 %vm687_vm3, %v2671_v42  ;;  %v398_v37 = vor.u32 %v396_v32, %v394_v24  ;;  %v402_v39 = vrot.slane %v400_v33, 1  ;;  %v3809_v47 = vsel %vm817_vm0, %v9931_v46, 0  ;;  %v404_v49 = vshrl.u32 %v14162_v25, 16  ;;  %v14170_v24 = vld [vmem:[%s19282_s0 + $0x58] sm:$0xff]  }
  0x16   :  { %11377 = vmatprep.mubr.msk.bf16.mxu0 %vm14388_vm2, %v19359_v0  ;;  %v2703_v34 = vsel %vm343_vm1, %v2698_v26, %v2702_v27  ;;  %v2706_v41 = vor.u32 %v19333_v35, %v2702_v27  ;;  %v2710_v42 = vrot.slane %v19328_v36, 1  ;;  %11542 = vmatpush3.bf16.msra.mxu0 %v3809_v47  ;;  %v19329_v53 = vshrl.u32 %v14612_v28, 16 }
  0x17   :  { %v403_v48 = vsel %vm343_vm1, %v398_v37, %v402_v39  ;;  %11715 = vmatprep.subr.bf16.mxu0 %v19359_v0  ;;  %v406_v57 = vor.u32 %v404_v49, %v402_v39  ;;  %v412_v1 = vshrl.u32 %v14164_v40, 16  ;;  %v19325_v10 = vshrl.u32 %v14634_v45, 16 }
  0x18   :  { %v2711_v52 = vsel %vm343_vm1, %v2706_v41, %v2710_v42  ;;  %v2714_v60 = vor.u32 %v19329_v53, %v2710_v42  ;;  %v424_v16 = vshll.u32 %v14168_v8, 16  ;;  %v420_v26 = vshrl.u32 %v14166_v59, 16  ;;  %v14705_v41 = vld [vmem:[%s19282_s0 + $0x5c] sm:$0xff]  }
  0x19   :  { %v19316_v33 = vshll.u32 %v14683_v22, 16  ;;  %v14172_v42 = vld [vmem:[%s19282_s0 + $0x60] sm:$0xff]   ;;  %v428_v47 = vshrl.u32 %v14168_v8, 16  ;;  %v19317_v49 = vshrl.u32 %v14683_v22, 16  ;;  %vm1670_vm4 = vcmask 1046528  }
  0x1a   :  { %v426_v27 = vrot.slane %v424_v16, 1  ;;  %v14739_v16 = vld [vmem:[%s19282_s0 + $0x6c] sm:$0xff]   ;;  %vm4278_vm5 = vsmask.f32 6400  ;;  %vm7025_vm6 = vcmask 1045504   ;;  %vm9449_vm7 = vcmask 326656  }
  0x1b   :  { %19459 = vst [vmem:[#allocation3_spill] sm:$0xff] %v14739_v16 }
  0x1c   :  { %10856 = vmatmul.mubr.msk.bf16.gmra.mrb[8].mxu1 %vm687_vm3, %v371_v51  ;;  %v408_v51 = vshll.u32 %v14164_v40, 16  ;;  %v2734_v40 = vrot.slane %v19316_v33, 1 }
  0x1d   :  { %10859 = vmatprep.mubr.msk.bf16.mxu1 %vm14388_vm2, %v19359_v0  ;;  %11378 = vmatmul.mubr.msk.bf16.gmra.mrb[8].mxu0 %vm687_vm3, %v2679_v54  ;;  %v19324_v54 = vshll.u32 %v14634_v45, 16 }
  0x1e   :  { %11381 = vmatprep.mubr.msk.bf16.mxu0 %vm14388_vm2, %v19359_v0  ;;  %v410_v58 = vrot.slane %v408_v51, 1 }
  0x1f   :  { %v2718_v61 = vrot.slane %v19324_v54, 1 }
  0x20   :  { %v411_v2 = vsel %vm343_vm1, %v406_v57, %v410_v58  ;;  %v414_v12 = vor.u32 %v412_v1, %v410_v58  ;;  %v440_v57 = vshll.u32 %v14172_v42, 16  ;;  %v430_v58 = vor.u32 %v428_v47, %v426_v27  ;;  %v14174_v1 = vld [vmem:[%s19282_s0 + $0x68] sm:$0xff]  }
  0x21   :  { %v2719_v9 = vsel %vm343_vm1, %v2714_v60, %v2718_v61  ;;  %v2722_v17 = vor.u32 %v19325_v10, %v2718_v61  ;;  %v14727_v61 = vld [vmem:[%s19282_s0 + $0x64] sm:$0xff]  }
  0x22   :  { %v442_v8 = vrot.slane %v440_v57, 1  ;;  %v19305_v57 = vshrl.u32 %v14739_v16, 16 }
  0x24   :  { %10860 = vmatmul.mubr.msk.bf16.gmra.mrb[12].mxu1 %vm687_vm3, %v379_v63  ;;  %v14661_v63 = vld [vmem:[%s19282_s0 + $0x4c] sm:$0xff]  }
  0x25   :  { %10863 = vmatprep.mubr.msk.bf16.mxu1 %vm14388_vm2, %v19359_v0  ;;  %11382 = vmatmul.mubr.msk.bf16.gmra.mrb[12].mxu0 %vm687_vm3, %v2687_v3  ;;  %v416_v3 = vshll.u32 %v14166_v59, 16  ;;  %v19320_v11 = vshll.u32 %v14661_v63, 16  ;;  %v2738_v59 = vor.u32 %v19317_v49, %v2734_v40 }
  0x26   :  { %11385 = vmatprep.mubr.msk.bf16.mxu0 %vm14388_vm2, %v19359_v0 }
  0x2c   :  { %10864 = vmatmul.mubr.msk.bf16.gmra.mrb[16].mxu1 %vm687_vm3, %v387_v14  ;;  %v418_v14 = vrot.slane %v416_v3, 1  ;;  %v436_v3 = vshrl.u32 %v14170_v24, 16 }
  0x2d   :  { %10867 = vmatprep.mubr.msk.bf16.mxu1 %vm14388_vm2, %v19359_v0  ;;  %11386 = vmatmul.mubr.msk.bf16.gmra.mrb[16].mxu0 %vm687_vm3, %v2695_v18  ;;  %v2726_v18 = vrot.slane %v19320_v11, 1 }
  0x2e   :  { %11389 = vmatprep.mubr.msk.bf16.mxu0 %vm14388_vm2, %v19359_v0  ;;  %v419_v25 = vsel %vm343_vm1, %v414_v12, %v418_v14  ;;  %v422_v37 = vor.u32 %v420_v26, %v418_v14  ;;  %v19308_v14 = vshll.u32 %v14727_v61, 16 }
  0x2f   :  { %v2727_v32 = vsel %vm343_vm1, %v2722_v17, %v2726_v18  ;;  %v444_v17 = vshrl.u32 %v14172_v42, 16 }
  0x30   :  { %v427_v46 = vsel %vm343_vm1, %v422_v37, %v426_v27  ;;  %v2750_v27 = vrot.slane %v19308_v14, 1  ;;  %v19309_v37 = vshrl.u32 %v14727_v61, 16 }
  0x34   :  { %10868 = vmatmul.mubr.msk.bf16.gmra.mrb[20].mxu1 %vm687_vm3, %v395_v29  ;;  %v19321_v29 = vshrl.u32 %v14661_v63, 16 }
  0x35   :  { %10871 = vmatprep.mubr.msk.bf16.mxu1 %vm14388_vm2, %v19359_v0  ;;  %11390 = vmatmul.mubr.msk.bf16.gmra.mrb[20].mxu0 %vm687_vm3, %v2703_v34  ;;  %v432_v34 = vshll.u32 %v14170_v24, 16 }
  0x36   :  { %11393 = vmatprep.mubr.msk.bf16.mxu0 %vm14388_vm2, %v19359_v0  ;;  %v2730_v39 = vor.u32 %v19321_v29, %v2726_v18  ;;  %v448_v18 = vshll.u32 %v14174_v1, 16 }
  0x38   :  { %v2735_v51 = vsel %vm343_vm1, %v2730_v39, %v2734_v40  ;;  %v14760_v39 = vld [vmem:[%s19282_s0 + $0x74] sm:$0xff]   ;;  %v450_v42 = vrot.slane %v448_v18, 1 }
  0x3c   :  { %10872 = vmatmul.mubr.msk.bf16.gmra.mrb[24].mxu1 %vm687_vm3, %v403_v48  ;;  %v434_v48 = vrot.slane %v432_v34, 1 }
  0x3d   :  { %10875 = vmatprep.mubr.msk.bf16.mxu1 %vm14388_vm2, %v19359_v0  ;;  %11394 = vmatmul.mubr.msk.bf16.gmra.mrb[24].mxu0 %vm687_vm3, %v2711_v52  ;;  %v19312_v52 = vshll.u32 %v14705_v41, 16 }
  0x3e   :  { %11397 = vmatprep.mubr.msk.bf16.mxu0 %vm14388_vm2, %v19359_v0  ;;  %v438_v24 = vor.u32 %v436_v3, %v434_v48 }
  0x3f   :  { %v2742_v60 = vrot.slane %v19312_v52, 1 }
  0x40   :  { %v443_v34 = vsel %vm343_vm1, %v438_v24, %v442_v8 }
  0x41   :  { %v2743_v12 = vsel %vm343_vm1, %v2738_v59, %v2742_v60  ;;  %v2754_v59 = vor.u32 %v19309_v37, %v2750_v27 }
  0x44   :  { %10876 = vmatmul.mubr.msk.bf16.gmra.mrb[28].mxu1 %vm687_vm3, %v411_v2  ;;  %v435_v2 = vsel %vm343_vm1, %v430_v58, %v434_v48  ;;  %v14178_v48 = vld [vmem:[%s19282_s0 + $0x78] sm:$0xff]   ;;  %v446_v58 = vor.u32 %v444_v17, %v442_v8 }
  0x45   :  { %10879 = vmatprep.mubr.msk.bf16.mxu1 %vm14388_vm2, %v19359_v0  ;;  %11398 = vmatmul.mubr.msk.bf16.gmra.mrb[28].mxu0 %vm687_vm3, %v2719_v9  ;;  %v19313_v9 = vshrl.u32 %v14705_v41, 16  ;;  %v14785_v17 = vld [vmem:[%s19282_s0 + $0x7c] sm:$0xff]  }
  0x46   :  { %11401 = vmatprep.mubr.msk.bf16.mxu0 %vm14388_vm2, %v19359_v0 }
  0x47   :  { %v2746_v26 = vor.u32 %v19313_v9, %v2742_v60 }
  0x49   :  { %v2751_v40 = vsel %vm343_vm1, %v2746_v26, %v2750_v27  ;;  %v19301_v27 = vshrl.u32 %v14760_v39, 16 }
  0x4c   :  { %10880 = vmatmul.mubr.msk.bf16.gmra.mrb[32].mxu1 %vm687_vm3, %v419_v25  ;;  %v14176_v25 = vld [vmem:[%s19282_s0 + $0x70] sm:$0xff]  }
  0x4d   :  { %10883 = vmatprep.mubr.msk.bf16.mxu1 %vm14388_vm2, %v19359_v0  ;;  %11402 = vmatmul.mubr.msk.bf16.gmra.mrb[32].mxu0 %vm687_vm3, %v2727_v32  ;;  %v19304_v32 = vshll.u32 %v14739_v16, 16  ;;  %v456_v47 = vshll.u32 %v14176_v25, 16  ;;  %v460_v3 = vshrl.u32 %v14176_v25, 16 }
  0x4e   :  { %11405 = vmatprep.mubr.msk.bf16.mxu0 %vm14388_vm2, %v19359_v0 }
  0x4f   :  { %v458_v60 = vrot.slane %v456_v47, 1  ;;  %v14180_v47 = vld [vmem:[%s19282_s0 + $0x80] sm:$0xff]  }
  0x54   :  { %10884 = vmatmul.mubr.msk.bf16.gmra.mrb[36].mxu1 %vm687_vm3, %v427_v46  ;;  %v452_v46 = vshrl.u32 %v14174_v1, 16  ;;  %v19300_v1 = vshll.u32 %v14760_v39, 16 }
  0x55   :  { %10887 = vmatprep.mubr.msk.bf16.mxu1 %vm14388_vm2, %v19359_v0  ;;  %11406 = vmatmul.mubr.msk.bf16.gmra.mrb[36].mxu0 %vm687_vm3, %v2735_v51  ;;  %v2758_v51 = vrot.slane %v19304_v32, 1 }
  0x56   :  { %11409 = vmatprep.mubr.msk.bf16.mxu0 %vm14388_vm2, %v19359_v0  ;;  %v2766_v8 = vrot.slane %v19300_v1, 1  ;;  %v454_v24 = vor.u32 %v452_v46, %v450_v42  ;;  %v468_v46 = vshrl.u32 %v14178_v48, 16 }
  0x57   :  { %v2759_v18 = vsel %vm343_vm1, %v2754_v59, %v2758_v51  ;;  %v2762_v25 = vor.u32 %v19305_v57, %v2758_v51  ;;  %v462_v51 = vor.u32 %v460_v3, %v458_v60 }
  0x58   :  { %v2770_v59 = vor.u32 %v19301_v27, %v2766_v8 }
  0x5c   :  { %10888 = vmatmul.mubr.msk.bf16.gmra.mrb[40].mxu1 %vm687_vm3, %v435_v2  ;;  %v451_v2 = vsel %vm343_vm1, %v446_v58, %v450_v42  ;;  %v2767_v42 = vsel %vm343_vm1, %v2762_v25, %v2766_v8  ;;  %v14805_v58 = vld [vmem:[%s19282_s0 + $0x84] sm:$0xff]  }
  0x5d   :  { %10891 = vmatprep.mubr.msk.bf16.mxu1 %vm14388_vm2, %v19359_v0  ;;  %11410 = vmatmul.mubr.msk.bf16.gmra.mrb[40].mxu0 %vm687_vm3, %v2743_v12  ;;  %v464_v12 = vshll.u32 %v14178_v48, 16  ;;  %v14182_v25 = vld [vmem:[%s19282_s0 + $0x88] sm:$0xff]  }
  0x5e   :  { %11413 = vmatprep.mubr.msk.bf16.mxu0 %vm14388_vm2, %v19359_v0 }
  0x5f   :  { %v466_v26 = vrot.slane %v464_v12, 1 }
  0x61   :  { %v467_v12 = vsel %vm343_vm1, %v462_v51, %v466_v26  ;;  %v470_v8 = vor.u32 %v468_v46, %v466_v26  ;;  %v14837_v51 = vld [vmem:[%s19282_s0 + $0x8c] sm:$0xff]   ;;  %v480_v26 = vshll.u32 %v14182_v25, 16 }
  0x64   :  { %10892 = vmatmul.mubr.msk.bf16.gmra.mrb[44].mxu1 %vm687_vm3, %v443_v34  ;;  %v459_v34 = vsel %vm343_vm1, %v454_v24, %v458_v60  ;;  %v19293_v24 = vshll.u32 %v14805_v58, 16 }
  0x65   :  { %10895 = vmatprep.mubr.msk.bf16.mxu1 %vm14388_vm2, %v19359_v0  ;;  %11414 = vmatmul.mubr.msk.bf16.gmra.mrb[44].mxu0 %vm687_vm3, %v2751_v40  ;;  %v19294_v40 = vshll.u32 %v14785_v17, 16 }
  0x66   :  { %11417 = vmatprep.mubr.msk.bf16.mxu0 %vm14388_vm2, %v19359_v0 }
  0x67   :  { %v2774_v48 = vrot.slane %v19294_v40, 1  ;;  %v14849_v40 = vld [vmem:[%s19282_s0 + $0x90] sm:$0xff]  }
  0x69   :  { %v2775_v60 = vsel %vm343_vm1, %v2770_v59, %v2774_v48 }
  0x6c   :  { %10896 = vmatmul.mubr.msk.bf16.gmra.mrb[48].mxu1 %vm687_vm3, %v451_v2  ;;  %v472_v2 = vshll.u32 %v14180_v47, 16 }
  0x6d   :  { %10899 = vmatprep.mubr.msk.bf16.mxu1 %vm14388_vm2, %v19359_v0  ;;  %11418 = vmatmul.mubr.msk.bf16.gmra.mrb[48].mxu0 %vm687_vm3, %v2759_v18  ;;  %v19295_v18 = vshrl.u32 %v14785_v17, 16 }
  0x6e   :  { %11421 = vmatprep.mubr.msk.bf16.mxu0 %vm14388_vm2, %v19359_v0  ;;  %v474_v3 = vrot.slane %v472_v2, 1  ;;  %v476_v2 = vshrl.u32 %v14180_v47, 16 }
  0x70   :  { %v475_v59 = vsel %vm343_vm1, %v470_v8, %v474_v3 }
  0x74   :  { %10900 = vmatmul.mubr.msk.bf16.gmra.mrb[52].mxu1 %vm687_vm3, %v459_v34  ;;  %v2778_v34 = vor.u32 %v19295_v18, %v2774_v48  ;;  %v478_v48 = vor.u32 %v476_v2, %v474_v3  ;;  %v14861_v3 = vld [vmem:[%s19282_s0 + $0x94] sm:$0xff]   ;;  %v488_v2 = vshll.u32 %v14849_v40, 16 }
  0x75   :  { %10903 = vmatprep.mubr.msk.bf16.mxu1 %vm14388_vm2, %v19359_v0  ;;  %11422 = vmatmul.mubr.msk.bf16.gmra.mrb[52].mxu0 %vm687_vm3, %v2767_v42  ;;  %v2782_v42 = vrot.slane %v19293_v24, 1  ;;  %v482_v24 = vrot.slane %v480_v26, 1  ;;  %v19298_v18 = vshll.u32 %v14861_v3, 16 }
  0x76   :  { %11425 = vmatprep.mubr.msk.bf16.mxu0 %vm14388_vm2, %v19359_v0 }
  0x77   :  { %v2783_v46 = vsel %vm343_vm1, %v2778_v34, %v2782_v42  ;;  %v483_v34 = vsel %vm343_vm1, %v478_v48, %v482_v24  ;;  %v14874_v48 = vld [vmem:[%s19282_s0 + $0x98] sm:$0xff]  }
  0x7c   :  { %10904 = vmatmul.mubr.msk.bf16.gmra.mrb[56].mxu1 %vm687_vm3, %v467_v12  ;;  %v19297_v12 = vshrl.u32 %v14805_v58, 16 }
  0x7d   :  { %10907 = vmatprep.mubr.msk.bf16.mxu1 %vm14388_vm2, %v19359_v0  ;;  %11426 = vmatmul.mubr.msk.bf16.gmra.mrb[56].mxu0 %vm687_vm3, %v2775_v60  ;;  %v19296_v60 = vshll.u32 %v14837_v51, 16 }
  0x7e   :  { %11429 = vmatprep.mubr.msk.bf16.mxu0 %vm14388_vm2, %v19359_v0  ;;  %v2786_v47 = vor.u32 %v19297_v12, %v2782_v42  ;;  %v19303_v12 = vshrl.u32 %v14861_v3, 16 }
  0x7f   :  { %v2790_v8 = vrot.slane %v19296_v60, 1  ;;  %v490_v60 = vrot.slane %v488_v2, 1  ;;  %v496_v2 = vshll.u32 %v14874_v48, 16 }
  0x81   :  { %v2791_v26 = vsel %vm343_vm1, %v2786_v47, %v2790_v8  ;;  %v2798_v47 = vrot.slane %v19298_v18, 1 }
  0x84   :  { %10908 = vmatmul.mubr.msk.bf16.gmra.mrb[60].mxu1 %vm687_vm3, %v475_v59  ;;  %v484_v59 = vshrl.u32 %v14182_v25, 16 }
  0x85   :  { %10911 = vmatprep.mubr.msk.bf16.mxu1 %vm14388_vm2, %v19359_v0  ;;  %11430 = vmatmul.mubr.msk.bf16.gmra.mrb[60].mxu0 %vm687_vm3, %v2783_v46  ;;  %v19299_v46 = vshrl.u32 %v14837_v51, 16 }
  0x86   :  { %11433 = vmatprep.mubr.msk.bf16.mxu0 %vm14388_vm2, %v19359_v0  ;;  %v486_v42 = vor.u32 %v484_v59, %v482_v24  ;;  %v14886_v24 = vld [vmem:[%s19282_s0 + $0x9c] sm:$0xff]   ;;  %v492_v59 = vshrl.u32 %v14849_v40, 16 }
  0x87   :  { %v2794_v25 = vor.u32 %v19299_v46, %v2790_v8  ;;  %v19302_v8 = vshll.u32 %v14886_v24, 16  ;;  %v498_v46 = vrot.slane %v496_v2, 1  ;;  %v500_v2 = vshrl.u32 %v14874_v48, 16 }
  0x88   :  { %v494_v18 = vor.u32 %v492_v59, %v490_v60  ;;  %v19307_v27 = vshrl.u32 %v14886_v24, 16 }
  0x8a   :  { %v499_v59 = vsel %vm343_vm1, %v494_v18, %v498_v46  ;;  %v14926_v18 = vld [vmem:[%s19282_s0 + $0xa8] sm:$0xff]  }
  0x8c   :  { %10912 = vmatmul.mubr.msk.bf16.gmra.mrb[64].mxu1 %vm687_vm3, %v483_v34  ;;  %v491_v34 = vsel %vm343_vm1, %v486_v42, %v490_v60  ;;  %v14900_v42 = vld [vmem:[%s19282_s0 + $0xa0] sm:$0xff]  }
  0x8d   :  { %10915 = vmatprep.mubr.msk.bf16.mxu1 %vm14388_vm2, %v19359_v0  ;;  %11434 = vmatmul.mubr.msk.bf16.gmra.mrb[64].mxu0 %vm687_vm3, %v2791_v26  ;;  %v2799_v26 = vsel %vm343_vm1, %v2794_v25, %v2798_v47  ;;  %v2802_v25 = vor.u32 %v19303_v12, %v2798_v47  ;;  %v14912_v60 = vld [vmem:[%s19282_s0 + $0xa4] sm:$0xff]  }
  0x8e   :  { %11437 = vmatprep.mubr.msk.bf16.mxu0 %vm14388_vm2, %v19359_v0  ;;  %v19306_v47 = vshll.u32 %v14912_v60, 16  ;;  %v19311_v57 = vshrl.u32 %v14912_v60, 16 }
  0x94   :  { %10916 = vmatmul.mubr.msk.bf16.gmra.mrb[68].mxu1 %vm687_vm3, %v491_v34  ;;  %v2806_v34 = vrot.slane %v19302_v8, 1  ;;  %v502_v8 = vor.u32 %v500_v2, %v498_v46  ;;  %v14938_v46 = vld [vmem:[%s19282_s0 + $0xac] sm:$0xff]  }
  0x95   :  { %10919 = vmatprep.mubr.msk.bf16.mxu1 %vm14388_vm2, %v19359_v0  ;;  %11438 = vmatmul.mubr.msk.bf16.gmra.mrb[68].mxu0 %vm687_vm3, %v2799_v26  ;;  %v504_v26 = vshll.u32 %v14900_v42, 16  ;;  %v19315_v37 = vshrl.u32 %v14938_v46, 16 }
  0x96   :  { %11441 = vmatprep.mubr.msk.bf16.mxu0 %vm14388_vm2, %v19359_v0  ;;  %v2807_v1 = vsel %vm343_vm1, %v2802_v25, %v2806_v34  ;;  %v2810_v25 = vor.u32 %v19307_v27, %v2806_v34  ;;  %v19310_v34 = vshll.u32 %v14938_v46, 16 }
  0x97   :  { %v506_v12 = vrot.slane %v504_v26, 1  ;;  %v508_v26 = vshrl.u32 %v14900_v42, 16 }
  0x99   :  { %v507_v2 = vsel %vm343_vm1, %v502_v8, %v506_v12  ;;  %v14952_v8 = vld [vmem:[%s19282_s0 + $0xb0] sm:$0xff]  }
  0x9c   :  { %10920 = vmatmul.mubr.msk.bf16.gmra.mrb[72].mxu1 %vm687_vm3, %v499_v59  ;;  %v2814_v59 = vrot.slane %v19306_v47, 1  ;;  %v510_v47 = vor.u32 %v508_v26, %v506_v12  ;;  %v14964_v12 = vld [vmem:[%s19282_s0 + $0xb4] sm:$0xff]  }
  0x9d   :  { %10923 = vmatprep.mubr.msk.bf16.mxu1 %vm14388_vm2, %v19359_v0  ;;  %11442 = vmatmul.mubr.msk.bf16.gmra.mrb[72].mxu0 %vm687_vm3, %v2807_v1  ;;  %v512_v1 = vshll.u32 %v14926_v18, 16  ;;  %v19319_v9 = vshrl.u32 %v14964_v12, 16 }
  0x9e   :  { %11445 = vmatprep.mubr.msk.bf16.mxu0 %vm14388_vm2, %v19359_v0  ;;  %v2815_v32 = vsel %vm343_vm1, %v2810_v25, %v2814_v59  ;;  %v2818_v25 = vor.u32 %v19311_v57, %v2814_v59  ;;  %v19314_v59 = vshll.u32 %v14964_v12, 16 }
  0x9f   :  { %v514_v27 = vrot.slane %v512_v1, 1  ;;  %v516_v1 = vshrl.u32 %v14926_v18, 16 }
  0xa1   :  { %v515_v26 = vsel %vm343_vm1, %v510_v47, %v514_v27  ;;  %v14978_v47 = vld [vmem:[%s19282_s0 + $0xb8] sm:$0xff]  }
  0xa4   :  { %10924 = vmatmul.mubr.msk.bf16.gmra.mrb[76].mxu1 %vm687_vm3, %v507_v2  ;;  %v2822_v2 = vrot.slane %v19310_v34, 1  ;;  %v518_v34 = vor.u32 %v516_v1, %v514_v27  ;;  %v14990_v27 = vld [vmem:[%s19282_s0 + $0xbc] sm:$0xff]  }
  0xa5   :  { %10927 = vmatprep.mubr.msk.bf16.mxu1 %vm14388_vm2, %v19359_v0  ;;  %11446 = vmatmul.mubr.msk.bf16.gmra.mrb[76].mxu0 %vm687_vm3, %v2815_v32  ;;  %v520_v32 = vshll.u32 %v14952_v8, 16  ;;  %v19323_v49 = vshrl.u32 %v14990_v27, 16 }
  0xa6   :  { %11449 = vmatprep.mubr.msk.bf16.mxu0 %vm14388_vm2, %v19359_v0  ;;  %v2823_v14 = vsel %vm343_vm1, %v2818_v25, %v2822_v2  ;;  %v2826_v25 = vor.u32 %v19315_v37, %v2822_v2  ;;  %v19318_v2 = vshll.u32 %v14990_v27, 16 }
  0xa7   :  { %v522_v57 = vrot.slane %v520_v32, 1  ;;  %v524_v32 = vshrl.u32 %v14952_v8, 16 }
  0xa9   :  { %v523_v1 = vsel %vm343_vm1, %v518_v34, %v522_v57  ;;  %v15004_v34 = vld [vmem:[%s19282_s0 + $0xc0] sm:$0xff]  }
  0xac   :  { %10928 = vmatmul.mubr.msk.bf16.gmra.mrb[80].mxu1 %vm687_vm3, %v515_v26  ;;  %v2830_v26 = vrot.slane %v19314_v59, 1  ;;  %v526_v59 = vor.u32 %v524_v32, %v522_v57  ;;  %v15016_v57 = vld [vmem:[%s19282_s0 + $0xc4] sm:$0xff]  }
  0xad   :  { %10931 = vmatprep.mubr.msk.bf16.mxu1 %vm14388_vm2, %v19359_v0  ;;  %11450 = vmatmul.mubr.msk.bf16.gmra.mrb[80].mxu0 %vm687_vm3, %v2823_v14  ;;  %v528_v14 = vshll.u32 %v14978_v47, 16  ;;  %v19327_v29 = vshrl.u32 %v15016_v57, 16 }
  0xae   :  { %11453 = vmatprep.mubr.msk.bf16.mxu0 %vm14388_vm2, %v19359_v0  ;;  %v2831_v52 = vsel %vm343_vm1, %v2826_v25, %v2830_v26  ;;  %v2834_v25 = vor.u32 %v19319_v9, %v2830_v26  ;;  %v19322_v26 = vshll.u32 %v15016_v57, 16 }
  0xaf   :  { %v530_v37 = vrot.slane %v528_v14, 1  ;;  %v532_v14 = vshrl.u32 %v14978_v47, 16 }
  0xb1   :  { %v531_v32 = vsel %vm343_vm1, %v526_v59, %v530_v37  ;;  %v15030_v59 = vld [vmem:[%s19282_s0 + $0xc8] sm:$0xff]  }
  0xb4   :  { %10932 = vmatmul.mubr.msk.bf16.gmra.mrb[84].mxu1 %vm687_vm3, %v523_v1  ;;  %v2838_v1 = vrot.slane %v19318_v2, 1  ;;  %v534_v2 = vor.u32 %v532_v14, %v530_v37  ;;  %v15042_v37 = vld [vmem:[%s19282_s0 + $0xcc] sm:$0xff]  }
  0xb5   :  { %10935 = vmatprep.mubr.msk.bf16.mxu1 %vm14388_vm2, %v19359_v0  ;;  %11454 = vmatmul.mubr.msk.bf16.gmra.mrb[84].mxu0 %vm687_vm3, %v2831_v52  ;;  %v536_v52 = vshll.u32 %v15004_v34, 16  ;;  %19460 = vst [vmem:[#allocation4_spill] sm:$0xff] %v15042_v37  ;;  %v19331_v10 = vshrl.u32 %v15042_v37, 16 }
  0xb6   :  { %11457 = vmatprep.mubr.msk.bf16.mxu0 %vm14388_vm2, %v19359_v0  ;;  %v2839_v33 = vsel %vm343_vm1, %v2834_v25, %v2838_v1  ;;  %v2842_v25 = vor.u32 %v19323_v49, %v2838_v1  ;;  %v19326_v1 = vshll.u32 %v15042_v37, 16 }
  0xb7   :  { %v538_v9 = vrot.slane %v536_v52, 1  ;;  %v540_v52 = vshrl.u32 %v15004_v34, 16 }
  0xb9   :  { %v539_v14 = vsel %vm343_vm1, %v534_v2, %v538_v9  ;;  %v15056_v2 = vld [vmem:[%s19282_s0 + $0xd0] sm:$0xff]  }
  0xbc   :  { %10936 = vmatmul.mubr.msk.bf16.gmra.mrb[88].mxu1 %vm687_vm3, %v531_v32  ;;  %v2846_v32 = vrot.slane %v19322_v26, 1  ;;  %v542_v26 = vor.u32 %v540_v52, %v538_v9  ;;  %v15068_v9 = vld [vmem:[%s19282_s0 + $0xd4] sm:$0xff]  }
  0xbd   :  { %10939 = vmatprep.mubr.msk.bf16.mxu1 %vm14388_vm2, %v19359_v0  ;;  %11458 = vmatmul.mubr.msk.bf16.gmra.mrb[88].mxu0 %vm687_vm3, %v2839_v33  ;;  %v544_v33 = vshll.u32 %v15030_v59, 16  ;;  %19461 = vst [vmem:[#allocation5_spill] sm:$0xff] %v15068_v9  ;;  %v19335_v53 = vshrl.u32 %v15068_v9, 16 }
  0xbe   :  { %11461 = vmatprep.mubr.msk.bf16.mxu0 %vm14388_vm2, %v19359_v0  ;;  %v2847_v11 = vsel %vm343_vm1, %v2842_v25, %v2846_v32  ;;  %v2850_v25 = vor.u32 %v19327_v29, %v2846_v32  ;;  %v19330_v32 = vshll.u32 %v15068_v9, 16 }
  0xbf   :  { %v546_v49 = vrot.slane %v544_v33, 1  ;;  %v548_v33 = vshrl.u32 %v15030_v59, 16 }
  0xc1   :  { %v547_v52 = vsel %vm343_vm1, %v542_v26, %v546_v49  ;;  %v15082_v26 = vld [vmem:[%s19282_s0 + $0xd8] sm:$0xff]  }
  0xc4   :  { %10940 = vmatmul.mubr.msk.bf16.gmra.mrb[92].mxu1 %vm687_vm3, %v539_v14  ;;  %v2854_v14 = vrot.slane %v19326_v1, 1  ;;  %v550_v1 = vor.u32 %v548_v33, %v546_v49  ;;  %v15094_v49 = vld [vmem:[%s19282_s0 + $0xdc] sm:$0xff]  }
  0xc5   :  { %10943 = vmatprep.mubr.msk.bf16.mxu1 %vm14388_vm2, %v19359_v0  ;;  %11462 = vmatmul.mubr.msk.bf16.gmra.mrb[92].mxu0 %vm687_vm3, %v2847_v11  ;;  %v552_v11 = vshll.u32 %v15056_v2, 16  ;;  %19462 = vst [vmem:[#allocation6_spill] sm:$0xff] %v15094_v49 }
  0xc6   :  { %11465 = vmatprep.mubr.msk.bf16.mxu0 %vm14388_vm2, %v19359_v0  ;;  %v2855_v54 = vsel %vm343_vm1, %v2850_v25, %v2854_v14  ;;  %v2858_v25 = vor.u32 %v19331_v10, %v2854_v14  ;;  %v19334_v14 = vshll.u32 %v15094_v49, 16 }
  0xc7   :  { %v554_v29 = vrot.slane %v552_v11, 1  ;;  %v556_v11 = vshrl.u32 %v15056_v2, 16 }
  0xc9   :  { %v555_v33 = vsel %vm343_vm1, %v550_v1, %v554_v29  ;;  %v15108_v1 = vld [vmem:[%s19282_s0 + $0xe0] sm:$0xff]  }
  0xcc   :  { %10944 = vmatmul.mubr.msk.bf16.gmra.mrb[96].mxu1 %vm687_vm3, %v547_v52  ;;  %v2862_v52 = vrot.slane %v19330_v32, 1  ;;  %v558_v32 = vor.u32 %v556_v11, %v554_v29  ;;  %v3588_v29 = vld [vmem:[%s19282_s0 + $0x4] sm:$0xe] }
  0xcd   :  { %10947 = vmatprep.mubr.msk.bf16.mxu1 %vm14388_vm2, %v19359_v0  ;;  %11466 = vmatmul.mubr.msk.bf16.gmra.mrb[96].mxu0 %vm687_vm3, %v2855_v54  ;;  %v560_v54 = vshll.u32 %v15082_v26, 16  ;;  %v15128_v35 = vcombine.low %v3588_v29, %v14282_v20  ;;  %v124_v20 = vld [vmem:[%s19281_s1] sm:$0xf] }
  0xce   :  { %11469 = vmatprep.mubr.msk.bf16.mxu0 %vm14388_vm2, %v19359_v0  ;;  %v2863_v36 = vsel %vm343_vm1, %v2858_v25, %v2862_v52  ;;  %v2866_v25 = vor.u32 %v19335_v53, %v2862_v52  ;;  %v15138_v53 = vld [vmem:[%s19282_s0 + $0xe8] sm:$0xff]  }
  0xcf   :  { %v562_v10 = vrot.slane %v560_v54, 1  ;;  %v564_v54 = vshrl.u32 %v15082_v26, 16 }
  0xd1   :  { %v563_v11 = vsel %vm343_vm1, %v558_v32, %v562_v10 }
  0xd4   :  { %10948 = vmatmul.mubr.msk.bf16.gmra.mrb[100].mxu1 %vm687_vm3, %v555_v33  ;;  %v15117_v33 = vrot.slane %v19334_v14, 1  ;;  %v566_v14 = vor.u32 %v564_v54, %v562_v10  ;;  %v14283_v10 = vld [vmem:[%s19282_s0 + $0xc] sm:$0xff]  }
  0xd5   :  { %10951 = vmatprep.mubr.msk.bf16.mxu1 %vm14388_vm2, %v19359_v0  ;;  %11470 = vmatmul.mubr.msk.bf16.gmra.mrb[100].mxu0 %vm687_vm3, %v2863_v36  ;;  %v568_v36 = vshll.u32 %v15108_v1, 16  ;;  %v3595_v29 = vrot.slane %v14283_v10, 1 }
  0xd6   :  { %11473 = vmatprep.mubr.msk.bf16.mxu0 %vm14388_vm2, %v19359_v0  ;;  %19463 = vst [vmem:[#allocation7_spill] sm:$0xff] %v15117_v33  ;;  %v2871_v52 = vsel %vm343_vm1, %v2866_v25, %v15117_v33  ;;  %v3594_v25 = vrot.slane %v15128_v35, 1 }
  0xd7   :  { %v570_v32 = vrot.slane %v568_v36, 1  ;;  %v572_v36 = vshrl.u32 %v15108_v1, 16 }
  0xd8   :  { %v15156_v6 = vsel %vm1670_vm4, %v3594_v25, %v3595_v29  ;;  %v14284_v25 = vld [vmem:[%s19282_s0 + $0x14] sm:$0xff]  }
  0xd9   :  { %v571_v54 = vsel %vm343_vm1, %v566_v14, %v570_v32  ;;  %19464 = vst [vmem:[#allocation8_spill] sm:$0xff] %v15156_v6  ;;  %v574_v10 = vor.u32 %v572_v36, %v570_v32  ;;  %v15164_v14 = vld [vmem:[%s19282_s0 + $0xf0] sm:$0xff]   ;;  %v580_v32 = vshrl.u32 %v15138_v53, 16 }
  0xda   :  { %v584_v36 = vshll.u32 %v15164_v14, 16 }
  0xdc   :  { %10952 = vmatmul.mubr.msk.bf16.gmra.mrb[104].mxu1 %vm687_vm3, %v563_v11  ;;  %v1286_v11 = vsel %vm817_vm0, %v124_v20, 0  ;;  %v586_v56 = vrot.slane %v584_v36, 1 }
  0xdd   :  { %10955 = vmatprep.mubr.msk.bf16.mxu1 %vm14388_vm2, %v19359_v0  ;;  %11474 = vmatmul.mubr.msk.bf16.gmra.mrb[104].mxu0 %vm687_vm3, %v2871_v52  ;;  %v576_v52 = vshll.u32 %v15138_v53, 16 }
  0xde   :  { %11543 = vmatprep.mubr.msk.bf16.mxu0 %vm14388_vm2, %v19359_v0  ;;  %11020 = vmatpush3.bf16.msra.mxu1 %v1286_v11  ;;  %v3597_v11 = vrot.slane %v14284_v25, 1  ;;  %v15185_v25 = vld [vmem:[%s19282_s0 + $0xf8] sm:$0xff]  }
  0xdf   :  { %11193 = vmatprep.subr.bf16.mxu1 %v19359_v0  ;;  %v578_v20 = vrot.slane %v576_v52, 1 }
  0xe0   :  { %v15177_v52 = vsel %vm1670_vm4, %v3595_v29, %v3597_v11  ;;  %v14285_v29 = vld [vmem:[%s19282_s0 + $0x1c] sm:$0xff]  }
  0xe1   :  { %19465 = vst [vmem:[#allocation9_spill] sm:$0xff] %v15177_v52  ;;  %v582_v19 = vor.u32 %v580_v32, %v578_v20  ;;  %v592_v32 = vshll.u32 %v15185_v25, 16 }
  0xe3   :  { %v594_v44 = vrot.slane %v592_v32, 1  ;;  %v596_v32 = vshrl.u32 %v15185_v25, 16 }
  0xe4   :  { %10956 = vmatmul.mubr.msk.bf16.gmra.mrb[108].mxu1 %vm687_vm3, %v571_v54  ;;  %v579_v54 = vsel %vm343_vm1, %v574_v10, %v578_v20  ;;  %v3599_v10 = vrot.slane %v14285_v29, 1  ;;  %v588_v20 = vshrl.u32 %v15164_v14, 16  ;;  %v15206_v29 = vld [vmem:[%s19282_s0 + $0x100] sm:$0xff]  }
  0xe5   :  { %10959 = vmatprep.mubr.msk.bf16.mxu1 %vm14388_vm2, %v19359_v0  ;;  %11544 = vmatmul.mubr.msk.bf16.vlgmr.msra.gmra.mrb[0].mxu0 %vm687_vm3, %v15156_v6  ;;  %v600_v55 = vshll.u32 %v15206_v29, 16 }
  0xe6   :  { %11547 = vmatprep.mubr.msk.bf16.mxu0 %vm14388_vm2, %v19359_v0  ;;  %v15198_v36 = vsel %vm1670_vm4, %v3597_v11, %v3599_v10  ;;  %v590_v4 = vor.u32 %v588_v20, %v586_v56 }
  0xe7   :  { %19466 = vst [vmem:[#allocation10_spill] sm:$0xff] %v15198_v36  ;;  %v602_v43 = vrot.slane %v600_v55, 1 }
  0xe8   :  { %v595_v20 = vsel %vm343_vm1, %v590_v4, %v594_v44  ;;  %v15232_v4 = vld [vmem:[%s19282_s0 + $0x108] sm:$0xff]  }
  0xe9   :  { %v608_v55 = vshll.u32 %v15232_v4, 16 }
  0xeb   :  { %v610_v30 = vrot.slane %v608_v55, 1 }
  0xec   :  { %10960 = vmatmul.mubr.msk.bf16.gmra.mrb[112].mxu1 %vm687_vm3, %v579_v54  ;;  %v587_v54 = vsel %vm343_vm1, %v582_v19, %v586_v56  ;;  %v9976_v19 = vld [vmem:[%s19281_s1 + $0x14] sm:$0xf]  ;;  %v14286_v56 = vld [vmem:[%s19282_s0 + $0x24] sm:$0xff]  }
  0xed   :  { %10963 = vmatprep.mubr.msk.bf16.mxu1 %vm14388_vm2, %v19359_v0  ;;  %11548 = vmatmul.mubr.msk.bf16.gmra.mrb[4].mxu0 %vm687_vm3, %v15177_v52  ;;  %v3601_v11 = vrot.slane %v14286_v56, 1  ;;  %v598_v56 = vor.u32 %v596_v32, %v594_v44  ;;  %v604_v44 = vshrl.u32 %v15206_v29, 16 }
  0xee   :  { %11551 = vmatprep.mubr.msk.bf16.mxu0 %vm14388_vm2, %v19359_v0 }
  0xef   :  { %v15224_v31 = vsel %vm1670_vm4, %v3599_v10, %v3601_v11  ;;  %v14287_v10 = vld [vmem:[%s19282_s0 + $0x2c] sm:$0xff]   ;;  %v606_v32 = vor.u32 %v604_v44, %v602_v43 }
  0xf0   :  { %19467 = vst [vmem:[#allocation11_spill] sm:$0xff] %v15224_v31 }
  0xf4   :  { %10964 = vmatmul.mubr.msk.bf16.gmra.mrb[116].mxu1 %vm687_vm3, %v587_v54  ;;  %v4590_v54 = vsel %vm817_vm0, %v9976_v19, 0  ;;  %v3603_v19 = vrot.slane %v14287_v10, 1  ;;  %v15253_v10 = vld [vmem:[%s19282_s0 + $0x110] sm:$0xff]  }
  0xf5   :  { %10967 = vmatprep.mubr.msk.bf16.mxu1 %vm14388_vm2, %v19359_v0  ;;  %11552 = vmatmul.mubr.msk.bf16.gmra.mrb[8].mxu0 %vm687_vm3, %v15198_v36  ;;  %v616_v44 = vshll.u32 %v15253_v10, 16 }
  0xf6   :  { %11555 = vmatprep.mubr.msk.bf16.mxu0 %vm14388_vm2, %v19359_v0  ;;  %11716 = vmatpush3.bf16.msra.mxu0 %v4590_v54  ;;  %v603_v54 = vsel %vm343_vm1, %v598_v56, %v602_v43  ;;  %v612_v43 = vshrl.u32 %v15232_v4, 16 }
  0xf7   :  { %11889 = vmatprep.subr.bf16.mxu0 %v19359_v0 }
  0xf8   :  { %v614_v21 = vor.u32 %v612_v43, %v610_v30 }
  0xfc   :  { %10968 = vmatmul.mubr.msk.bf16.gmra.mrb[120].mxu1 %vm687_vm3, %v595_v20  ;;  %v15245_v20 = vsel %vm1670_vm4, %v3601_v11, %v3603_v19  ;;  %v14288_v11 = vld [vmem:[%s19282_s0 + $0x34] sm:$0xff]  }
  0xfd   :  { %10971 = vmatprep.mubr.msk.bf16.mxu1 %vm14388_vm2, %v19359_v0  ;;  %11556 = vmatmul.mubr.msk.bf16.gmra.mrb[12].mxu0 %vm687_vm3, %v15224_v31  ;;  %19468 = vst [vmem:[#allocation12_spill] sm:$0xff] %v15245_v20  ;;  %v3605_v56 = vrot.slane %v14288_v11, 1  ;;  %v15274_v11 = vld [vmem:[%s19282_s0 + $0x118] sm:$0xff]  }
  0xfe   :  { %11559 = vmatprep.mubr.msk.bf16.mxu0 %vm14388_vm2, %v19359_v0  ;;  %v624_v43 = vshll.u32 %v15274_v11, 16 }
  0xff   :  { %v15266_v55 = vsel %vm1670_vm4, %v3603_v19, %v3605_v56  ;;  %v14289_v19 = vld [vmem:[%s19282_s0 + $0x3c] sm:$0xff]  }
 0x100   :  { %19469 = vst [vmem:[#allocation13_spill] sm:$0xff] %v15266_v55  ;;  %v626_v31 = vrot.slane %v624_v43, 1 }
 0x104   :  { %10972 = vmatmul.mubr.msk.bf16.gmra.mrb[124].mxu1 %vm687_vm3, %v603_v54  ;;  %v611_v54 = vsel %vm343_vm1, %v606_v32, %v610_v30  ;;  %v3607_v32 = vrot.slane %v14289_v19, 1  ;;  %v620_v30 = vshrl.u32 %v15253_v10, 16  ;;  %v15295_v19 = vld [vmem:[%s19282_s0 + $0x120] sm:$0xff]  }
 0x105   :  { %10975 = vmatprep.mubr.msk.bf16.mxu1 %vm14388_vm2, %v19359_v0  ;;  %11560 = vmatmul.mubr.msk.bf16.gmra.mrb[16].mxu0 %vm687_vm3, %v15245_v20  ;;  %v618_v20 = vrot.slane %v616_v44, 1 }
 0x106   :  { %11563 = vmatprep.mubr.msk.bf16.mxu0 %vm14388_vm2, %v19359_v0  ;;  %v15287_v44 = vsel %vm1670_vm4, %v3605_v56, %v3607_v32 }
 0x107   :  { %19470 = vst [vmem:[#allocation14_spill] sm:$0xff] %v15287_v44 }
 0x10c   :  { %10976 = vmatmul.mubr.msk.bf16.gmra.mrb[128].mxu1 %vm687_vm3, %v611_v54  ;;  %v619_v54 = vsel %vm343_vm1, %v614_v21, %v618_v20  ;;  %v14290_v21 = vld [vmem:[%s19282_s0 + $0x44] sm:$0xff]  }
 0x10d   :  { %10979 = vmatprep.mubr.msk.bf16.mxu1 %vm14388_vm2, %v19359_v0  ;;  %11564 = vmatmul.mubr.msk.bf16.gmra.mrb[20].mxu0 %vm687_vm3, %v15266_v55  ;;  %v622_v55 = vor.u32 %v620_v30, %v618_v20  ;;  %v3609_v56 = vrot.slane %v14290_v21, 1  ;;  %v628_v20 = vshrl.u32 %v15274_v11, 16  ;;  %v632_v30 = vshll.u32 %v15295_v19, 16  ;;  %v15316_v21 = vld [vmem:[%s19282_s0 + $0x128] sm:$0xff]  }
 0x10e   :  { %11567 = vmatprep.mubr.msk.bf16.mxu0 %vm14388_vm2, %v19359_v0 }
 0x10f   :  { %v15308_v43 = vsel %vm1670_vm4, %v3607_v32, %v3609_v56  ;;  %v634_v36 = vrot.slane %v632_v30, 1 }
 0x110   :  { %19471 = vst [vmem:[#allocation15_spill] sm:$0xff] %v15308_v43 }
 0x114   :  { %10980 = vmatmul.mubr.msk.bf16.gmra.mrb[132].mxu1 %vm687_vm3, %v619_v54  ;;  %v627_v54 = vsel %vm343_vm1, %v622_v55, %v626_v31  ;;  %v14291_v55 = vld [vmem:[%s19282_s0 + $0x4c] sm:$0xff]  }
 0x115   :  { %10983 = vmatprep.mubr.msk.bf16.mxu1 %vm14388_vm2, %v19359_v0  ;;  %11568 = vmatmul.mubr.msk.bf16.gmra.mrb[24].mxu0 %vm687_vm3, %v15287_v44  ;;  %v630_v44 = vor.u32 %v628_v20, %v626_v31  ;;  %v3611_v32 = vrot.slane %v14291_v55, 1  ;;  %v636_v31 = vshrl.u32 %v15295_v19, 16  ;;  %v640_v20 = vshll.u32 %v15316_v21, 16  ;;  %v15337_v55 = vld [vmem:[%s19282_s0 + $0x130] sm:$0xff]  }
 0x116   :  { %11571 = vmatprep.mubr.msk.bf16.mxu0 %vm14388_vm2, %v19359_v0  ;;  %19473 = vst [vmem:[#allocation17_spill] sm:$0xff] %v15337_v55 }
 0x117   :  { %v15329_v30 = vsel %vm1670_vm4, %v3609_v56, %v3611_v32  ;;  %v642_v52 = vrot.slane %v640_v20, 1 }
 0x118   :  { %19472 = vst [vmem:[#allocation16_spill] sm:$0xff] %v15329_v30 }
 0x11c   :  { %10984 = vmatmul.mubr.msk.bf16.gmra.mrb[136].mxu1 %vm687_vm3, %v627_v54  ;;  %v635_v54 = vsel %vm343_vm1, %v630_v44, %v634_v36  ;;  %v14292_v44 = vld [vmem:[%s19282_s0 + $0x54] sm:$0xff]  }
 0x11d   :  { %10987 = vmatprep.mubr.msk.bf16.mxu1 %vm14388_vm2, %v19359_v0  ;;  %11572 = vmatmul.mubr.msk.bf16.gmra.mrb[28].mxu0 %vm687_vm3, %v15308_v43  ;;  %v638_v43 = vor.u32 %v636_v31, %v634_v36  ;;  %v3613_v56 = vrot.slane %v14292_v44, 1  ;;  %v644_v36 = vshrl.u32 %v15316_v21, 16  ;;  %v648_v31 = vshll.u32 %v15337_v55, 16  ;;  %v15358_v44 = vld [vmem:[%s19282_s0 + $0x138] sm:$0xff]  }
 0x11e   :  { %11575 = vmatprep.mubr.msk.bf16.mxu0 %vm14388_vm2, %v19359_v0  ;;  %19475 = vst [vmem:[#allocation19_spill] sm:$0xff] %v15358_v44 }
 0x11f   :  { %v15350_v20 = vsel %vm1670_vm4, %v3611_v32, %v3613_v56  ;;  %v650_v6 = vrot.slane %v648_v31, 1 }
 0x120   :  { %19474 = vst [vmem:[#allocation18_spill] sm:$0xff] %v15350_v20 }
 0x124   :  { %10988 = vmatmul.mubr.msk.bf16.gmra.mrb[140].mxu1 %vm687_vm3, %v635_v54  ;;  %v643_v54 = vsel %vm343_vm1, %v638_v43, %v642_v52  ;;  %v14293_v43 = vld [vmem:[%s19282_s0 + $0x5c] sm:$0xff]  }
 0x125   :  { %10991 = vmatprep.mubr.msk.bf16.mxu1 %vm14388_vm2, %v19359_v0  ;;  %11576 = vmatmul.mubr.msk.bf16.gmra.mrb[32].mxu0 %vm687_vm3, %v15329_v30  ;;  %v646_v30 = vor.u32 %v644_v36, %v642_v52  ;;  %v3615_v32 = vrot.slane %v14293_v43, 1  ;;  %v652_v52 = vshrl.u32 %v15337_v55, 16  ;;  %v656_v36 = vshll.u32 %v15358_v44, 16  ;;  %v15379_v43 = vld [vmem:[%s19282_s0 + $0x140] sm:$0xff]  }
 0x126   :  { %11579 = vmatprep.mubr.msk.bf16.mxu0 %vm14388_vm2, %v19359_v0  ;;  %19477 = vst [vmem:[#allocation21_spill] sm:$0xff] %v15379_v43  ;;  %v3621_v55 = vrot.slane %v14760_v39, 1 }
 0x127   :  { %v15371_v31 = vsel %vm1670_vm4, %v3613_v56, %v3615_v32  ;;  %v658_v33 = vrot.slane %v656_v36, 1 }
 0x128   :  { %19476 = vst [vmem:[#allocation20_spill] sm:$0xff] %v15371_v31 }
 0x12c   :  { %10992 = vmatmul.mubr.msk.bf16.gmra.mrb[144].mxu1 %vm687_vm3, %v643_v54  ;;  %v651_v54 = vsel %vm343_vm1, %v646_v30, %v650_v6  ;;  %v14294_v30 = vld [vmem:[%s19282_s0 + $0x64] sm:$0xff]  }
 0x12d   :  { %10995 = vmatprep.mubr.msk.bf16.mxu1 %vm14388_vm2, %v19359_v0  ;;  %11580 = vmatmul.mubr.msk.bf16.gmra.mrb[36].mxu0 %vm687_vm3, %v15350_v20  ;;  %v654_v20 = vor.u32 %v652_v52, %v650_v6  ;;  %v3617_v56 = vrot.slane %v14294_v30, 1  ;;  %v660_v6 = vshrl.u32 %v15358_v44, 16  ;;  %v664_v52 = vshll.u32 %v15379_v43, 16  ;;  %v15400_v30 = vld [vmem:[%s19282_s0 + $0x148] sm:$0xff]  }
 0x12e   :  { %11583 = vmatprep.mubr.msk.bf16.mxu0 %vm14388_vm2, %v19359_v0 }
 0x12f   :  { %v15392_v36 = vsel %vm1670_vm4, %v3615_v32, %v3617_v56  ;;  %v666_v5 = vrot.slane %v664_v52, 1  ;;  %v15415_v52 = vld [vmem:[%s19282_s0 + $0x150] sm:$0xf] }
 0x130   :  { %19478 = vst [vmem:[#allocation22_spill] sm:$0xff] %v15392_v36 }
 0x134   :  { %10996 = vmatmul.mubr.msk.bf16.gmra.mrb[148].mxu1 %vm687_vm3, %v651_v54  ;;  %v659_v54 = vsel %vm343_vm1, %v654_v20, %v658_v33  ;;  %v14295_v20 = vld [vmem:[%s19282_s0 + $0x6c] sm:$0xff]  }
 0x135   :  { %10999 = vmatprep.mubr.msk.bf16.mxu1 %vm14388_vm2, %v19359_v0  ;;  %11584 = vmatmul.mubr.msk.bf16.gmra.mrb[40].mxu0 %vm687_vm3, %v15371_v31  ;;  %v662_v31 = vor.u32 %v660_v6, %v658_v33  ;;  %v3619_v32 = vrot.slane %v14295_v20, 1  ;;  %v668_v33 = vshrl.u32 %v15379_v43, 16  ;;  %v672_v6 = vshll.u32 %v15400_v30, 16 }
 0x136   :  { %11587 = vmatprep.mubr.msk.bf16.mxu0 %vm14388_vm2, %v19359_v0  ;;  %v19480_v20 = vmov 0.0  }
 0x137   :  { %v674_v43 = vrot.slane %v672_v6, 1  ;;  %v3623_v6 = vrot.slane %v14785_v17, 1 }
 0x13c   :  { %11000 = vmatmul.mubr.msk.bf16.gmra.mrb[152].mxu1 %vm687_vm3, %v659_v54  ;;  %v667_v54 = vsel %vm343_vm1, %v662_v31, %v666_v5  ;;  %v670_v31 = vor.u32 %v668_v33, %v666_v5  ;;  %v15438_v5 = vsel %vm1670_vm4, %v3619_v32, %v3621_v55 }
 0x13d   :  { %11003 = vmatprep.mubr.msk.bf16.mxu1 %vm14388_vm2, %v19359_v0  ;;  %11588 = vmatmul.mubr.msk.bf16.gmra.mrb[44].mxu0 %vm687_vm3, %v15392_v36  ;;  %v15421_v36 = vsel %vm1670_vm4, %v3617_v56, %v3619_v32  ;;  %19482 = vst [vmem:[#allocation25_spill] sm:$0xff] %v15438_v5  ;;  %v15450_v32 = vsel %vm1670_vm4, %v3621_v55, %v3623_v6  ;;  %v3627_v55 = vrot.slane %v14837_v51, 1 }
 0x13e   :  { %11591 = vmatprep.mubr.msk.bf16.mxu0 %vm14388_vm2, %v19359_v0  ;;  %v125_v0 = vld [vmem:[%s19282_s0 + $0x154] sm:$0x1]  ;;  %19479 = vst [vmem:[#allocation23_spill] sm:$0xff] %v15421_v36  ;;  %v675_v56 = vsel %vm343_vm1, %v670_v31, %v674_v43  ;;  %19483 = vst [vmem:[#allocation26_spill] sm:$0xff] %v15450_v32 }
 0x13f   :  { %v15427_v44 = vcombine.low %v15415_v52, %v125_v0 }
 0x141   :  { %19481 = vst [vmem:[#allocation24_spill] sm:$0xff] %v15427_v44  ;;  %v680_v16 = vshll.u32 %v15427_v44, 16 }
 0x143   :  { %v682_v33 = vrot.slane %v680_v16, 1  ;;  %v3625_v16 = vrot.slane %v14805_v58, 1 }
 0x144   :  { %11004 = vmatmul.mubr.msk.bf16.gmra.mrb[156].mxu1 %vm687_vm3, %v667_v54  ;;  %v676_v54 = vshrl.u32 %v15400_v30, 16 }
 0x145   :  { %11007 = vmatprep.mubr.msk.bf16.mxu1 %vm14388_vm2, %v19480_v20  ;;  %11592 = vmatmul.mubr.msk.bf16.gmra.mrb[48].mxu0 %vm687_vm3, %v15421_v36  ;;  %v15626_v36 = vld [vmem:[%s19282_s0 + $0x48] sm:$0xff]  }
 0x146   :  { %11595 = vmatprep.mubr.msk.bf16.mxu0 %vm14388_vm2, %v19480_v20  ;;  %v678_v0 = vor.u32 %v676_v54, %v674_v43  ;;  %v15462_v54 = vsel %vm1670_vm4, %v3623_v6, %v3625_v16  ;;  %19496 = vst [vmem:[#allocation39_spill] sm:$0xff] %v15626_v36 }
 0x147   :  { %19484 = vst [vmem:[#allocation27_spill] sm:$0xff] %v15462_v54 }
 0x148   :  { %v683_v31 = vsel %vm343_vm1, %v678_v0, %v682_v33  ;;  %v15473_v0 = vsel %vm1670_vm4, %v3625_v16, %v3627_v55  ;;  %v15507_v16 = vld [vmem:[%s19282_s0 + $0x10] sm:$0xff]  }
 0x149   :  { %19485 = vst [vmem:[#allocation28_spill] sm:$0xff] %v15473_v0 }
 0x14c   :  { %11008 = vmatmul.mubr.msk.bf16.gmra.mrb[160].mxu1 %vm687_vm3, %v675_v56  ;;  %v684_v56 = vshrl.u32 %v15427_v44, 16  ;;  %v15643_v44 = vld [vmem:[%s19282_s0 + $0xe4] sm:$0xff]  }
 0x14d   :  { %11011 = vmatprep.mubr.msk.bf16.mxu1 %vm14388_vm2, %v19480_v20  ;;  %11596 = vmatmul.mubr.msk.bf16.gmra.mrb[52].mxu0 %vm687_vm3, %v15438_v5  ;;  %v15609_v5 = vld [vmem:[%s19282_s0 + $0x40] sm:$0xff]  }
 0x14e   :  { %11599 = vmatprep.mubr.msk.bf16.mxu0 %vm14388_vm2, %v19480_v20  ;;  %v686_v43 = vor.u32 %v684_v56, %v682_v33  ;;  %v3629_v33 = vrot.slane %v14861_v3, 1  ;;  %19494 = vst [vmem:[#allocation37_spill] sm:$0xff] %v15609_v5 }
 0x150   :  { %v15485_v6 = vsel %vm1670_vm4, %v3627_v55, %v3629_v33 }
 0x151   :  { %19486 = vst [vmem:[#allocation29_spill] sm:$0xff] %v15485_v6 }
 0x154   :  { %11012 = vmatmul.mubr.msk.bf16.gmra.mrb[164].mxu1 %vm687_vm3, %v683_v31  ;;  %v15490_v31 = vld [vmem:[%s19282_s0 + $0x8] sm:$0xff]  }
 0x155   :  { %11015 = vmatprep.mubr.msk.bf16.mxu1 %vm14388_vm2, %v19480_v20  ;;  %11600 = vmatmul.mubr.msk.bf16.gmra.mrb[56].mxu0 %vm687_vm3, %v15450_v32  ;;  %v15592_v32 = vld [vmem:[%s19282_s0 + $0x38] sm:$0xff]  }
 0x156   :  { %11603 = vmatprep.mubr.msk.bf16.mxu0 %vm14388_vm2, %v19480_v20 }
 0x15c   :  { %11016 = vmatmul.mubr.msk.bf16.gmra.mrb[168].mxu1 %vm687_vm3, %v686_v43  ;;  %v3633_v43 = vrot.slane %v14912_v60, 1 }
 0x15d   :  { %11021 = vmatprep.mubr.msk.bf16.mxu1 %vm14388_vm2, %v19480_v20  ;;  %11604 = vmatmul.mubr.msk.bf16.gmra.mrb[60].mxu0 %vm687_vm3, %v15462_v54  ;;  %v15575_v54 = vld [vmem:[%s19282_s0 + $0x30] sm:$0xff]  }
 0x15e   :  { %11607 = vmatprep.mubr.msk.bf16.mxu0 %vm14388_vm2, %v19480_v20 }
 0x164   :  { %11022 = vmatmul.mubr.msk.bf16.vlgmr.msra.gmra.mrb[0].mxu1 %vm687_vm3, %v14473_v7  ;;  %v3631_v7 = vrot.slane %v14886_v24, 1 }
 0x165   :  { %11025 = vmatprep.mubr.msk.bf16.mxu1 %vm14388_vm2, %v19480_v20  ;;  %11608 = vmatmul.mubr.msk.bf16.gmra.mrb[64].mxu0 %vm687_vm3, %v15473_v0  ;;  %v15558_v0 = vld [vmem:[%s19282_s0 + $0x28] sm:$0xff]  }
 0x166   :  { %11611 = vmatprep.mubr.msk.bf16.mxu0 %vm14388_vm2, %v19480_v20  ;;  %v15502_v56 = vsel %vm1670_vm4, %v3629_v33, %v3631_v7  ;;  %v15519_v55 = vsel %vm1670_vm4, %v3631_v7, %v3633_v43  ;;  %v15524_v33 = vld [vmem:[%s19282_s0 + $0x18] sm:$0xff]   ;;  %v3635_v7 = vrot.slane %v14938_v46, 1 }
 0x167   :  { %19487 = vst [vmem:[#allocation30_spill] sm:$0xff] %v15502_v56  ;;  %19488 = vst [vmem:[#allocation31_spill] sm:$0xff] %v15519_v55 }
 0x16c   :  { %11026 = vmatmul.mubr.msk.bf16.gmra.mrb[4].mxu1 %vm687_vm3, %v15490_v31 }
 0x16d   :  { %11029 = vmatprep.mubr.msk.bf16.mxu1 %vm14388_vm2, %v19480_v20  ;;  %11612 = vmatmul.mubr.msk.bf16.gmra.mrb[68].mxu0 %vm687_vm3, %v15485_v6  ;;  %v15541_v6 = vld [vmem:[%s19282_s0 + $0x20] sm:$0xff]  }
 0x16e   :  { %11615 = vmatprep.mubr.msk.bf16.mxu0 %vm14388_vm2, %v19480_v20 }
 0x174   :  { %11030 = vmatmul.mubr.msk.bf16.gmra.mrb[8].mxu1 %vm687_vm3, %v15507_v16 }
 0x175   :  { %11033 = vmatprep.mubr.msk.bf16.mxu1 %vm14388_vm2, %v19480_v20  ;;  %11616 = vmatmul.mubr.msk.bf16.gmra.mrb[72].mxu0 %vm687_vm3, %v15502_v56  ;;  %v15536_v56 = vsel %vm1670_vm4, %v3633_v43, %v3635_v7  ;;  %v3637_v43 = vrot.slane %v14964_v12, 1 }
 0x176   :  { %11619 = vmatprep.mubr.msk.bf16.mxu0 %vm14388_vm2, %v19480_v20  ;;  %19489 = vst [vmem:[#allocation32_spill] sm:$0xff] %v15536_v56 }
 0x17c   :  { %11034 = vmatmul.mubr.msk.bf16.gmra.mrb[12].mxu1 %vm687_vm3, %v15524_v33 }
 0x17d   :  { %11037 = vmatprep.mubr.msk.bf16.mxu1 %vm14388_vm2, %v19480_v20  ;;  %11620 = vmatmul.mubr.msk.bf16.gmra.mrb[76].mxu0 %vm687_vm3, %v15519_v55  ;;  %v15553_v55 = vsel %vm1670_vm4, %v3635_v7, %v3637_v43  ;;  %v3639_v7 = vrot.slane %v14990_v27, 1 }
 0x17e   :  { %11623 = vmatprep.mubr.msk.bf16.mxu0 %vm14388_vm2, %v19480_v20  ;;  %19490 = vst [vmem:[#allocation33_spill] sm:$0xff] %v15553_v55 }
 0x184   :  { %11038 = vmatmul.mubr.msk.bf16.gmra.mrb[16].mxu1 %vm687_vm3, %v15541_v6 }
 0x185   :  { %11041 = vmatprep.mubr.msk.bf16.mxu1 %vm14388_vm2, %v19480_v20  ;;  %11624 = vmatmul.mubr.msk.bf16.gmra.mrb[80].mxu0 %vm687_vm3, %v15536_v56  ;;  %v15570_v56 = vsel %vm1670_vm4, %v3637_v43, %v3639_v7  ;;  %v3641_v43 = vrot.slane %v15016_v57, 1 }
 0x186   :  { %11627 = vmatprep.mubr.msk.bf16.mxu0 %vm14388_vm2, %v19480_v20  ;;  %19491 = vst [vmem:[#allocation34_spill] sm:$0xff] %v15570_v56 }
 0x18c   :  { %11042 = vmatmul.mubr.msk.bf16.gmra.mrb[20].mxu1 %vm687_vm3, %v15558_v0 }
 0x18d   :  { %11045 = vmatprep.mubr.msk.bf16.mxu1 %vm14388_vm2, %v19480_v20  ;;  %11628 = vmatmul.mubr.msk.bf16.gmra.mrb[84].mxu0 %vm687_vm3, %v15553_v55  ;;  %v15587_v55 = vsel %vm1670_vm4, %v3639_v7, %v3641_v43  ;;  %v3643_v7 = vrot.slane %v15042_v37, 1  ;;  %v3649_v37 = vrot.slane %v15643_v44, 1 }
 0x18e   :  { %11631 = vmatprep.mubr.msk.bf16.mxu0 %vm14388_vm2, %v19480_v20  ;;  %19492 = vst [vmem:[#allocation35_spill] sm:$0xff] %v15587_v55 }
 0x194   :  { %11046 = vmatmul.mubr.msk.bf16.gmra.mrb[24].mxu1 %vm687_vm3, %v15575_v54 }
 0x195   :  { %11049 = vmatprep.mubr.msk.bf16.mxu1 %vm14388_vm2, %v19480_v20  ;;  %11632 = vmatmul.mubr.msk.bf16.gmra.mrb[88].mxu0 %vm687_vm3, %v15570_v56  ;;  %v15604_v56 = vsel %vm1670_vm4, %v3641_v43, %v3643_v7  ;;  %v3645_v43 = vrot.slane %v15068_v9, 1  ;;  %v15648_v9 = vld [vmem:[%s19282_s0 + $0x50] sm:$0xff]  }
 0x196   :  { %11635 = vmatprep.mubr.msk.bf16.mxu0 %vm14388_vm2, %v19480_v20  ;;  %19493 = vst [vmem:[#allocation36_spill] sm:$0xff] %v15604_v56  ;;  %19498 = vst [vmem:[#allocation41_spill] sm:$0xff] %v15648_v9 }
 0x19c   :  { %11050 = vmatmul.mubr.msk.bf16.gmra.mrb[28].mxu1 %vm687_vm3, %v15592_v32 }
 0x19d   :  { %11053 = vmatprep.mubr.msk.bf16.mxu1 %vm14388_vm2, %v19480_v20  ;;  %11636 = vmatmul.mubr.msk.bf16.gmra.mrb[92].mxu0 %vm687_vm3, %v15587_v55  ;;  %v15621_v55 = vsel %vm1670_vm4, %v3643_v7, %v3645_v43  ;;  %v3647_v7 = vrot.slane %v15094_v49, 1  ;;  %v19500_v49 = vshrl.u32 %v14491_v15, 16 }
 0x19e   :  { %11639 = vmatprep.mubr.msk.bf16.mxu0 %vm14388_vm2, %v19480_v20  ;;  %19495 = vst [vmem:[#allocation38_spill] sm:$0xff] %v15621_v55 }
 0x1a4   :  { %11054 = vmatmul.mubr.msk.bf16.gmra.mrb[32].mxu1 %vm687_vm3, %v15609_v5  ;;  %v15664_v5 = vsel %vm1670_vm4, %v3647_v7, %v3649_v37 }
 0x1a5   :  { %11057 = vmatprep.mubr.msk.bf16.mxu1 %vm14388_vm2, %v19480_v20  ;;  %11640 = vmatmul.mubr.msk.bf16.gmra.mrb[96].mxu0 %vm687_vm3, %v15604_v56  ;;  %v15638_v56 = vsel %vm1670_vm4, %v3645_v43, %v3647_v7  ;;  %v19499_v43 = vshll.u32 %v14491_v15, 16  ;;  %19501 = vst [vmem:[#allocation42_spill] sm:$0xff] %v15664_v5  ;;  %v15676_v15 = vld [vmem:[%s19282_s0 + $0x58] sm:$0xff]   ;;  %v15698_v7 = vld [vmem:[%s19282_s0 + $0x60] sm:$0xff]  }
 0x1a6   :  { %11643 = vmatprep.mubr.msk.bf16.mxu0 %vm14388_vm2, %v19480_v20  ;;  %19497 = vst [vmem:[#allocation40_spill] sm:$0xff] %v15638_v56 }
 0x1ac   :  { %11058 = vmatmul.mubr.msk.bf16.gmra.mrb[36].mxu1 %vm687_vm3, %v15626_v36  ;;  %v4287_v36 = vrot.slane %v19500_v49, 1 }
 0x1ad   :  { %11061 = vmatprep.mubr.msk.bf16.mxu1 %vm14388_vm2, %v19480_v20  ;;  %11644 = vmatmul.mubr.msk.bf16.gmra.mrb[100].mxu0 %vm687_vm3, %v15621_v55  ;;  %v4288_v55 = vrot.slane %v19499_v43, 2 }
 0x1ae   :  { %11647 = vmatprep.mubr.msk.bf16.mxu0 %vm14388_vm2, %v19480_v20 }
 0x1b4   :  { %11062 = vmatmul.mubr.msk.bf16.gmra.mrb[40].mxu1 %vm687_vm3, %v15648_v9  ;;  %v15669_v9 = vld [vmem:[%s19282_s0 + $0xec] sm:$0xff]  }
 0x1b5   :  { %11065 = vmatprep.mubr.msk.bf16.mxu1 %vm14388_vm2, %v19480_v20  ;;  %11648 = vmatmul.mubr.msk.bf16.gmra.mrb[104].mxu0 %vm687_vm3, %v15638_v56  ;;  %19502 = vst [vmem:[#allocation43_spill] sm:$0xff] %v15669_v9  ;;  %v15671_v56 = vor.u32 %v4288_v55, %v4287_v36  ;;  %v3651_v49 = vrot.slane %v15669_v9, 1  ;;  %v15693_v55 = vld [vmem:[%s19282_s0 + $0xf4] sm:$0xff]   ;;  %v15720_v9 = vld [vmem:[%s19282_s0 + $0x68] sm:$0xff]  }
 0x1b6   :  { %11651 = vmatprep.mubr.msk.bf16.mxu0 %vm14388_vm2, %v19480_v20  ;;  %19504 = vst [vmem:[#allocation45_spill] sm:$0xff] %v15693_v55  ;;  %19507 = vst [vmem:[#allocation48_spill] sm:$0xff] %v15720_v9 }
 0x1b7   :  { %v15688_v36 = vsel %vm1670_vm4, %v3649_v37, %v3651_v49  ;;  %v3653_v37 = vrot.slane %v15693_v55, 1  ;;  %v15737_v55 = vld [vmem:[%s19282_s0 + $0x104] sm:$0xff]  }
 0x1b8   :  { %19503 = vst [vmem:[#allocation44_spill] sm:$0xff] %v15688_v36  ;;  %19509 = vst [vmem:[#allocation50_spill] sm:$0xff] %v15737_v55 }
 0x1b9   :  { %v15710_v43 = vsel %vm1670_vm4, %v3651_v49, %v3653_v37 }
 0x1ba   :  { %19505 = vst [vmem:[#allocation46_spill] sm:$0xff] %v15710_v43 }
 0x1bc   :  { %11066 = vmatmul.mubr.msk.bf16.gmra.mrb[44].mxu1 %vm687_vm3, %v15676_v15 }
 0x1bd   :  { %11069 = vmatprep.mubr.msk.bf16.mxu1 %vm14388_vm2, %v19480_v20  ;;  %11652 = vmatmul.mubr.msk.bf16.gmra.mrb[108].mxu0 %vm687_vm3, %v15664_v5  ;;  %v15715_v5 = vld [vmem:[%s19282_s0 + $0xfc] sm:$0xff]  }
 0x1be   :  { %11655 = vmatprep.mubr.msk.bf16.mxu0 %vm14388_vm2, %v19480_v20  ;;  %19506 = vst [vmem:[#allocation47_spill] sm:$0xff] %v15715_v5  ;;  %v3655_v49 = vrot.slane %v15715_v5, 1  ;;  %v15759_v5 = vld [vmem:[%s19282_s0 + $0x10c] sm:$0xff]  }
 0x1bf   :  { %19512 = vst [vmem:[#allocation53_spill] sm:$0xff] %v15759_v5 }
 0x1c4   :  { %11070 = vmatmul.mubr.msk.bf16.gmra.mrb[48].mxu1 %vm687_vm3, %v15698_v7 }
 0x1c5   :  { %11073 = vmatprep.mubr.msk.bf16.mxu1 %vm14388_vm2, %v19480_v20  ;;  %11656 = vmatmul.mubr.msk.bf16.gmra.mrb[112].mxu0 %vm687_vm3, %v15688_v36  ;;  %v15732_v36 = vsel %vm1670_vm4, %v3653_v37, %v3655_v49  ;;  %v3657_v37 = vrot.slane %v15737_v55, 1  ;;  %v15781_v55 = vld [vmem:[%s19282_s0 + $0x114] sm:$0xff]  }
 0x1c6   :  { %11659 = vmatprep.mubr.msk.bf16.mxu0 %vm14388_vm2, %v19480_v20  ;;  %19508 = vst [vmem:[#allocation49_spill] sm:$0xff] %v15732_v36  ;;  %19515 = vst [vmem:[#allocation56_spill] sm:$0xff] %v15781_v55 }
 0x1cc   :  { %11074 = vmatmul.mubr.msk.bf16.gmra.mrb[52].mxu1 %vm687_vm3, %v15720_v9  ;;  %v15742_v9 = vld [vmem:[%s19282_s0 + $0x70] sm:$0xff]  }
 0x1cd   :  { %11077 = vmatprep.mubr.msk.bf16.mxu1 %vm14388_vm2, %v19480_v20  ;;  %11660 = vmatmul.mubr.msk.bf16.gmra.mrb[116].mxu0 %vm687_vm3, %v15710_v43  ;;  %19510 = vst [vmem:[#allocation51_spill] sm:$0xff] %v15742_v9  ;;  %v15754_v43 = vsel %vm1670_vm4, %v3655_v49, %v3657_v37  ;;  %v3659_v49 = vrot.slane %v15759_v5, 1  ;;  %v15803_v5 = vld [vmem:[%s19282_s0 + $0x11c] sm:$0xff]  }
 0x1ce   :  { %11663 = vmatprep.mubr.msk.bf16.mxu0 %vm14388_vm2, %v19480_v20  ;;  %19511 = vst [vmem:[#allocation52_spill] sm:$0xff] %v15754_v43  ;;  %19518 = vst [vmem:[#allocation59_spill] sm:$0xff] %v15803_v5 }
 0x1d4   :  { %11078 = vmatmul.mubr.msk.bf16.gmra.mrb[56].mxu1 %vm687_vm3, %v15742_v9  ;;  %v15764_v9 = vld [vmem:[%s19282_s0 + $0x78] sm:$0xff]  }
 0x1d5   :  { %11081 = vmatprep.mubr.msk.bf16.mxu1 %vm14388_vm2, %v19480_v20  ;;  %11664 = vmatmul.mubr.msk.bf16.gmra.mrb[120].mxu0 %vm687_vm3, %v15732_v36  ;;  %19513 = vst [vmem:[#allocation54_spill] sm:$0xff] %v15764_v9  ;;  %v15776_v36 = vsel %vm1670_vm4, %v3657_v37, %v3659_v49  ;;  %v3661_v37 = vrot.slane %v15781_v55, 1  ;;  %v15825_v55 = vld [vmem:[%s19282_s0 + $0x124] sm:$0xff]  }
 0x1d6   :  { %11667 = vmatprep.mubr.msk.bf16.mxu0 %vm14388_vm2, %v19480_v20  ;;  %19514 = vst [vmem:[#allocation55_spill] sm:$0xff] %v15776_v36 }
 0x1dc   :  { %11082 = vmatmul.mubr.msk.bf16.gmra.mrb[60].mxu1 %vm687_vm3, %v15764_v9  ;;  %v15786_v9 = vld [vmem:[%s19282_s0 + $0x80] sm:$0xff]  }
 0x1dd   :  { %11085 = vmatprep.mubr.msk.bf16.mxu1 %vm14388_vm2, %v19480_v20  ;;  %11668 = vmatmul.mubr.msk.bf16.gmra.mrb[124].mxu0 %vm687_vm3, %v15754_v43  ;;  %19516 = vst [vmem:[#allocation57_spill] sm:$0xff] %v15786_v9  ;;  %v15798_v43 = vsel %vm1670_vm4, %v3659_v49, %v3661_v37  ;;  %v3663_v49 = vrot.slane %v15803_v5, 1  ;;  %v15842_v5 = vld [vmem:[%s19282_s0 + $0x12c] sm:$0xff]  }
 0x1de   :  { %11671 = vmatprep.mubr.msk.bf16.mxu0 %vm14388_vm2, %v19480_v20  ;;  %19517 = vst [vmem:[#allocation58_spill] sm:$0xff] %v15798_v43 }
 0x1e4   :  { %11086 = vmatmul.mubr.msk.bf16.gmra.mrb[64].mxu1 %vm687_vm3, %v15786_v9  ;;  %v15808_v9 = vld [vmem:[%s19282_s0 + $0x88] sm:$0xff]  }
 0x1e5   :  { %11089 = vmatprep.mubr.msk.bf16.mxu1 %vm14388_vm2, %v19480_v20  ;;  %11672 = vmatmul.mubr.msk.bf16.gmra.mrb[128].mxu0 %vm687_vm3, %v15776_v36  ;;  %v15820_v36 = vsel %vm1670_vm4, %v3661_v37, %v3663_v49  ;;  %v3665_v37 = vrot.slane %v15825_v55, 1 }
 0x1e6   :  { %11675 = vmatprep.mubr.msk.bf16.mxu0 %vm14388_vm2, %v19480_v20  ;;  %19519 = vst [vmem:[#allocation60_spill] sm:$0xff] %v15820_v36 }
 0x1ec   :  { %11090 = vmatmul.mubr.msk.bf16.gmra.mrb[68].mxu1 %vm687_vm3, %v15808_v9 }
 0x1ed   :  { %11093 = vmatprep.mubr.msk.bf16.mxu1 %vm14388_vm2, %v19480_v20  ;;  %11676 = vmatmul.mubr.msk.bf16.gmra.mrb[132].mxu0 %vm687_vm3, %v15798_v43  ;;  %v15837_v43 = vsel %vm1670_vm4, %v3663_v49, %v3665_v37 }
 0x1ee   :  { %11679 = vmatprep.mubr.msk.bf16.mxu0 %vm14388_vm2, %v19480_v20  ;;  %19520 = vst [vmem:[#allocation61_spill] sm:$0xff] %v15837_v43 }
 0x1f4   :  { %11094 = vmatmul.mubr.msk.bf16.gmra.mrb[72].mxu1 %vm687_vm3, %v14849_v40  ;;  %v3667_v40 = vrot.slane %v15842_v5, 1 }
 0x1f5   :  { %11097 = vmatprep.mubr.msk.bf16.mxu1 %vm14388_vm2, %v19480_v20  ;;  %11680 = vmatmul.mubr.msk.bf16.gmra.mrb[136].mxu0 %vm687_vm3, %v15820_v36  ;;  %v15859_v36 = vld [vmem:[%s19282_s0 + $0x134] sm:$0xff]  }
 0x1f6   :  { %11683 = vmatprep.mubr.msk.bf16.mxu0 %vm14388_vm2, %v19480_v20  ;;  %v15854_v49 = vsel %vm1670_vm4, %v3665_v37, %v3667_v40 }
 0x1f7   :  { %19521 = vst [vmem:[#allocation62_spill] sm:$0xff] %v15854_v49 }
 0x1fc   :  { %11098 = vmatmul.mubr.msk.bf16.gmra.mrb[76].mxu1 %vm687_vm3, %v14874_v48  ;;  %v3669_v48 = vrot.slane %v15859_v36, 1 }
 0x1fd   :  { %11101 = vmatprep.mubr.msk.bf16.mxu1 %vm14388_vm2, %v19480_v20  ;;  %11684 = vmatmul.mubr.msk.bf16.gmra.mrb[140].mxu0 %vm687_vm3, %v15837_v43  ;;  %v15876_v43 = vld [vmem:[%s19282_s0 + $0x13c] sm:$0xff]  }
 0x1fe   :  { %11687 = vmatprep.mubr.msk.bf16.mxu0 %vm14388_vm2, %v19480_v20  ;;  %v15871_v37 = vsel %vm1670_vm4, %v3667_v40, %v3669_v48 }
 0x1ff   :  { %19522 = vst [vmem:[#allocation63_spill] sm:$0xff] %v15871_v37 }
 0x204   :  { %11102 = vmatmul.mubr.msk.bf16.gmra.mrb[80].mxu1 %vm687_vm3, %v14900_v42  ;;  %v3671_v42 = vrot.slane %v15876_v43, 1 }
 0x205   :  { %11105 = vmatprep.mubr.msk.bf16.mxu1 %vm14388_vm2, %v19480_v20  ;;  %11688 = vmatmul.mubr.msk.bf16.gmra.mrb[144].mxu0 %vm687_vm3, %v15854_v49  ;;  %v15893_v49 = vld [vmem:[%s19282_s0 + $0x144] sm:$0xff]  }
 0x206   :  { %11691 = vmatprep.mubr.msk.bf16.mxu0 %vm14388_vm2, %v19480_v20  ;;  %v15888_v40 = vsel %vm1670_vm4, %v3669_v48, %v3671_v42  ;;  %19524 = vst [vmem:[#allocation65_spill] sm:$0xff] %v15893_v49 }
 0x207   :  { %19523 = vst [vmem:[#allocation64_spill] sm:$0xff] %v15888_v40 }
 0x20c   :  { %11106 = vmatmul.mubr.msk.bf16.gmra.mrb[84].mxu1 %vm687_vm3, %v14926_v18  ;;  %v3673_v18 = vrot.slane %v15893_v49, 1 }
 0x20d   :  { %11109 = vmatprep.mubr.msk.bf16.mxu1 %vm14388_vm2, %v19480_v20  ;;  %11692 = vmatmul.mubr.msk.bf16.gmra.mrb[148].mxu0 %vm687_vm3, %v15871_v37  ;;  %v15910_v37 = vld [vmem:[%s19282_s0 + $0x14c] sm:$0xff]  }
 0x20e   :  { %11695 = vmatprep.mubr.msk.bf16.mxu0 %vm14388_vm2, %v19480_v20  ;;  %v15905_v48 = vsel %vm1670_vm4, %v3671_v42, %v3673_v18  ;;  %v15924_v42 = vld [vmem:[%s19282_s0 + $0x154] sm:$0xf] }
 0x20f   :  { %19525 = vst [vmem:[#allocation66_spill] sm:$0xff] %v15905_v48 }
 0x214   :  { %11110 = vmatmul.mubr.msk.bf16.gmra.mrb[88].mxu1 %vm687_vm3, %v14952_v8  ;;  %v3675_v8 = vrot.slane %v15910_v37, 1 }
 0x215   :  { %11113 = vmatprep.mubr.msk.bf16.mxu1 %vm14388_vm2, %v19480_v20  ;;  %11696 = vmatmul.mubr.msk.bf16.gmra.mrb[152].mxu0 %vm687_vm3, %v15888_v40 }
 0x216   :  { %11699 = vmatprep.mubr.msk.bf16.mxu0 %vm14388_vm2, %v19480_v20  ;;  %v15930_v40 = vsel %vm1670_vm4, %v3673_v18, %v3675_v8 }
 0x217   :  { %19526 = vst [vmem:[#allocation67_spill] sm:$0xff] %v15930_v40 }
 0x21c   :  { %11114 = vmatmul.mubr.msk.bf16.gmra.mrb[92].mxu1 %vm687_vm3, %v14978_v47  ;;  %v2434_v47 = vld [vmem:[%s19282_s0 + $0x158] sm:$0x1] }
 0x21d   :  { %11117 = vmatprep.mubr.msk.bf16.mxu1 %vm14388_vm2, %v19480_v20  ;;  %11700 = vmatmul.mubr.msk.bf16.gmra.mrb[156].mxu0 %vm687_vm3, %v15905_v48  ;;  %v15933_v49 = vcombine.low %v15924_v42, %v2434_v47  ;;  %v4283_v47 = vshll.u32 %v15128_v35, 16 }
 0x21e   :  { %11703 = vmatprep.mubr.msk.bf16.mxu0 %vm14388_vm2, %v19480_v20 }
 0x21f   :  { %19527 = vst [vmem:[#allocation68_spill] sm:$0xff] %v15933_v49  ;;  %v15944_v48 = vrot.slane %v15933_v49, 1  ;;  %v4285_v49 = vrot.slane %v4283_v47, 2 }
 0x221   :  { %19528 = vst [vmem:[#allocation69_spill] sm:$0xff] %v15944_v48  ;;  %v15948_v18 = vsel %vm1670_vm4, %v3675_v8, %v15944_v48 }
 0x222   :  { %19529 = vst [vmem:[#allocation70_spill] sm:$0xff] %v15948_v18 }
 0x224   :  { %11118 = vmatmul.mubr.msk.bf16.gmra.mrb[96].mxu1 %vm687_vm3, %v15004_v34  ;;  %v4280_v34 = vshrl.u32 %v15128_v35, 16 }
 0x225   :  { %11121 = vmatprep.mubr.msk.bf16.mxu1 %vm14388_vm2, %v19480_v20  ;;  %11704 = vmatmul.mubr.msk.bf16.gmra.mrb[160].mxu0 %vm687_vm3, %v15930_v40 }
 0x226   :  { %11707 = vmatprep.mubr.msk.bf16.mxu0 %vm14388_vm2, %v19480_v20  ;;  %v4282_v40 = vrot.slane %v4280_v34, 1  ;;  %v19530_v34 = vshrl.u32 %v14500_v23, 16 }
 0x228   :  { %v4286_v8 = vor.u32 %v4285_v49, %v4282_v40  ;;  %v4291_v47 = vrot.slane %v19530_v34, 1 }
 0x22c   :  { %11122 = vmatmul.mubr.msk.bf16.gmra.mrb[100].mxu1 %vm687_vm3, %v15030_v59  ;;  %v9799_v59 = vld [vmem:[%s19281_s1 + $0x8] sm:$0xf] }
 0x22d   :  { %11125 = vmatprep.mubr.msk.bf16.mxu1 %vm14388_vm2, %v19480_v20  ;;  %11708 = vmatmul.mubr.msk.bf16.gmra.mrb[164].mxu0 %vm687_vm3, %v15948_v18  ;;  %v1886_v35 = vsel %vm817_vm0, %v9799_v59, 0  ;;  %v19532_v59 = vshrl.u32 %v14524_v38, 16 }
 0x22e   :  { %11711 = vmatprep.mubr.msk.bf16.mxu0 %vm14388_vm2, %v19480_v20  ;;  %11194 = vmatpush3.bf16.msra.mxu1 %v1886_v35 }
 0x22f   :  { %12853 = vmatprep.subr.bf16.mxu1 %v19480_v20 }
 0x234   :  { %11126 = vmatmul.mubr.msk.bf16.gmra.mrb[104].mxu1 %vm687_vm3, %v15056_v2  ;;  %v4290_v2 = vsel %vm4278_vm5, %v4286_v8, %v15671_v56  ;;  %v4295_v8 = vrot.slane %v19532_v59, 1 }
 0x235   :  { %11129 = vmatprep.mubr.msk.bf16.mxu1 %vm14388_vm2, %v19480_v20  ;;  %11712 = vmatmul.mubr.msk.bf16.gmra.mrb[168].mxu0 %vm687_vm3, %v15944_v48  ;;  %v19531_v48 = vshll.u32 %v14500_v23, 16  ;;  %v19533_v23 = vshll.u32 %v14524_v38, 16  ;;  %v19535_v38 = vshll.u32 %v14546_v50, 16 }
 0x236   :  { %11717 = vmatprep.mubr.msk.bf16.mxu0 %vm14388_vm2, %v19480_v20 }
 0x237   :  { %v4292_v18 = vrot.slane %v19531_v48, 2  ;;  %v4296_v48 = vrot.slane %v19533_v23, 2 }
 0x239   :  { %v4293_v49 = vor.u32 %v4292_v18, %v4291_v47  ;;  %v19534_v18 = vshrl.u32 %v14546_v50, 16 }
 0x23b   :  { %v4294_v40 = vsel %vm4278_vm5, %v15671_v56, %v4293_v49  ;;  %v4299_v35 = vrot.slane %v19534_v18, 1 }
 0x23c   :  { %11130 = vmatmul.mubr.msk.bf16.gmra.mrb[108].mxu1 %vm687_vm3, %v15082_v26  ;;  %v4297_v26 = vor.u32 %v4296_v48, %v4295_v8  ;;  %v19538_v48 = vshrl.u32 %v14590_v13, 16 }
 0x23d   :  { %11133 = vmatprep.mubr.msk.bf16.mxu1 %vm14388_vm2, %v19480_v20  ;;  %11718 = vmatmul.mubr.msk.bf16.vlgmr.msra.gmra.mrb[0].mxu0 %vm687_vm3, %v4290_v2  ;;  %v4300_v2 = vrot.slane %v19535_v38, 2 }
 0x23e   :  { %11721 = vmatprep.mubr.msk.bf16.mxu0 %vm14388_vm2, %v19480_v20  ;;  %v4298_v56 = vsel %vm4278_vm5, %v4293_v49, %v4297_v26 }
 0x23f   :  { %v4301_v34 = vor.u32 %v4300_v2, %v4299_v35  ;;  %v19540_v35 = vshrl.u32 %v14612_v28, 16 }
 0x241   :  { %v4302_v50 = vsel %vm4278_vm5, %v4297_v26, %v4301_v34  ;;  %v4307_v26 = vrot.slane %v19538_v48, 1  ;;  %v4311_v38 = vrot.slane %v19540_v35, 1 }
 0x244   :  { %11134 = vmatmul.mubr.msk.bf16.gmra.mrb[112].mxu1 %vm687_vm3, %v15108_v1  ;;  %v10021_v1 = vld [vmem:[%s19281_s1 + $0x18] sm:$0xf] }
 0x245   :  { %11137 = vmatprep.mubr.msk.bf16.mxu1 %vm14388_vm2, %v19480_v20  ;;  %11722 = vmatmul.mubr.msk.bf16.gmra.mrb[4].mxu0 %vm687_vm3, %v4294_v40  ;;  %v5571_v47 = vsel %vm817_vm0, %v10021_v1, 0  ;;  %v19537_v40 = vshll.u32 %v14568_v62, 16 }
 0x246   :  { %11725 = vmatprep.mubr.msk.bf16.mxu0 %vm14388_vm2, %v19480_v20  ;;  %11890 = vmatpush3.bf16.msra.mxu0 %v5571_v47 }
 0x247   :  { %12063 = vmatprep.subr.bf16.mxu0 %v19480_v20  ;;  %v4304_v59 = vrot.slane %v19537_v40, 2 }
 0x24c   :  { %11138 = vmatmul.mubr.msk.bf16.gmra.mrb[116].mxu1 %vm687_vm3, %v15138_v53  ;;  %v19536_v53 = vshrl.u32 %v14568_v62, 16  ;;  %v19539_v62 = vshll.u32 %v14590_v13, 16  ;;  %v19541_v13 = vshll.u32 %v14612_v28, 16  ;;  %v19543_v28 = vshll.u32 %v14634_v45, 16 }
 0x24d   :  { %11141 = vmatprep.mubr.msk.bf16.mxu1 %vm14388_vm2, %v19480_v20  ;;  %11726 = vmatmul.mubr.msk.bf16.gmra.mrb[8].mxu0 %vm687_vm3, %v4298_v56 }
 0x24e   :  { %11729 = vmatprep.mubr.msk.bf16.mxu0 %vm14388_vm2, %v19480_v20  ;;  %v4303_v49 = vrot.slane %v19536_v53, 1  ;;  %v4308_v56 = vrot.slane %v19539_v62, 2  ;;  %v4312_v2 = vrot.slane %v19541_v13, 2 }
 0x250   :  { %v4305_v8 = vor.u32 %v4304_v59, %v4303_v49  ;;  %v19544_v49 = vshrl.u32 %v14661_v63, 16 }
 0x252   :  { %v4306_v23 = vsel %vm4278_vm5, %v4301_v34, %v4305_v8  ;;  %v19542_v34 = vshrl.u32 %v14634_v45, 16  ;;  %v4319_v40 = vrot.slane %v19544_v49, 1  ;;  %v19545_v45 = vshll.u32 %v14661_v63, 16 }
 0x253   :  { %v19547_v63 = vshll.u32 %v14683_v22, 16 }
 0x254   :  { %11142 = vmatmul.mubr.msk.bf16.gmra.mrb[120].mxu1 %vm687_vm3, %v15164_v14  ;;  %v4309_v14 = vor.u32 %v4308_v56, %v4307_v26  ;;  %v4315_v47 = vrot.slane %v19542_v34, 1  ;;  %v4320_v59 = vrot.slane %v19545_v45, 2  ;;  %v19548_v56 = vshrl.u32 %v14705_v41, 16 }
 0x255   :  { %11145 = vmatprep.mubr.msk.bf16.mxu1 %vm14388_vm2, %v19480_v20  ;;  %11730 = vmatmul.mubr.msk.bf16.gmra.mrb[12].mxu0 %vm687_vm3, %v4302_v50  ;;  %v4316_v50 = vrot.slane %v19543_v28, 2  ;;  %v4324_v26 = vrot.slane %v19547_v63, 2 }
 0x256   :  { %11733 = vmatprep.mubr.msk.bf16.mxu0 %vm14388_vm2, %v19480_v20  ;;  %v4310_v18 = vsel %vm4278_vm5, %v4305_v8, %v4309_v14 }
 0x25c   :  { %11146 = vmatmul.mubr.msk.bf16.gmra.mrb[124].mxu1 %vm687_vm3, %v15185_v25  ;;  %v4313_v25 = vor.u32 %v4312_v2, %v4311_v38  ;;  %v19550_v38 = vshrl.u32 %v14727_v61, 16 }
 0x25d   :  { %11149 = vmatprep.mubr.msk.bf16.mxu1 %vm14388_vm2, %v19480_v20  ;;  %11734 = vmatmul.mubr.msk.bf16.gmra.mrb[16].mxu0 %vm687_vm3, %v4306_v23  ;;  %v19546_v23 = vshrl.u32 %v14683_v22, 16  ;;  %v19549_v22 = vshll.u32 %v14705_v41, 16  ;;  %v19551_v41 = vshll.u32 %v14727_v61, 16 }
 0x25e   :  { %11737 = vmatprep.mubr.msk.bf16.mxu0 %vm14388_vm2, %v19480_v20  ;;  %v4314_v1 = vsel %vm4278_vm5, %v4309_v14, %v4313_v25  ;;  %v4327_v14 = vrot.slane %v19548_v56, 1  ;;  %v4331_v13 = vrot.slane %v19550_v38, 1  ;;  %v19562_v56 = vshrl.u32 %v14805_v58, 16 }
 0x25f   :  { %v4323_v48 = vrot.slane %v19546_v23, 1  ;;  %v4332_v2 = vrot.slane %v19551_v41, 2  ;;  %v19559_v23 = vshrl.u32 %v14785_v17, 16 }
 0x264   :  { %11150 = vmatmul.mubr.msk.bf16.gmra.mrb[128].mxu1 %vm687_vm3, %v15206_v29  ;;  %v4317_v29 = vor.u32 %v4316_v50, %v4315_v47  ;;  %v19555_v50 = vld [vmem:[#allocation17_spill] sm:$0xff] }
 0x265   :  { %11153 = vmatprep.mubr.msk.bf16.mxu1 %vm14388_vm2, %v19480_v20  ;;  %11738 = vmatmul.mubr.msk.bf16.gmra.mrb[20].mxu0 %vm687_vm3, %v4310_v18  ;;  %v4328_v18 = vrot.slane %v19549_v22, 2 }
 0x266   :  { %11741 = vmatprep.mubr.msk.bf16.mxu0 %vm14388_vm2, %v19480_v20  ;;  %v4318_v53 = vsel %vm4278_vm5, %v4313_v25, %v4317_v29 }
 0x26c   :  { %11154 = vmatmul.mubr.msk.bf16.gmra.mrb[132].mxu1 %vm687_vm3, %v15232_v4  ;;  %v4321_v4 = vor.u32 %v4320_v59, %v4319_v40  ;;  %v19557_v40 = vshll.u32 %v14760_v39, 16  ;;  %v19558_v59 = vld [vmem:[#allocation19_spill] sm:$0xff] }
 0x26d   :  { %11157 = vmatprep.mubr.msk.bf16.mxu1 %vm14388_vm2, %v19480_v20  ;;  %11742 = vmatmul.mubr.msk.bf16.gmra.mrb[24].mxu0 %vm687_vm3, %v4314_v1  ;;  %v19552_v1 = vld [vmem:[#allocation3_spill] sm:$0xff] }
 0x26e   :  { %11745 = vmatprep.mubr.msk.bf16.mxu0 %vm14388_vm2, %v19480_v20  ;;  %v4322_v8 = vsel %vm4278_vm5, %v4317_v29, %v4321_v4  ;;  %v19553_v34 = vshrl.u32 %v19552_v1, 16  ;;  %v19554_v61 = vshll.u32 %v19552_v1, 16  ;;  %v4340_v45 = vrot.slane %v19557_v40, 2 }
 0x270   :  { %v4335_v47 = vrot.slane %v19553_v34, 1  ;;  %v4336_v28 = vrot.slane %v19554_v61, 2 }
 0x274   :  { %11158 = vmatmul.mubr.msk.bf16.gmra.mrb[136].mxu1 %vm687_vm3, %v15253_v10  ;;  %v4325_v10 = vor.u32 %v4324_v26, %v4323_v48  ;;  %v4343_v48 = vrot.slane %v19559_v23, 1  ;;  %v19561_v26 = vld [vmem:[#allocation21_spill] sm:$0xff] }
 0x275   :  { %11161 = vmatprep.mubr.msk.bf16.mxu1 %vm14388_vm2, %v19480_v20  ;;  %11746 = vmatmul.mubr.msk.bf16.gmra.mrb[28].mxu0 %vm687_vm3, %v4318_v53  ;;  %v19556_v53 = vshrl.u32 %v14760_v39, 16  ;;  %v19560_v39 = vshll.u32 %v14785_v17, 16  ;;  %v19563_v17 = vshll.u32 %v14805_v58, 16  ;;  %v9755_v58 = vcombine.low %v15415_v52, %v15415_v52 }
 0x276   :  { %11749 = vmatprep.mubr.msk.bf16.mxu0 %vm14388_vm2, %v19480_v20  ;;  %v4326_v62 = vsel %vm4278_vm5, %v4321_v4, %v4325_v10  ;;  %v1672_v52 = vrot.slane %v15490_v31, 1  ;;  %v1674_v31 = vrot.slane %v15507_v16, 1 }
 0x277   :  { %v4339_v49 = vrot.slane %v19556_v53, 1  ;;  %v4344_v63 = vrot.slane %v19560_v39, 2  ;;  %v4348_v22 = vrot.slane %v19563_v17, 2  ;;  %v19572_v39 = vshll.u32 %v14912_v60, 16 }
 0x279   :  { %v4341_v4 = vor.u32 %v4340_v45, %v4339_v49  ;;  %v19569_v49 = vshrl.u32 %v14886_v24, 16  ;;  %v19570_v45 = vshll.u32 %v14886_v24, 16  ;;  %v19571_v24 = vshrl.u32 %v14912_v60, 16 }
 0x27a   :  { %v19573_v60 = vshrl.u32 %v14938_v46, 16 }
 0x27b   :  { %v4359_v40 = vrot.slane %v19569_v49, 1  ;;  %v4360_v16 = vrot.slane %v19570_v45, 2 }
 0x27c   :  { %11162 = vmatmul.mubr.msk.bf16.gmra.mrb[140].mxu1 %vm687_vm3, %v15274_v11  ;;  %v4329_v11 = vor.u32 %v4328_v18, %v4327_v14  ;;  %v4347_v14 = vrot.slane %v19562_v56, 1  ;;  %v1664_v18 = vld [vmem:[%s19282_s0] sm:$0xe]  ;;  %v4367_v56 = vrot.slane %v19573_v60, 1 }
 0x27d   :  { %11165 = vmatprep.mubr.msk.bf16.mxu1 %vm14388_vm2, %v19480_v20  ;;  %11750 = vmatmul.mubr.msk.bf16.gmra.mrb[32].mxu0 %vm687_vm3, %v4322_v8 }
 0x27e   :  { %11753 = vmatprep.mubr.msk.bf16.mxu0 %vm14388_vm2, %v19480_v20  ;;  %v4330_v35 = vsel %vm4278_vm5, %v4325_v10, %v4329_v11  ;;  %v4345_v10 = vor.u32 %v4344_v63, %v4343_v48  ;;  %v4363_v48 = vrot.slane %v19571_v24, 1  ;;  %v4364_v63 = vrot.slane %v19572_v39, 2 }
 0x284   :  { %11166 = vmatmul.mubr.msk.bf16.gmra.mrb[144].mxu1 %vm687_vm3, %v15295_v19  ;;  %v4333_v19 = vor.u32 %v4332_v2, %v4331_v13  ;;  %v19564_v13 = vshrl.u32 %v14837_v51, 16  ;;  %v19565_v2 = vshll.u32 %v14837_v51, 16  ;;  %v19566_v51 = vshrl.u32 %v14861_v3, 16 }
 0x285   :  { %11169 = vmatprep.mubr.msk.bf16.mxu1 %vm14388_vm2, %v19480_v20  ;;  %11754 = vmatmul.mubr.msk.bf16.gmra.mrb[36].mxu0 %vm687_vm3, %v4326_v62  ;;  %v4346_v62 = vsel %vm4278_vm5, %v4341_v4, %v4345_v10 }
 0x286   :  { %11757 = vmatprep.mubr.msk.bf16.mxu0 %vm14388_vm2, %v19480_v20  ;;  %v4334_v25 = vsel %vm4278_vm5, %v4329_v11, %v4333_v19  ;;  %v4349_v11 = vor.u32 %v4348_v22, %v4347_v14  ;;  %v4351_v41 = vrot.slane %v19564_v13, 1  ;;  %v4355_v61 = vrot.slane %v19566_v51, 1 }
 0x287   :  { %v19574_v14 = vshll.u32 %v14938_v46, 16  ;;  %v19575_v46 = vshrl.u32 %v14964_v12, 16  ;;  %v19580_v51 = vshll.u32 %v15016_v57, 16 }
 0x288   :  { %v4350_v38 = vsel %vm4278_vm5, %v4345_v10, %v4349_v11 }
 0x289   :  { %v4368_v17 = vrot.slane %v19574_v14, 2 }
 0x28b   :  { %v4369_v22 = vor.u32 %v4368_v17, %v4367_v56  ;;  %v19590_v17 = vld [vmem:[#allocation6_spill] sm:$0xff] }
 0x28c   :  { %11170 = vmatmul.mubr.msk.bf16.gmra.mrb[148].mxu1 %vm687_vm3, %v15316_v21  ;;  %v4337_v21 = vor.u32 %v4336_v28, %v4335_v47  ;;  %v19567_v28 = vshll.u32 %v14861_v3, 16  ;;  %v1675_v3 = vsel %vm1670_vm4, %v1672_v52, %v1674_v31 }
 0x28d   :  { %11173 = vmatprep.mubr.msk.bf16.mxu1 %vm14388_vm2, %v19480_v20  ;;  %11758 = vmatmul.mubr.msk.bf16.gmra.mrb[40].mxu0 %vm687_vm3, %v4330_v35 }
 0x28e   :  { %11761 = vmatprep.mubr.msk.bf16.mxu0 %vm14388_vm2, %v19480_v20  ;;  %v4338_v29 = vsel %vm4278_vm5, %v4333_v19, %v4337_v21  ;;  %v4342_v8 = vsel %vm4278_vm5, %v4337_v21, %v4341_v4  ;;  %v4352_v19 = vrot.slane %v19565_v2, 2  ;;  %v19568_v21 = vld [vmem:[#allocation2_spill] sm:$0xff]  ;;  %v4361_v4 = vor.u32 %v4360_v16, %v4359_v40  ;;  %v19585_v40 = vld [vmem:[#allocation39_spill] sm:$0xff] }
 0x28f   :  { %v1688_v45 = vrot.slane %v19585_v40, 1 }
 0x290   :  { %v4353_v1 = vor.u32 %v4352_v19, %v4351_v41  ;;  %v19578_v19 = vshll.u32 %v14990_v27, 16 }
 0x292   :  { %v4354_v47 = vsel %vm4278_vm5, %v4349_v11, %v4353_v1 }
 0x294   :  { %11174 = vmatmul.mubr.msk.bf16.gmra.mrb[152].mxu1 %vm687_vm3, %v19555_v50  ;;  %v4356_v50 = vrot.slane %v19567_v28, 2 }
 0x295   :  { %11177 = vmatprep.mubr.msk.bf16.mxu1 %vm14388_vm2, %v19480_v20  ;;  %11762 = vmatmul.mubr.msk.bf16.gmra.mrb[44].mxu0 %vm687_vm3, %v4334_v25 }
 0x296   :  { %11765 = vmatprep.mubr.msk.bf16.mxu0 %vm14388_vm2, %v19480_v20 }
 0x29c   :  { %11178 = vmatmul.mubr.msk.bf16.gmra.mrb[156].mxu1 %vm687_vm3, %v19558_v59  ;;  %v1676_v59 = vrot.slane %v15524_v33, 1  ;;  %v1678_v33 = vrot.slane %v15541_v6, 1  ;;  %v1680_v6 = vrot.slane %v15558_v0, 1  ;;  %v1682_v0 = vrot.slane %v15575_v54, 1 }
 0x29d   :  { %11181 = vmatprep.mubr.msk.bf16.mxu1 %vm14388_vm2, %v19480_v20  ;;  %11766 = vmatmul.mubr.msk.bf16.gmra.mrb[48].mxu0 %vm687_vm3, %v4338_v29  ;;  %v4357_v29 = vor.u32 %v4356_v50, %v4355_v61  ;;  %v1684_v54 = vrot.slane %v15592_v32, 1  ;;  %v4380_v61 = vrot.slane %v19580_v51, 2  ;;  %v19581_v32 = vld [vmem:[#allocation37_spill] sm:$0xff] }
 0x29e   :  { %11769 = vmatprep.mubr.msk.bf16.mxu0 %vm14388_vm2, %v19480_v20  ;;  %v1679_v10 = vsel %vm1670_vm4, %v1676_v59, %v1678_v33  ;;  %v1683_v13 = vsel %vm1670_vm4, %v1680_v6, %v1682_v0  ;;  %v1686_v28 = vrot.slane %v19581_v32, 1 }
 0x29f   :  { %v4358_v53 = vsel %vm4278_vm5, %v4353_v1, %v4357_v29  ;;  %v4362_v23 = vsel %vm4278_vm5, %v4357_v29, %v4361_v4  ;;  %v1685_v1 = vsel %vm1670_vm4, %v1682_v0, %v1684_v54  ;;  %v19582_v29 = vld [vmem:[#allocation4_spill] sm:$0xff] }
 0x2a4   :  { %11182 = vmatmul.mubr.msk.bf16.gmra.mrb[160].mxu1 %vm687_vm3, %v19561_v26  ;;  %v4365_v26 = vor.u32 %v4364_v63, %v4363_v48  ;;  %v19589_v63 = vld [vmem:[#allocation41_spill] sm:$0xff] }
 0x2a5   :  { %11185 = vmatprep.mubr.msk.bf16.mxu1 %vm14388_vm2, %v19480_v20  ;;  %11770 = vmatmul.mubr.msk.bf16.gmra.mrb[52].mxu0 %vm687_vm3, %v4342_v8  ;;  %v1677_v8 = vsel %vm1670_vm4, %v1674_v31, %v1676_v59  ;;  %v1687_v31 = vsel %vm1670_vm4, %v1684_v54, %v1686_v28  ;;  %v1689_v59 = vsel %vm1670_vm4, %v1686_v28, %v1688_v45 }
 0x2a6   :  { %11773 = vmatprep.mubr.msk.bf16.mxu0 %vm14388_vm2, %v19480_v20  ;;  %v4370_v11 = vsel %vm4278_vm5, %v4365_v26, %v4369_v22 }
 0x2ac   :  { %11186 = vmatmul.mubr.msk.bf16.gmra.mrb[164].mxu1 %vm687_vm3, %v15400_v30  ;;  %v14313_v30 = vld [vmem:[%s19282_s0 + $0x4] sm:$0xf] }
 0x2ad   :  { %11189 = vmatprep.mubr.msk.bf16.mxu1 %vm14388_vm2, %v19480_v20  ;;  %11774 = vmatmul.mubr.msk.bf16.gmra.mrb[56].mxu0 %vm687_vm3, %v4346_v62  ;;  %v9800_v35 = vcombine.low %v1664_v18, %v14313_v30  ;;  %v4366_v62 = vsel %vm4278_vm5, %v4361_v4, %v4365_v26  ;;  %v1681_v18 = vsel %vm1670_vm4, %v1678_v33, %v1680_v6  ;;  %v19576_v30 = vshll.u32 %v14964_v12, 16  ;;  %v16300_v26 = vld [vmem:[%s19282_s0 + $0xdc] sm:$0xff]  }
 0x2ae   :  { %11777 = vmatprep.mubr.msk.bf16.mxu0 %vm14388_vm2, %v19480_v20  ;;  %v19577_v12 = vshrl.u32 %v14990_v27, 16  ;;  %v19579_v27 = vshrl.u32 %v15016_v57, 16  ;;  %v19583_v57 = vshrl.u32 %v19582_v29, 16  ;;  %v1690_v33 = vrot.slane %v19589_v63, 1 }
 0x2af   :  { %v1671_v25 = vrot.slane %v9800_v35, 1  ;;  %v4372_v35 = vrot.slane %v19576_v30, 2  ;;  %v19591_v6 = vshll.u32 %v19590_v17, 16  ;;  %v19600_v17 = vld [vmem:[#allocation53_spill] sm:$0xff] }
 0x2b0   :  { %v4375_v2 = vrot.slane %v19577_v12, 1  ;;  %v1691_v60 = vsel %vm1670_vm4, %v1688_v45, %v1690_v33 }
 0x2b1   :  { %v1673_v34 = vsel %vm1670_vm4, %v1671_v25, %v1672_v52  ;;  %v4376_v25 = vrot.slane %v19578_v19, 2 }
 0x2b3   :  { %v4377_v52 = vor.u32 %v4376_v25, %v4375_v2 }
 0x2b4   :  { %11190 = vmatmul.mubr.msk.bf16.gmra.mrb[168].mxu1 %vm687_vm3, %v9755_v58  ;;  %v4371_v58 = vrot.slane %v19575_v46, 1  ;;  %v19456_v46 = vshll.u32 %v15643_v44, 16 }
 0x2b5   :  { %11195 = vmatprep.mubr.msk.bf16.mxu1 %vm14388_vm2, %v19480_v20  ;;  %11778 = vmatmul.mubr.msk.bf16.gmra.mrb[60].mxu0 %vm687_vm3, %v4350_v38 }
 0x2b6   :  { %11781 = vmatprep.mubr.msk.bf16.mxu0 %vm14388_vm2, %v19480_v20  ;;  %v4373_v38 = vor.u32 %v4372_v35, %v4371_v58  ;;  %v19455_v58 = vshrl.u32 %v15643_v44, 16 }
 0x2b8   :  { %v4374_v41 = vsel %vm4278_vm5, %v4369_v22, %v4373_v38  ;;  %v4392_v22 = vrot.slane %v19591_v6, 2  ;;  %v4395_v0 = vrot.slane %v19455_v58, 1  ;;  %v19446_v6 = vshll.u32 %v19600_v17, 16 }
 0x2bc   :  { %11196 = vmatmul.mubr.msk.bf16.vlgmr.msra.gmra.mrb[0].mxu1 %vm687_vm3, %v1673_v34  ;;  %v4378_v34 = vsel %vm4278_vm5, %v4373_v38, %v4377_v52  ;;  %v1694_v38 = vrot.slane %v15698_v7, 1 }
 0x2bd   :  { %11199 = vmatprep.mubr.msk.bf16.mxu1 %vm14388_vm2, %v19480_v20  ;;  %12854 = vmatpush3.bf16.msra.mxu1 %v19568_v21 }
 0x2be   :  { %11782 = vmatmul.mubr.msk.bf16.gmra.mrb[64].mxu0 %vm687_vm3, %v4354_v47  ;;  %12411 = vmatprep.subr.bf16.mxu1 %v19480_v20  ;;  %v4379_v47 = vrot.slane %v19579_v27, 1  ;;  %v19594_v27 = vld [vmem:[#allocation45_spill] sm:$0xff] }
 0x2bf   :  { %11785 = vmatprep.mubr.msk.bf16.mxu0 %vm14388_vm2, %v19480_v20  ;;  %v19451_v51 = vshrl.u32 %v19594_v27, 16 }
 0x2c0   :  { %v4381_v50 = vor.u32 %v4380_v61, %v4379_v47  ;;  %v19452_v47 = vshll.u32 %v19594_v27, 16 }
 0x2c1   :  { %v4403_v28 = vrot.slane %v19451_v51, 1 }
 0x2c2   :  { %v4382_v21 = vsel %vm4278_vm5, %v4377_v52, %v4381_v50  ;;  %v19593_v52 = vld [vmem:[#allocation48_spill] sm:$0xff] }
 0x2c4   :  { %11200 = vmatmul.mubr.msk.bf16.gmra.mrb[4].mxu1 %vm687_vm3, %v1675_v3  ;;  %v4383_v3 = vrot.slane %v19583_v57, 1  ;;  %v19596_v57 = vld [vmem:[#allocation47_spill] sm:$0xff] }
 0x2c5   :  { %11203 = vmatprep.mubr.msk.bf16.mxu1 %vm14388_vm2, %v19480_v20 }
 0x2c6   :  { %11786 = vmatmul.mubr.msk.bf16.gmra.mrb[68].mxu0 %vm687_vm3, %v4358_v53  ;;  %v19584_v53 = vshll.u32 %v19582_v29, 16 }
 0x2c7   :  { %11789 = vmatprep.mubr.msk.bf16.mxu0 %vm14388_vm2, %v19480_v20 }
 0x2c8   :  { %v4384_v49 = vrot.slane %v19584_v53, 2  ;;  %v19449_v53 = vshrl.u32 %v19596_v57, 16 }
 0x2ca   :  { %v4385_v16 = vor.u32 %v4384_v49, %v4383_v3  ;;  %v19450_v3 = vshll.u32 %v19596_v57, 16  ;;  %v4407_v45 = vrot.slane %v19449_v53, 1 }
 0x2cc   :  { %11204 = vmatmul.mubr.msk.bf16.gmra.mrb[8].mxu1 %vm687_vm3, %v1677_v8  ;;  %v4386_v4 = vsel %vm4278_vm5, %v4381_v50, %v4385_v16  ;;  %v19586_v8 = vld [vmem:[#allocation5_spill] sm:$0xff]  ;;  %v4404_v50 = vrot.slane %v19452_v47, 2 }
 0x2cd   :  { %11207 = vmatprep.mubr.msk.bf16.mxu1 %vm14388_vm2, %v19480_v20  ;;  %v19588_v48 = vshll.u32 %v19586_v8, 16 }
 0x2ce   :  { %11790 = vmatmul.mubr.msk.bf16.gmra.mrb[72].mxu0 %vm687_vm3, %v4362_v23  ;;  %v19587_v23 = vshrl.u32 %v19586_v8, 16  ;;  %v4405_v29 = vor.u32 %v4404_v50, %v4403_v28 }
 0x2cf   :  { %11793 = vmatprep.mubr.msk.bf16.mxu0 %vm14388_vm2, %v19480_v20  ;;  %v4388_v39 = vrot.slane %v19588_v48, 2 }
 0x2d0   :  { %v4387_v24 = vrot.slane %v19587_v23, 1  ;;  %v19598_v23 = vld [vmem:[#allocation50_spill] sm:$0xff] }
 0x2d1   :  { %v19447_v48 = vshrl.u32 %v19598_v23, 16 }
 0x2d4   :  { %11208 = vmatmul.mubr.msk.bf16.gmra.mrb[12].mxu1 %vm687_vm3, %v1679_v10  ;;  %v19457_v10 = vshrl.u32 %v16300_v26, 16 }
 0x2d5   :  { %11211 = vmatprep.mubr.msk.bf16.mxu1 %vm14388_vm2, %v19480_v20 }
 0x2d6   :  { %11794 = vmatmul.mubr.msk.bf16.gmra.mrb[76].mxu0 %vm687_vm3, %v4366_v62  ;;  %v4389_v62 = vor.u32 %v4388_v39, %v4387_v24  ;;  %v4391_v14 = vrot.slane %v19457_v10, 1  ;;  %v19448_v24 = vshll.u32 %v19598_v23, 16 }
 0x2d7   :  { %11797 = vmatprep.mubr.msk.bf16.mxu0 %vm14388_vm2, %v19480_v20 }
 0x2d8   :  { %v4390_v56 = vsel %vm4278_vm5, %v4385_v16, %v4389_v62  ;;  %v4408_v16 = vrot.slane %v19450_v3, 2 }
 0x2da   :  { %v4409_v8 = vor.u32 %v4408_v16, %v4407_v45  ;;  %v19440_v16 = vshll.u32 %v15825_v55, 16 }
 0x2dc   :  { %11212 = vmatmul.mubr.msk.bf16.gmra.mrb[16].mxu1 %vm687_vm3, %v1681_v18  ;;  %v1692_v18 = vrot.slane %v15676_v15, 1  ;;  %v4396_v15 = vrot.slane %v19456_v46, 2  ;;  %v4410_v63 = vsel %vm4278_vm5, %v4405_v29, %v4409_v8 }
 0x2dd   :  { %11215 = vmatprep.mubr.msk.bf16.mxu1 %vm14388_vm2, %v19480_v20 }
 0x2de   :  { %11798 = vmatmul.mubr.msk.bf16.gmra.mrb[80].mxu0 %vm687_vm3, %v4370_v11  ;;  %v4393_v11 = vor.u32 %v4392_v22, %v4391_v14  ;;  %v1693_v30 = vsel %vm1670_vm4, %v1690_v33, %v1692_v18  ;;  %v1695_v19 = vsel %vm1670_vm4, %v1692_v18, %v1694_v38  ;;  %v4411_v33 = vrot.slane %v19447_v48, 1 }
 0x2df   :  { %11801 = vmatprep.mubr.msk.bf16.mxu0 %vm14388_vm2, %v19480_v20  ;;  %v19445_v22 = vshrl.u32 %v19600_v17, 16 }
 0x2e0   :  { %v4394_v35 = vsel %vm4278_vm5, %v4389_v62, %v4393_v11  ;;  %v4412_v62 = vrot.slane %v19448_v24, 2 }
 0x2e2   :  { %v4413_v14 = vor.u32 %v4412_v62, %v4411_v33  ;;  %v14317_v33 = vld [vmem:[%s19282_s0 + $0xa0] sm:$0xff]  }
 0x2e3   :  { %v1710_v62 = vrot.slane %v14317_v33, 1 }
 0x2e4   :  { %11216 = vmatmul.mubr.msk.bf16.gmra.mrb[20].mxu1 %vm687_vm3, %v1683_v13  ;;  %v4397_v13 = vor.u32 %v4396_v15, %v4395_v0  ;;  %v1704_v0 = vrot.slane %v15808_v9, 1 }
 0x2e5   :  { %11219 = vmatprep.mubr.msk.bf16.mxu1 %vm14388_vm2, %v19480_v20 }
 0x2e6   :  { %11802 = vmatmul.mubr.msk.bf16.gmra.mrb[84].mxu0 %vm687_vm3, %v4374_v41  ;;  %v19592_v41 = vld [vmem:[#allocation43_spill] sm:$0xff]  ;;  %v4398_v25 = vsel %vm4278_vm5, %v4393_v11, %v4397_v13  ;;  %v4414_v11 = vsel %vm4278_vm5, %v4409_v8, %v4413_v14 }
 0x2e7   :  { %11805 = vmatprep.mubr.msk.bf16.mxu0 %vm14388_vm2, %v19480_v20  ;;  %v19454_v12 = vshll.u32 %v19592_v41, 16  ;;  %v19453_v2 = vshrl.u32 %v19592_v41, 16 }
 0x2e9   :  { %v4399_v54 = vrot.slane %v19453_v2, 1  ;;  %v4400_v7 = vrot.slane %v19454_v12, 2 }
 0x2ec   :  { %11220 = vmatmul.mubr.msk.bf16.gmra.mrb[24].mxu1 %vm687_vm3, %v1685_v1  ;;  %v1696_v1 = vrot.slane %v19593_v52, 1  ;;  %v14315_v52 = vld [vmem:[%s19282_s0 + $0x90] sm:$0xff]  }
 0x2ed   :  { %11223 = vmatprep.mubr.msk.bf16.mxu1 %vm14388_vm2, %v19480_v20 }
 0x2ee   :  { %11806 = vmatmul.mubr.msk.bf16.gmra.mrb[88].mxu0 %vm687_vm3, %v4378_v34  ;;  %v4401_v34 = vor.u32 %v4400_v7, %v4399_v54  ;;  %v1697_v61 = vsel %vm1670_vm4, %v1694_v38, %v1696_v1  ;;  %v19601_v38 = vld [vmem:[#allocation56_spill] sm:$0xff] }
 0x2ef   :  { %11809 = vmatprep.mubr.msk.bf16.mxu0 %vm14388_vm2, %v19480_v20 }
 0x2f0   :  { %v4402_v32 = vsel %vm4278_vm5, %v4397_v13, %v4401_v34  ;;  %v4406_v40 = vsel %vm4278_vm5, %v4401_v34, %v4405_v29  ;;  %v19444_v13 = vshll.u32 %v19601_v38, 16 }
 0x2f2   :  { %v4420_v9 = vrot.slane %v19444_v13, 2 }
 0x2f4   :  { %11224 = vmatmul.mubr.msk.bf16.gmra.mrb[28].mxu1 %vm687_vm3, %v1687_v31  ;;  %v19595_v31 = vld [vmem:[#allocation51_spill] sm:$0xff] }
 0x2f5   :  { %11227 = vmatprep.mubr.msk.bf16.mxu1 %vm14388_vm2, %v19480_v20 }
 0x2f6   :  { %11810 = vmatmul.mubr.msk.bf16.gmra.mrb[92].mxu0 %vm687_vm3, %v4382_v21  ;;  %v1698_v21 = vrot.slane %v19595_v31, 1 }
 0x2f7   :  { %11813 = vmatprep.mubr.msk.bf16.mxu0 %vm14388_vm2, %v19480_v20 }
 0x2f8   :  { %v1699_v49 = vsel %vm1670_vm4, %v1696_v1, %v1698_v21  ;;  %v1706_v1 = vrot.slane %v14315_v52, 1 }
 0x2fa   :  { %v1707_v50 = vsel %vm1670_vm4, %v1704_v0, %v1706_v1 }
 0x2fc   :  { %11228 = vmatmul.mubr.msk.bf16.gmra.mrb[32].mxu1 %vm687_vm3, %v1689_v59  ;;  %v19597_v59 = vld [vmem:[#allocation54_spill] sm:$0xff] }
 0x2fd   :  { %11231 = vmatprep.mubr.msk.bf16.mxu1 %vm14388_vm2, %v19480_v20 }
 0x2fe   :  { %11814 = vmatmul.mubr.msk.bf16.gmra.mrb[96].mxu0 %vm687_vm3, %v4386_v4  ;;  %v1700_v4 = vrot.slane %v19597_v59, 1  ;;  %v19439_v59 = vshrl.u32 %v15825_v55, 16 }
 0x2ff   :  { %11817 = vmatprep.mubr.msk.bf16.mxu0 %vm14388_vm2, %v19480_v20 }
 0x300   :  { %v1701_v39 = vsel %vm1670_vm4, %v1698_v21, %v1700_v4 }
 0x304   :  { %11232 = vmatmul.mubr.msk.bf16.gmra.mrb[36].mxu1 %vm687_vm3, %v1691_v60  ;;  %v19599_v60 = vld [vmem:[#allocation57_spill] sm:$0xff] }
 0x305   :  { %11235 = vmatprep.mubr.msk.bf16.mxu1 %vm14388_vm2, %v19480_v20 }
 0x306   :  { %11818 = vmatmul.mubr.msk.bf16.gmra.mrb[100].mxu0 %vm687_vm3, %v4390_v56  ;;  %v1702_v56 = vrot.slane %v19599_v60, 1 }
 0x307   :  { %11821 = vmatprep.mubr.msk.bf16.mxu0 %vm14388_vm2, %v19480_v20 }
 0x308   :  { %v1703_v18 = vsel %vm1670_vm4, %v1700_v4, %v1702_v56 }
 0x30c   :  { %11236 = vmatmul.mubr.msk.bf16.gmra.mrb[40].mxu1 %vm687_vm3, %v1693_v30  ;;  %v4415_v30 = vrot.slane %v19445_v22, 1 }
 0x30d   :  { %11239 = vmatprep.mubr.msk.bf16.mxu1 %vm14388_vm2, %v19480_v20 }
 0x30e   :  { %11822 = vmatmul.mubr.msk.bf16.gmra.mrb[104].mxu0 %vm687_vm3, %v4394_v35  ;;  %v4416_v35 = vrot.slane %v19446_v6, 2 }
 0x30f   :  { %11825 = vmatprep.mubr.msk.bf16.mxu0 %vm14388_vm2, %v19480_v20 }
 0x310   :  { %v4417_v15 = vor.u32 %v4416_v35, %v4415_v30 }
 0x312   :  { %v4418_v54 = vsel %vm4278_vm5, %v4413_v14, %v4417_v15  ;;  %v19437_v14 = vshrl.u32 %v15842_v5, 16 }
 0x314   :  { %11240 = vmatmul.mubr.msk.bf16.gmra.mrb[44].mxu1 %vm687_vm3, %v1695_v19  ;;  %v19443_v19 = vshrl.u32 %v19601_v38, 16  ;;  %v4431_v30 = vrot.slane %v19437_v14, 1 }
 0x315   :  { %11243 = vmatprep.mubr.msk.bf16.mxu1 %vm14388_vm2, %v19480_v20 }
 0x316   :  { %11826 = vmatmul.mubr.msk.bf16.gmra.mrb[108].mxu0 %vm687_vm3, %v4398_v25  ;;  %v1705_v25 = vsel %vm1670_vm4, %v1702_v56, %v1704_v0  ;;  %v4419_v7 = vrot.slane %v19443_v19, 1  ;;  %v19438_v56 = vshll.u32 %v15842_v5, 16  ;;  %v14318_v0 = vld [vmem:[%s19282_s0 + $0xa8] sm:$0xff]  }
 0x317   :  { %11829 = vmatprep.mubr.msk.bf16.mxu0 %vm14388_vm2, %v19480_v20 }
 0x318   :  { %v4421_v34 = vor.u32 %v4420_v9, %v4419_v7  ;;  %v4432_v35 = vrot.slane %v19438_v56, 2  ;;  %v19435_v7 = vshrl.u32 %v15859_v36, 16 }
 0x31a   :  { %v4422_v31 = vsel %vm4278_vm5, %v4417_v15, %v4421_v34  ;;  %v1712_v15 = vrot.slane %v14318_v0, 1 }
 0x31c   :  { %11244 = vmatmul.mubr.msk.bf16.gmra.mrb[48].mxu1 %vm687_vm3, %v1697_v61  ;;  %v19602_v61 = vld [vmem:[#allocation59_spill] sm:$0xff]  ;;  %v1713_v9 = vsel %vm1670_vm4, %v1710_v62, %v1712_v15 }
 0x31d   :  { %11247 = vmatprep.mubr.msk.bf16.mxu1 %vm14388_vm2, %v19480_v20  ;;  %v19441_v28 = vshrl.u32 %v19602_v61, 16 }
 0x31e   :  { %11830 = vmatmul.mubr.msk.bf16.gmra.mrb[112].mxu0 %vm687_vm3, %v4402_v32  ;;  %v19442_v32 = vshll.u32 %v19602_v61, 16 }
 0x31f   :  { %11833 = vmatprep.mubr.msk.bf16.mxu0 %vm14388_vm2, %v19480_v20  ;;  %v4423_v21 = vrot.slane %v19441_v28, 1 }
 0x320   :  { %v4424_v29 = vrot.slane %v19442_v32, 2 }
 0x322   :  { %v4425_v45 = vor.u32 %v4424_v29, %v4423_v21  ;;  %v19434_v29 = vshll.u32 %v15876_v43, 16 }
 0x324   :  { %11248 = vmatmul.mubr.msk.bf16.gmra.mrb[52].mxu1 %vm687_vm3, %v1699_v49  ;;  %v14316_v49 = vld [vmem:[%s19282_s0 + $0x98] sm:$0xff]   ;;  %v4426_v8 = vsel %vm4278_vm5, %v4421_v34, %v4425_v45 }
 0x325   :  { %11251 = vmatprep.mubr.msk.bf16.mxu1 %vm14388_vm2, %v19480_v20 }
 0x326   :  { %11834 = vmatmul.mubr.msk.bf16.gmra.mrb[116].mxu0 %vm687_vm3, %v4406_v40  ;;  %v1708_v40 = vrot.slane %v14316_v49, 1  ;;  %v19433_v49 = vshrl.u32 %v15876_v43, 16 }
 0x327   :  { %11837 = vmatprep.mubr.msk.bf16.mxu0 %vm14388_vm2, %v19480_v20 }
 0x328   :  { %v1709_v4 = vsel %vm1670_vm4, %v1706_v1, %v1708_v40  ;;  %v4435_v1 = vrot.slane %v19435_v7, 1 }
 0x32c   :  { %11252 = vmatmul.mubr.msk.bf16.gmra.mrb[56].mxu1 %vm687_vm3, %v1701_v39  ;;  %v4427_v39 = vrot.slane %v19439_v59, 1 }
 0x32d   :  { %11255 = vmatprep.mubr.msk.bf16.mxu1 %vm14388_vm2, %v19480_v20 }
 0x32e   :  { %11838 = vmatmul.mubr.msk.bf16.gmra.mrb[120].mxu0 %vm687_vm3, %v4410_v63  ;;  %v4428_v63 = vrot.slane %v19440_v16, 2 }
 0x32f   :  { %11841 = vmatprep.mubr.msk.bf16.mxu0 %vm14388_vm2, %v19480_v20 }
 0x330   :  { %v4429_v60 = vor.u32 %v4428_v63, %v4427_v39  ;;  %v14320_v39 = vld [vmem:[%s19282_s0 + $0xb8] sm:$0xff]  }
 0x331   :  { %v1716_v63 = vrot.slane %v14320_v39, 1 }
 0x334   :  { %11256 = vmatmul.mubr.msk.bf16.gmra.mrb[60].mxu1 %vm687_vm3, %v1703_v18  ;;  %v1711_v18 = vsel %vm1670_vm4, %v1708_v40, %v1710_v62  ;;  %v19603_v62 = vld [vmem:[#allocation65_spill] sm:$0xff] }
 0x335   :  { %11259 = vmatprep.mubr.msk.bf16.mxu1 %vm14388_vm2, %v19480_v20 }
 0x336   :  { %11842 = vmatmul.mubr.msk.bf16.gmra.mrb[124].mxu0 %vm687_vm3, %v4414_v11  ;;  %v4430_v11 = vsel %vm4278_vm5, %v4425_v45, %v4429_v60 }
 0x337   :  { %11845 = vmatprep.mubr.msk.bf16.mxu0 %vm14388_vm2, %v19480_v20 }
 0x33c   :  { %11260 = vmatmul.mubr.msk.bf16.gmra.mrb[64].mxu1 %vm687_vm3, %v1705_v25  ;;  %v4433_v25 = vor.u32 %v4432_v35, %v4431_v30 }
 0x33d   :  { %11263 = vmatprep.mubr.msk.bf16.mxu1 %vm14388_vm2, %v19480_v20 }
 0x33e   :  { %11846 = vmatmul.mubr.msk.bf16.gmra.mrb[128].mxu0 %vm687_vm3, %v4418_v54  ;;  %v19436_v54 = vshll.u32 %v15859_v36, 16  ;;  %v4434_v52 = vsel %vm4278_vm5, %v4429_v60, %v4433_v25  ;;  %v19432_v60 = vshll.u32 %v19603_v62, 16 }
 0x33f   :  { %11849 = vmatprep.mubr.msk.bf16.mxu0 %vm14388_vm2, %v19480_v20 }
 0x340   :  { %v4436_v34 = vrot.slane %v19436_v54, 2  ;;  %v4444_v0 = vrot.slane %v19432_v60, 2 }
 0x342   :  { %v4437_v21 = vor.u32 %v4436_v34, %v4435_v1  ;;  %v19429_v1 = vshrl.u32 %v15910_v37, 16  ;;  %v4272_v34 = vld [vmem:[%s19282_s0 + $0x158] sm:$0x3] }
 0x344   :  { %11264 = vmatmul.mubr.msk.bf16.gmra.mrb[68].mxu1 %vm687_vm3, %v1707_v50  ;;  %v14319_v50 = vld [vmem:[%s19282_s0 + $0xb0] sm:$0xff]   ;;  %v4438_v45 = vsel %vm4278_vm5, %v4433_v25, %v4437_v21 }
 0x345   :  { %11267 = vmatprep.mubr.msk.bf16.mxu1 %vm14388_vm2, %v19480_v20 }
 0x346   :  { %11850 = vmatmul.mubr.msk.bf16.gmra.mrb[132].mxu0 %vm687_vm3, %v4422_v31  ;;  %v1714_v31 = vrot.slane %v14319_v50, 1 }
 0x347   :  { %11853 = vmatprep.mubr.msk.bf16.mxu0 %vm14388_vm2, %v19480_v20 }
 0x348   :  { %v1715_v40 = vsel %vm1670_vm4, %v1712_v15, %v1714_v31  ;;  %v14321_v15 = vld [vmem:[%s19282_s0 + $0xc0] sm:$0xff]  }
 0x349   :  { %v1718_v25 = vrot.slane %v14321_v15, 1 }
 0x34b   :  { %v1719_v50 = vsel %vm1670_vm4, %v1716_v63, %v1718_v25 }
 0x34c   :  { %11268 = vmatmul.mubr.msk.bf16.gmra.mrb[72].mxu1 %vm687_vm3, %v1709_v4  ;;  %v4439_v4 = vrot.slane %v19433_v49, 1  ;;  %v16671_v49 = vld [vmem:[%s19282_s0 + $0x30] sm:$0xff]  }
 0x34d   :  { %11271 = vmatprep.mubr.msk.bf16.mxu1 %vm14388_vm2, %v19480_v20 }
 0x34e   :  { %11854 = vmatmul.mubr.msk.bf16.gmra.mrb[136].mxu0 %vm687_vm3, %v4426_v8  ;;  %v4440_v8 = vrot.slane %v19434_v29, 2 }
 0x34f   :  { %11857 = vmatprep.mubr.msk.bf16.mxu0 %vm14388_vm2, %v19480_v20 }
 0x350   :  { %v4441_v33 = vor.u32 %v4440_v8, %v4439_v4  ;;  %v14322_v4 = vld [vmem:[%s19282_s0 + $0xc8] sm:$0xff]  }
 0x351   :  { %v1720_v8 = vrot.slane %v14322_v4, 1 }
 0x352   :  { %v4442_v30 = vsel %vm4278_vm5, %v4437_v21, %v4441_v33  ;;  %v4447_v21 = vrot.slane %v19429_v1, 1 }
 0x354   :  { %11272 = vmatmul.mubr.msk.bf16.gmra.mrb[76].mxu1 %vm687_vm3, %v1711_v18  ;;  %v19431_v18 = vshrl.u32 %v19603_v62, 16 }
 0x355   :  { %11275 = vmatprep.mubr.msk.bf16.mxu1 %vm14388_vm2, %v19480_v20 }
 0x356   :  { %11858 = vmatmul.mubr.msk.bf16.gmra.mrb[140].mxu0 %vm687_vm3, %v4430_v11  ;;  %v1717_v11 = vsel %vm1670_vm4, %v1714_v31, %v1716_v63  ;;  %v4443_v35 = vrot.slane %v19431_v18, 1  ;;  %v10108_v18 = vld [vmem:[%s19281_s1 + $0x1c] sm:$0xf] }
 0x357   :  { %11861 = vmatprep.mubr.msk.bf16.mxu0 %vm14388_vm2, %v19480_v20 }
 0x35c   :  { %11276 = vmatmul.mubr.msk.bf16.gmra.mrb[80].mxu1 %vm687_vm3, %v1713_v9  ;;  %v4445_v9 = vor.u32 %v4444_v0, %v4443_v35  ;;  %v14323_v0 = vld [vmem:[%s19282_s0 + $0xd0] sm:$0xff]  }
 0x35d   :  { %11279 = vmatprep.mubr.msk.bf16.mxu1 %vm14388_vm2, %v19480_v20  ;;  %v1722_v15 = vrot.slane %v14323_v0, 1 }
 0x35e   :  { %11862 = vmatmul.mubr.msk.bf16.gmra.mrb[144].mxu0 %vm687_vm3, %v4434_v52  ;;  %v19430_v52 = vshll.u32 %v15910_v37, 16  ;;  %v4446_v31 = vsel %vm4278_vm5, %v4441_v33, %v4445_v9 }
 0x35f   :  { %11865 = vmatprep.mubr.msk.bf16.mxu0 %vm14388_vm2, %v19480_v20 }
 0x364   :  { %11280 = vmatmul.mubr.msk.bf16.gmra.mrb[84].mxu1 %vm687_vm3, %v1715_v40  ;;  %v4448_v40 = vrot.slane %v19430_v52, 2 }
 0x365   :  { %11283 = vmatprep.mubr.msk.bf16.mxu1 %vm14388_vm2, %v19480_v20 }
 0x366   :  { %11866 = vmatmul.mubr.msk.bf16.gmra.mrb[148].mxu0 %vm687_vm3, %v4438_v45  ;;  %v9977_v45 = vcombine.low %v15924_v42, %v4272_v34  ;;  %v4449_v39 = vor.u32 %v4448_v40, %v4447_v21  ;;  %v1721_v42 = vsel %vm1670_vm4, %v1718_v25, %v1720_v8  ;;  %v5053_v21 = vld [vmem:[%s19282_s0 + $0x8] sm:$0xe]  ;;  %v5054_v40 = vld [vmem:[%s19282_s0 + $0xc] sm:$0xf] }
 0x367   :  { %11869 = vmatprep.mubr.msk.bf16.mxu0 %vm14388_vm2, %v19480_v20  ;;  %v16577_v4 = vcombine.low %v5053_v21, %v5054_v40 }
 0x368   :  { %v4452_v63 = vshrl.u32 %v9977_v45, 16  ;;  %v4455_v33 = vshll.u32 %v9977_v45, 16 }
 0x36a   :  { %v4457_v35 = vrot.slane %v4455_v33, 2 }
 0x36c   :  { %11284 = vmatmul.mubr.msk.bf16.gmra.mrb[88].mxu1 %vm687_vm3, %v1717_v11  ;;  %v4450_v11 = vsel %vm4278_vm5, %v4445_v9, %v4449_v39  ;;  %v1723_v9 = vsel %vm1670_vm4, %v1720_v8, %v1722_v15  ;;  %v16582_v8 = vld [vmem:[%s19282_s0 + $0x10] sm:$0xff]  }
 0x36d   :  { %11287 = vmatprep.mubr.msk.bf16.mxu1 %vm14388_vm2, %v19480_v20 }
 0x36e   :  { %11870 = vmatmul.mubr.msk.bf16.gmra.mrb[152].mxu0 %vm687_vm3, %v4442_v30  ;;  %v4454_v30 = vrot.slane %v4452_v63, 1 }
 0x36f   :  { %11873 = vmatprep.mubr.msk.bf16.mxu0 %vm14388_vm2, %v19480_v20 }
 0x370   :  { %v4458_v25 = vor.u32 %v4457_v35, %v4454_v30 }
 0x372   :  { %v4459_v34 = vsel %vm4278_vm5, %v4449_v39, %v4458_v25  ;;  %v14325_v39 = vld [vmem:[%s19282_s0 + $0xe0] sm:$0xff]  }
 0x373   :  { %v1726_v63 = vrot.slane %v14325_v39, 1 }
 0x374   :  { %11288 = vmatmul.mubr.msk.bf16.gmra.mrb[92].mxu1 %vm687_vm3, %v1719_v50  ;;  %v14324_v50 = vld [vmem:[%s19282_s0 + $0xd8] sm:$0xff]  }
 0x375   :  { %11291 = vmatprep.mubr.msk.bf16.mxu1 %vm14388_vm2, %v19480_v20 }
 0x376   :  { %11874 = vmatmul.mubr.msk.bf16.gmra.mrb[156].mxu0 %vm687_vm3, %v4446_v31  ;;  %v1724_v31 = vrot.slane %v14324_v50, 1 }
 0x377   :  { %11877 = vmatprep.mubr.msk.bf16.mxu0 %vm14388_vm2, %v19480_v20 }
 0x378   :  { %v1725_v45 = vsel %vm1670_vm4, %v1722_v15, %v1724_v31  ;;  %v1727_v0 = vsel %vm1670_vm4, %v1724_v31, %v1726_v63 }
 0x37c   :  { %11292 = vmatmul.mubr.msk.bf16.gmra.mrb[96].mxu1 %vm687_vm3, %v1721_v42  ;;  %v5356_v42 = vrot.slane %v16577_v4, 1 }
 0x37d   :  { %11295 = vmatprep.mubr.msk.bf16.mxu1 %vm14388_vm2, %v19480_v20 }
 0x37e   :  { %11878 = vmatmul.mubr.msk.bf16.gmra.mrb[160].mxu0 %vm687_vm3, %v4450_v11  ;;  %v5357_v11 = vrot.slane %v16582_v8, 1 }
 0x37f   :  { %11881 = vmatprep.mubr.msk.bf16.mxu0 %vm14388_vm2, %v19480_v20 }
 0x384   :  { %11296 = vmatmul.mubr.msk.bf16.gmra.mrb[100].mxu1 %vm687_vm3, %v1723_v9  ;;  %v5358_v9 = vsel %vm1670_vm4, %v5356_v42, %v5357_v11 }
 0x385   :  { %11299 = vmatprep.mubr.msk.bf16.mxu1 %vm14388_vm2, %v19480_v20 }
 0x386   :  { %11882 = vmatmul.mubr.msk.bf16.gmra.mrb[164].mxu0 %vm687_vm3, %v4459_v34  ;;  %v14326_v34 = vld [vmem:[%s19282_s0 + $0xe8] sm:$0xff]  }
 0x387   :  { %11885 = vmatprep.mubr.msk.bf16.mxu0 %vm14388_vm2, %v19480_v20  ;;  %v1728_v50 = vrot.slane %v14326_v34, 1 }
 0x389   :  { %v1729_v39 = vsel %vm1670_vm4, %v1726_v63, %v1728_v50 }
 0x38c   :  { %11300 = vmatmul.mubr.msk.bf16.gmra.mrb[104].mxu1 %vm687_vm3, %v1725_v45 }
 0x38d   :  { %11303 = vmatprep.mubr.msk.bf16.mxu1 %vm14388_vm2, %v19480_v20 }
 0x38e   :  { %11886 = vmatmul.mubr.msk.bf16.gmra.mrb[168].mxu0 %vm687_vm3, %v4458_v25  ;;  %v16604_v25 = vld [vmem:[%s19282_s0 + $0x18] sm:$0xff]  }
 0x38f   :  { %v16591_v33 = vpop.f32.mrb[0].mxu1  ;;  %11891 = vmatprep.mubr.msk.bf16.mxu0 %vm14388_vm2, %v19480_v20  ;;  %v5359_v21 = vrot.slane %v16604_v25, 1 }
 0x390   :  { %v11197_v30 = vpop.f32.mrb[1].mxu1 }
 0x391   :  { %v16597_v35 = vpop.f32.mrb[2].mxu1  ;;  %v5360_v30 = vsel %vm1670_vm4, %v5357_v11, %v5359_v21 }
 0x392   :  { %v11198_v15 = vpop.f32.mrb[3].mxu1 }
 0x393   :  { %v14327_v15 = vld [vmem:[%s19282_s0 + $0xf0] sm:$0xff]  }
 0x394   :  { %11304 = vmatmul.mubr.msk.bf16.gmra.mrb[108].mxu1 %vm687_vm3, %v1727_v0  ;;  %v16625_v0 = vld [vmem:[%s19282_s0 + $0x20] sm:$0xff]  }
 0x395   :  { %11307 = vmatprep.mubr.msk.bf16.mxu1 %vm14388_vm2, %v19480_v20  ;;  %v5361_v11 = vrot.slane %v16625_v0, 1 }
 0x396   :  { %11892 = vmatmul.mubr.msk.bf16.vlgmr.msra.gmra.mrb[0].mxu0 %vm687_vm3, %v5358_v9  ;;  %v1730_v9 = vrot.slane %v14327_v15, 1  ;;  %v16646_v15 = vld [vmem:[%s19282_s0 + $0x28] sm:$0xff]  }
 0x397   :  { %v16613_v31 = vpop.f32.mrb[4].mxu1  ;;  %11895 = vmatprep.mubr.msk.bf16.mxu0 %vm14388_vm2, %v19480_v20  ;;  %v5362_v1 = vsel %vm1670_vm4, %v5359_v21, %v5361_v11  ;;  %v5363_v21 = vrot.slane %v16646_v15, 1 }
 0x398   :  { %v11201_v40 = vpop.f32.mrb[5].mxu1 }
 0x399   :  { %v16618_v45 = vpop.f32.mrb[6].mxu1 }
 0x39a   :  { %v11202_v42 = vpop.f32.mrb[7].mxu1 }
 0x39c   :  { %11308 = vmatmul.mubr.msk.bf16.gmra.mrb[112].mxu1 %vm687_vm3, %v1729_v39  ;;  %v1731_v39 = vsel %vm1670_vm4, %v1728_v50, %v1730_v9 }
 0x39d   :  { %11311 = vmatprep.mubr.msk.bf16.mxu1 %vm14388_vm2, %v19480_v20 }
 0x39e   :  { %11896 = vmatmul.mubr.msk.bf16.gmra.mrb[4].mxu0 %vm687_vm3, %v5360_v30  ;;  %v14328_v30 = vld [vmem:[%s19282_s0 + $0xf8] sm:$0xff]  }
 0x39f   :  { %v16634_v63 = vpop.f32.mrb[8].mxu1  ;;  %11899 = vmatprep.mubr.msk.bf16.mxu0 %vm14388_vm2, %v19480_v20 }
 0x3a0   :  { %v11205_v34 = vpop.f32.mrb[9].mxu1 }
 0x3a1   :  { %v16639_v40 = vpop.f32.mrb[10].mxu1  ;;  %v1732_v34 = vrot.slane %v14328_v30, 1  ;;  %v6556_v30 = vsel %vm817_vm0, %v10108_v18, 0 }
 0x3a2   :  { %19604 = vst [vmem:[#allocation3_spill] sm:$0xff] %v16639_v40  ;;  %v11206_v42 = vpop.f32.mrb[11].mxu1  ;;  %12064 = vmatpush3.bf16.msra.mxu0 %v6556_v30 }
 0x3a3   :  { %12237 = vmatprep.subr.bf16.mxu0 %v19480_v20 }
 0x3a4   :  { %11312 = vmatmul.mubr.msk.bf16.gmra.mrb[116].mxu1 %vm687_vm3, %v1731_v39  ;;  %v1733_v39 = vsel %vm1670_vm4, %v1730_v9, %v1732_v34 }
 0x3a5   :  { %11315 = vmatprep.mubr.msk.bf16.mxu1 %vm14388_vm2, %v19480_v20 }
 0x3a6   :  { %11900 = vmatmul.mubr.msk.bf16.gmra.mrb[8].mxu0 %vm687_vm3, %v5362_v1  ;;  %v5364_v1 = vsel %vm1670_vm4, %v5361_v11, %v5363_v21  ;;  %v5365_v11 = vrot.slane %v16671_v49, 1 }
 0x3a7   :  { %v16655_v50 = vpop.f32.mrb[12].mxu1  ;;  %11903 = vmatprep.mubr.msk.bf16.mxu0 %vm14388_vm2, %v19480_v20 }
 0x3a8   :  { %19605 = vst [vmem:[#allocation17_spill] sm:$0xff] %v16655_v50  ;;  %v11209_v42 = vpop.f32.mrb[13].mxu1  ;;  %v5366_v7 = vsel %vm1670_vm4, %v5363_v21, %v5365_v11 }
 0x3a9   :  { %v16660_v52 = vpop.f32.mrb[14].mxu1 }
 0x3aa   :  { %19606 = vst [vmem:[#allocation19_spill] sm:$0xff] %v16660_v52  ;;  %v11210_v60 = vpop.f32.mrb[15].mxu1  ;;  %v6058_v52 = vshrl.u32 %v16604_v25, 16 }
 0x3ab   :  { %v14329_v60 = vld [vmem:[%s19282_s0 + $0x100] sm:$0xff]  }
 0x3ac   :  { %11316 = vmatmul.mubr.msk.bf16.gmra.mrb[120].mxu1 %vm687_vm3, %v1733_v39  ;;  %v1734_v18 = vrot.slane %v14329_v60, 1  ;;  %v16693_v60 = vld [vmem:[%s19282_s0 + $0x38] sm:$0xff]  }
 0x3ad   :  { %11319 = vmatprep.mubr.msk.bf16.mxu1 %vm14388_vm2, %v19480_v20 }
 0x3ae   :  { %11904 = vmatmul.mubr.msk.bf16.gmra.mrb[12].mxu0 %vm687_vm3, %v5364_v1  ;;  %v1735_v30 = vsel %vm1670_vm4, %v1732_v34, %v1734_v18  ;;  %v14330_v1 = vld [vmem:[%s19282_s0 + $0x108] sm:$0xff]   ;;  %v5367_v34 = vrot.slane %v16693_v60, 1 }
 0x3af   :  { %v16681_v9 = vpop.f32.mrb[16].mxu1  ;;  %11907 = vmatprep.mubr.msk.bf16.mxu0 %vm14388_vm2, %v19480_v20 }
 0x3b0   :  { %19607 = vst [vmem:[#allocation21_spill] sm:$0xff] %v16681_v9  ;;  %v11213_v42 = vpop.f32.mrb[17].mxu1  ;;  %v5368_v56 = vsel %vm1670_vm4, %v5365_v11, %v5367_v34 }
 0x3b1   :  { %v16686_v39 = vpop.f32.mrb[18].mxu1  ;;  %v1736_v42 = vrot.slane %v14330_v1, 1  ;;  %v16714_v1 = vld [vmem:[%s19282_s0 + $0x40] sm:$0xff]  }
 0x3b2   :  { %19608 = vst [vmem:[#allocation2_spill] sm:$0xff] %v16686_v39  ;;  %v11214_v29 = vpop.f32.mrb[19].mxu1 }
 0x3b4   :  { %11320 = vmatmul.mubr.msk.bf16.gmra.mrb[124].mxu1 %vm687_vm3, %v1735_v30  ;;  %v1737_v30 = vsel %vm1670_vm4, %v1734_v18, %v1736_v42  ;;  %v5369_v18 = vrot.slane %v16714_v1, 1 }
 0x3b5   :  { %11323 = vmatprep.mubr.msk.bf16.mxu1 %vm14388_vm2, %v19480_v20 }
 0x3b6   :  { %11908 = vmatmul.mubr.msk.bf16.gmra.mrb[16].mxu0 %vm687_vm3, %v5366_v7  ;;  %v14331_v7 = vld [vmem:[%s19282_s0 + $0x110] sm:$0xff]   ;;  %v5370_v28 = vsel %vm1670_vm4, %v5367_v34, %v5369_v18 }
 0x3b7   :  { %v16702_v29 = vpop.f32.mrb[20].mxu1  ;;  %11911 = vmatprep.mubr.msk.bf16.mxu0 %vm14388_vm2, %v19480_v20 }
 0x3b8   :  { %19609 = vst [vmem:[#allocation37_spill] sm:$0xff] %v16702_v29  ;;  %v11217_v21 = vpop.f32.mrb[21].mxu1 }
 0x3b9   :  { %v16707_v54 = vpop.f32.mrb[22].mxu1  ;;  %v1738_v21 = vrot.slane %v14331_v7, 1  ;;  %v16735_v7 = vld [vmem:[%s19282_s0 + $0x48] sm:$0xff]  }
 0x3ba   :  { %19610 = vst [vmem:[#allocation4_spill] sm:$0xff] %v16707_v54  ;;  %v11218_v14 = vpop.f32.mrb[23].mxu1  ;;  %v6044_v54 = vshll.u32 %v16577_v4, 16 }
 0x3bc   :  { %11324 = vmatmul.mubr.msk.bf16.gmra.mrb[128].mxu1 %vm687_vm3, %v1737_v30  ;;  %v1739_v30 = vsel %vm1670_vm4, %v1736_v42, %v1738_v21  ;;  %v5371_v42 = vrot.slane %v16735_v7, 1  ;;  %v6046_v29 = vrot.slane %v6044_v54, 2 }
 0x3bd   :  { %11327 = vmatprep.mubr.msk.bf16.mxu1 %vm14388_vm2, %v19480_v20 }
 0x3be   :  { %11912 = vmatmul.mubr.msk.bf16.gmra.mrb[20].mxu0 %vm687_vm3, %v5368_v56  ;;  %v14332_v56 = vld [vmem:[%s19282_s0 + $0x118] sm:$0xff]   ;;  %v5372_v13 = vsel %vm1670_vm4, %v5369_v18, %v5371_v42 }
 0x3bf   :  { %v16723_v14 = vpop.f32.mrb[24].mxu1  ;;  %11915 = vmatprep.mubr.msk.bf16.mxu0 %vm14388_vm2, %v19480_v20 }
 0x3c0   :  { %19611 = vst [vmem:[#allocation39_spill] sm:$0xff] %v16723_v14  ;;  %v11221_v11 = vpop.f32.mrb[25].mxu1  ;;  %v6041_v14 = vshrl.u32 %v16577_v4, 16  ;;  %v6061_v4 = vshll.u32 %v16604_v25, 16  ;;  %v6070_v25 = vshll.u32 %v16625_v0, 16 }
 0x3c1   :  { %v16728_v59 = vpop.f32.mrb[26].mxu1  ;;  %v1740_v11 = vrot.slane %v14332_v56, 1  ;;  %v16756_v56 = vld [vmem:[%s19282_s0 + $0x50] sm:$0xff]  }
 0x3c2   :  { %19612 = vst [vmem:[#allocation5_spill] sm:$0xff] %v16728_v59  ;;  %v11222_v16 = vpop.f32.mrb[27].mxu1 }
 0x3c4   :  { %11328 = vmatmul.mubr.msk.bf16.gmra.mrb[132].mxu1 %vm687_vm3, %v1739_v30  ;;  %v1741_v30 = vsel %vm1670_vm4, %v1738_v21, %v1740_v11  ;;  %v5373_v21 = vrot.slane %v16756_v56, 1 }
 0x3c5   :  { %11331 = vmatprep.mubr.msk.bf16.mxu1 %vm14388_vm2, %v19480_v20 }
 0x3c6   :  { %11916 = vmatmul.mubr.msk.bf16.gmra.mrb[24].mxu0 %vm687_vm3, %v5370_v28  ;;  %v14333_v28 = vld [vmem:[%s19282_s0 + $0x120] sm:$0xff]   ;;  %v5374_v48 = vsel %vm1670_vm4, %v5371_v42, %v5373_v21 }
 0x3c7   :  { %v16744_v16 = vpop.f32.mrb[28].mxu1  ;;  %11919 = vmatprep.mubr.msk.bf16.mxu0 %vm14388_vm2, %v19480_v20 }
 0x3c8   :  { %19613 = vst [vmem:[#allocation41_spill] sm:$0xff] %v16744_v16  ;;  %v11225_v34 = vpop.f32.mrb[29].mxu1 }
 0x3c9   :  { %v16749_v32 = vpop.f32.mrb[30].mxu1  ;;  %v1742_v34 = vrot.slane %v14333_v28, 1  ;;  %v16777_v28 = vld [vmem:[%s19282_s0 + $0x58] sm:$0xff]  }
 0x3ca   :  { %19614 = vst [vmem:[#allocation6_spill] sm:$0xff] %v16749_v32  ;;  %v11226_v19 = vpop.f32.mrb[31].mxu1 }
 0x3cc   :  { %11332 = vmatmul.mubr.msk.bf16.gmra.mrb[136].mxu1 %vm687_vm3, %v1741_v30  ;;  %v1743_v30 = vsel %vm1670_vm4, %v1740_v11, %v1742_v34  ;;  %v5375_v11 = vrot.slane %v16777_v28, 1 }
 0x3cd   :  { %11335 = vmatprep.mubr.msk.bf16.mxu1 %vm14388_vm2, %v19480_v20 }
 0x3ce   :  { %11920 = vmatmul.mubr.msk.bf16.gmra.mrb[28].mxu0 %vm687_vm3, %v5372_v13  ;;  %v14334_v13 = vld [vmem:[%s19282_s0 + $0x128] sm:$0xff]   ;;  %v5376_v3 = vsel %vm1670_vm4, %v5373_v21, %v5375_v11 }
 0x3cf   :  { %v16765_v19 = vpop.f32.mrb[32].mxu1  ;;  %11923 = vmatprep.mubr.msk.bf16.mxu0 %vm14388_vm2, %v19480_v20 }
 0x3d0   :  { %19615 = vst [vmem:[#allocation43_spill] sm:$0xff] %v16765_v19  ;;  %v11229_v18 = vpop.f32.mrb[33].mxu1  ;;  %v17329_v19 = vld [vmem:[%s19282_s0 + $0x150] sm:$0xff]  }
 0x3d1   :  { %v16770_v22 = vpop.f32.mrb[34].mxu1  ;;  %v1744_v18 = vrot.slane %v14334_v13, 1  ;;  %v16798_v13 = vld [vmem:[%s19282_s0 + $0x60] sm:$0xff]  }
 0x3d2   :  { %19616 = vst [vmem:[#allocation48_spill] sm:$0xff] %v16770_v22  ;;  %v11230_v6 = vpop.f32.mrb[35].mxu1 }
 0x3d4   :  { %11336 = vmatmul.mubr.msk.bf16.gmra.mrb[140].mxu1 %vm687_vm3, %v1743_v30  ;;  %v1745_v30 = vsel %vm1670_vm4, %v1742_v34, %v1744_v18  ;;  %v5377_v34 = vrot.slane %v16798_v13, 1 }
 0x3d5   :  { %11339 = vmatprep.mubr.msk.bf16.mxu1 %vm14388_vm2, %v19480_v20 }
 0x3d6   :  { %11924 = vmatmul.mubr.msk.bf16.gmra.mrb[32].mxu0 %vm687_vm3, %v5374_v48  ;;  %v14335_v48 = vld [vmem:[%s19282_s0 + $0x130] sm:$0xff]   ;;  %v5378_v2 = vsel %vm1670_vm4, %v5375_v11, %v5377_v34 }
 0x3d7   :  { %v16786_v6 = vpop.f32.mrb[36].mxu1  ;;  %11927 = vmatprep.mubr.msk.bf16.mxu0 %vm14388_vm2, %v19480_v20 }
 0x3d8   :  { %19617 = vst [vmem:[#allocation45_spill] sm:$0xff] %v16786_v6  ;;  %v11233_v42 = vpop.f32.mrb[37].mxu1 }
 0x3d9   :  { %v16791_v24 = vpop.f32.mrb[38].mxu1  ;;  %v1746_v42 = vrot.slane %v14335_v48, 1  ;;  %v16819_v48 = vld [vmem:[%s19282_s0 + $0x68] sm:$0xff]  }
 0x3da   :  { %19618 = vst [vmem:[#allocation51_spill] sm:$0xff] %v16791_v24  ;;  %v11234_v53 = vpop.f32.mrb[39].mxu1 }
 0x3dc   :  { %11340 = vmatmul.mubr.msk.bf16.gmra.mrb[144].mxu1 %vm687_vm3, %v1745_v30  ;;  %v1747_v30 = vsel %vm1670_vm4, %v1744_v18, %v1746_v42  ;;  %v5379_v18 = vrot.slane %v16819_v48, 1 }
 0x3dd   :  { %11343 = vmatprep.mubr.msk.bf16.mxu1 %vm14388_vm2, %v19480_v20 }
 0x3de   :  { %11928 = vmatmul.mubr.msk.bf16.gmra.mrb[36].mxu0 %vm687_vm3, %v5376_v3  ;;  %v14336_v3 = vld [vmem:[%s19282_s0 + $0x138] sm:$0xff]   ;;  %v5380_v46 = vsel %vm1670_vm4, %v5377_v34, %v5379_v18 }
 0x3df   :  { %v16807_v53 = vpop.f32.mrb[40].mxu1  ;;  %11931 = vmatprep.mubr.msk.bf16.mxu0 %vm14388_vm2, %v19480_v20 }
 0x3e0   :  { %19619 = vst [vmem:[#allocation47_spill] sm:$0xff] %v16807_v53  ;;  %v11237_v21 = vpop.f32.mrb[41].mxu1 }
 0x3e1   :  { %v16812_v51 = vpop.f32.mrb[42].mxu1  ;;  %v1748_v21 = vrot.slane %v14336_v3, 1  ;;  %v16840_v3 = vld [vmem:[%s19282_s0 + $0x70] sm:$0xff]  }
 0x3e2   :  { %19620 = vst [vmem:[#allocation54_spill] sm:$0xff] %v16812_v51  ;;  %v11238_v47 = vpop.f32.mrb[43].mxu1 }
 0x3e4   :  { %11344 = vmatmul.mubr.msk.bf16.gmra.mrb[148].mxu1 %vm687_vm3, %v1747_v30  ;;  %v1749_v30 = vsel %vm1670_vm4, %v1746_v42, %v1748_v21  ;;  %v5381_v42 = vrot.slane %v16840_v3, 1 }
 0x3e5   :  { %11347 = vmatprep.mubr.msk.bf16.mxu1 %vm14388_vm2, %v19480_v20 }
 0x3e6   :  { %11932 = vmatmul.mubr.msk.bf16.gmra.mrb[40].mxu0 %vm687_vm3, %v5378_v2  ;;  %v14337_v2 = vld [vmem:[%s19282_s0 + $0x140] sm:$0xff]  }
 0x3e7   :  { %v16828_v47 = vpop.f32.mrb[44].mxu1  ;;  %11935 = vmatprep.mubr.msk.bf16.mxu0 %vm14388_vm2, %v19480_v20 }
 0x3e8   :  { %19621 = vst [vmem:[#allocation50_spill] sm:$0xff] %v16828_v47  ;;  %v11241_v11 = vpop.f32.mrb[45].mxu1  ;;  %v5382_v47 = vsel %vm1670_vm4, %v5379_v18, %v5381_v42 }
 0x3e9   :  { %v16833_v12 = vpop.f32.mrb[46].mxu1  ;;  %v1750_v11 = vrot.slane %v14337_v2, 1  ;;  %v16861_v2 = vld [vmem:[%s19282_s0 + $0x78] sm:$0xff]  }
 0x3ea   :  { %19622 = vst [vmem:[#allocation57_spill] sm:$0xff] %v16833_v12  ;;  %v11242_v58 = vpop.f32.mrb[47].mxu1 }
 0x3ec   :  { %11348 = vmatmul.mubr.msk.bf16.gmra.mrb[152].mxu1 %vm687_vm3, %v1749_v30  ;;  %v1751_v30 = vsel %vm1670_vm4, %v1748_v21, %v1750_v11  ;;  %v5383_v21 = vrot.slane %v16861_v2, 1 }
 0x3ed   :  { %11351 = vmatprep.mubr.msk.bf16.mxu1 %vm14388_vm2, %v19480_v20 }
 0x3ee   :  { %11936 = vmatmul.mubr.msk.bf16.gmra.mrb[44].mxu0 %vm687_vm3, %v5380_v46  ;;  %v14338_v46 = vld [vmem:[%s19282_s0 + $0x148] sm:$0xff]   ;;  %v5384_v51 = vsel %vm1670_vm4, %v5381_v42, %v5383_v21 }
 0x3ef   :  { %v16849_v58 = vpop.f32.mrb[48].mxu1  ;;  %11939 = vmatprep.mubr.msk.bf16.mxu0 %vm14388_vm2, %v19480_v20 }
 0x3f0   :  { %19623 = vst [vmem:[#allocation53_spill] sm:$0xff] %v16849_v58  ;;  %v11245_v34 = vpop.f32.mrb[49].mxu1 }
 0x3f1   :  { %v16854_v10 = vpop.f32.mrb[50].mxu1  ;;  %v1752_v34 = vrot.slane %v14338_v46, 1  ;;  %v16882_v46 = vld [vmem:[%s19282_s0 + $0x80] sm:$0xff]  }
 0x3f2   :  { %19624 = vst [vmem:[#allocation56_spill] sm:$0xff] %v16854_v10  ;;  %v11246_v12 = vpop.f32.mrb[51].mxu1 }
 0x3f4   :  { %11352 = vmatmul.mubr.msk.bf16.gmra.mrb[156].mxu1 %vm687_vm3, %v1751_v30  ;;  %v1753_v30 = vsel %vm1670_vm4, %v1750_v11, %v1752_v34  ;;  %v5385_v11 = vrot.slane %v16882_v46, 1 }
 0x3f5   :  { %11355 = vmatprep.mubr.msk.bf16.mxu1 %vm14388_vm2, %v19480_v20 }
 0x3f6   :  { %11940 = vmatmul.mubr.msk.bf16.gmra.mrb[48].mxu0 %vm687_vm3, %v5382_v47  ;;  %v19627_v47 = vld [vmem:[#allocation24_spill] sm:$0xff]  ;;  %v5386_v53 = vsel %vm1670_vm4, %v5383_v21, %v5385_v11 }
 0x3f7   :  { %v16870_v12 = vpop.f32.mrb[52].mxu1  ;;  %11943 = vmatprep.mubr.msk.bf16.mxu0 %vm14388_vm2, %v19480_v20 }
 0x3f8   :  { %19625 = vst [vmem:[#allocation59_spill] sm:$0xff] %v16870_v12  ;;  %v11249_v18 = vpop.f32.mrb[53].mxu1  ;;  %v1754_v12 = vrot.slane %v19627_v47, 1  ;;  %v16901_v47 = vld [vmem:[%s19282_s0 + $0x88] sm:$0xff]  }
 0x3f9   :  { %v16875_v10 = vpop.f32.mrb[54].mxu1 }
 0x3fa   :  { %19626 = vst [vmem:[#allocation65_spill] sm:$0xff] %v16875_v10  ;;  %v11250_v58 = vpop.f32.mrb[55].mxu1  ;;  %v1755_v10 = vsel %vm1670_vm4, %v1752_v34, %v1754_v12  ;;  %v5387_v34 = vrot.slane %v16901_v47, 1 }
 0x3fc   :  { %11356 = vmatmul.mubr.msk.bf16.gmra.mrb[160].mxu1 %vm687_vm3, %v1753_v30 }
 0x3fd   :  { %11359 = vmatprep.mubr.msk.bf16.mxu1 %vm14388_vm2, %v19480_v20 }
 0x3fe   :  { %11944 = vmatmul.mubr.msk.bf16.gmra.mrb[52].mxu0 %vm687_vm3, %v5384_v51 }
 0x3ff   :  { %v16889_v18 = vpop.f32.mrb[56].mxu1  ;;  %11947 = vmatprep.mubr.msk.bf16.mxu0 %vm14388_vm2, %v19480_v20 }
 0x400   :  { %19628 = vst [vmem:[#allocation24_spill] sm:$0xff] %v16889_v18  ;;  %v11253_v58 = vpop.f32.mrb[57].mxu1 }
 0x401   :  { %v16894_v42 = vpop.f32.mrb[58].mxu1 }
 0x402   :  { %19629 = vst [vmem:[#allocation71_spill] sm:$0xff] %v16894_v42  ;;  %v11254_v30 = vpop.f32.mrb[59].mxu1  ;;  %v5388_v42 = vsel %vm1670_vm4, %v5385_v11, %v5387_v34 }
 0x404   :  { %11360 = vmatmul.mubr.msk.bf16.gmra.mrb[164].mxu1 %vm687_vm3, %v1755_v10  ;;  %v16918_v10 = vld [vmem:[%s19282_s0 + $0x90] sm:$0xff]  }
 0x405   :  { %11363 = vmatprep.mubr.msk.bf16.mxu1 %vm14388_vm2, %v19480_v20 }
 0x406   :  { %11948 = vmatmul.mubr.msk.bf16.gmra.mrb[56].mxu0 %vm687_vm3, %v5386_v53  ;;  %v19632_v53 = vld [vmem:[#allocation7_spill] sm:$0xff] }
 0x407   :  { %v16907_v51 = vpop.f32.mrb[60].mxu1  ;;  %11951 = vmatprep.mubr.msk.bf16.mxu0 %vm14388_vm2, %v19480_v20 }
 0x408   :  { %19630 = vst [vmem:[#allocation72_spill] sm:$0xff] %v16907_v51  ;;  %v11257_v21 = vpop.f32.mrb[61].mxu1  ;;  %v19633_v51 = vshrl.u32 %v16300_v26, 16 }
 0x409   :  { %v16912_v58 = vpop.f32.mrb[62].mxu1  ;;  %v19634_v21 = vshll.u32 %v15643_v44, 16 }
 0x40a   :  { %19631 = vst [vmem:[#allocation73_spill] sm:$0xff] %v16912_v58  ;;  %v11258_v30 = vpop.f32.mrb[63].mxu1  ;;  %v2874_v18 = vor.u32 %v19633_v51, %v19632_v53 }
 0x40b   :  { %v2878_v58 = vrot.slane %v19634_v21, 1  ;;  %v5389_v30 = vrot.slane %v16918_v10, 1  ;;  %v16941_v21 = vld [vmem:[%s19282_s0 + $0x98] sm:$0xff]  }
 0x40c   :  { %11364 = vmatmul.mubr.msk.bf16.gmra.mrb[168].mxu1 %vm687_vm3, %v1754_v12 }
 0x40d   :  { %11477 = vmatprep.mubr.msk.bf16.mxu1 %vm14388_vm2, %v19480_v20  ;;  %v2879_v26 = vsel %vm343_vm1, %v2874_v18, %v2878_v58  ;;  %v5390_v53 = vsel %vm1670_vm4, %v5387_v34, %v5389_v30  ;;  %v5391_v34 = vrot.slane %v16941_v21, 1 }
 0x40e   :  { %11952 = vmatmul.mubr.msk.bf16.gmra.mrb[60].mxu0 %vm687_vm3, %v5388_v42  ;;  %v19637_v42 = vshrl.u32 %v15643_v44, 16 }
 0x40f   :  { %v16929_v11 = vpop.f32.mrb[64].mxu1  ;;  %11955 = vmatprep.mubr.msk.bf16.mxu0 %vm14388_vm2, %v19480_v20  ;;  %v5392_v44 = vsel %vm1670_vm4, %v5389_v30, %v5391_v34 }
 0x410   :  { %19635 = vst [vmem:[#allocation7_spill] sm:$0xff] %v16929_v11  ;;  %v11261_v12 = vpop.f32.mrb[65].mxu1 }
 0x411   :  { %v16934_v24 = vpop.f32.mrb[66].mxu1  ;;  %v2882_v12 = vor.u32 %v19637_v42, %v2878_v58  ;;  %v19641_v58 = vshrl.u32 %v19592_v41, 16  ;;  %v19642_v42 = vshll.u32 %v19594_v27, 16 }
 0x412   :  { %19636 = vst [vmem:[#allocation74_spill] sm:$0xff] %v16934_v24  ;;  %v11262_v51 = vpop.f32.mrb[67].mxu1  ;;  %v19638_v24 = vshll.u32 %v19592_v41, 16 }
 0x414   :  { %11478 = vmatmul.mubr.msk.bf16.vlgmr.msra.gmra.mrb[108].mxu1 %vm687_vm3, %v2879_v26  ;;  %v2886_v11 = vrot.slane %v19638_v24, 1  ;;  %v16963_v24 = vld [vmem:[%s19282_s0 + $0xa0] sm:$0xff]  }
 0x415   :  { %11481 = vmatprep.mubr.msk.bf16.mxu1 %vm14388_vm2, %v19480_v20  ;;  %v5393_v30 = vrot.slane %v16963_v24, 1 }
 0x416   :  { %11956 = vmatmul.mubr.msk.bf16.gmra.mrb[64].mxu0 %vm687_vm3, %v5390_v53  ;;  %v2887_v6 = vsel %vm343_vm1, %v2882_v12, %v2886_v11  ;;  %v2890_v53 = vor.u32 %v19641_v58, %v2886_v11  ;;  %v16985_v11 = vld [vmem:[%s19282_s0 + $0xa8] sm:$0xff]  }
 0x417   :  { %v16951_v18 = vpop.f32.mrb[68].mxu1  ;;  %11959 = vmatprep.mubr.msk.bf16.mxu0 %vm14388_vm2, %v19480_v20  ;;  %v5394_v41 = vsel %vm1670_vm4, %v5391_v34, %v5393_v30  ;;  %v5395_v34 = vrot.slane %v16985_v11, 1 }
 0x418   :  { %19639 = vst [vmem:[#allocation75_spill] sm:$0xff] %v16951_v18  ;;  %v11265_v51 = vpop.f32.mrb[69].mxu1 }
 0x419   :  { %v16956_v26 = vpop.f32.mrb[70].mxu1  ;;  %v2894_v51 = vrot.slane %v19642_v42, 1  ;;  %v19646_v42 = vshll.u32 %v19596_v57, 16 }
 0x41a   :  { %19640 = vst [vmem:[#allocation76_spill] sm:$0xff] %v16956_v26  ;;  %v11266_v22 = vpop.f32.mrb[71].mxu1 }
 0x41b   :  { %v2895_v26 = vsel %vm343_vm1, %v2890_v53, %v2894_v51 }
 0x41c   :  { %11482 = vmatmul.mubr.msk.bf16.gmra.mrb[112].mxu1 %vm687_vm3, %v2887_v6 }
 0x41d   :  { %11485 = vmatprep.mubr.msk.bf16.mxu1 %vm14388_vm2, %v19480_v20 }
 0x41e   :  { %11960 = vmatmul.mubr.msk.bf16.gmra.mrb[68].mxu0 %vm687_vm3, %v5392_v44  ;;  %v19645_v44 = vshrl.u32 %v19594_v27, 16  ;;  %v5396_v27 = vsel %vm1670_vm4, %v5393_v30, %v5395_v34 }
 0x41f   :  { %v16973_v22 = vpop.f32.mrb[72].mxu1  ;;  %11963 = vmatprep.mubr.msk.bf16.mxu0 %vm14388_vm2, %v19480_v20 }
 0x420   :  { %19643 = vst [vmem:[#allocation77_spill] sm:$0xff] %v16973_v22  ;;  %v11269_v12 = vpop.f32.mrb[73].mxu1  ;;  %v2898_v58 = vor.u32 %v19645_v44, %v2894_v51  ;;  %v17007_v51 = vld [vmem:[%s19282_s0 + $0xb0] sm:$0xff]  }
 0x421   :  { %v16978_v6 = vpop.f32.mrb[74].mxu1  ;;  %v2902_v12 = vrot.slane %v19646_v42, 1  ;;  %v19650_v42 = vshll.u32 %v19598_v23, 16  ;;  %v5397_v30 = vrot.slane %v17007_v51, 1 }
 0x422   :  { %19644 = vst [vmem:[#allocation78_spill] sm:$0xff] %v16978_v6  ;;  %v11270_v18 = vpop.f32.mrb[75].mxu1 }
 0x423   :  { %v2903_v6 = vsel %vm343_vm1, %v2898_v58, %v2902_v12 }
 0x424   :  { %11486 = vmatmul.mubr.msk.bf16.gmra.mrb[116].mxu1 %vm687_vm3, %v2895_v26 }
 0x425   :  { %11489 = vmatprep.mubr.msk.bf16.mxu1 %vm14388_vm2, %v19480_v20 }
 0x426   :  { %11964 = vmatmul.mubr.msk.bf16.gmra.mrb[72].mxu0 %vm687_vm3, %v5394_v41  ;;  %v19649_v41 = vshrl.u32 %v19596_v57, 16  ;;  %v5398_v57 = vsel %vm1670_vm4, %v5395_v34, %v5397_v30 }
 0x427   :  { %v16995_v18 = vpop.f32.mrb[76].mxu1  ;;  %11967 = vmatprep.mubr.msk.bf16.mxu0 %vm14388_vm2, %v19480_v20 }
 0x428   :  { %19647 = vst [vmem:[#allocation79_spill] sm:$0xff] %v16995_v18  ;;  %v11273_v53 = vpop.f32.mrb[77].mxu1  ;;  %v2906_v44 = vor.u32 %v19649_v41, %v2902_v12  ;;  %v17029_v12 = vld [vmem:[%s19282_s0 + $0xb8] sm:$0xff]  }
 0x429   :  { %v17000_v26 = vpop.f32.mrb[78].mxu1  ;;  %v2910_v53 = vrot.slane %v19650_v42, 1  ;;  %v19654_v42 = vshll.u32 %v19600_v17, 16  ;;  %v5399_v34 = vrot.slane %v17029_v12, 1 }
 0x42a   :  { %19648 = vst [vmem:[#allocation80_spill] sm:$0xff] %v17000_v26  ;;  %v11274_v22 = vpop.f32.mrb[79].mxu1 }
 0x42b   :  { %v2911_v26 = vsel %vm343_vm1, %v2906_v44, %v2910_v53 }
 0x42c   :  { %11490 = vmatmul.mubr.msk.bf16.gmra.mrb[120].mxu1 %vm687_vm3, %v2903_v6 }
 0x42d   :  { %11493 = vmatprep.mubr.msk.bf16.mxu1 %vm14388_vm2, %v19480_v20 }
 0x42e   :  { %11968 = vmatmul.mubr.msk.bf16.gmra.mrb[76].mxu0 %vm687_vm3, %v5396_v27  ;;  %v19653_v27 = vshrl.u32 %v19598_v23, 16  ;;  %v5400_v23 = vsel %vm1670_vm4, %v5397_v30, %v5399_v34 }
 0x42f   :  { %v17017_v22 = vpop.f32.mrb[80].mxu1  ;;  %11971 = vmatprep.mubr.msk.bf16.mxu0 %vm14388_vm2, %v19480_v20 }
 0x430   :  { %19651 = vst [vmem:[#allocation81_spill] sm:$0xff] %v17017_v22  ;;  %v11277_v58 = vpop.f32.mrb[81].mxu1  ;;  %v2914_v41 = vor.u32 %v19653_v27, %v2910_v53  ;;  %v17051_v53 = vld [vmem:[%s19282_s0 + $0xc0] sm:$0xff]  }
 0x431   :  { %v17022_v6 = vpop.f32.mrb[82].mxu1  ;;  %v2918_v58 = vrot.slane %v19654_v42, 1  ;;  %v19658_v42 = vshll.u32 %v19601_v38, 16  ;;  %v5401_v30 = vrot.slane %v17051_v53, 1 }
 0x432   :  { %19652 = vst [vmem:[#allocation82_spill] sm:$0xff] %v17022_v6  ;;  %v11278_v18 = vpop.f32.mrb[83].mxu1 }
 0x433   :  { %v2919_v6 = vsel %vm343_vm1, %v2914_v41, %v2918_v58 }
 0x434   :  { %11494 = vmatmul.mubr.msk.bf16.gmra.mrb[124].mxu1 %vm687_vm3, %v2911_v26 }
 0x435   :  { %11497 = vmatprep.mubr.msk.bf16.mxu1 %vm14388_vm2, %v19480_v20 }
 0x436   :  { %11972 = vmatmul.mubr.msk.bf16.gmra.mrb[80].mxu0 %vm687_vm3, %v5398_v57  ;;  %v19657_v57 = vshrl.u32 %v19600_v17, 16  ;;  %v5402_v17 = vsel %vm1670_vm4, %v5399_v34, %v5401_v30 }
 0x437   :  { %v17039_v18 = vpop.f32.mrb[84].mxu1  ;;  %11975 = vmatprep.mubr.msk.bf16.mxu0 %vm14388_vm2, %v19480_v20 }
 0x438   :  { %19655 = vst [vmem:[#allocation83_spill] sm:$0xff] %v17039_v18  ;;  %v11281_v44 = vpop.f32.mrb[85].mxu1  ;;  %v2922_v27 = vor.u32 %v19657_v57, %v2918_v58  ;;  %v17073_v58 = vld [vmem:[%s19282_s0 + $0xc8] sm:$0xff]  }
 0x439   :  { %v17044_v26 = vpop.f32.mrb[86].mxu1  ;;  %v2926_v44 = vrot.slane %v19658_v42, 1  ;;  %v19662_v42 = vshll.u32 %v19602_v61, 16  ;;  %v5403_v34 = vrot.slane %v17073_v58, 1 }
 0x43a   :  { %19656 = vst [vmem:[#allocation84_spill] sm:$0xff] %v17044_v26  ;;  %v11282_v22 = vpop.f32.mrb[87].mxu1 }
 0x43b   :  { %v2927_v26 = vsel %vm343_vm1, %v2922_v27, %v2926_v44 }
 0x43c   :  { %11498 = vmatmul.mubr.msk.bf16.gmra.mrb[128].mxu1 %vm687_vm3, %v2919_v6 }
 0x43d   :  { %11501 = vmatprep.mubr.msk.bf16.mxu1 %vm14388_vm2, %v19480_v20 }
 0x43e   :  { %11976 = vmatmul.mubr.msk.bf16.gmra.mrb[84].mxu0 %vm687_vm3, %v5400_v23  ;;  %v19661_v23 = vshrl.u32 %v19601_v38, 16  ;;  %v5404_v38 = vsel %vm1670_vm4, %v5401_v30, %v5403_v34 }
 0x43f   :  { %v17061_v22 = vpop.f32.mrb[88].mxu1  ;;  %11979 = vmatprep.mubr.msk.bf16.mxu0 %vm14388_vm2, %v19480_v20 }
 0x440   :  { %19659 = vst [vmem:[#allocation85_spill] sm:$0xff] %v17061_v22  ;;  %v11285_v41 = vpop.f32.mrb[89].mxu1  ;;  %v2930_v57 = vor.u32 %v19661_v23, %v2926_v44  ;;  %v17095_v44 = vld [vmem:[%s19282_s0 + $0xd0] sm:$0xff]  }
 0x441   :  { %v17066_v6 = vpop.f32.mrb[90].mxu1  ;;  %v2934_v41 = vrot.slane %v19662_v42, 1  ;;  %v19666_v42 = vshll.u32 %v15825_v55, 16  ;;  %v5405_v30 = vrot.slane %v17095_v44, 1 }
 0x442   :  { %19660 = vst [vmem:[#allocation86_spill] sm:$0xff] %v17066_v6  ;;  %v11286_v18 = vpop.f32.mrb[91].mxu1 }
 0x443   :  { %v2935_v6 = vsel %vm343_vm1, %v2930_v57, %v2934_v41 }
 0x444   :  { %11502 = vmatmul.mubr.msk.bf16.gmra.mrb[132].mxu1 %vm687_vm3, %v2927_v26 }
 0x445   :  { %11505 = vmatprep.mubr.msk.bf16.mxu1 %vm14388_vm2, %v19480_v20 }
 0x446   :  { %11980 = vmatmul.mubr.msk.bf16.gmra.mrb[88].mxu0 %vm687_vm3, %v5402_v17  ;;  %v19665_v17 = vshrl.u32 %v19602_v61, 16  ;;  %v5406_v61 = vsel %vm1670_vm4, %v5403_v34, %v5405_v30 }
 0x447   :  { %v17083_v18 = vpop.f32.mrb[92].mxu1  ;;  %11983 = vmatprep.mubr.msk.bf16.mxu0 %vm14388_vm2, %v19480_v20 }
 0x448   :  { %19663 = vst [vmem:[#allocation87_spill] sm:$0xff] %v17083_v18  ;;  %v11289_v27 = vpop.f32.mrb[93].mxu1  ;;  %v2938_v23 = vor.u32 %v19665_v17, %v2934_v41  ;;  %v17117_v41 = vld [vmem:[%s19282_s0 + $0xd8] sm:$0xff]  }
 0x449   :  { %v17088_v26 = vpop.f32.mrb[94].mxu1  ;;  %v2942_v27 = vrot.slane %v19666_v42, 1  ;;  %v19670_v42 = vshll.u32 %v15842_v5, 16  ;;  %v5407_v34 = vrot.slane %v17117_v41, 1 }
 0x44a   :  { %19664 = vst [vmem:[#allocation88_spill] sm:$0xff] %v17088_v26  ;;  %v11290_v22 = vpop.f32.mrb[95].mxu1 }
 0x44b   :  { %v2943_v26 = vsel %vm343_vm1, %v2938_v23, %v2942_v27 }
 0x44c   :  { %11506 = vmatmul.mubr.msk.bf16.gmra.mrb[136].mxu1 %vm687_vm3, %v2935_v6 }
 0x44d   :  { %11509 = vmatprep.mubr.msk.bf16.mxu1 %vm14388_vm2, %v19480_v20 }
 0x44e   :  { %11984 = vmatmul.mubr.msk.bf16.gmra.mrb[92].mxu0 %vm687_vm3, %v5404_v38  ;;  %v19669_v38 = vshrl.u32 %v15825_v55, 16  ;;  %v5408_v55 = vsel %vm1670_vm4, %v5405_v30, %v5407_v34 }
 0x44f   :  { %v17105_v22 = vpop.f32.mrb[96].mxu1  ;;  %11987 = vmatprep.mubr.msk.bf16.mxu0 %vm14388_vm2, %v19480_v20 }
 0x450   :  { %19667 = vst [vmem:[#allocation89_spill] sm:$0xff] %v17105_v22  ;;  %v11293_v57 = vpop.f32.mrb[97].mxu1  ;;  %v2946_v17 = vor.u32 %v19669_v38, %v2942_v27  ;;  %v17139_v27 = vld [vmem:[%s19282_s0 + $0xe0] sm:$0xff]  }
 0x451   :  { %v17110_v6 = vpop.f32.mrb[98].mxu1  ;;  %v2950_v57 = vrot.slane %v19670_v42, 1  ;;  %v19674_v42 = vshll.u32 %v15859_v36, 16  ;;  %v5409_v30 = vrot.slane %v17139_v27, 1 }
 0x452   :  { %19668 = vst [vmem:[#allocation90_spill] sm:$0xff] %v17110_v6  ;;  %v11294_v18 = vpop.f32.mrb[99].mxu1 }
 0x453   :  { %v2951_v6 = vsel %vm343_vm1, %v2946_v17, %v2950_v57 }
 0x454   :  { %11510 = vmatmul.mubr.msk.bf16.gmra.mrb[140].mxu1 %vm687_vm3, %v2943_v26 }
 0x455   :  { %11513 = vmatprep.mubr.msk.bf16.mxu1 %vm14388_vm2, %v19480_v20 }
 0x456   :  { %11988 = vmatmul.mubr.msk.bf16.gmra.mrb[96].mxu0 %vm687_vm3, %v5406_v61  ;;  %v19673_v61 = vshrl.u32 %v15842_v5, 16  ;;  %v5410_v5 = vsel %vm1670_vm4, %v5407_v34, %v5409_v30 }
 0x457   :  { %v17127_v18 = vpop.f32.mrb[100].mxu1  ;;  %11991 = vmatprep.mubr.msk.bf16.mxu0 %vm14388_vm2, %v19480_v20 }
 0x458   :  { %19671 = vst [vmem:[#allocation91_spill] sm:$0xff] %v17127_v18  ;;  %v11297_v23 = vpop.f32.mrb[101].mxu1  ;;  %v2954_v38 = vor.u32 %v19673_v61, %v2950_v57  ;;  %v17161_v57 = vld [vmem:[%s19282_s0 + $0xe8] sm:$0xff]  }
 0x459   :  { %v17132_v26 = vpop.f32.mrb[102].mxu1  ;;  %v2958_v23 = vrot.slane %v19674_v42, 1  ;;  %v19678_v42 = vshll.u32 %v15876_v43, 16 }
 0x45a   :  { %19672 = vst [vmem:[#allocation92_spill] sm:$0xff] %v17132_v26  ;;  %v11298_v22 = vpop.f32.mrb[103].mxu1 }
 0x45b   :  { %v2959_v26 = vsel %vm343_vm1, %v2954_v38, %v2958_v23  ;;  %v17179_v38 = vld [vmem:[%s19282_s0 + $0xf0] sm:$0xff]  }
 0x45c   :  { %11514 = vmatmul.mubr.msk.bf16.gmra.mrb[144].mxu1 %vm687_vm3, %v2951_v6 }
 0x45d   :  { %11517 = vmatprep.mubr.msk.bf16.mxu1 %vm14388_vm2, %v19480_v20 }
 0x45e   :  { %11992 = vmatmul.mubr.msk.bf16.gmra.mrb[100].mxu0 %vm687_vm3, %v5408_v55  ;;  %v19677_v55 = vshrl.u32 %v15859_v36, 16  ;;  %v19679_v36 = vshrl.u32 %v15876_v43, 16  ;;  %v19681_v43 = vshrl.u32 %v19603_v62, 16 }
 0x45f   :  { %v17149_v22 = vpop.f32.mrb[104].mxu1  ;;  %11995 = vmatprep.mubr.msk.bf16.mxu0 %vm14388_vm2, %v19480_v20 }
 0x460   :  { %19675 = vst [vmem:[#allocation93_spill] sm:$0xff] %v17149_v22  ;;  %v11301_v17 = vpop.f32.mrb[105].mxu1  ;;  %v2962_v61 = vor.u32 %v19677_v55, %v2958_v23  ;;  %v17319_v22 = vld [vmem:[%s19282_s0 + $0x148] sm:$0xff]  }
 0x461   :  { %v17154_v6 = vpop.f32.mrb[106].mxu1  ;;  %v2966_v17 = vrot.slane %v19678_v42, 1 }
 0x462   :  { %19676 = vst [vmem:[#allocation94_spill] sm:$0xff] %v17154_v6  ;;  %v11302_v18 = vpop.f32.mrb[107].mxu1 }
 0x463   :  { %v5411_v18 = vrot.slane %v17161_v57, 1  ;;  %v2967_v34 = vsel %vm343_vm1, %v2962_v61, %v2966_v17  ;;  %v2970_v23 = vor.u32 %v19679_v36, %v2966_v17 }
 0x464   :  { %11518 = vmatmul.mubr.msk.bf16.gmra.mrb[148].mxu1 %vm687_vm3, %v2959_v26 }
 0x465   :  { %11521 = vmatprep.mubr.msk.bf16.mxu1 %vm14388_vm2, %v19480_v20  ;;  %v5412_v26 = vsel %vm1670_vm4, %v5409_v30, %v5411_v18  ;;  %v5413_v30 = vrot.slane %v17179_v38, 1 }
 0x466   :  { %11996 = vmatmul.mubr.msk.bf16.gmra.mrb[104].mxu0 %vm687_vm3, %v5410_v5  ;;  %v19680_v5 = vshll.u32 %v19603_v62, 16  ;;  %v17216_v62 = vld [vmem:[%s19282_s0 + $0x100] sm:$0xff]  }
 0x467   :  { %11999 = vmatprep.mubr.msk.bf16.mxu0 %vm14388_vm2, %v19480_v20  ;;  %v5414_v42 = vsel %vm1670_vm4, %v5411_v18, %v5413_v30 }
 0x468   :  { %v2974_v55 = vrot.slane %v19680_v5, 1  ;;  %v19683_v5 = vld [vmem:[#allocation68_spill] sm:$0xff] }
 0x46a   :  { %v2975_v61 = vsel %vm343_vm1, %v2970_v23, %v2974_v55  ;;  %v2978_v17 = vor.u32 %v19681_v43, %v2974_v55  ;;  %v19684_v55 = vshrl.u32 %v15910_v37, 16 }
 0x46c   :  { %11522 = vmatmul.mubr.msk.bf16.gmra.mrb[152].mxu1 %vm687_vm3, %v2967_v34  ;;  %v17197_v34 = vld [vmem:[%s19282_s0 + $0xf8] sm:$0xff]  }
 0x46d   :  { %11525 = vmatprep.mubr.msk.bf16.mxu1 %vm14388_vm2, %v19480_v20  ;;  %v5415_v18 = vrot.slane %v17197_v34, 1 }
 0x46e   :  { %12000 = vmatmul.mubr.msk.bf16.gmra.mrb[108].mxu0 %vm687_vm3, %v5412_v26  ;;  %v19682_v26 = vshll.u32 %v15910_v37, 16  ;;  %v2992_v37 = vshrl.u32 %v19683_v5, 16 }
 0x46f   :  { %12003 = vmatprep.mubr.msk.bf16.mxu0 %vm14388_vm2, %v19480_v20  ;;  %v5416_v6 = vsel %vm1670_vm4, %v5413_v30, %v5415_v18  ;;  %v5417_v30 = vrot.slane %v17216_v62, 1 }
 0x470   :  { %v2982_v36 = vrot.slane %v19682_v26, 1 }
 0x471   :  { %v5418_v26 = vsel %vm1670_vm4, %v5415_v18, %v5417_v30 }
 0x472   :  { %v2983_v23 = vsel %vm343_vm1, %v2978_v17, %v2982_v36 }
 0x474   :  { %11526 = vmatmul.mubr.msk.bf16.gmra.mrb[156].mxu1 %vm687_vm3, %v2975_v61  ;;  %v2988_v61 = vshll.u32 %v19683_v5, 16 }
 0x475   :  { %11529 = vmatprep.mubr.msk.bf16.mxu1 %vm14388_vm2, %v19480_v20 }
 0x476   :  { %12004 = vmatmul.mubr.msk.bf16.gmra.mrb[112].mxu0 %vm687_vm3, %v5414_v42  ;;  %v2986_v42 = vor.u32 %v19684_v55, %v2982_v36  ;;  %v2990_v43 = vrot.slane %v2988_v61, 1  ;;  %v17246_v61 = vld [vmem:[%s19282_s0 + $0x110] sm:$0xff]  }
 0x477   :  { %12007 = vmatprep.mubr.msk.bf16.mxu0 %vm14388_vm2, %v19480_v20  ;;  %v5421_v5 = vrot.slane %v17246_v61, 1 }
 0x478   :  { %v2991_v17 = vsel %vm343_vm1, %v2986_v42, %v2990_v43  ;;  %v2994_v36 = vor.u32 %v2992_v37, %v2990_v43  ;;  %v17259_v42 = vld [vmem:[%s19282_s0 + $0x118] sm:$0xff]  }
 0x479   :  { %v5423_v43 = vrot.slane %v17259_v42, 1 }
 0x47c   :  { %11530 = vmatmul.mubr.msk.bf16.gmra.mrb[160].mxu1 %vm687_vm3, %v2983_v23  ;;  %v17232_v23 = vld [vmem:[%s19282_s0 + $0x108] sm:$0xff]  }
 0x47d   :  { %11533 = vmatprep.mubr.msk.bf16.mxu1 %vm14388_vm2, %v19480_v20 }
 0x47e   :  { %12008 = vmatmul.mubr.msk.bf16.gmra.mrb[116].mxu0 %vm687_vm3, %v5416_v6  ;;  %v5419_v6 = vrot.slane %v17232_v23, 1 }
 0x47f   :  { %12011 = vmatprep.mubr.msk.bf16.mxu0 %vm14388_vm2, %v19480_v20 }
 0x480   :  { %v5420_v18 = vsel %vm1670_vm4, %v5417_v30, %v5419_v6  ;;  %v5422_v55 = vsel %vm1670_vm4, %v5419_v6, %v5421_v5  ;;  %v5424_v30 = vsel %vm1670_vm4, %v5421_v5, %v5423_v43  ;;  %v17279_v6 = vld [vmem:[%s19282_s0 + $0x128] sm:$0xff]   ;;  %v17289_v5 = vld [vmem:[%s19282_s0 + $0x130] sm:$0xff]  }
 0x484   :  { %11534 = vmatmul.mubr.msk.bf16.gmra.mrb[164].mxu1 %vm687_vm3, %v2991_v17  ;;  %v17269_v17 = vld [vmem:[%s19282_s0 + $0x120] sm:$0xff]  }
 0x485   :  { %11537 = vmatprep.mubr.msk.bf16.mxu1 %vm14388_vm2, %v19480_v20 }
 0x486   :  { %12012 = vmatmul.mubr.msk.bf16.gmra.mrb[120].mxu0 %vm687_vm3, %v5418_v26  ;;  %v5425_v26 = vrot.slane %v17269_v17, 1 }
 0x487   :  { %12015 = vmatprep.mubr.msk.bf16.mxu0 %vm14388_vm2, %v19480_v20 }
 0x488   :  { %v5426_v37 = vsel %vm1670_vm4, %v5423_v43, %v5425_v26 }
 0x48c   :  { %11538 = vmatmul.mubr.msk.bf16.gmra.mrb[168].mxu1 %vm687_vm3, %v2994_v36  ;;  %v5427_v36 = vrot.slane %v17279_v6, 1 }
 0x48d   :  { %12413 = vmatprep.mubr.msk.bf16.mxu1 %vm14388_vm2, %v19480_v20 }
 0x48e   :  { %12016 = vmatmul.mubr.msk.bf16.gmra.mrb[124].mxu0 %vm687_vm3, %v5420_v18  ;;  %v5428_v18 = vsel %vm1670_vm4, %v5425_v26, %v5427_v36 }
 0x48f   :  { %12019 = vmatprep.mubr.msk.bf16.mxu0 %vm14388_vm2, %v19480_v20 }
 0x496   :  { %12020 = vmatmul.mubr.msk.bf16.gmra.mrb[128].mxu0 %vm687_vm3, %v5422_v55  ;;  %v5429_v55 = vrot.slane %v17289_v5, 1 }
 0x497   :  { %12023 = vmatprep.mubr.msk.bf16.mxu0 %vm14388_vm2, %v19480_v20 }
 0x498   :  { %v5430_v43 = vsel %vm1670_vm4, %v5427_v36, %v5429_v55 }
 0x49e   :  { %12024 = vmatmul.mubr.msk.bf16.gmra.mrb[132].mxu0 %vm687_vm3, %v5424_v30  ;;  %v17299_v30 = vld [vmem:[%s19282_s0 + $0x138] sm:$0xff]  }
 0x49f   :  { %12027 = vmatprep.mubr.msk.bf16.mxu0 %vm14388_vm2, %v19480_v20  ;;  %v5431_v26 = vrot.slane %v17299_v30, 1 }
 0x4a6   :  { %12028 = vmatmul.mubr.msk.bf16.gmra.mrb[136].mxu0 %vm687_vm3, %v5426_v37  ;;  %v5432_v37 = vsel %vm1670_vm4, %v5429_v55, %v5431_v26  ;;  %v5435_v55 = vrot.slane %v17319_v22, 1 }
 0x4a7   :  { %12031 = vmatprep.mubr.msk.bf16.mxu0 %vm14388_vm2, %v19480_v20 }
 0x4ae   :  { %12032 = vmatmul.mubr.msk.bf16.gmra.mrb[140].mxu0 %vm687_vm3, %v5428_v18  ;;  %v17309_v18 = vld [vmem:[%s19282_s0 + $0x140] sm:$0xff]  }
 0x4af   :  { %12035 = vmatprep.mubr.msk.bf16.mxu0 %vm14388_vm2, %v19480_v20  ;;  %v5433_v36 = vrot.slane %v17309_v18, 1 }
 0x4b6   :  { %12036 = vmatmul.mubr.msk.bf16.gmra.mrb[144].mxu0 %vm687_vm3, %v5430_v43  ;;  %v5434_v43 = vsel %vm1670_vm4, %v5431_v26, %v5433_v36  ;;  %v5437_v26 = vrot.slane %v17329_v19, 1 }
 0x4b7   :  { %12039 = vmatprep.mubr.msk.bf16.mxu0 %vm14388_vm2, %v19480_v20 }
 0x4b8   :  { %v5438_v32 = vsel %vm1670_vm4, %v5435_v55, %v5437_v26 }
 0x4be   :  { %12040 = vmatmul.mubr.msk.bf16.gmra.mrb[148].mxu0 %vm687_vm3, %v5432_v37  ;;  %v5436_v37 = vsel %vm1670_vm4, %v5433_v36, %v5435_v55  ;;  %v5138_v36 = vld [vmem:[%s19282_s0 + $0x15c] sm:$0x1]  ;;  %v6049_v55 = vshrl.u32 %v16582_v8, 16 }
 0x4bf   :  { %12043 = vmatprep.mubr.msk.bf16.mxu0 %vm14388_vm2, %v19480_v20 }
 0x4c0   :  { %v6051_v39 = vrot.slane %v6049_v55, 1  ;;  %v6063_v55 = vrot.slane %v6061_v4, 2 }
 0x4c6   :  { %12044 = vmatmul.mubr.msk.bf16.gmra.mrb[152].mxu0 %vm687_vm3, %v5434_v43  ;;  %v17338_v43 = vld [vmem:[%s19282_s0 + $0x158] sm:$0xf] }
 0x4c7   :  { %12047 = vmatprep.mubr.msk.bf16.mxu0 %vm14388_vm2, %v19480_v20  ;;  %v10064_v16 = vcombine.low %v17338_v43, %v5138_v36  ;;  %v6052_v36 = vshll.u32 %v16582_v8, 16 }
 0x4c9   :  { %v6054_v9 = vrot.slane %v6052_v36, 2 }
 0x4ce   :  { %12048 = vmatmul.mubr.msk.bf16.gmra.mrb[156].mxu0 %vm687_vm3, %v5436_v37  ;;  %v5439_v37 = vrot.slane %v10064_v16, 1 }
 0x4cf   :  { %12051 = vmatprep.mubr.msk.bf16.mxu0 %vm14388_vm2, %v19480_v20 }
 0x4d0   :  { %v5440_v59 = vsel %vm1670_vm4, %v5437_v26, %v5439_v37  ;;  %v6055_v26 = vor.u32 %v6054_v9, %v6051_v39  ;;  %v6067_v39 = vshrl.u32 %v16625_v0, 16  ;;  %v6079_v0 = vshll.u32 %v16646_v15, 16 }
 0x4d6   :  { %12052 = vmatmul.mubr.msk.bf16.gmra.mrb[160].mxu0 %vm687_vm3, %v5438_v32  ;;  %v6043_v32 = vrot.slane %v6041_v14, 1  ;;  %v6060_v14 = vrot.slane %v6058_v52, 1  ;;  %v6069_v52 = vrot.slane %v6067_v39, 1 }
 0x4d7   :  { %12055 = vmatprep.mubr.msk.bf16.mxu0 %vm14388_vm2, %v19480_v20 }
 0x4d8   :  { %v6064_v9 = vor.u32 %v6063_v55, %v6060_v14 }
 0x4de   :  { %12056 = vmatmul.mubr.msk.bf16.gmra.mrb[164].mxu0 %vm687_vm3, %v5440_v59  ;;  %v6047_v59 = vor.u32 %v6046_v29, %v6043_v32  ;;  %v6065_v32 = vsel %vm4278_vm5, %v6055_v26, %v6064_v9 }
 0x4df   :  { %12059 = vmatprep.mubr.msk.bf16.mxu0 %vm14388_vm2, %v19480_v20 }
 0x4e0   :  { %v6056_v54 = vsel %vm4278_vm5, %v6047_v59, %v6055_v26  ;;  %v6072_v59 = vrot.slane %v6070_v25, 2  ;;  %v6081_v25 = vrot.slane %v6079_v0, 2 }
 0x4e6   :  { %12060 = vmatmul.mubr.msk.bf16.gmra.mrb[168].mxu0 %vm687_vm3, %v5439_v37 }
 0x4e7   :  { %v17357_v16 = vpop.f32.mrb[108].mxu1  ;;  %12065 = vmatprep.mubr.msk.bf16.mxu0 %vm14388_vm2, %v19480_v20 }
 0x4e8   :  { %v11479_v50 = vpop.f32.mrb[109].mxu1 }
 0x4e9   :  { %v17363_v40 = vpop.f32.mrb[110].mxu1 }
 0x4ea   :  { %v11480_v8 = vpop.f32.mrb[111].mxu1 }
 0x4eb   :  { %v6073_v8 = vor.u32 %v6072_v59, %v6069_v52  ;;  %v6085_v52 = vshrl.u32 %v16671_v49, 16  ;;  %v6088_v59 = vshll.u32 %v16671_v49, 16  ;;  %v6094_v49 = vshrl.u32 %v16693_v60, 16 }
 0x4ed   :  { %v6074_v26 = vsel %vm4278_vm5, %v6064_v9, %v6073_v8 }
 0x4ee   :  { %12066 = vmatmul.mubr.msk.bf16.vlgmr.msra.gmra.mrb[0].mxu0 %vm687_vm3, %v6056_v54  ;;  %v6076_v54 = vshrl.u32 %v16646_v15, 16 }
 0x4ef   :  { %v17367_v37 = vpop.f32.mrb[112].mxu1  ;;  %12069 = vmatprep.mubr.msk.bf16.mxu0 %vm14388_vm2, %v19480_v20 }
 0x4f0   :  { %v11483_v50 = vpop.f32.mrb[113].mxu1  ;;  %v6078_v39 = vrot.slane %v6076_v54, 1 }
 0x4f1   :  { %v17373_v29 = vpop.f32.mrb[114].mxu1 }
 0x4f2   :  { %v11484_v36 = vpop.f32.mrb[115].mxu1  ;;  %v6082_v15 = vor.u32 %v6081_v25, %v6078_v39  ;;  %v6097_v25 = vshll.u32 %v16693_v60, 16  ;;  %v6106_v60 = vshll.u32 %v16714_v1, 16 }
 0x4f3   :  { %v10153_v36 = vld [vmem:[%s19281_s1 + $0x20] sm:$0xf] }
 0x4f4   :  { %v7241_v9 = vsel %vm817_vm0, %v10153_v36, 0 }
 0x4f5   :  { %12238 = vmatpush3.bf16.msra.mxu0 %v7241_v9 }
 0x4f6   :  { %12070 = vmatmul.mubr.msk.bf16.gmra.mrb[4].mxu0 %vm687_vm3, %v6065_v32 }
 0x4f7   :  { %v17377_v4 = vpop.f32.mrb[116].mxu1  ;;  %12073 = vmatprep.mubr.msk.bf16.mxu0 %vm14388_vm2, %v19480_v20 }
 0x4f8   :  { %v11487_v14 = vpop.f32.mrb[117].mxu1 }
 0x4f9   :  { %v17383_v55 = vpop.f32.mrb[118].mxu1 }
 0x4fa   :  { %19685 = vst [vmem:[#allocation68_spill] sm:$0xff] %v17383_v55  ;;  %v11488_v50 = vpop.f32.mrb[119].mxu1  ;;  %v6090_v55 = vrot.slane %v6088_v59, 2  ;;  %v6099_v59 = vrot.slane %v6097_v25, 2  ;;  %v6108_v25 = vrot.slane %v6106_v60, 2 }
 0x4fb   :  { %v6083_v50 = vsel %vm4278_vm5, %v6073_v8, %v6082_v15 }
 0x4fe   :  { %12074 = vmatmul.mubr.msk.bf16.gmra.mrb[8].mxu0 %vm687_vm3, %v6074_v26  ;;  %v6087_v26 = vrot.slane %v6085_v52, 1  ;;  %v6096_v52 = vrot.slane %v6094_v49, 1 }
 0x4ff   :  { %v17390_v32 = vpop.f32.mrb[120].mxu1  ;;  %12077 = vmatprep.mubr.msk.bf16.mxu0 %vm14388_vm2, %v19480_v20 }
 0x500   :  { %19686 = vst [vmem:[#allocation95_spill] sm:$0xff] %v17390_v32  ;;  %v11491_v54 = vpop.f32.mrb[121].mxu1  ;;  %v6091_v39 = vor.u32 %v6090_v55, %v6087_v26  ;;  %v6100_v55 = vor.u32 %v6099_v59, %v6096_v52  ;;  %v6112_v59 = vshrl.u32 %v16735_v7, 16 }
 0x501   :  { %v17397_v0 = vpop.f32.mrb[122].mxu1 }
 0x502   :  { %v11492_v14 = vpop.f32.mrb[123].mxu1  ;;  %v6092_v8 = vsel %vm4278_vm5, %v6082_v15, %v6091_v39  ;;  %v6101_v15 = vsel %vm4278_vm5, %v6091_v39, %v6100_v55 }
 0x506   :  { %12078 = vmatmul.mubr.msk.bf16.gmra.mrb[12].mxu0 %vm687_vm3, %v6083_v50  ;;  %v6103_v50 = vshrl.u32 %v16714_v1, 16  ;;  %v6115_v1 = vshll.u32 %v16735_v7, 16  ;;  %v6124_v7 = vshll.u32 %v16756_v56, 16 }
 0x507   :  { %v17401_v32 = vpop.f32.mrb[124].mxu1  ;;  %12081 = vmatprep.mubr.msk.bf16.mxu0 %vm14388_vm2, %v19480_v20 }
 0x508   :  { %v11495_v36 = vpop.f32.mrb[125].mxu1  ;;  %v6105_v49 = vrot.slane %v6103_v50, 1  ;;  %v6114_v50 = vrot.slane %v6112_v59, 1  ;;  %v6117_v60 = vrot.slane %v6115_v1, 2  ;;  %v6126_v1 = vrot.slane %v6124_v7, 2 }
 0x509   :  { %v17407_v9 = vpop.f32.mrb[126].mxu1 }
 0x50a   :  { %v11496_v54 = vpop.f32.mrb[127].mxu1  ;;  %v6109_v52 = vor.u32 %v6108_v25, %v6105_v49  ;;  %v6118_v49 = vor.u32 %v6117_v60, %v6114_v50  ;;  %v6121_v25 = vshrl.u32 %v16756_v56, 16  ;;  %v6130_v60 = vshrl.u32 %v16777_v28, 16 }
 0x50b   :  { %v6133_v56 = vshll.u32 %v16777_v28, 16  ;;  %v6142_v28 = vshll.u32 %v16798_v13, 16 }
 0x50c   :  { %v6110_v39 = vsel %vm4278_vm5, %v6100_v55, %v6109_v52  ;;  %v6119_v55 = vsel %vm4278_vm5, %v6109_v52, %v6118_v49  ;;  %v6123_v59 = vrot.slane %v6121_v25, 1  ;;  %v6132_v25 = vrot.slane %v6130_v60, 1 }
 0x50d   :  { %v6135_v7 = vrot.slane %v6133_v56, 2  ;;  %v6144_v56 = vrot.slane %v6142_v28, 2 }
 0x50e   :  { %12082 = vmatmul.mubr.msk.bf16.gmra.mrb[16].mxu0 %vm687_vm3, %v6092_v8  ;;  %v6127_v50 = vor.u32 %v6126_v1, %v6123_v59  ;;  %v6139_v1 = vshrl.u32 %v16798_v13, 16  ;;  %v6151_v13 = vshll.u32 %v16819_v48, 16 }
 0x50f   :  { %v17411_v14 = vpop.f32.mrb[128].mxu1  ;;  %12085 = vmatprep.mubr.msk.bf16.mxu0 %vm14388_vm2, %v19480_v20  ;;  %v6136_v59 = vor.u32 %v6135_v7, %v6132_v25  ;;  %v6148_v7 = vshrl.u32 %v16819_v48, 16  ;;  %v6160_v48 = vshll.u32 %v16840_v3, 16 }
 0x510   :  { %19687 = vst [vmem:[#allocation96_spill] sm:$0xff] %v17411_v14  ;;  %v11499_v26 = vpop.f32.mrb[129].mxu1  ;;  %v6128_v52 = vsel %vm4278_vm5, %v6118_v49, %v6127_v50  ;;  %v6141_v60 = vrot.slane %v6139_v1, 1  ;;  %v6153_v28 = vrot.slane %v6151_v13, 2 }
 0x511   :  { %v17417_v36 = vpop.f32.mrb[130].mxu1  ;;  %v6137_v49 = vsel %vm4278_vm5, %v6127_v50, %v6136_v59  ;;  %v6150_v1 = vrot.slane %v6148_v7, 1  ;;  %v6162_v13 = vrot.slane %v6160_v48, 2 }
 0x512   :  { %v11500_v54 = vpop.f32.mrb[131].mxu1  ;;  %v6145_v25 = vor.u32 %v6144_v56, %v6141_v60  ;;  %v6157_v56 = vshrl.u32 %v16840_v3, 16  ;;  %v6169_v3 = vshll.u32 %v16861_v2, 16 }
 0x513   :  { %v6154_v60 = vor.u32 %v6153_v28, %v6150_v1  ;;  %v6166_v28 = vshrl.u32 %v16861_v2, 16  ;;  %v6178_v2 = vshll.u32 %v16882_v46, 16 }
 0x514   :  { %v6146_v50 = vsel %vm4278_vm5, %v6136_v59, %v6145_v25  ;;  %v6159_v7 = vrot.slane %v6157_v56, 1  ;;  %v6171_v48 = vrot.slane %v6169_v3, 2 }
 0x515   :  { %v6155_v59 = vsel %vm4278_vm5, %v6145_v25, %v6154_v60  ;;  %v6168_v56 = vrot.slane %v6166_v28, 1  ;;  %v6180_v3 = vrot.slane %v6178_v2, 2 }
 0x516   :  { %12086 = vmatmul.mubr.msk.bf16.gmra.mrb[20].mxu0 %vm687_vm3, %v6101_v15  ;;  %v6163_v1 = vor.u32 %v6162_v13, %v6159_v7  ;;  %v6175_v13 = vshrl.u32 %v16882_v46, 16  ;;  %v6187_v46 = vshll.u32 %v16901_v47, 16 }
 0x517   :  { %v17421_v8 = vpop.f32.mrb[132].mxu1  ;;  %12089 = vmatprep.mubr.msk.bf16.mxu0 %vm14388_vm2, %v19480_v20  ;;  %v6172_v7 = vor.u32 %v6171_v48, %v6168_v56  ;;  %v6184_v48 = vshrl.u32 %v16901_v47, 16  ;;  %v6196_v47 = vshll.u32 %v16918_v10, 16 }
 0x518   :  { %19688 = vst [vmem:[#allocation97_spill] sm:$0xff] %v17421_v8  ;;  %v11503_v26 = vpop.f32.mrb[133].mxu1  ;;  %v6164_v25 = vsel %vm4278_vm5, %v6154_v60, %v6163_v1  ;;  %v6177_v28 = vrot.slane %v6175_v13, 1  ;;  %v6189_v2 = vrot.slane %v6187_v46, 2 }
 0x519   :  { %v17427_v14 = vpop.f32.mrb[134].mxu1  ;;  %v6173_v60 = vsel %vm4278_vm5, %v6163_v1, %v6172_v7  ;;  %v6186_v13 = vrot.slane %v6184_v48, 1  ;;  %v6198_v48 = vrot.slane %v6196_v47, 2 }
 0x51a   :  { %v11504_v54 = vpop.f32.mrb[135].mxu1  ;;  %v6181_v56 = vor.u32 %v6180_v3, %v6177_v28  ;;  %v6193_v3 = vshrl.u32 %v16918_v10, 16 }
 0x51b   :  { %v6190_v28 = vor.u32 %v6189_v2, %v6186_v13  ;;  %v6205_v13 = vshll.u32 %v16941_v21, 16 }
 0x51c   :  { %v6182_v1 = vsel %vm4278_vm5, %v6172_v7, %v6181_v56  ;;  %v6195_v7 = vrot.slane %v6193_v3, 1 }
 0x51e   :  { %12090 = vmatmul.mubr.msk.bf16.gmra.mrb[24].mxu0 %vm687_vm3, %v6110_v39  ;;  %v6199_v46 = vor.u32 %v6198_v48, %v6195_v7  ;;  %v6223_v7 = vshll.u32 %v16985_v11, 16 }
 0x51f   :  { %v17431_v15 = vpop.f32.mrb[136].mxu1  ;;  %12093 = vmatprep.mubr.msk.bf16.mxu0 %vm14388_vm2, %v19480_v20 }
 0x520   :  { %19689 = vst [vmem:[#allocation98_spill] sm:$0xff] %v17431_v15  ;;  %v11507_v26 = vpop.f32.mrb[137].mxu1  ;;  %v6200_v2 = vsel %vm4278_vm5, %v6190_v28, %v6199_v46 }
 0x521   :  { %v17437_v8 = vpop.f32.mrb[138].mxu1 }
 0x522   :  { %v11508_v54 = vpop.f32.mrb[139].mxu1 }
 0x526   :  { %12094 = vmatmul.mubr.msk.bf16.gmra.mrb[28].mxu0 %vm687_vm3, %v6119_v55 }
 0x527   :  { %v17441_v39 = vpop.f32.mrb[140].mxu1  ;;  %12097 = vmatprep.mubr.msk.bf16.mxu0 %vm14388_vm2, %v19480_v20 }
 0x528   :  { %19690 = vst [vmem:[#allocation99_spill] sm:$0xff] %v17441_v39  ;;  %v11511_v26 = vpop.f32.mrb[141].mxu1 }
 0x529   :  { %v17447_v15 = vpop.f32.mrb[142].mxu1 }
 0x52a   :  { %v11512_v54 = vpop.f32.mrb[143].mxu1 }
 0x52e   :  { %12098 = vmatmul.mubr.msk.bf16.gmra.mrb[32].mxu0 %vm687_vm3, %v6128_v52 }
 0x52f   :  { %v17451_v55 = vpop.f32.mrb[144].mxu1  ;;  %12101 = vmatprep.mubr.msk.bf16.mxu0 %vm14388_vm2, %v19480_v20 }
 0x530   :  { %19691 = vst [vmem:[#allocation100_spill] sm:$0xff] %v17451_v55  ;;  %v11515_v26 = vpop.f32.mrb[145].mxu1 }
 0x531   :  { %v17457_v39 = vpop.f32.mrb[146].mxu1 }
 0x532   :  { %v11516_v54 = vpop.f32.mrb[147].mxu1 }
 0x536   :  { %12102 = vmatmul.mubr.msk.bf16.gmra.mrb[36].mxu0 %vm687_vm3, %v6137_v49 }
 0x537   :  { %v17461_v52 = vpop.f32.mrb[148].mxu1  ;;  %12105 = vmatprep.mubr.msk.bf16.mxu0 %vm14388_vm2, %v19480_v20 }
 0x538   :  { %19692 = vst [vmem:[#allocation101_spill] sm:$0xff] %v17461_v52  ;;  %v11519_v26 = vpop.f32.mrb[149].mxu1 }
 0x539   :  { %v17467_v55 = vpop.f32.mrb[150].mxu1 }
 0x53a   :  { %v11520_v54 = vpop.f32.mrb[151].mxu1 }
 0x53e   :  { %12106 = vmatmul.mubr.msk.bf16.gmra.mrb[40].mxu0 %vm687_vm3, %v6146_v50 }
 0x53f   :  { %v17471_v49 = vpop.f32.mrb[152].mxu1  ;;  %12109 = vmatprep.mubr.msk.bf16.mxu0 %vm14388_vm2, %v19480_v20 }
 0x540   :  { %19693 = vst [vmem:[#allocation102_spill] sm:$0xff] %v17471_v49  ;;  %v11523_v26 = vpop.f32.mrb[153].mxu1 }
 0x541   :  { %v17477_v52 = vpop.f32.mrb[154].mxu1 }
 0x542   :  { %v11524_v54 = vpop.f32.mrb[155].mxu1 }
 0x546   :  { %12110 = vmatmul.mubr.msk.bf16.gmra.mrb[44].mxu0 %vm687_vm3, %v6155_v59 }
 0x547   :  { %v17481_v50 = vpop.f32.mrb[156].mxu1  ;;  %12113 = vmatprep.mubr.msk.bf16.mxu0 %vm14388_vm2, %v19480_v20 }
 0x548   :  { %19694 = vst [vmem:[#allocation103_spill] sm:$0xff] %v17481_v50  ;;  %v11527_v26 = vpop.f32.mrb[157].mxu1 }
 0x549   :  { %v17487_v49 = vpop.f32.mrb[158].mxu1 }
 0x54a   :  { %v11528_v54 = vpop.f32.mrb[159].mxu1 }
 0x54e   :  { %12114 = vmatmul.mubr.msk.bf16.gmra.mrb[48].mxu0 %vm687_vm3, %v6164_v25 }
 0x54f   :  { %v17491_v59 = vpop.f32.mrb[160].mxu1  ;;  %12117 = vmatprep.mubr.msk.bf16.mxu0 %vm14388_vm2, %v19480_v20 }
 0x550   :  { %19695 = vst [vmem:[#allocation104_spill] sm:$0xff] %v17491_v59  ;;  %v11531_v26 = vpop.f32.mrb[161].mxu1 }
 0x551   :  { %v17497_v50 = vpop.f32.mrb[162].mxu1 }
 0x552   :  { %v11532_v54 = vpop.f32.mrb[163].mxu1 }
 0x556   :  { %12118 = vmatmul.mubr.msk.bf16.gmra.mrb[52].mxu0 %vm687_vm3, %v6173_v60 }
 0x557   :  { %v17501_v25 = vpop.f32.mrb[164].mxu1  ;;  %12121 = vmatprep.mubr.msk.bf16.mxu0 %vm14388_vm2, %v19480_v20 }
 0x558   :  { %19696 = vst [vmem:[#allocation105_spill] sm:$0xff] %v17501_v25  ;;  %v11535_v26 = vpop.f32.mrb[165].mxu1 }
 0x559   :  { %v17507_v59 = vpop.f32.mrb[166].mxu1 }
 0x55a   :  { %19697 = vst [vmem:[#allocation106_spill] sm:$0xff] %v17507_v59  ;;  %v11536_v54 = vpop.f32.mrb[167].mxu1 }
 0x55b   :  { %v6191_v54 = vsel %vm4278_vm5, %v6181_v56, %v6190_v28  ;;  %v6214_v56 = vshll.u32 %v16963_v24, 16  ;;  %v6220_v28 = vshrl.u32 %v16985_v11, 16 }
 0x55e   :  { %12122 = vmatmul.mubr.msk.bf16.gmra.mrb[56].mxu0 %vm687_vm3, %v6182_v1  ;;  %v6202_v1 = vshrl.u32 %v16941_v21, 16 }
 0x55f   :  { %v17511_v60 = vpop.f32.mrb[168].mxu1  ;;  %12125 = vmatprep.mubr.msk.bf16.mxu0 %vm14388_vm2, %v19480_v20 }
 0x560   :  { %v11539_v26 = vpop.f32.mrb[169].mxu1  ;;  %v6204_v10 = vrot.slane %v6202_v1, 1  ;;  %v6222_v1 = vrot.slane %v6220_v28, 1  ;;  %v6250_v28 = vshll.u32 %v17051_v53, 16 }
 0x561   :  { %v3500_v25 = vpop.f32.mrb[170].mxu1  ;;  %v6207_v26 = vrot.slane %v6205_v13, 2  ;;  %v6225_v13 = vrot.slane %v6223_v7, 2 }
 0x562   :  { %v11540_v59 = vpop.f32.mrb[171].mxu1  ;;  %v6211_v25 = vshrl.u32 %v16963_v24, 16 }
 0x563   :  { %v6208_v59 = vor.u32 %v6207_v26, %v6204_v10  ;;  %v6226_v24 = vor.u32 %v6225_v13, %v6222_v1  ;;  %v6252_v1 = vrot.slane %v6250_v28, 2  ;;  %v6256_v13 = vshrl.u32 %v17073_v58, 16 }
 0x564   :  { %v6213_v47 = vrot.slane %v6211_v25, 1  ;;  %v6283_v28 = vshrl.u32 %v17139_v27, 16 }
 0x565   :  { %v6209_v3 = vsel %vm4278_vm5, %v6199_v46, %v6208_v59  ;;  %v6229_v46 = vshrl.u32 %v17007_v51, 16 }
 0x566   :  { %12126 = vmatmul.mubr.msk.bf16.gmra.mrb[60].mxu0 %vm687_vm3, %v6191_v54  ;;  %v6216_v54 = vrot.slane %v6214_v56, 2  ;;  %v6241_v56 = vshll.u32 %v17029_v12, 16 }
 0x567   :  { %12129 = vmatprep.mubr.msk.bf16.mxu0 %vm14388_vm2, %v19480_v20  ;;  %v6231_v26 = vrot.slane %v6229_v46, 1 }
 0x568   :  { %v6217_v21 = vor.u32 %v6216_v54, %v6213_v47  ;;  %v6243_v54 = vrot.slane %v6241_v56, 2 }
 0x56a   :  { %v6218_v48 = vsel %vm4278_vm5, %v6208_v59, %v6217_v21  ;;  %v6227_v10 = vsel %vm4278_vm5, %v6217_v21, %v6226_v24  ;;  %v6238_v59 = vshrl.u32 %v17029_v12, 16  ;;  %v6247_v21 = vshrl.u32 %v17051_v53, 16 }
 0x56c   :  { %v6240_v47 = vrot.slane %v6238_v59, 1 }
 0x56e   :  { %12130 = vmatmul.mubr.msk.bf16.gmra.mrb[64].mxu0 %vm687_vm3, %v6200_v2  ;;  %v6232_v2 = vshll.u32 %v17007_v51, 16  ;;  %v6244_v51 = vor.u32 %v6243_v54, %v6240_v47  ;;  %v6277_v47 = vshll.u32 %v17117_v41, 16 }
 0x56f   :  { %12133 = vmatprep.mubr.msk.bf16.mxu0 %vm14388_vm2, %v19480_v20 }
 0x570   :  { %v6234_v25 = vrot.slane %v6232_v2, 2  ;;  %v6258_v2 = vrot.slane %v6256_v13, 1  ;;  %v6292_v13 = vshrl.u32 %v17161_v57, 16 }
 0x572   :  { %v6235_v11 = vor.u32 %v6234_v25, %v6231_v26  ;;  %v6265_v26 = vshrl.u32 %v17095_v44, 16  ;;  %v6268_v25 = vshll.u32 %v17095_v44, 16 }
 0x574   :  { %v6245_v7 = vsel %vm4278_vm5, %v6235_v11, %v6244_v51  ;;  %v6267_v59 = vrot.slane %v6265_v26, 1  ;;  %v6270_v56 = vrot.slane %v6268_v25, 2  ;;  %v6304_v26 = vshll.u32 %v17179_v38, 16 }
 0x576   :  { %12134 = vmatmul.mubr.msk.bf16.gmra.mrb[68].mxu0 %vm687_vm3, %v6209_v3  ;;  %v6236_v3 = vsel %vm4278_vm5, %v6226_v24, %v6235_v11  ;;  %v6259_v24 = vshll.u32 %v17073_v58, 16  ;;  %v6271_v58 = vor.u32 %v6270_v56, %v6267_v59  ;;  %v6306_v59 = vrot.slane %v6304_v26, 2 }
 0x577   :  { %12137 = vmatprep.mubr.msk.bf16.mxu0 %vm14388_vm2, %v19480_v20  ;;  %v6310_v56 = vshrl.u32 %v17197_v34, 16  ;;  %v6349_v26 = vshll.u32 %v17259_v42, 16 }
 0x57e   :  { %12138 = vmatmul.mubr.msk.bf16.gmra.mrb[72].mxu0 %vm687_vm3, %v6218_v48  ;;  %v6249_v48 = vrot.slane %v6247_v21, 1  ;;  %v6279_v21 = vrot.slane %v6277_v47, 2  ;;  %v6312_v47 = vrot.slane %v6310_v56, 1  ;;  %v6358_v56 = vshll.u32 %v17269_v17, 16 }
 0x57f   :  { %12141 = vmatprep.mubr.msk.bf16.mxu0 %vm14388_vm2, %v19480_v20 }
 0x580   :  { %v6253_v12 = vor.u32 %v6252_v1, %v6249_v48  ;;  %v6285_v1 = vrot.slane %v6283_v28, 1 }
 0x582   :  { %v6254_v46 = vsel %vm4278_vm5, %v6244_v51, %v6253_v12 }
 0x586   :  { %12142 = vmatmul.mubr.msk.bf16.gmra.mrb[76].mxu0 %vm687_vm3, %v6227_v10  ;;  %v6261_v10 = vrot.slane %v6259_v24, 2  ;;  %v6295_v24 = vshll.u32 %v17161_v57, 16 }
 0x587   :  { %12145 = vmatprep.mubr.msk.bf16.mxu0 %vm14388_vm2, %v19480_v20 }
 0x588   :  { %v6262_v53 = vor.u32 %v6261_v10, %v6258_v2  ;;  %v6294_v2 = vrot.slane %v6292_v13, 1  ;;  %v6297_v10 = vrot.slane %v6295_v24, 2  ;;  %v6337_v24 = vshrl.u32 %v17246_v61, 16 }
 0x58a   :  { %v6263_v11 = vsel %vm4278_vm5, %v6253_v12, %v6262_v53  ;;  %v6272_v54 = vsel %vm4278_vm5, %v6262_v53, %v6271_v58  ;;  %v6301_v53 = vshrl.u32 %v17179_v38, 16 }
 0x58e   :  { %12146 = vmatmul.mubr.msk.bf16.gmra.mrb[80].mxu0 %vm687_vm3, %v6236_v3  ;;  %v6274_v3 = vshrl.u32 %v17117_v41, 16 }
 0x58f   :  { %12149 = vmatprep.mubr.msk.bf16.mxu0 %vm14388_vm2, %v19480_v20 }
 0x590   :  { %v6276_v51 = vrot.slane %v6274_v3, 1 }
 0x592   :  { %v6280_v44 = vor.u32 %v6279_v21, %v6276_v51  ;;  %v6319_v51 = vshrl.u32 %v17216_v62, 16  ;;  %v6322_v21 = vshll.u32 %v17216_v62, 16 }
 0x594   :  { %v6281_v48 = vsel %vm4278_vm5, %v6271_v58, %v6280_v44  ;;  %v6313_v58 = vshll.u32 %v17197_v34, 16  ;;  %v6321_v28 = vrot.slane %v6319_v51, 1 }
 0x596   :  { %12150 = vmatmul.mubr.msk.bf16.gmra.mrb[84].mxu0 %vm687_vm3, %v6245_v7  ;;  %v6286_v7 = vshll.u32 %v17139_v27, 16  ;;  %v6298_v27 = vor.u32 %v6297_v10, %v6294_v2  ;;  %v6339_v10 = vrot.slane %v6337_v24, 1 }
 0x597   :  { %12153 = vmatprep.mubr.msk.bf16.mxu0 %vm14388_vm2, %v19480_v20 }
 0x598   :  { %v6288_v12 = vrot.slane %v6286_v7, 2  ;;  %v6324_v7 = vrot.slane %v6322_v21, 2 }
 0x59a   :  { %v6289_v41 = vor.u32 %v6288_v12, %v6285_v1  ;;  %v6325_v34 = vor.u32 %v6324_v7, %v6321_v28  ;;  %v6331_v1 = vshll.u32 %v17232_v23, 16  ;;  %v6373_v28 = vshrl.u32 %v17289_v5, 16 }
 0x59b   :  { %v6376_v7 = vshll.u32 %v17289_v5, 16 }
 0x59c   :  { %v6299_v25 = vsel %vm4278_vm5, %v6289_v41, %v6298_v27  ;;  %v6333_v13 = vrot.slane %v6331_v1, 2 }
 0x59d   :  { %v6378_v1 = vrot.slane %v6376_v7, 2 }
 0x59e   :  { %12154 = vmatmul.mubr.msk.bf16.gmra.mrb[88].mxu0 %vm687_vm3, %v6254_v46  ;;  %v6290_v46 = vsel %vm4278_vm5, %v6280_v44, %v6289_v41 }
 0x59f   :  { %12157 = vmatprep.mubr.msk.bf16.mxu0 %vm14388_vm2, %v19480_v20 }
 0x5a6   :  { %12158 = vmatmul.mubr.msk.bf16.gmra.mrb[92].mxu0 %vm687_vm3, %v6263_v11  ;;  %v6303_v11 = vrot.slane %v6301_v53, 1  ;;  %v6346_v53 = vshrl.u32 %v17259_v42, 16 }
 0x5a7   :  { %12161 = vmatprep.mubr.msk.bf16.mxu0 %vm14388_vm2, %v19480_v20 }
 0x5a8   :  { %v6307_v57 = vor.u32 %v6306_v59, %v6303_v11  ;;  %v6348_v11 = vrot.slane %v6346_v53, 1  ;;  %v6351_v59 = vrot.slane %v6349_v26, 2  ;;  %v6400_v53 = vshrl.u32 %v17319_v22, 16 }
 0x5a9   :  { %v6403_v26 = vshll.u32 %v17319_v22, 16 }
 0x5aa   :  { %v6308_v3 = vsel %vm4278_vm5, %v6298_v27, %v6307_v57 }
 0x5ae   :  { %12162 = vmatmul.mubr.msk.bf16.gmra.mrb[96].mxu0 %vm687_vm3, %v6272_v54  ;;  %v6315_v54 = vrot.slane %v6313_v58, 2 }
 0x5af   :  { %12165 = vmatprep.mubr.msk.bf16.mxu0 %vm14388_vm2, %v19480_v20 }
 0x5b0   :  { %v6316_v38 = vor.u32 %v6315_v54, %v6312_v47  ;;  %v6360_v47 = vrot.slane %v6358_v56, 2  ;;  %v6364_v54 = vshrl.u32 %v17279_v6, 16  ;;  %v6034_v56 = vld [vmem:[%s19282_s0 + $0x15c] sm:$0x3] }
 0x5b1   :  { %v17665_v22 = vcombine.low %v17338_v43, %v6034_v56 }
 0x5b2   :  { %v6317_v44 = vsel %vm4278_vm5, %v6307_v57, %v6316_v38  ;;  %v6326_v12 = vsel %vm4278_vm5, %v6316_v38, %v6325_v34  ;;  %v6355_v57 = vshrl.u32 %v17269_v17, 16  ;;  %v6367_v38 = vshll.u32 %v17279_v6, 16 }
 0x5b3   :  { %v6366_v21 = vrot.slane %v6364_v54, 1  ;;  %v6418_v54 = vshrl.u32 %v17665_v22, 16 }
 0x5b6   :  { %12166 = vmatmul.mubr.msk.bf16.gmra.mrb[100].mxu0 %vm687_vm3, %v6281_v48  ;;  %v6328_v48 = vshrl.u32 %v17232_v23, 16 }
 0x5b7   :  { %12169 = vmatprep.mubr.msk.bf16.mxu0 %vm14388_vm2, %v19480_v20 }
 0x5b8   :  { %v6330_v41 = vrot.slane %v6328_v48, 1  ;;  %v6375_v48 = vrot.slane %v6373_v28, 1  ;;  %v14339_v28 = vld [vmem:[%s19282_s0 + $0xc] sm:$0xf] }
 0x5ba   :  { %v6334_v62 = vor.u32 %v6333_v13, %v6330_v41  ;;  %v6379_v6 = vor.u32 %v6378_v1, %v6375_v48  ;;  %v6385_v41 = vshll.u32 %v17299_v30, 16  ;;  %v14340_v48 = vld [vmem:[%s19282_s0 + $0x10] sm:$0xff]  }
 0x5bb   :  { %v7027_v1 = vrot.slane %v14340_v48, 2 }
 0x5bc   :  { %v6335_v2 = vsel %vm4278_vm5, %v6325_v34, %v6334_v62  ;;  %v6387_v24 = vrot.slane %v6385_v41, 2 }
 0x5be   :  { %12170 = vmatmul.mubr.msk.bf16.gmra.mrb[104].mxu0 %vm687_vm3, %v6290_v46  ;;  %v6340_v46 = vshll.u32 %v17246_v61, 16  ;;  %v6352_v61 = vor.u32 %v6351_v59, %v6348_v11  ;;  %v6402_v11 = vrot.slane %v6400_v53, 1  ;;  %v6405_v59 = vrot.slane %v6403_v26, 2  ;;  %v14345_v53 = vld [vmem:[%s19282_s0 + $0x38] sm:$0xff]  }
 0x5bf   :  { %12173 = vmatprep.mubr.msk.bf16.mxu0 %vm14388_vm2, %v19480_v20  ;;  %v7037_v26 = vrot.slane %v14345_v53, 2 }
 0x5c0   :  { %v6342_v27 = vrot.slane %v6340_v46, 2  ;;  %v6391_v46 = vshrl.u32 %v17309_v18, 16 }
 0x5c2   :  { %v6343_v23 = vor.u32 %v6342_v27, %v6339_v10  ;;  %v6393_v27 = vrot.slane %v6391_v46, 1  ;;  %v14343_v46 = vld [vmem:[%s19282_s0 + $0x28] sm:$0xff]  }
 0x5c4   :  { %v6353_v58 = vsel %vm4278_vm5, %v6343_v23, %v6352_v61 }
 0x5c6   :  { %12174 = vmatmul.mubr.msk.bf16.gmra.mrb[108].mxu0 %vm687_vm3, %v6299_v25  ;;  %v6344_v25 = vsel %vm4278_vm5, %v6334_v62, %v6343_v23 }
 0x5c7   :  { %12177 = vmatprep.mubr.msk.bf16.mxu0 %vm14388_vm2, %v19480_v20 }
 0x5ce   :  { %12178 = vmatmul.mubr.msk.bf16.gmra.mrb[112].mxu0 %vm687_vm3, %v6308_v3  ;;  %v6357_v3 = vrot.slane %v6355_v57, 1  ;;  %v6412_v57 = vshll.u32 %v17329_v19, 16 }
 0x5cf   :  { %12181 = vmatprep.mubr.msk.bf16.mxu0 %vm14388_vm2, %v19480_v20 }
 0x5d0   :  { %v6361_v42 = vor.u32 %v6360_v47, %v6357_v3  ;;  %v6414_v47 = vrot.slane %v6412_v57, 2 }
 0x5d2   :  { %v6362_v51 = vsel %vm4278_vm5, %v6352_v61, %v6361_v42  ;;  %v6409_v61 = vshrl.u32 %v17329_v19, 16  ;;  %v6421_v19 = vshll.u32 %v17665_v22, 16 }
 0x5d4   :  { %v6411_v3 = vrot.slane %v6409_v61, 1  ;;  %v14347_v61 = vld [vmem:[%s19282_s0 + $0x48] sm:$0xff]  }
 0x5d5   :  { %v7041_v57 = vrot.slane %v14347_v61, 2 }
 0x5d6   :  { %12182 = vmatmul.mubr.msk.bf16.gmra.mrb[116].mxu0 %vm687_vm3, %v6317_v44  ;;  %v6369_v44 = vrot.slane %v6367_v38, 2 }
 0x5d7   :  { %12185 = vmatprep.mubr.msk.bf16.mxu0 %vm14388_vm2, %v19480_v20 }
 0x5d8   :  { %v6370_v17 = vor.u32 %v6369_v44, %v6366_v21  ;;  %v6423_v21 = vrot.slane %v6421_v19, 2 }
 0x5da   :  { %v6371_v34 = vsel %vm4278_vm5, %v6361_v42, %v6370_v17  ;;  %v6380_v13 = vsel %vm4278_vm5, %v6370_v17, %v6379_v6  ;;  %v6415_v42 = vor.u32 %v6414_v47, %v6411_v3  ;;  %v7019_v17 = vld [vmem:[%s19282_s0 + $0x8] sm:$0xc] }
 0x5db   :  { %v10154_v7 = vcombine.low %v7019_v17, %v14339_v28  ;;  %v14352_v28 = vld [vmem:[%s19282_s0 + $0x70] sm:$0xff]  }
 0x5de   :  { %12186 = vmatmul.mubr.msk.bf16.gmra.mrb[120].mxu0 %vm687_vm3, %v6326_v12  ;;  %v6382_v12 = vshrl.u32 %v17299_v30, 16 }
 0x5df   :  { %12189 = vmatprep.mubr.msk.bf16.mxu0 %vm14388_vm2, %v19480_v20 }
 0x5e0   :  { %v6384_v62 = vrot.slane %v6382_v12, 1  ;;  %v14341_v12 = vld [vmem:[%s19282_s0 + $0x18] sm:$0xff]  }
 0x5e1   :  { %v7029_v41 = vrot.slane %v14341_v12, 2 }
 0x5e2   :  { %v6388_v5 = vor.u32 %v6387_v24, %v6384_v62  ;;  %v14342_v62 = vld [vmem:[%s19282_s0 + $0x20] sm:$0xff]  }
 0x5e3   :  { %v7031_v24 = vrot.slane %v14342_v62, 2 }
 0x5e4   :  { %v6389_v10 = vsel %vm4278_vm5, %v6379_v6, %v6388_v5 }
 0x5e6   :  { %12190 = vmatmul.mubr.msk.bf16.gmra.mrb[124].mxu0 %vm687_vm3, %v6335_v2  ;;  %v6394_v2 = vshll.u32 %v17309_v18, 16  ;;  %v6406_v18 = vor.u32 %v6405_v59, %v6402_v11  ;;  %v14346_v11 = vld [vmem:[%s19282_s0 + $0x40] sm:$0xff]  }
 0x5e7   :  { %12193 = vmatprep.mubr.msk.bf16.mxu0 %vm14388_vm2, %v19480_v20  ;;  %v7039_v59 = vrot.slane %v14346_v11, 2 }
 0x5e8   :  { %v6396_v23 = vrot.slane %v6394_v2, 2  ;;  %v6416_v38 = vsel %vm4278_vm5, %v6406_v18, %v6415_v42  ;;  %v7033_v2 = vrot.slane %v14343_v46, 2 }
 0x5e9   :  { %v7042_v56 = vsel %vm7025_vm6, %v7039_v59, %v7041_v57 }
 0x5ea   :  { %v6397_v30 = vor.u32 %v6396_v23, %v6393_v27  ;;  %v14344_v27 = vld [vmem:[%s19282_s0 + $0x30] sm:$0xff]  }
 0x5eb   :  { %v7035_v23 = vrot.slane %v14344_v27, 2 }
 0x5ee   :  { %12194 = vmatmul.mubr.msk.bf16.gmra.mrb[128].mxu0 %vm687_vm3, %v6344_v25  ;;  %v6398_v25 = vsel %vm4278_vm5, %v6388_v5, %v6397_v30  ;;  %v7032_v5 = vsel %vm7025_vm6, %v7029_v41, %v7031_v24 }
 0x5ef   :  { %12197 = vmatprep.mubr.msk.bf16.mxu0 %vm14388_vm2, %v19480_v20 }
 0x5f6   :  { %12198 = vmatmul.mubr.msk.bf16.gmra.mrb[132].mxu0 %vm687_vm3, %v6353_v58  ;;  %v6407_v58 = vsel %vm4278_vm5, %v6397_v30, %v6406_v18  ;;  %v7036_v30 = vsel %vm7025_vm6, %v7033_v2, %v7035_v23  ;;  %v7040_v18 = vsel %vm7025_vm6, %v7037_v26, %v7039_v59 }
 0x5f7   :  { %12201 = vmatprep.mubr.msk.bf16.mxu0 %vm14388_vm2, %v19480_v20 }
 0x5fe   :  { %12202 = vmatmul.mubr.msk.bf16.gmra.mrb[136].mxu0 %vm687_vm3, %v6362_v51  ;;  %v6420_v51 = vrot.slane %v6418_v54, 1 }
 0x5ff   :  { %12205 = vmatprep.mubr.msk.bf16.mxu0 %vm14388_vm2, %v19480_v20 }
 0x600   :  { %v6424_v43 = vor.u32 %v6423_v21, %v6420_v51 }
 0x602   :  { %v6425_v44 = vsel %vm4278_vm5, %v6415_v42, %v6424_v43  ;;  %v14349_v42 = vld [vmem:[%s19282_s0 + $0x58] sm:$0xff]  }
 0x603   :  { %v7045_v54 = vrot.slane %v14349_v42, 2 }
 0x606   :  { %12206 = vmatmul.mubr.msk.bf16.gmra.mrb[140].mxu0 %vm687_vm3, %v6371_v34  ;;  %v7026_v34 = vrot.slane %v10154_v7, 2  ;;  %v7051_v7 = vrot.slane %v14352_v28, 2 }
 0x607   :  { %12209 = vmatprep.mubr.msk.bf16.mxu0 %vm14388_vm2, %v19480_v20 }
 0x608   :  { %v7028_v6 = vsel %vm7025_vm6, %v7026_v34, %v7027_v1  ;;  %v8016_v34 = vld [vmem:[%s19283_s3] sm:$0xf] }
 0x609   :  { %v8147_v48 = vsel %vm817_vm0, %v8016_v34, 0  ;;  %v14365_v34 = vld [vmem:[%s19282_s0 + $0xd8] sm:$0xff]  }
 0x60a   :  { %12412 = vmatpush3.bf16.msra.mxu1 %v8147_v48  ;;  %v7077_v48 = vrot.slane %v14365_v34, 2 }
 0x60b   :  { %12585 = vmatprep.subr.bf16.mxu1 %v19480_v20 }
 0x60e   :  { %12210 = vmatmul.mubr.msk.bf16.gmra.mrb[144].mxu0 %vm687_vm3, %v6380_v13  ;;  %v7030_v13 = vsel %vm7025_vm6, %v7027_v1, %v7029_v41 }
 0x60f   :  { %12213 = vmatprep.mubr.msk.bf16.mxu0 %vm14388_vm2, %v19480_v20 }
 0x616   :  { %12214 = vmatmul.mubr.msk.bf16.gmra.mrb[148].mxu0 %vm687_vm3, %v6389_v10  ;;  %v7034_v10 = vsel %vm7025_vm6, %v7031_v24, %v7033_v2 }
 0x617   :  { %12217 = vmatprep.mubr.msk.bf16.mxu0 %vm14388_vm2, %v19480_v20 }
 0x61e   :  { %12218 = vmatmul.mubr.msk.bf16.gmra.mrb[152].mxu0 %vm687_vm3, %v6398_v25  ;;  %v7038_v25 = vsel %vm7025_vm6, %v7035_v23, %v7037_v26 }
 0x61f   :  { %12221 = vmatprep.mubr.msk.bf16.mxu0 %vm14388_vm2, %v19480_v20 }
 0x626   :  { %12222 = vmatmul.mubr.msk.bf16.gmra.mrb[156].mxu0 %vm687_vm3, %v6407_v58  ;;  %v14348_v58 = vld [vmem:[%s19282_s0 + $0x50] sm:$0xff]  }
 0x627   :  { %12225 = vmatprep.mubr.msk.bf16.mxu0 %vm14388_vm2, %v19480_v20  ;;  %v7043_v3 = vrot.slane %v14348_v58, 2 }
 0x629   :  { %v7044_v47 = vsel %vm7025_vm6, %v7041_v57, %v7043_v3  ;;  %v7046_v19 = vsel %vm7025_vm6, %v7043_v3, %v7045_v54 }
 0x62e   :  { %12226 = vmatmul.mubr.msk.bf16.gmra.mrb[160].mxu0 %vm687_vm3, %v6416_v38  ;;  %v14350_v38 = vld [vmem:[%s19282_s0 + $0x60] sm:$0xff]  }
 0x62f   :  { %12229 = vmatprep.mubr.msk.bf16.mxu0 %vm14388_vm2, %v19480_v20  ;;  %v7047_v51 = vrot.slane %v14350_v38, 2 }
 0x631   :  { %v7048_v21 = vsel %vm7025_vm6, %v7045_v54, %v7047_v51 }
 0x636   :  { %12230 = vmatmul.mubr.msk.bf16.gmra.mrb[164].mxu0 %vm687_vm3, %v6425_v44 }
 0x637   :  { %12233 = vmatprep.mubr.msk.bf16.mxu0 %vm14388_vm2, %v19480_v20 }
 0x63e   :  { %12234 = vmatmul.mubr.msk.bf16.gmra.mrb[168].mxu0 %vm687_vm3, %v6424_v43  ;;  %v14351_v43 = vld [vmem:[%s19282_s0 + $0x68] sm:$0xff]  }
 0x63f   :  { %12239 = vmatprep.mubr.msk.bf16.mxu0 %vm14388_vm2, %v19480_v20  ;;  %v7049_v44 = vrot.slane %v14351_v43, 2 }
 0x641   :  { %v7050_v17 = vsel %vm7025_vm6, %v7047_v51, %v7049_v44  ;;  %v7052_v1 = vsel %vm7025_vm6, %v7049_v44, %v7051_v7 }
 0x646   :  { %12240 = vmatmul.mubr.msk.bf16.vlgmr.msra.gmra.mrb[0].mxu0 %vm687_vm3, %v7028_v6  ;;  %v14353_v6 = vld [vmem:[%s19282_s0 + $0x78] sm:$0xff]  }
 0x647   :  { %12243 = vmatprep.mubr.msk.bf16.mxu0 %vm14388_vm2, %v19480_v20  ;;  %v7053_v12 = vrot.slane %v14353_v6, 2  ;;  %v14366_v6 = vld [vmem:[%s19282_s0 + $0xe0] sm:$0xff]  }
 0x649   :  { %v7054_v41 = vsel %vm7025_vm6, %v7051_v7, %v7053_v12 }
 0x64e   :  { %12244 = vmatmul.mubr.msk.bf16.gmra.mrb[4].mxu0 %vm687_vm3, %v7030_v13  ;;  %v14354_v13 = vld [vmem:[%s19282_s0 + $0x80] sm:$0xff]  }
 0x64f   :  { %12247 = vmatprep.mubr.msk.bf16.mxu0 %vm14388_vm2, %v19480_v20  ;;  %v7055_v62 = vrot.slane %v14354_v13, 2  ;;  %v14367_v13 = vld [vmem:[%s19282_s0 + $0xe8] sm:$0xff]  }
 0x651   :  { %v7056_v24 = vsel %vm7025_vm6, %v7053_v12, %v7055_v62  ;;  %v7079_v12 = vrot.slane %v14366_v6, 2 }
 0x656   :  { %12248 = vmatmul.mubr.msk.bf16.gmra.mrb[8].mxu0 %vm687_vm3, %v7032_v5  ;;  %v14355_v5 = vld [vmem:[%s19282_s0 + $0x88] sm:$0xff]  }
 0x657   :  { %12251 = vmatprep.mubr.msk.bf16.mxu0 %vm14388_vm2, %v19480_v20  ;;  %v7057_v46 = vrot.slane %v14355_v5, 2  ;;  %v17890_v5 = vld [vmem:[%s19284_s4] ss:$0 sm:$0xff] }
 0x659   :  { %v7058_v2 = vsel %vm7025_vm6, %v7055_v62, %v7057_v46  ;;  %v7081_v62 = vrot.slane %v14367_v13, 2 }
 0x65e   :  { %12252 = vmatmul.mubr.msk.bf16.gmra.mrb[12].mxu0 %vm687_vm3, %v7034_v10  ;;  %v14356_v10 = vld [vmem:[%s19282_s0 + $0x90] sm:$0xff]  }
 0x65f   :  { %12255 = vmatprep.mubr.msk.bf16.mxu0 %vm14388_vm2, %v19480_v20  ;;  %v7059_v27 = vrot.slane %v14356_v10, 2  ;;  %v17896_v10 = vld [vmem:[%s19285_s5] ss:$0 sm:$0xff] }
 0x661   :  { %v7060_v23 = vsel %vm7025_vm6, %v7057_v46, %v7059_v27 }
 0x666   :  { %12256 = vmatmul.mubr.msk.bf16.gmra.mrb[16].mxu0 %vm687_vm3, %v7036_v30  ;;  %v14357_v30 = vld [vmem:[%s19282_s0 + $0x98] sm:$0xff]  }
 0x667   :  { %12259 = vmatprep.mubr.msk.bf16.mxu0 %vm14388_vm2, %v19480_v20  ;;  %v7061_v53 = vrot.slane %v14357_v30, 2 }
 0x669   :  { %v7062_v26 = vsel %vm7025_vm6, %v7059_v27, %v7061_v53 }
 0x66e   :  { %12260 = vmatmul.mubr.msk.bf16.gmra.mrb[20].mxu0 %vm687_vm3, %v7038_v25  ;;  %v14358_v25 = vld [vmem:[%s19282_s0 + $0xa0] sm:$0xff]  }
 0x66f   :  { %12263 = vmatprep.mubr.msk.bf16.mxu0 %vm14388_vm2, %v19480_v20  ;;  %v7063_v11 = vrot.slane %v14358_v25, 2 }
 0x671   :  { %v7064_v59 = vsel %vm7025_vm6, %v7061_v53, %v7063_v11 }
 0x676   :  { %12264 = vmatmul.mubr.msk.bf16.gmra.mrb[24].mxu0 %vm687_vm3, %v7040_v18  ;;  %v14359_v18 = vld [vmem:[%s19282_s0 + $0xa8] sm:$0xff]  }
 0x677   :  { %12267 = vmatprep.mubr.msk.bf16.mxu0 %vm14388_vm2, %v19480_v20  ;;  %v7065_v61 = vrot.slane %v14359_v18, 2 }
 0x679   :  { %v7066_v57 = vsel %vm7025_vm6, %v7063_v11, %v7065_v61 }
 0x67e   :  { %12268 = vmatmul.mubr.msk.bf16.gmra.mrb[28].mxu0 %vm687_vm3, %v7042_v56  ;;  %v14360_v56 = vld [vmem:[%s19282_s0 + $0xb0] sm:$0xff]  }
 0x67f   :  { %12271 = vmatprep.mubr.msk.bf16.mxu0 %vm14388_vm2, %v19480_v20  ;;  %v7067_v58 = vrot.slane %v14360_v56, 2 }
 0x681   :  { %v7068_v3 = vsel %vm7025_vm6, %v7065_v61, %v7067_v58 }
 0x686   :  { %12272 = vmatmul.mubr.msk.bf16.gmra.mrb[32].mxu0 %vm687_vm3, %v7044_v47  ;;  %v14361_v47 = vld [vmem:[%s19282_s0 + $0xb8] sm:$0xff]  }
 0x687   :  { %12275 = vmatprep.mubr.msk.bf16.mxu0 %vm14388_vm2, %v19480_v20  ;;  %v7069_v42 = vrot.slane %v14361_v47, 2 }
 0x689   :  { %v7070_v54 = vsel %vm7025_vm6, %v7067_v58, %v7069_v42 }
 0x68e   :  { %12276 = vmatmul.mubr.msk.bf16.gmra.mrb[36].mxu0 %vm687_vm3, %v7046_v19  ;;  %v14362_v19 = vld [vmem:[%s19282_s0 + $0xc0] sm:$0xff]  }
 0x68f   :  { %12279 = vmatprep.mubr.msk.bf16.mxu0 %vm14388_vm2, %v19480_v20  ;;  %v7071_v38 = vrot.slane %v14362_v19, 2 }
 0x691   :  { %v7072_v51 = vsel %vm7025_vm6, %v7069_v42, %v7071_v38 }
 0x696   :  { %12280 = vmatmul.mubr.msk.bf16.gmra.mrb[40].mxu0 %vm687_vm3, %v7048_v21  ;;  %v14363_v21 = vld [vmem:[%s19282_s0 + $0xc8] sm:$0xff]  }
 0x697   :  { %12283 = vmatprep.mubr.msk.bf16.mxu0 %vm14388_vm2, %v19480_v20  ;;  %v7073_v43 = vrot.slane %v14363_v21, 2 }
 0x699   :  { %v7074_v44 = vsel %vm7025_vm6, %v7071_v38, %v7073_v43 }
 0x69e   :  { %12284 = vmatmul.mubr.msk.bf16.gmra.mrb[44].mxu0 %vm687_vm3, %v7050_v17  ;;  %v14364_v17 = vld [vmem:[%s19282_s0 + $0xd0] sm:$0xff]  }
 0x69f   :  { %12287 = vmatprep.mubr.msk.bf16.mxu0 %vm14388_vm2, %v19480_v20  ;;  %v7075_v28 = vrot.slane %v14364_v17, 2 }
 0x6a1   :  { %v7076_v7 = vsel %vm7025_vm6, %v7073_v43, %v7075_v28 }
 0x6a6   :  { %12288 = vmatmul.mubr.msk.bf16.gmra.mrb[48].mxu0 %vm687_vm3, %v7052_v1  ;;  %v7078_v1 = vsel %vm7025_vm6, %v7075_v28, %v7077_v48 }
 0x6a7   :  { %12291 = vmatprep.mubr.msk.bf16.mxu0 %vm14388_vm2, %v19480_v20 }
 0x6ae   :  { %12292 = vmatmul.mubr.msk.bf16.gmra.mrb[52].mxu0 %vm687_vm3, %v7054_v41  ;;  %v7080_v41 = vsel %vm7025_vm6, %v7077_v48, %v7079_v12 }
 0x6af   :  { %12295 = vmatprep.mubr.msk.bf16.mxu0 %vm14388_vm2, %v19480_v20 }
 0x6b6   :  { %12296 = vmatmul.mubr.msk.bf16.gmra.mrb[56].mxu0 %vm687_vm3, %v7056_v24 }
 0x6b7   :  { %12299 = vmatprep.mubr.msk.bf16.mxu0 %vm14388_vm2, %v19480_v20 }
 0x6be   :  { %12300 = vmatmul.mubr.msk.bf16.gmra.mrb[60].mxu0 %vm687_vm3, %v7058_v2 }
 0x6bf   :  { %12303 = vmatprep.mubr.msk.bf16.mxu0 %vm14388_vm2, %v19480_v20 }
 0x6c6   :  { %12304 = vmatmul.mubr.msk.bf16.gmra.mrb[64].mxu0 %vm687_vm3, %v7060_v23  ;;  %v7082_v23 = vsel %vm7025_vm6, %v7079_v12, %v7081_v62 }
 0x6c7   :  { %12307 = vmatprep.mubr.msk.bf16.mxu0 %vm14388_vm2, %v19480_v20 }
 0x6ce   :  { %12308 = vmatmul.mubr.msk.bf16.gmra.mrb[68].mxu0 %vm687_vm3, %v7062_v26 }
 0x6cf   :  { %12311 = vmatprep.mubr.msk.bf16.mxu0 %vm14388_vm2, %v19480_v20 }
 0x6d6   :  { %12312 = vmatmul.mubr.msk.bf16.gmra.mrb[72].mxu0 %vm687_vm3, %v7064_v59 }
 0x6d7   :  { %12315 = vmatprep.mubr.msk.bf16.mxu0 %vm14388_vm2, %v19480_v20 }
 0x6de   :  { %12316 = vmatmul.mubr.msk.bf16.gmra.mrb[76].mxu0 %vm687_vm3, %v7066_v57 }
 0x6df   :  { %12319 = vmatprep.mubr.msk.bf16.mxu0 %vm14388_vm2, %v19480_v20 }
 0x6e6   :  { %12320 = vmatmul.mubr.msk.bf16.gmra.mrb[80].mxu0 %vm687_vm3, %v7068_v3 }
 0x6e7   :  { %12323 = vmatprep.mubr.msk.bf16.mxu0 %vm14388_vm2, %v19480_v20 }
 0x6ee   :  { %12324 = vmatmul.mubr.msk.bf16.gmra.mrb[84].mxu0 %vm687_vm3, %v7070_v54 }
 0x6ef   :  { %12327 = vmatprep.mubr.msk.bf16.mxu0 %vm14388_vm2, %v19480_v20 }
 0x6f6   :  { %12328 = vmatmul.mubr.msk.bf16.gmra.mrb[88].mxu0 %vm687_vm3, %v7072_v51 }
 0x6f7   :  { %12331 = vmatprep.mubr.msk.bf16.mxu0 %vm14388_vm2, %v19480_v20 }
 0x6fe   :  { %12332 = vmatmul.mubr.msk.bf16.gmra.mrb[92].mxu0 %vm687_vm3, %v7074_v44 }
 0x6ff   :  { %12335 = vmatprep.mubr.msk.bf16.mxu0 %vm14388_vm2, %v19480_v20 }
 0x706   :  { %12336 = vmatmul.mubr.msk.bf16.gmra.mrb[96].mxu0 %vm687_vm3, %v7076_v7 }
 0x707   :  { %12339 = vmatprep.mubr.msk.bf16.mxu0 %vm14388_vm2, %v19480_v20 }
 0x70e   :  { %12340 = vmatmul.mubr.msk.bf16.gmra.mrb[100].mxu0 %vm687_vm3, %v7078_v1 }
 0x70f   :  { %12343 = vmatprep.mubr.msk.bf16.mxu0 %vm14388_vm2, %v19480_v20 }
 0x716   :  { %12344 = vmatmul.mubr.msk.bf16.gmra.mrb[104].mxu0 %vm687_vm3, %v7080_v41  ;;  %v19698_v41 = vld [vmem:[#allocation3_spill] sm:$0xff] }
 0x717   :  { %12347 = vmatprep.mubr.msk.bf16.mxu0 %vm14388_vm2, %v19480_v20 }
 0x719   :  { %v7277_v24 = vpop.f32.mrb[0].mxu0 }
 0x71a   :  { %v12855_v46 = vadd.f32 %v7277_v24, %v16591_v33  ;;  %v12241_v2 = vpop.f32.mrb[1].mxu0  ;;  %v14368_v33 = vld [vmem:[%s19282_s0 + $0xf0] sm:$0xff]  }
 0x71b   :  { %v7280_v27 = vpop.f32.mrb[2].mxu0  ;;  %v7083_v59 = vrot.slane %v14368_v33, 2 }
 0x71c   :  { %v7711_v30 = vmul.f32 %v12855_v46, %v17890_v5  ;;  %v12856_v53 = vadd.f32 %v7280_v27, %v16597_v35  ;;  %v12242_v26 = vpop.f32.mrb[3].mxu0 }
 0x71d   :  { %v7084_v47 = vsel %vm7025_vm6, %v7081_v62, %v7083_v59  ;;  %v19699_v26 = vld [vmem:[#allocation17_spill] sm:$0xff] }
 0x71e   :  { %v7803_v25 = vadd.f32 %v17896_v10, %v7711_v30  ;;  %v7712_v11 = vmul.f32 %v12856_v53, %v17890_v5  ;;  %12348 = vmatmul.mubr.msk.bf16.gmra.mrb[108].mxu0 %vm687_vm3, %v7082_v23 }
 0x71f   :  { %12351 = vmatprep.mubr.msk.bf16.mxu0 %vm14388_vm2, %v19480_v20 }
 0x720   :  { %v7804_v18 = vadd.f32 %v17896_v10, %v7712_v11  ;;  %v7888_v57 = vmax.f32 %v7803_v25, 0.0 }
 0x721   :  { %v7285_v61 = vpop.f32.mrb[4].mxu0 }
 0x722   :  { %v7889_v35 = vmax.f32 %v7804_v18, 0.0  ;;  %v12857_v56 = vadd.f32 %v7285_v61, %v16613_v31  ;;  %v12245_v58 = vpop.f32.mrb[5].mxu0  ;;  %v14369_v31 = vld [vmem:[%s19282_s0 + $0xf8] sm:$0xff]  }
 0x723   :  { %v7288_v3 = vpop.f32.mrb[6].mxu0 }
 0x724   :  { %v7973_v42 = vpack.c.bf16 %v7889_v35, %v7888_v57  ;;  %v7713_v54 = vmul.f32 %v12857_v56, %v17890_v5  ;;  %v12858_v19 = vadd.f32 %v7288_v3, %v16618_v45  ;;  %v12246_v38 = vpop.f32.mrb[7].mxu0  ;;  %v7085_v45 = vrot.slane %v14369_v31, 2  ;;  %v19700_v57 = vld [vmem:[#allocation19_spill] sm:$0xff] }
 0x726   :  { %v7805_v51 = vadd.f32 %v17896_v10, %v7713_v54  ;;  %v7714_v21 = vmul.f32 %v12858_v19, %v17890_v5  ;;  %12352 = vmatmul.mubr.msk.bf16.gmra.mrb[112].mxu0 %vm687_vm3, %v7084_v47  ;;  %12414 = vmatmul.mubr.msk.bf16.vlgmr.msra.gmra.mrb[172].mxu1 %vm687_vm3, %v7973_v42  ;;  %v7086_v1 = vsel %vm7025_vm6, %v7083_v59, %v7085_v45  ;;  %v14371_v47 = vld [vmem:[%s19282_s0 + $0x108] sm:$0xff]  }
 0x727   :  { %12355 = vmatprep.mubr.msk.bf16.mxu0 %vm14388_vm2, %v19480_v20  ;;  %12417 = vmatprep.mubr.msk.bf16.mxu1 %vm14388_vm2, %v19480_v20  ;;  %v7089_v42 = vrot.slane %v14371_v47, 2 }
 0x728   :  { %v7806_v43 = vadd.f32 %v17896_v10, %v7714_v21  ;;  %v7890_v17 = vmax.f32 %v7805_v51, 0.0  ;;  %v19701_v21 = vld [vmem:[#allocation21_spill] sm:$0xff] }
 0x729   :  { %v7293_v44 = vpop.f32.mrb[8].mxu0 }
 0x72a   :  { %v7891_v28 = vmax.f32 %v7806_v43, 0.0  ;;  %v12859_v7 = vadd.f32 %v7293_v44, %v16634_v63  ;;  %v12249_v34 = vpop.f32.mrb[9].mxu0  ;;  %v14370_v63 = vld [vmem:[%s19282_s0 + $0x100] sm:$0xff]  }
 0x72b   :  { %v7296_v48 = vpop.f32.mrb[10].mxu0  ;;  %v7087_v2 = vrot.slane %v14370_v63, 2  ;;  %v19703_v63 = vld [vmem:[#allocation37_spill] sm:$0xff] }
 0x72c   :  { %v7974_v6 = vpack.c.bf16 %v7891_v28, %v7890_v17  ;;  %v7715_v12 = vmul.f32 %v12859_v7, %v17890_v5  ;;  %v12860_v13 = vadd.f32 %v7296_v48, %v19698_v41  ;;  %v12250_v62 = vpop.f32.mrb[11].mxu0  ;;  %v19702_v7 = vld [vmem:[#allocation2_spill] sm:$0xff] }
 0x72d   :  { %v7088_v59 = vsel %vm7025_vm6, %v7085_v45, %v7087_v2  ;;  %v7090_v44 = vsel %vm7025_vm6, %v7087_v2, %v7089_v42 }
 0x72e   :  { %v7807_v24 = vadd.f32 %v17896_v10, %v7715_v12  ;;  %v7716_v46 = vmul.f32 %v12860_v13, %v17890_v5  ;;  %12356 = vmatmul.mubr.msk.bf16.gmra.mrb[116].mxu0 %vm687_vm3, %v7086_v1  ;;  %12418 = vmatmul.mubr.msk.bf16.gmra.mrb[176].mxu1 %vm687_vm3, %v7974_v6  ;;  %v14372_v12 = vld [vmem:[%s19282_s0 + $0x110] sm:$0xff]  }
 0x72f   :  { %12359 = vmatprep.mubr.msk.bf16.mxu0 %vm14388_vm2, %v19480_v20  ;;  %12421 = vmatprep.mubr.msk.bf16.mxu1 %vm14388_vm2, %v19480_v20  ;;  %v7091_v41 = vrot.slane %v14372_v12, 2 }
 0x730   :  { %v7808_v27 = vadd.f32 %v17896_v10, %v7716_v46  ;;  %v7892_v30 = vmax.f32 %v7807_v24, 0.0 }
 0x731   :  { %v7301_v23 = vpop.f32.mrb[12].mxu0 }
 0x732   :  { %v7893_v53 = vmax.f32 %v7808_v27, 0.0  ;;  %v12861_v25 = vadd.f32 %v7301_v23, %v19699_v26  ;;  %v12253_v11 = vpop.f32.mrb[13].mxu0 }
 0x733   :  { %v7304_v33 = vpop.f32.mrb[14].mxu0 }
 0x734   :  { %v7975_v18 = vpack.c.bf16 %v7893_v53, %v7892_v30  ;;  %v7717_v61 = vmul.f32 %v12861_v25, %v17890_v5  ;;  %v12862_v35 = vadd.f32 %v7304_v33, %v19700_v57  ;;  %v12254_v56 = vpop.f32.mrb[15].mxu0  ;;  %v7092_v30 = vsel %vm7025_vm6, %v7089_v42, %v7091_v41  ;;  %v19704_v25 = vld [vmem:[#allocation4_spill] sm:$0xff] }
 0x736   :  { %v7809_v58 = vadd.f32 %v17896_v10, %v7717_v61  ;;  %v7718_v3 = vmul.f32 %v12862_v35, %v17890_v5  ;;  %12360 = vmatmul.mubr.msk.bf16.gmra.mrb[120].mxu0 %vm687_vm3, %v7088_v59  ;;  %12422 = vmatmul.mubr.msk.bf16.gmra.mrb[180].mxu1 %vm687_vm3, %v7975_v18  ;;  %v8709_v59 = vld [vmem:[%s19286_s2] sm:$0xf]  ;;  %v14373_v35 = vld [vmem:[%s19282_s0 + $0x118] sm:$0xff]  }
 0x737   :  { %12363 = vmatprep.mubr.msk.bf16.mxu0 %vm14388_vm2, %v19480_v20  ;;  %12425 = vmatprep.mubr.msk.bf16.mxu1 %vm14388_vm2, %v19480_v20  ;;  %v8711_v57 = vsel %vm817_vm0, %v8709_v59, 0  ;;  %v7093_v56 = vrot.slane %v14373_v35, 2  ;;  %v19709_v35 = vld [vmem:[#allocation43_spill] sm:$0xff] }
 0x738   :  { %v7810_v54 = vadd.f32 %v17896_v10, %v7718_v3  ;;  %v7894_v38 = vmax.f32 %v7809_v58, 0.0  ;;  %12586 = vmatpush3.bf16.msra.mxu1 %v8711_v57 }
 0x739   :  { %v7309_v19 = vpop.f32.mrb[16].mxu0 }
 0x73a   :  { %v7895_v51 = vmax.f32 %v7810_v54, 0.0  ;;  %v12863_v31 = vadd.f32 %v7309_v19, %v19701_v21  ;;  %v12257_v45 = vpop.f32.mrb[17].mxu0  ;;  %v19705_v54 = vld [vmem:[#allocation39_spill] sm:$0xff]  ;;  %v7094_v21 = vsel %vm7025_vm6, %v7091_v41, %v7093_v56 }
 0x73b   :  { %v7312_v43 = vpop.f32.mrb[18].mxu0 }
 0x73c   :  { %v7976_v17 = vpack.c.bf16 %v7895_v51, %v7894_v38  ;;  %v7719_v28 = vmul.f32 %v12863_v31, %v17890_v5  ;;  %v12864_v34 = vadd.f32 %v7312_v43, %v19702_v7  ;;  %v12258_v48 = vpop.f32.mrb[19].mxu0  ;;  %v19706_v43 = vld [vmem:[#allocation5_spill] sm:$0xff] }
 0x73e   :  { %v7811_v1 = vadd.f32 %v17896_v10, %v7719_v28  ;;  %v7720_v6 = vmul.f32 %v12864_v34, %v17890_v5  ;;  %12364 = vmatmul.mubr.msk.bf16.gmra.mrb[124].mxu0 %vm687_vm3, %v7090_v44  ;;  %12426 = vmatmul.mubr.msk.bf16.gmra.mrb[184].mxu1 %vm687_vm3, %v7976_v17  ;;  %v14374_v34 = vld [vmem:[%s19282_s0 + $0x120] sm:$0xff]  }
 0x73f   :  { %12367 = vmatprep.mubr.msk.bf16.mxu0 %vm14388_vm2, %v19480_v20  ;;  %12429 = vmatprep.mubr.msk.bf16.mxu1 %vm14388_vm2, %v19480_v20  ;;  %v7095_v48 = vrot.slane %v14374_v34, 2  ;;  %v19711_v34 = vld [vmem:[#allocation45_spill] sm:$0xff] }
 0x740   :  { %v7812_v13 = vadd.f32 %v17896_v10, %v7720_v6  ;;  %v7896_v24 = vmax.f32 %v7811_v1, 0.0 }
 0x741   :  { %v7317_v62 = vpop.f32.mrb[20].mxu0 }
 0x742   :  { %v7897_v46 = vmax.f32 %v7812_v13, 0.0  ;;  %v12865_v2 = vadd.f32 %v7317_v62, %v19703_v63  ;;  %v12261_v27 = vpop.f32.mrb[21].mxu0  ;;  %v19707_v13 = vld [vmem:[#allocation41_spill] sm:$0xff]  ;;  %v7096_v63 = vsel %vm7025_vm6, %v7093_v56, %v7095_v48 }
 0x743   :  { %v7320_v23 = vpop.f32.mrb[22].mxu0 }
 0x744   :  { %v7977_v53 = vpack.c.bf16 %v7897_v46, %v7896_v24  ;;  %v7721_v26 = vmul.f32 %v12865_v2, %v17890_v5  ;;  %v12866_v11 = vadd.f32 %v7320_v23, %v19704_v25  ;;  %v12262_v33 = vpop.f32.mrb[23].mxu0  ;;  %v19708_v23 = vld [vmem:[#allocation6_spill] sm:$0xff] }
 0x746   :  { %v7813_v18 = vadd.f32 %v17896_v10, %v7721_v26  ;;  %v7722_v61 = vmul.f32 %v12866_v11, %v17890_v5  ;;  %12368 = vmatmul.mubr.msk.bf16.gmra.mrb[128].mxu0 %vm687_vm3, %v7092_v30  ;;  %12430 = vmatmul.mubr.msk.bf16.gmra.mrb[188].mxu1 %vm687_vm3, %v7977_v53  ;;  %v14375_v11 = vld [vmem:[%s19282_s0 + $0x128] sm:$0xff]  }
 0x747   :  { %12371 = vmatprep.mubr.msk.bf16.mxu0 %vm14388_vm2, %v19480_v20  ;;  %12433 = vmatprep.mubr.msk.bf16.mxu1 %vm14388_vm2, %v19480_v20  ;;  %v7097_v33 = vrot.slane %v14375_v11, 2  ;;  %v19713_v11 = vld [vmem:[#allocation47_spill] sm:$0xff] }
 0x748   :  { %v7814_v58 = vadd.f32 %v17896_v10, %v7722_v61  ;;  %v7898_v47 = vmax.f32 %v7813_v18, 0.0 }
 0x749   :  { %v7325_v3 = vpop.f32.mrb[24].mxu0 }
 0x74a   :  { %v7899_v42 = vmax.f32 %v7814_v58, 0.0  ;;  %v12867_v19 = vadd.f32 %v7325_v3, %v19705_v54  ;;  %v12265_v38 = vpop.f32.mrb[25].mxu0 }
 0x74b   :  { %v7328_v51 = vpop.f32.mrb[26].mxu0 }
 0x74c   :  { %v7978_v31 = vpack.c.bf16 %v7899_v42, %v7898_v47  ;;  %v7723_v45 = vmul.f32 %v12867_v19, %v17890_v5  ;;  %v12868_v44 = vadd.f32 %v7328_v51, %v19706_v43  ;;  %v12266_v17 = vpop.f32.mrb[27].mxu0  ;;  %v7098_v47 = vsel %vm7025_vm6, %v7095_v48, %v7097_v33  ;;  %v19710_v19 = vld [vmem:[#allocation48_spill] sm:$0xff] }
 0x74e   :  { %v7815_v28 = vadd.f32 %v17896_v10, %v7723_v45  ;;  %v7724_v7 = vmul.f32 %v12868_v44, %v17890_v5  ;;  %12372 = vmatmul.mubr.msk.bf16.gmra.mrb[132].mxu0 %vm687_vm3, %v7094_v21  ;;  %12434 = vmatmul.mubr.msk.bf16.gmra.mrb[192].mxu1 %vm687_vm3, %v7978_v31  ;;  %v14376_v45 = vld [vmem:[%s19282_s0 + $0x130] sm:$0xff]  }
 0x74f   :  { %12375 = vmatprep.mubr.msk.bf16.mxu0 %vm14388_vm2, %v19480_v20  ;;  %12437 = vmatprep.mubr.msk.bf16.mxu1 %vm14388_vm2, %v19480_v20  ;;  %v7099_v43 = vrot.slane %v14376_v45, 2  ;;  %v19715_v45 = vld [vmem:[#allocation50_spill] sm:$0xff] }
 0x750   :  { %v7816_v1 = vadd.f32 %v17896_v10, %v7724_v7  ;;  %v7900_v12 = vmax.f32 %v7815_v28, 0.0 }
 0x751   :  { %v7333_v6 = vpop.f32.mrb[28].mxu0 }
 0x752   :  { %v7901_v41 = vmax.f32 %v7816_v1, 0.0  ;;  %v12869_v62 = vadd.f32 %v7333_v6, %v19707_v13  ;;  %v12269_v24 = vpop.f32.mrb[29].mxu0 }
 0x753   :  { %v7336_v46 = vpop.f32.mrb[30].mxu0 }
 0x754   :  { %v7979_v2 = vpack.c.bf16 %v7901_v41, %v7900_v12  ;;  %v7725_v27 = vmul.f32 %v12869_v62, %v17890_v5  ;;  %v12870_v30 = vadd.f32 %v7336_v46, %v19708_v23  ;;  %v12270_v53 = vpop.f32.mrb[31].mxu0  ;;  %v7100_v12 = vsel %vm7025_vm6, %v7097_v33, %v7099_v43  ;;  %v19712_v62 = vld [vmem:[#allocation51_spill] sm:$0xff] }
 0x756   :  { %v7817_v26 = vadd.f32 %v17896_v10, %v7725_v27  ;;  %v7726_v25 = vmul.f32 %v12870_v30, %v17890_v5  ;;  %12376 = vmatmul.mubr.msk.bf16.gmra.mrb[136].mxu0 %vm687_vm3, %v7096_v63  ;;  %12438 = vmatmul.mubr.msk.bf16.gmra.mrb[196].mxu1 %vm687_vm3, %v7979_v2  ;;  %v14377_v27 = vld [vmem:[%s19282_s0 + $0x138] sm:$0xff]  }
 0x757   :  { %12379 = vmatprep.mubr.msk.bf16.mxu0 %vm14388_vm2, %v19480_v20  ;;  %12441 = vmatprep.mubr.msk.bf16.mxu1 %vm14388_vm2, %v19480_v20  ;;  %v7101_v23 = vrot.slane %v14377_v27, 2  ;;  %v19717_v27 = vld [vmem:[#allocation53_spill] sm:$0xff] }
 0x758   :  { %v7818_v59 = vadd.f32 %v17896_v10, %v7726_v25  ;;  %v7902_v61 = vmax.f32 %v7817_v26, 0.0 }
 0x759   :  { %v7341_v18 = vpop.f32.mrb[32].mxu0 }
 0x75a   :  { %v7903_v57 = vmax.f32 %v7818_v59, 0.0  ;;  %v12871_v56 = vadd.f32 %v7341_v18, %v19709_v35  ;;  %v12273_v58 = vpop.f32.mrb[33].mxu0 }
 0x75b   :  { %v7344_v3 = vpop.f32.mrb[34].mxu0 }
 0x75c   :  { %v7980_v42 = vpack.c.bf16 %v7903_v57, %v7902_v61  ;;  %v7727_v54 = vmul.f32 %v12871_v56, %v17890_v5  ;;  %v12872_v38 = vadd.f32 %v7344_v3, %v19710_v19  ;;  %v12274_v51 = vpop.f32.mrb[35].mxu0  ;;  %v7102_v61 = vsel %vm7025_vm6, %v7099_v43, %v7101_v23  ;;  %v19714_v56 = vld [vmem:[#allocation54_spill] sm:$0xff] }
 0x75e   :  { %v7819_v21 = vadd.f32 %v17896_v10, %v7727_v54  ;;  %v7728_v31 = vmul.f32 %v12872_v38, %v17890_v5  ;;  %12380 = vmatmul.mubr.msk.bf16.gmra.mrb[140].mxu0 %vm687_vm3, %v7098_v47  ;;  %12442 = vmatmul.mubr.msk.bf16.gmra.mrb[200].mxu1 %vm687_vm3, %v7980_v42  ;;  %v14378_v54 = vld [vmem:[%s19282_s0 + $0x140] sm:$0xff]  }
 0x75f   :  { %12383 = vmatprep.mubr.msk.bf16.mxu0 %vm14388_vm2, %v19480_v20  ;;  %12445 = vmatprep.mubr.msk.bf16.mxu1 %vm14388_vm2, %v19480_v20  ;;  %v7103_v19 = vrot.slane %v14378_v54, 2  ;;  %v19719_v54 = vld [vmem:[#allocation59_spill] sm:$0xff] }
 0x760   :  { %v7820_v44 = vadd.f32 %v17896_v10, %v7728_v31  ;;  %v7904_v28 = vmax.f32 %v7819_v21, 0.0 }
 0x761   :  { %v7349_v17 = vpop.f32.mrb[36].mxu0 }
 0x762   :  { %v7905_v7 = vmax.f32 %v7820_v44, 0.0  ;;  %v12873_v48 = vadd.f32 %v7349_v17, %v19711_v34  ;;  %v12277_v1 = vpop.f32.mrb[37].mxu0 }
 0x763   :  { %v7352_v6 = vpop.f32.mrb[38].mxu0 }
 0x764   :  { %v7981_v41 = vpack.c.bf16 %v7905_v7, %v7904_v28  ;;  %v7729_v13 = vmul.f32 %v12873_v48, %v17890_v5  ;;  %v12874_v24 = vadd.f32 %v7352_v6, %v19712_v62  ;;  %v12278_v46 = vpop.f32.mrb[39].mxu0  ;;  %v7104_v28 = vsel %vm7025_vm6, %v7101_v23, %v7103_v19  ;;  %v19716_v48 = vld [vmem:[#allocation57_spill] sm:$0xff] }
 0x766   :  { %v7821_v63 = vadd.f32 %v17896_v10, %v7729_v13  ;;  %v7730_v2 = vmul.f32 %v12874_v24, %v17890_v5  ;;  %12384 = vmatmul.mubr.msk.bf16.gmra.mrb[144].mxu0 %vm687_vm3, %v7100_v12  ;;  %12446 = vmatmul.mubr.msk.bf16.gmra.mrb[204].mxu1 %vm687_vm3, %v7981_v41  ;;  %v14379_v13 = vld [vmem:[%s19282_s0 + $0x148] sm:$0xff]  }
 0x767   :  { %12387 = vmatprep.mubr.msk.bf16.mxu0 %vm14388_vm2, %v19480_v20  ;;  %12449 = vmatprep.mubr.msk.bf16.mxu1 %vm14388_vm2, %v19480_v20  ;;  %v7105_v62 = vrot.slane %v14379_v13, 2 }
 0x768   :  { %v7822_v30 = vadd.f32 %v17896_v10, %v7730_v2  ;;  %v7906_v26 = vmax.f32 %v7821_v63, 0.0 }
 0x769   :  { %v7357_v53 = vpop.f32.mrb[40].mxu0 }
 0x76a   :  { %v7907_v25 = vmax.f32 %v7822_v30, 0.0  ;;  %v12875_v33 = vadd.f32 %v7357_v53, %v19713_v11  ;;  %v12281_v59 = vpop.f32.mrb[41].mxu0 }
 0x76b   :  { %v7360_v18 = vpop.f32.mrb[42].mxu0 }
 0x76c   :  { %v7982_v57 = vpack.c.bf16 %v7907_v25, %v7906_v26  ;;  %v7731_v35 = vmul.f32 %v12875_v33, %v17890_v5  ;;  %v12876_v58 = vadd.f32 %v7360_v18, %v19714_v56  ;;  %v12282_v3 = vpop.f32.mrb[43].mxu0  ;;  %v7106_v26 = vsel %vm7025_vm6, %v7103_v19, %v7105_v62  ;;  %v19718_v33 = vld [vmem:[#allocation56_spill] sm:$0xff] }
 0x76e   :  { %v7823_v47 = vadd.f32 %v17896_v10, %v7731_v35  ;;  %v7732_v42 = vmul.f32 %v12876_v58, %v17890_v5  ;;  %12388 = vmatmul.mubr.msk.bf16.gmra.mrb[148].mxu0 %vm687_vm3, %v7102_v61  ;;  %12450 = vmatmul.mubr.msk.bf16.gmra.mrb[208].mxu1 %vm687_vm3, %v7982_v57  ;;  %v14380_v35 = vld [vmem:[%s19282_s0 + $0x150] sm:$0xff]  }
 0x76f   :  { %12391 = vmatprep.mubr.msk.bf16.mxu0 %vm14388_vm2, %v19480_v20  ;;  %12453 = vmatprep.mubr.msk.bf16.mxu1 %vm14388_vm2, %v19480_v20  ;;  %v7107_v56 = vrot.slane %v14380_v35, 2 }
 0x770   :  { %v7824_v38 = vadd.f32 %v17896_v10, %v7732_v42  ;;  %v7908_v21 = vmax.f32 %v7823_v47, 0.0 }
 0x771   :  { %v7365_v51 = vpop.f32.mrb[44].mxu0 }
 0x772   :  { %v7909_v31 = vmax.f32 %v7824_v38, 0.0  ;;  %v12877_v43 = vadd.f32 %v7365_v51, %v19715_v45  ;;  %v12285_v44 = vpop.f32.mrb[45].mxu0 }
 0x773   :  { %v7368_v17 = vpop.f32.mrb[46].mxu0 }
 0x774   :  { %v7983_v7 = vpack.c.bf16 %v7909_v31, %v7908_v21  ;;  %v7733_v34 = vmul.f32 %v12877_v43, %v17890_v5  ;;  %v12878_v1 = vadd.f32 %v7368_v17, %v19716_v48  ;;  %v12286_v6 = vpop.f32.mrb[47].mxu0  ;;  %v7108_v21 = vsel %vm7025_vm6, %v7105_v62, %v7107_v56  ;;  %v19720_v43 = vld [vmem:[#allocation65_spill] sm:$0xff] }
 0x776   :  { %v7825_v12 = vadd.f32 %v17896_v10, %v7733_v34  ;;  %v7734_v41 = vmul.f32 %v12878_v1, %v17890_v5  ;;  %12392 = vmatmul.mubr.msk.bf16.gmra.mrb[152].mxu0 %vm687_vm3, %v7104_v28  ;;  %12454 = vmatmul.mubr.msk.bf16.gmra.mrb[212].mxu1 %vm687_vm3, %v7983_v7  ;;  %v7109_v34 = vrot.slane %v17665_v22, 2 }
 0x777   :  { %12395 = vmatprep.mubr.msk.bf16.mxu0 %vm14388_vm2, %v19480_v20  ;;  %12457 = vmatprep.mubr.msk.bf16.mxu1 %vm14388_vm2, %v19480_v20 }
 0x778   :  { %v7826_v24 = vadd.f32 %v17896_v10, %v7734_v41  ;;  %v7910_v63 = vmax.f32 %v7825_v12, 0.0  ;;  %v19721_v41 = vld [vmem:[#allocation24_spill] sm:$0xff] }
 0x779   :  { %v7373_v46 = vpop.f32.mrb[48].mxu0 }
 0x77a   :  { %v7911_v2 = vmax.f32 %v7826_v24, 0.0  ;;  %v12879_v23 = vadd.f32 %v7373_v46, %v19717_v27  ;;  %v12289_v30 = vpop.f32.mrb[49].mxu0  ;;  %v7110_v46 = vsel %vm7025_vm6, %v7107_v56, %v7109_v34  ;;  %v19722_v27 = vld [vmem:[#allocation71_spill] sm:$0xff] }
 0x77b   :  { %v7376_v53 = vpop.f32.mrb[50].mxu0 }
 0x77c   :  { %v7984_v25 = vpack.c.bf16 %v7911_v2, %v7910_v63  ;;  %v7735_v11 = vmul.f32 %v12879_v23, %v17890_v5  ;;  %v12880_v59 = vadd.f32 %v7376_v53, %v19718_v33  ;;  %v12290_v18 = vpop.f32.mrb[51].mxu0 }
 0x77e   :  { %v7827_v61 = vadd.f32 %v17896_v10, %v7735_v11  ;;  %v7736_v57 = vmul.f32 %v12880_v59, %v17890_v5  ;;  %12396 = vmatmul.mubr.msk.bf16.gmra.mrb[156].mxu0 %vm687_vm3, %v7106_v26  ;;  %12458 = vmatmul.mubr.msk.bf16.gmra.mrb[216].mxu1 %vm687_vm3, %v7984_v25  ;;  %v19723_v59 = vld [vmem:[#allocation72_spill] sm:$0xff] }
 0x77f   :  { %12399 = vmatprep.mubr.msk.bf16.mxu0 %vm14388_vm2, %v19480_v20  ;;  %12461 = vmatprep.mubr.msk.bf16.mxu1 %vm14388_vm2, %v19480_v20 }
 0x780   :  { %v7828_v58 = vadd.f32 %v17896_v10, %v7736_v57  ;;  %v7912_v47 = vmax.f32 %v7827_v61, 0.0 }
 0x781   :  { %v7381_v3 = vpop.f32.mrb[52].mxu0 }
 0x782   :  { %v7913_v42 = vmax.f32 %v7828_v58, 0.0  ;;  %v12881_v19 = vadd.f32 %v7381_v3, %v19719_v54  ;;  %v12293_v38 = vpop.f32.mrb[53].mxu0  ;;  %v19724_v58 = vld [vmem:[#allocation73_spill] sm:$0xff] }
 0x783   :  { %v7384_v51 = vpop.f32.mrb[54].mxu0 }
 0x784   :  { %v7985_v31 = vpack.c.bf16 %v7913_v42, %v7912_v47  ;;  %v7737_v45 = vmul.f32 %v12881_v19, %v17890_v5  ;;  %v12882_v44 = vadd.f32 %v7384_v51, %v19720_v43  ;;  %v12294_v17 = vpop.f32.mrb[55].mxu0 }
 0x786   :  { %v7829_v28 = vadd.f32 %v17896_v10, %v7737_v45  ;;  %v7738_v7 = vmul.f32 %v12882_v44, %v17890_v5  ;;  %12400 = vmatmul.mubr.msk.bf16.gmra.mrb[160].mxu0 %vm687_vm3, %v7108_v21  ;;  %12462 = vmatmul.mubr.msk.bf16.gmra.mrb[220].mxu1 %vm687_vm3, %v7985_v31  ;;  %v19725_v31 = vld [vmem:[#allocation7_spill] sm:$0xff] }
 0x787   :  { %12403 = vmatprep.mubr.msk.bf16.mxu0 %vm14388_vm2, %v19480_v20  ;;  %12465 = vmatprep.mubr.msk.bf16.mxu1 %vm14388_vm2, %v19480_v20 }
 0x788   :  { %v7830_v48 = vadd.f32 %v17896_v10, %v7738_v7  ;;  %v7914_v6 = vmax.f32 %v7829_v28, 0.0  ;;  %v19726_v7 = vld [vmem:[#allocation74_spill] sm:$0xff] }
 0x789   :  { %v7389_v1 = vpop.f32.mrb[56].mxu0 }
 0x78a   :  { %v7915_v12 = vmax.f32 %v7830_v48, 0.0  ;;  %v12883_v13 = vadd.f32 %v7389_v1, %v19721_v41  ;;  %v12297_v62 = vpop.f32.mrb[57].mxu0 }
 0x78b   :  { %v7392_v24 = vpop.f32.mrb[58].mxu0 }
 0x78c   :  { %v7986_v63 = vpack.c.bf16 %v7915_v12, %v7914_v6  ;;  %v7739_v2 = vmul.f32 %v12883_v13, %v17890_v5  ;;  %v12884_v23 = vadd.f32 %v7392_v24, %v19722_v27  ;;  %v12298_v30 = vpop.f32.mrb[59].mxu0  ;;  %v19727_v24 = vld [vmem:[#allocation75_spill] sm:$0xff] }
 0x78d   :  { %v19728_v30 = vld [vmem:[#allocation76_spill] sm:$0xff] }
 0x78e   :  { %v7831_v53 = vadd.f32 %v17896_v10, %v7739_v2  ;;  %v7740_v22 = vmul.f32 %v12884_v23, %v17890_v5  ;;  %12404 = vmatmul.mubr.msk.bf16.gmra.mrb[164].mxu0 %vm687_vm3, %v7110_v46  ;;  %12466 = vmatmul.mubr.msk.bf16.gmra.mrb[224].mxu1 %vm687_vm3, %v7986_v63 }
 0x78f   :  { %12407 = vmatprep.mubr.msk.bf16.mxu0 %vm14388_vm2, %v19480_v20  ;;  %12469 = vmatprep.mubr.msk.bf16.mxu1 %vm14388_vm2, %v19480_v20 }
 0x790   :  { %v7832_v26 = vadd.f32 %v17896_v10, %v7740_v22  ;;  %v7916_v11 = vmax.f32 %v7831_v53, 0.0 }
 0x791   :  { %v7397_v25 = vpop.f32.mrb[60].mxu0 }
 0x792   :  { %v7917_v33 = vmax.f32 %v7832_v26, 0.0  ;;  %v12885_v18 = vadd.f32 %v7397_v25, %v19723_v59  ;;  %v12301_v61 = vpop.f32.mrb[61].mxu0 }
 0x793   :  { %v7400_v57 = vpop.f32.mrb[62].mxu0  ;;  %v19729_v61 = vld [vmem:[#allocation77_spill] sm:$0xff] }
 0x794   :  { %v7987_v35 = vpack.c.bf16 %v7917_v33, %v7916_v11  ;;  %v7741_v56 = vmul.f32 %v12885_v18, %v17890_v5  ;;  %v12886_v3 = vadd.f32 %v7400_v57, %v19724_v58  ;;  %v12302_v47 = vpop.f32.mrb[63].mxu0 }
 0x795   :  { %v19730_v47 = vld [vmem:[#allocation78_spill] sm:$0xff] }
 0x796   :  { %v7833_v42 = vadd.f32 %v17896_v10, %v7741_v56  ;;  %v7742_v54 = vmul.f32 %v12886_v3, %v17890_v5  ;;  %12408 = vmatmul.mubr.msk.bf16.gmra.mrb[168].mxu0 %vm687_vm3, %v7109_v34  ;;  %12470 = vmatmul.mubr.msk.bf16.gmra.mrb[228].mxu1 %vm687_vm3, %v7987_v35 }
 0x797   :  { %12473 = vmatprep.mubr.msk.bf16.mxu1 %vm14388_vm2, %v19480_v20 }
 0x798   :  { %v7834_v19 = vadd.f32 %v17896_v10, %v7742_v54  ;;  %v7918_v51 = vmax.f32 %v7833_v42, 0.0 }
 0x799   :  { %v7405_v38 = vpop.f32.mrb[64].mxu0 }
 0x79a   :  { %v7919_v21 = vmax.f32 %v7834_v19, 0.0  ;;  %v12887_v45 = vadd.f32 %v7405_v38, %v19725_v31  ;;  %v12305_v43 = vpop.f32.mrb[65].mxu0 }
 0x79b   :  { %v7408_v44 = vpop.f32.mrb[66].mxu0  ;;  %v19731_v43 = vld [vmem:[#allocation79_spill] sm:$0xff] }
 0x79c   :  { %v7988_v17 = vpack.c.bf16 %v7919_v21, %v7918_v51  ;;  %v7743_v28 = vmul.f32 %v12887_v45, %v17890_v5  ;;  %v12888_v48 = vadd.f32 %v7408_v44, %v19726_v7  ;;  %v12306_v34 = vpop.f32.mrb[67].mxu0 }
 0x79d   :  { %v19732_v34 = vld [vmem:[#allocation80_spill] sm:$0xff] }
 0x79e   :  { %v7835_v1 = vadd.f32 %v17896_v10, %v7743_v28  ;;  %v7744_v6 = vmul.f32 %v12888_v48, %v17890_v5  ;;  %12474 = vmatmul.mubr.msk.bf16.gmra.mrb[232].mxu1 %vm687_vm3, %v7988_v17 }
 0x79f   :  { %12477 = vmatprep.mubr.msk.bf16.mxu1 %vm14388_vm2, %v19480_v20 }
 0x7a0   :  { %v7836_v12 = vadd.f32 %v17896_v10, %v7744_v6  ;;  %v7920_v13 = vmax.f32 %v7835_v1, 0.0 }
 0x7a1   :  { %v7413_v41 = vpop.f32.mrb[68].mxu0 }
 0x7a2   :  { %v7921_v62 = vmax.f32 %v7836_v12, 0.0  ;;  %v12889_v46 = vadd.f32 %v7413_v41, %v19727_v24  ;;  %v12309_v63 = vpop.f32.mrb[69].mxu0 }
 0x7a3   :  { %v7416_v2 = vpop.f32.mrb[70].mxu0  ;;  %v19733_v63 = vld [vmem:[#allocation81_spill] sm:$0xff] }
 0x7a4   :  { %v7989_v27 = vpack.c.bf16 %v7921_v62, %v7920_v13  ;;  %v7745_v23 = vmul.f32 %v12889_v46, %v17890_v5  ;;  %v12890_v53 = vadd.f32 %v7416_v2, %v19728_v30  ;;  %v12310_v22 = vpop.f32.mrb[71].mxu0 }
 0x7a5   :  { %v19734_v22 = vld [vmem:[#allocation82_spill] sm:$0xff] }
 0x7a6   :  { %v7837_v26 = vadd.f32 %v17896_v10, %v7745_v23  ;;  %v7746_v25 = vmul.f32 %v12890_v53, %v17890_v5  ;;  %12478 = vmatmul.mubr.msk.bf16.gmra.mrb[236].mxu1 %vm687_vm3, %v7989_v27 }
 0x7a7   :  { %12481 = vmatprep.mubr.msk.bf16.mxu1 %vm14388_vm2, %v19480_v20 }
 0x7a8   :  { %v7838_v11 = vadd.f32 %v17896_v10, %v7746_v25  ;;  %v7922_v59 = vmax.f32 %v7837_v26, 0.0 }
 0x7a9   :  { %v7421_v33 = vpop.f32.mrb[72].mxu0 }
 0x7aa   :  { %v7923_v18 = vmax.f32 %v7838_v11, 0.0  ;;  %v12891_v57 = vadd.f32 %v7421_v33, %v19729_v61  ;;  %v12313_v35 = vpop.f32.mrb[73].mxu0 }
 0x7ab   :  { %v7424_v56 = vpop.f32.mrb[74].mxu0  ;;  %v19735_v35 = vld [vmem:[#allocation83_spill] sm:$0xff] }
 0x7ac   :  { %v7990_v58 = vpack.c.bf16 %v7923_v18, %v7922_v59  ;;  %v7747_v3 = vmul.f32 %v12891_v57, %v17890_v5  ;;  %v12892_v42 = vadd.f32 %v7424_v56, %v19730_v47  ;;  %v12314_v54 = vpop.f32.mrb[75].mxu0 }
 0x7ad   :  { %v19736_v54 = vld [vmem:[#allocation84_spill] sm:$0xff] }
 0x7ae   :  { %v7839_v19 = vadd.f32 %v17896_v10, %v7747_v3  ;;  %v7748_v38 = vmul.f32 %v12892_v42, %v17890_v5  ;;  %12482 = vmatmul.mubr.msk.bf16.gmra.mrb[240].mxu1 %vm687_vm3, %v7990_v58 }
 0x7af   :  { %12485 = vmatprep.mubr.msk.bf16.mxu1 %vm14388_vm2, %v19480_v20 }
 0x7b0   :  { %v7840_v51 = vadd.f32 %v17896_v10, %v7748_v38  ;;  %v7924_v31 = vmax.f32 %v7839_v19, 0.0 }
 0x7b1   :  { %v7429_v21 = vpop.f32.mrb[76].mxu0 }
 0x7b2   :  { %v7925_v45 = vmax.f32 %v7840_v51, 0.0  ;;  %v12893_v44 = vadd.f32 %v7429_v21, %v19731_v43  ;;  %v12317_v17 = vpop.f32.mrb[77].mxu0 }
 0x7b3   :  { %v7432_v28 = vpop.f32.mrb[78].mxu0  ;;  %v19737_v17 = vld [vmem:[#allocation85_spill] sm:$0xff] }
 0x7b4   :  { %v7991_v7 = vpack.c.bf16 %v7925_v45, %v7924_v31  ;;  %v7749_v48 = vmul.f32 %v12893_v44, %v17890_v5  ;;  %v12894_v1 = vadd.f32 %v7432_v28, %v19732_v34  ;;  %v12318_v6 = vpop.f32.mrb[79].mxu0 }
 0x7b5   :  { %v19738_v6 = vld [vmem:[#allocation86_spill] sm:$0xff] }
 0x7b6   :  { %v7841_v12 = vadd.f32 %v17896_v10, %v7749_v48  ;;  %v7750_v41 = vmul.f32 %v12894_v1, %v17890_v5  ;;  %12486 = vmatmul.mubr.msk.bf16.gmra.mrb[244].mxu1 %vm687_vm3, %v7991_v7 }
 0x7b7   :  { %12489 = vmatprep.mubr.msk.bf16.mxu1 %vm14388_vm2, %v19480_v20 }
 0x7b8   :  { %v7842_v13 = vadd.f32 %v17896_v10, %v7750_v41  ;;  %v7926_v24 = vmax.f32 %v7841_v12, 0.0 }
 0x7b9   :  { %v7437_v62 = vpop.f32.mrb[80].mxu0 }
 0x7ba   :  { %v7927_v46 = vmax.f32 %v7842_v13, 0.0  ;;  %v12895_v2 = vadd.f32 %v7437_v62, %v19733_v63  ;;  %v12321_v27 = vpop.f32.mrb[81].mxu0 }
 0x7bb   :  { %v7440_v23 = vpop.f32.mrb[82].mxu0  ;;  %v19739_v27 = vld [vmem:[#allocation87_spill] sm:$0xff] }
 0x7bc   :  { %v7992_v30 = vpack.c.bf16 %v7927_v46, %v7926_v24  ;;  %v7751_v53 = vmul.f32 %v12895_v2, %v17890_v5  ;;  %v12896_v26 = vadd.f32 %v7440_v23, %v19734_v22  ;;  %v12322_v25 = vpop.f32.mrb[83].mxu0 }
 0x7bd   :  { %v19740_v25 = vld [vmem:[#allocation88_spill] sm:$0xff] }
 0x7be   :  { %v7843_v11 = vadd.f32 %v17896_v10, %v7751_v53  ;;  %v7752_v33 = vmul.f32 %v12896_v26, %v17890_v5  ;;  %12490 = vmatmul.mubr.msk.bf16.gmra.mrb[248].mxu1 %vm687_vm3, %v7992_v30 }
 0x7bf   :  { %12493 = vmatprep.mubr.msk.bf16.mxu1 %vm14388_vm2, %v19480_v20 }
 0x7c0   :  { %v7844_v59 = vadd.f32 %v17896_v10, %v7752_v33  ;;  %v7928_v61 = vmax.f32 %v7843_v11, 0.0 }
 0x7c1   :  { %v7445_v18 = vpop.f32.mrb[84].mxu0 }
 0x7c2   :  { %v7929_v57 = vmax.f32 %v7844_v59, 0.0  ;;  %v12897_v56 = vadd.f32 %v7445_v18, %v19735_v35  ;;  %v12325_v58 = vpop.f32.mrb[85].mxu0 }
 0x7c3   :  { %v7448_v3 = vpop.f32.mrb[86].mxu0  ;;  %v19741_v58 = vld [vmem:[#allocation89_spill] sm:$0xff] }
 0x7c4   :  { %v7993_v47 = vpack.c.bf16 %v7929_v57, %v7928_v61  ;;  %v7753_v42 = vmul.f32 %v12897_v56, %v17890_v5  ;;  %v12898_v19 = vadd.f32 %v7448_v3, %v19736_v54  ;;  %v12326_v38 = vpop.f32.mrb[87].mxu0 }
 0x7c5   :  { %v19742_v38 = vld [vmem:[#allocation90_spill] sm:$0xff] }
 0x7c6   :  { %v7845_v51 = vadd.f32 %v17896_v10, %v7753_v42  ;;  %v7754_v21 = vmul.f32 %v12898_v19, %v17890_v5  ;;  %12494 = vmatmul.mubr.msk.bf16.gmra.mrb[252].mxu1 %vm687_vm3, %v7993_v47 }
 0x7c7   :  { %12497 = vmatprep.mubr.msk.bf16.mxu1 %vm14388_vm2, %v19480_v20 }
 0x7c8   :  { %v7846_v31 = vadd.f32 %v17896_v10, %v7754_v21  ;;  %v7930_v43 = vmax.f32 %v7845_v51, 0.0 }
 0x7c9   :  { %v7453_v45 = vpop.f32.mrb[88].mxu0 }
 0x7ca   :  { %v7931_v44 = vmax.f32 %v7846_v31, 0.0  ;;  %v12899_v28 = vadd.f32 %v7453_v45, %v19737_v17  ;;  %v12329_v7 = vpop.f32.mrb[89].mxu0 }
 0x7cb   :  { %v7456_v48 = vpop.f32.mrb[90].mxu0  ;;  %v19743_v7 = vld [vmem:[#allocation91_spill] sm:$0xff] }
 0x7cc   :  { %v7994_v34 = vpack.c.bf16 %v7931_v44, %v7930_v43  ;;  %v7755_v1 = vmul.f32 %v12899_v28, %v17890_v5  ;;  %v12900_v12 = vadd.f32 %v7456_v48, %v19738_v6  ;;  %v12330_v41 = vpop.f32.mrb[91].mxu0 }
 0x7cd   :  { %v19744_v41 = vld [vmem:[#allocation92_spill] sm:$0xff] }
 0x7ce   :  { %v7847_v13 = vadd.f32 %v17896_v10, %v7755_v1  ;;  %v7756_v62 = vmul.f32 %v12900_v12, %v17890_v5  ;;  %12498 = vmatmul.mubr.msk.bf16.gmra.mrb[0].mxu1 %vm687_vm3, %v7994_v34 }
 0x7cf   :  { %12501 = vmatprep.mubr.msk.bf16.mxu1 %vm14388_vm2, %v19480_v20 }
 0x7d0   :  { %v7848_v24 = vadd.f32 %v17896_v10, %v7756_v62  ;;  %v7932_v63 = vmax.f32 %v7847_v13, 0.0 }
 0x7d1   :  { %v7461_v46 = vpop.f32.mrb[92].mxu0 }
 0x7d2   :  { %v7933_v2 = vmax.f32 %v7848_v24, 0.0  ;;  %v12901_v23 = vadd.f32 %v7461_v46, %v19739_v27  ;;  %v12333_v30 = vpop.f32.mrb[93].mxu0 }
 0x7d3   :  { %v7464_v53 = vpop.f32.mrb[94].mxu0  ;;  %v19745_v30 = vld [vmem:[#allocation93_spill] sm:$0xff] }
 0x7d4   :  { %v7995_v22 = vpack.c.bf16 %v7933_v2, %v7932_v63  ;;  %v7757_v26 = vmul.f32 %v12901_v23, %v17890_v5  ;;  %v12902_v11 = vadd.f32 %v7464_v53, %v19740_v25  ;;  %v12334_v33 = vpop.f32.mrb[95].mxu0 }
 0x7d5   :  { %v19746_v33 = vld [vmem:[#allocation94_spill] sm:$0xff] }
 0x7d6   :  { %v7849_v59 = vadd.f32 %v17896_v10, %v7757_v26  ;;  %v7758_v18 = vmul.f32 %v12902_v11, %v17890_v5  ;;  %12502 = vmatmul.mubr.msk.bf16.gmra.mrb[4].mxu1 %vm687_vm3, %v7995_v22 }
 0x7d7   :  { %12505 = vmatprep.mubr.msk.bf16.mxu1 %vm14388_vm2, %v19480_v20 }
 0x7d8   :  { %v7850_v61 = vadd.f32 %v17896_v10, %v7758_v18  ;;  %v7934_v35 = vmax.f32 %v7849_v59, 0.0 }
 0x7d9   :  { %v7469_v57 = vpop.f32.mrb[96].mxu0 }
 0x7da   :  { %v7935_v56 = vmax.f32 %v7850_v61, 0.0  ;;  %v12903_v3 = vadd.f32 %v7469_v57, %v19741_v58  ;;  %v12337_v47 = vpop.f32.mrb[97].mxu0 }
 0x7db   :  { %v7472_v42 = vpop.f32.mrb[98].mxu0 }
 0x7dc   :  { %v7996_v54 = vpack.c.bf16 %v7935_v56, %v7934_v35  ;;  %v7759_v19 = vmul.f32 %v12903_v3, %v17890_v5  ;;  %v12904_v51 = vadd.f32 %v7472_v42, %v19742_v38  ;;  %v12338_v21 = vpop.f32.mrb[99].mxu0 }
 0x7de   :  { %v7851_v31 = vadd.f32 %v17896_v10, %v7759_v19  ;;  %v7760_v45 = vmul.f32 %v12904_v51, %v17890_v5  ;;  %12506 = vmatmul.mubr.msk.bf16.gmra.mrb[8].mxu1 %vm687_vm3, %v7996_v54 }
 0x7df   :  { %12509 = vmatprep.mubr.msk.bf16.mxu1 %vm14388_vm2, %v19480_v20 }
 0x7e0   :  { %v7852_v43 = vadd.f32 %v17896_v10, %v7760_v45  ;;  %v7936_v17 = vmax.f32 %v7851_v31, 0.0 }
 0x7e1   :  { %v7477_v44 = vpop.f32.mrb[100].mxu0 }
 0x7e2   :  { %v7937_v28 = vmax.f32 %v7852_v43, 0.0  ;;  %v12905_v48 = vadd.f32 %v7477_v44, %v19743_v7  ;;  %v12341_v34 = vpop.f32.mrb[101].mxu0 }
 0x7e3   :  { %v7480_v1 = vpop.f32.mrb[102].mxu0 }
 0x7e4   :  { %v7997_v6 = vpack.c.bf16 %v7937_v28, %v7936_v17  ;;  %v7761_v12 = vmul.f32 %v12905_v48, %v17890_v5  ;;  %v12906_v13 = vadd.f32 %v7480_v1, %v19744_v41  ;;  %v12342_v62 = vpop.f32.mrb[103].mxu0 }
 0x7e6   :  { %v7853_v24 = vadd.f32 %v17896_v10, %v7761_v12  ;;  %v7762_v46 = vmul.f32 %v12906_v13, %v17890_v5  ;;  %12510 = vmatmul.mubr.msk.bf16.gmra.mrb[12].mxu1 %vm687_vm3, %v7997_v6 }
 0x7e7   :  { %12513 = vmatprep.mubr.msk.bf16.mxu1 %vm14388_vm2, %v19480_v20 }
 0x7e8   :  { %v7854_v63 = vadd.f32 %v17896_v10, %v7762_v46  ;;  %v7938_v27 = vmax.f32 %v7853_v24, 0.0 }
 0x7e9   :  { %v7485_v2 = vpop.f32.mrb[104].mxu0 }
 0x7ea   :  { %v7939_v23 = vmax.f32 %v7854_v63, 0.0  ;;  %v12907_v53 = vadd.f32 %v7485_v2, %v19745_v30  ;;  %v12345_v22 = vpop.f32.mrb[105].mxu0 }
 0x7eb   :  { %v7488_v26 = vpop.f32.mrb[106].mxu0 }
 0x7ec   :  { %v7998_v25 = vpack.c.bf16 %v7939_v23, %v7938_v27  ;;  %v7763_v11 = vmul.f32 %v12907_v53, %v17890_v5  ;;  %v12908_v59 = vadd.f32 %v7488_v26, %v19746_v33  ;;  %v12346_v18 = vpop.f32.mrb[107].mxu0  ;;  %v19747_v33 = vld [vmem:[#allocation68_spill] sm:$0xff] }
 0x7ee   :  { %v7855_v61 = vadd.f32 %v17896_v10, %v7763_v11  ;;  %v7764_v57 = vmul.f32 %v12908_v59, %v17890_v5  ;;  %12514 = vmatmul.mubr.msk.bf16.gmra.mrb[16].mxu1 %vm687_vm3, %v7998_v25 }
 0x7ef   :  { %12517 = vmatprep.mubr.msk.bf16.mxu1 %vm14388_vm2, %v19480_v20 }
 0x7f0   :  { %v7856_v35 = vadd.f32 %v17896_v10, %v7764_v57  ;;  %v7940_v58 = vmax.f32 %v7855_v61, 0.0 }
 0x7f1   :  { %v7493_v56 = vpop.f32.mrb[108].mxu0 }
 0x7f2   :  { %v7941_v3 = vmax.f32 %v7856_v35, 0.0  ;;  %v12909_v47 = vadd.f32 %v7493_v56, %v17357_v16  ;;  %v12349_v42 = vpop.f32.mrb[109].mxu0  ;;  %v18275_v35 = vld [vmem:[%s19284_s4] ss:$0 sm:$0xff] }
 0x7f3   :  { %v7496_v54 = vpop.f32.mrb[110].mxu0  ;;  %v19748_v42 = vld [vmem:[#allocation95_spill] sm:$0xff] }
 0x7f4   :  { %v7999_v19 = vpack.c.bf16 %v7941_v3, %v7940_v58  ;;  %v7765_v38 = vmul.f32 %v12909_v47, %v17890_v5  ;;  %v12910_v51 = vadd.f32 %v7496_v54, %v17363_v40  ;;  %v12350_v21 = vpop.f32.mrb[111].mxu0 }
 0x7f6   :  { %v7857_v31 = vadd.f32 %v17896_v10, %v7765_v38  ;;  %v7766_v45 = vmul.f32 %v12910_v51, %v17890_v5  ;;  %12518 = vmatmul.mubr.msk.bf16.gmra.mrb[20].mxu1 %vm687_vm3, %v7999_v19 }
 0x7f7   :  { %12521 = vmatprep.mubr.msk.bf16.mxu1 %vm14388_vm2, %v19480_v20 }
 0x7f8   :  { %v7858_v43 = vadd.f32 %v17896_v10, %v7766_v45  ;;  %v7942_v17 = vmax.f32 %v7857_v31, 0.0 }
 0x7f9   :  { %v7501_v16 = vpop.f32.mrb[112].mxu0  ;;  %v18251_v44 = vpop.f32.mrb[172].mxu1 }
 0x7fa   :  { %v7943_v28 = vmax.f32 %v7858_v43, 0.0  ;;  %v12911_v7 = vadd.f32 %v7501_v16, %v17367_v37  ;;  %v12353_v40 = vpop.f32.mrb[113].mxu0  ;;  %v12415_v48 = vpop.f32.mrb[173].mxu1 }
 0x7fb   :  { %v7504_v34 = vpop.f32.mrb[114].mxu0  ;;  %v18254_v1 = vpop.f32.mrb[174].mxu1 }
 0x7fc   :  { %v8000_v6 = vpack.c.bf16 %v7943_v28, %v7942_v17  ;;  %v7767_v12 = vmul.f32 %v12911_v7, %v17890_v5  ;;  %v12912_v41 = vadd.f32 %v7504_v34, %v17373_v29  ;;  %v12354_v13 = vpop.f32.mrb[115].mxu0  ;;  %v12416_v62 = vpop.f32.mrb[175].mxu1 }
 0x7fe   :  { %v7859_v24 = vadd.f32 %v17896_v10, %v7767_v12  ;;  %v7768_v46 = vmul.f32 %v12912_v41, %v17890_v5  ;;  %12522 = vmatmul.mubr.msk.bf16.gmra.mrb[24].mxu1 %vm687_vm3, %v8000_v6 }
 0x7ff   :  { %12525 = vmatprep.mubr.msk.bf16.mxu1 %vm14388_vm2, %v19480_v20 }
 0x800   :  { %v7860_v37 = vadd.f32 %v17896_v10, %v7768_v46  ;;  %v7944_v27 = vmax.f32 %v7859_v24, 0.0 }
 0x801   :  { %v7509_v63 = vpop.f32.mrb[116].mxu0  ;;  %v18264_v2 = vpop.f32.mrb[176].mxu1 }
 0x802   :  { %v7945_v23 = vmax.f32 %v7860_v37, 0.0  ;;  %v12913_v29 = vadd.f32 %v7509_v63, %v17377_v4  ;;  %v12357_v30 = vpop.f32.mrb[117].mxu0  ;;  %v12419_v53 = vpop.f32.mrb[177].mxu1 }
 0x803   :  { %v7512_v22 = vpop.f32.mrb[118].mxu0  ;;  %v18267_v26 = vpop.f32.mrb[178].mxu1 }
 0x804   :  { %v8001_v25 = vpack.c.bf16 %v7945_v23, %v7944_v27  ;;  %v7769_v11 = vmul.f32 %v12913_v29, %v17890_v5  ;;  %v12914_v59 = vadd.f32 %v7512_v22, %v19747_v33  ;;  %v12358_v18 = vpop.f32.mrb[119].mxu0  ;;  %v12420_v61 = vpop.f32.mrb[179].mxu1  ;;  %v18284_v5 = vld [vmem:[%s19285_s5] ss:$0 sm:$0xff]  ;;  %v19749_v33 = vld [vmem:[#allocation96_spill] sm:$0xff] }
 0x806   :  { %v7861_v57 = vadd.f32 %v17896_v10, %v7769_v11  ;;  %v7770_v4 = vmul.f32 %v18275_v35, %v12914_v59  ;;  %12526 = vmatmul.mubr.msk.bf16.gmra.mrb[28].mxu1 %vm687_vm3, %v8001_v25 }
 0x807   :  { %12529 = vmatprep.mubr.msk.bf16.mxu1 %vm14388_vm2, %v19480_v20 }
 0x808   :  { %v7862_v56 = vadd.f32 %v18284_v5, %v7770_v4  ;;  %v7946_v3 = vmax.f32 %v7861_v57, 0.0 }
 0x809   :  { %v7517_v10 = vpop.f32.mrb[120].mxu0  ;;  %v18287_v58 = vpop.f32.mrb[180].mxu1 }
 0x80a   :  { %v7947_v47 = vmax.f32 %v7862_v56, 0.0  ;;  %v12915_v54 = vadd.f32 %v7517_v10, %v19748_v42  ;;  %v12361_v19 = vpop.f32.mrb[121].mxu0  ;;  %v12423_v38 = vpop.f32.mrb[181].mxu1 }
 0x80b   :  { %v7520_v51 = vpop.f32.mrb[122].mxu0  ;;  %v18290_v21 = vpop.f32.mrb[182].mxu1 }
 0x80c   :  { %v8002_v31 = vpack.c.bf16 %v7947_v47, %v7946_v3  ;;  %v7771_v45 = vmul.f32 %v18275_v35, %v12915_v54  ;;  %v12916_v43 = vadd.f32 %v7520_v51, %v17397_v0  ;;  %v12362_v16 = vpop.f32.mrb[123].mxu0  ;;  %v12424_v17 = vpop.f32.mrb[183].mxu1 }
 0x80e   :  { %v7863_v28 = vadd.f32 %v18284_v5, %v7771_v45  ;;  %v7772_v7 = vmul.f32 %v18275_v35, %v12916_v43  ;;  %12530 = vmatmul.mubr.msk.bf16.gmra.mrb[32].mxu1 %vm687_vm3, %v8002_v31  ;;  %v19750_v43 = vld [vmem:[#allocation97_spill] sm:$0xff] }
 0x80f   :  { %12533 = vmatprep.mubr.msk.bf16.mxu1 %vm14388_vm2, %v19480_v20 }
 0x810   :  { %v7864_v40 = vadd.f32 %v18284_v5, %v7772_v7  ;;  %v7948_v6 = vmax.f32 %v7863_v28, 0.0 }
 0x811   :  { %v7525_v48 = vpop.f32.mrb[124].mxu0  ;;  %v18300_v34 = vpop.f32.mrb[184].mxu1 }
 0x812   :  { %v7949_v12 = vmax.f32 %v7864_v40, 0.0  ;;  %v12917_v0 = vadd.f32 %v7525_v48, %v17401_v32  ;;  %v12365_v41 = vpop.f32.mrb[125].mxu0  ;;  %v12427_v13 = vpop.f32.mrb[185].mxu1 }
 0x813   :  { %v7528_v62 = vpop.f32.mrb[126].mxu0  ;;  %v18303_v24 = vpop.f32.mrb[186].mxu1 }
 0x814   :  { %v8003_v46 = vpack.c.bf16 %v7949_v12, %v7948_v6  ;;  %v7773_v37 = vmul.f32 %v18275_v35, %v12917_v0  ;;  %v12918_v63 = vadd.f32 %v7528_v62, %v17407_v9  ;;  %v12366_v27 = vpop.f32.mrb[127].mxu0  ;;  %v12428_v23 = vpop.f32.mrb[187].mxu1 }
 0x815   :  { %v19751_v23 = vld [vmem:[#allocation98_spill] sm:$0xff] }
 0x816   :  { %v7865_v29 = vadd.f32 %v18284_v5, %v7773_v37  ;;  %v7774_v30 = vmul.f32 %v18275_v35, %v12918_v63  ;;  %12534 = vmatmul.mubr.msk.bf16.gmra.mrb[36].mxu1 %vm687_vm3, %v8003_v46 }
 0x817   :  { %12537 = vmatprep.mubr.msk.bf16.mxu1 %vm14388_vm2, %v19480_v20 }
 0x818   :  { %v7866_v32 = vadd.f32 %v18284_v5, %v7774_v30  ;;  %v7950_v25 = vmax.f32 %v7865_v29, 0.0 }
 0x819   :  { %v7533_v53 = vpop.f32.mrb[128].mxu0  ;;  %v18313_v22 = vpop.f32.mrb[188].mxu1 }
 0x81a   :  { %v7951_v11 = vmax.f32 %v7866_v32, 0.0  ;;  %v12919_v9 = vadd.f32 %v7533_v53, %v19749_v33  ;;  %v12369_v59 = vpop.f32.mrb[129].mxu0  ;;  %v12431_v18 = vpop.f32.mrb[189].mxu1 }
 0x81b   :  { %v7536_v61 = vpop.f32.mrb[130].mxu0  ;;  %v18316_v57 = vpop.f32.mrb[190].mxu1 }
 0x81c   :  { %v8004_v4 = vpack.c.bf16 %v7951_v11, %v7950_v25  ;;  %v7775_v56 = vmul.f32 %v18275_v35, %v12919_v9  ;;  %v12920_v10 = vadd.f32 %v7536_v61, %v17417_v36  ;;  %v12370_v3 = vpop.f32.mrb[131].mxu0  ;;  %v12432_v47 = vpop.f32.mrb[191].mxu1 }
 0x81e   :  { %v7867_v42 = vadd.f32 %v18284_v5, %v7775_v56  ;;  %v7776_v54 = vmul.f32 %v18275_v35, %v12920_v10  ;;  %12538 = vmatmul.mubr.msk.bf16.gmra.mrb[40].mxu1 %vm687_vm3, %v8004_v4 }
 0x81f   :  { %12541 = vmatprep.mubr.msk.bf16.mxu1 %vm14388_vm2, %v19480_v20 }
 0x820   :  { %v7868_v19 = vadd.f32 %v18284_v5, %v7776_v54  ;;  %v7952_v31 = vmax.f32 %v7867_v42, 0.0  ;;  %v19752_v42 = vld [vmem:[#allocation99_spill] sm:$0xff] }
 0x821   :  { %v7541_v38 = vpop.f32.mrb[132].mxu0  ;;  %v18326_v51 = vpop.f32.mrb[192].mxu1 }
 0x822   :  { %v7953_v45 = vmax.f32 %v7868_v19, 0.0  ;;  %v12921_v36 = vadd.f32 %v7541_v38, %v19750_v43  ;;  %v12373_v16 = vpop.f32.mrb[133].mxu0  ;;  %v12435_v17 = vpop.f32.mrb[193].mxu1 }
 0x823   :  { %v7544_v28 = vpop.f32.mrb[134].mxu0  ;;  %v18329_v7 = vpop.f32.mrb[194].mxu1 }
 0x824   :  { %v8005_v40 = vpack.c.bf16 %v7953_v45, %v7952_v31  ;;  %v7777_v48 = vmul.f32 %v18275_v35, %v12921_v36  ;;  %v12922_v6 = vadd.f32 %v7544_v28, %v17427_v14  ;;  %v12374_v12 = vpop.f32.mrb[135].mxu0  ;;  %v12436_v0 = vpop.f32.mrb[195].mxu1 }
 0x826   :  { %v7869_v41 = vadd.f32 %v18284_v5, %v7777_v48  ;;  %v7778_v13 = vmul.f32 %v18275_v35, %v12922_v6  ;;  %12542 = vmatmul.mubr.msk.bf16.gmra.mrb[44].mxu1 %vm687_vm3, %v8005_v40 }
 0x827   :  { %12545 = vmatprep.mubr.msk.bf16.mxu1 %vm14388_vm2, %v19480_v20 }
 0x828   :  { %v7870_v62 = vadd.f32 %v18284_v5, %v7778_v13  ;;  %v7954_v63 = vmax.f32 %v7869_v41, 0.0  ;;  %v19753_v13 = vld [vmem:[#allocation100_spill] sm:$0xff] }
 0x829   :  { %v7549_v46 = vpop.f32.mrb[136].mxu0  ;;  %v18339_v37 = vpop.f32.mrb[196].mxu1 }
 0x82a   :  { %v7955_v27 = vmax.f32 %v7870_v62, 0.0  ;;  %v12923_v14 = vadd.f32 %v7549_v46, %v19751_v23  ;;  %v12377_v29 = vpop.f32.mrb[137].mxu0  ;;  %v12439_v30 = vpop.f32.mrb[197].mxu1 }
 0x82b   :  { %v7552_v32 = vpop.f32.mrb[138].mxu0  ;;  %v18342_v53 = vpop.f32.mrb[198].mxu1 }
 0x82c   :  { %v8006_v25 = vpack.c.bf16 %v7955_v27, %v7954_v63  ;;  %v7779_v11 = vmul.f32 %v18275_v35, %v12923_v14  ;;  %v12924_v33 = vadd.f32 %v7552_v32, %v17437_v8  ;;  %v12378_v9 = vpop.f32.mrb[139].mxu0  ;;  %v12440_v59 = vpop.f32.mrb[199].mxu1 }
 0x82e   :  { %v7871_v18 = vadd.f32 %v18284_v5, %v7779_v11  ;;  %v7780_v61 = vmul.f32 %v18275_v35, %v12924_v33  ;;  %12546 = vmatmul.mubr.msk.bf16.gmra.mrb[48].mxu1 %vm687_vm3, %v8006_v25 }
 0x82f   :  { %12549 = vmatprep.mubr.msk.bf16.mxu1 %vm14388_vm2, %v19480_v20 }
 0x830   :  { %v7872_v4 = vadd.f32 %v18284_v5, %v7780_v61  ;;  %v7956_v3 = vmax.f32 %v7871_v18, 0.0 }
 0x831   :  { %v7557_v56 = vpop.f32.mrb[140].mxu0  ;;  %v18352_v10 = vpop.f32.mrb[200].mxu1 }
 0x832   :  { %v7957_v47 = vmax.f32 %v7872_v4, 0.0  ;;  %v12925_v8 = vadd.f32 %v7557_v56, %v19752_v42  ;;  %v12381_v54 = vpop.f32.mrb[141].mxu0  ;;  %v12443_v19 = vpop.f32.mrb[201].mxu1  ;;  %v19754_v4 = vld [vmem:[#allocation101_spill] sm:$0xff] }
 0x833   :  { %v7560_v38 = vpop.f32.mrb[142].mxu0  ;;  %v18355_v31 = vpop.f32.mrb[202].mxu1 }
 0x834   :  { %v8007_v45 = vpack.c.bf16 %v7957_v47, %v7956_v3  ;;  %v7781_v43 = vmul.f32 %v18275_v35, %v12925_v8  ;;  %v12926_v36 = vadd.f32 %v7560_v38, %v17447_v15  ;;  %v12382_v16 = vpop.f32.mrb[143].mxu0  ;;  %v12444_v17 = vpop.f32.mrb[203].mxu1 }
 0x836   :  { %v7873_v28 = vadd.f32 %v18284_v5, %v7781_v43  ;;  %v7782_v40 = vmul.f32 %v18275_v35, %v12926_v36  ;;  %12550 = vmatmul.mubr.msk.bf16.gmra.mrb[52].mxu1 %vm687_vm3, %v8007_v45 }
 0x837   :  { %12553 = vmatprep.mubr.msk.bf16.mxu1 %vm14388_vm2, %v19480_v20 }
 0x838   :  { %v7874_v48 = vadd.f32 %v18284_v5, %v7782_v40  ;;  %v7958_v0 = vmax.f32 %v7873_v28, 0.0 }
 0x839   :  { %v7565_v6 = vpop.f32.mrb[144].mxu0  ;;  %v18365_v12 = vpop.f32.mrb[204].mxu1 }
 0x83a   :  { %v7959_v41 = vmax.f32 %v7874_v48, 0.0  ;;  %v12927_v15 = vadd.f32 %v7565_v6, %v19753_v13  ;;  %v12385_v62 = vpop.f32.mrb[145].mxu0  ;;  %v12447_v46 = vpop.f32.mrb[205].mxu1  ;;  %v19755_v6 = vld [vmem:[#allocation102_spill] sm:$0xff] }
 0x83b   :  { %v7568_v63 = vpop.f32.mrb[146].mxu0  ;;  %v18368_v27 = vpop.f32.mrb[206].mxu1 }
 0x83c   :  { %v8008_v23 = vpack.c.bf16 %v7959_v41, %v7958_v0  ;;  %v7783_v14 = vmul.f32 %v18275_v35, %v12927_v15  ;;  %v12928_v29 = vadd.f32 %v7568_v63, %v17457_v39  ;;  %v12386_v30 = vpop.f32.mrb[147].mxu0  ;;  %v12448_v32 = vpop.f32.mrb[207].mxu1 }
 0x83e   :  { %v7875_v25 = vadd.f32 %v18284_v5, %v7783_v14  ;;  %v7784_v11 = vmul.f32 %v18275_v35, %v12928_v29  ;;  %12554 = vmatmul.mubr.msk.bf16.gmra.mrb[56].mxu1 %vm687_vm3, %v8008_v23 }
 0x83f   :  { %12557 = vmatprep.mubr.msk.bf16.mxu1 %vm14388_vm2, %v19480_v20 }
 0x840   :  { %v7876_v33 = vadd.f32 %v18284_v5, %v7784_v11  ;;  %v7960_v18 = vmax.f32 %v7875_v25, 0.0 }
 0x841   :  { %v7573_v9 = vpop.f32.mrb[148].mxu0  ;;  %v18378_v59 = vpop.f32.mrb[208].mxu1 }
 0x842   :  { %v7961_v61 = vmax.f32 %v7876_v33, 0.0  ;;  %v12929_v39 = vadd.f32 %v7573_v9, %v19754_v4  ;;  %v12389_v56 = vpop.f32.mrb[149].mxu0  ;;  %v12451_v3 = vpop.f32.mrb[209].mxu1 }
 0x843   :  { %v7576_v47 = vpop.f32.mrb[150].mxu0  ;;  %v18381_v42 = vpop.f32.mrb[210].mxu1 }
 0x844   :  { %v8009_v8 = vpack.c.bf16 %v7961_v61, %v7960_v18  ;;  %v7785_v54 = vmul.f32 %v18275_v35, %v12929_v39  ;;  %v12930_v19 = vadd.f32 %v7576_v47, %v17467_v55  ;;  %v12390_v38 = vpop.f32.mrb[151].mxu0  ;;  %v12452_v45 = vpop.f32.mrb[211].mxu1  ;;  %v19756_v18 = vld [vmem:[#allocation103_spill] sm:$0xff] }
 0x846   :  { %v7877_v43 = vadd.f32 %v18284_v5, %v7785_v54  ;;  %v7786_v36 = vmul.f32 %v18275_v35, %v12930_v19  ;;  %12558 = vmatmul.mubr.msk.bf16.gmra.mrb[60].mxu1 %vm687_vm3, %v8009_v8 }
 0x847   :  { %12561 = vmatprep.mubr.msk.bf16.mxu1 %vm14388_vm2, %v19480_v20 }
 0x848   :  { %v7878_v16 = vadd.f32 %v18284_v5, %v7786_v36  ;;  %v7962_v40 = vmax.f32 %v7877_v43, 0.0 }
 0x849   :  { %v7581_v17 = vpop.f32.mrb[152].mxu0  ;;  %v18391_v28 = vpop.f32.mrb[212].mxu1 }
 0x84a   :  { %v7963_v48 = vmax.f32 %v7878_v16, 0.0  ;;  %v12931_v55 = vadd.f32 %v7581_v17, %v19755_v6  ;;  %v12393_v0 = vpop.f32.mrb[153].mxu0  ;;  %v12455_v41 = vpop.f32.mrb[213].mxu1 }
 0x84b   :  { %v7584_v13 = vpop.f32.mrb[154].mxu0  ;;  %v18394_v15 = vpop.f32.mrb[214].mxu1 }
 0x84c   :  { %v8010_v62 = vpack.c.bf16 %v7963_v48, %v7962_v40  ;;  %v7787_v46 = vmul.f32 %v18275_v35, %v12931_v55  ;;  %v12932_v63 = vadd.f32 %v7584_v13, %v17477_v52  ;;  %v12394_v23 = vpop.f32.mrb[155].mxu0  ;;  %v12456_v14 = vpop.f32.mrb[215].mxu1  ;;  %v19757_v48 = vld [vmem:[#allocation104_spill] sm:$0xff] }
 0x84e   :  { %v7879_v29 = vadd.f32 %v18284_v5, %v7787_v46  ;;  %v7788_v30 = vmul.f32 %v18275_v35, %v12932_v63  ;;  %12562 = vmatmul.mubr.msk.bf16.gmra.mrb[64].mxu1 %vm687_vm3, %v8010_v62 }
 0x84f   :  { %12565 = vmatprep.mubr.msk.bf16.mxu1 %vm14388_vm2, %v19480_v20 }
 0x850   :  { %v7880_v32 = vadd.f32 %v18284_v5, %v7788_v30  ;;  %v7964_v33 = vmax.f32 %v7879_v29, 0.0 }
 0x851   :  { %v7589_v25 = vpop.f32.mrb[156].mxu0  ;;  %v18404_v11 = vpop.f32.mrb[216].mxu1 }
 0x852   :  { %v7965_v9 = vmax.f32 %v7880_v32, 0.0  ;;  %v12933_v52 = vadd.f32 %v7589_v25, %v19756_v18  ;;  %v12397_v61 = vpop.f32.mrb[157].mxu0  ;;  %v12459_v4 = vpop.f32.mrb[217].mxu1  ;;  %v19758_v18 = vld [vmem:[#allocation105_spill] sm:$0xff] }
 0x853   :  { %v7592_v39 = vpop.f32.mrb[158].mxu0  ;;  %v18407_v56 = vpop.f32.mrb[218].mxu1 }
 0x854   :  { %v8011_v3 = vpack.c.bf16 %v7965_v9, %v7964_v33  ;;  %v7789_v47 = vmul.f32 %v18275_v35, %v12933_v52  ;;  %v12934_v8 = vadd.f32 %v7592_v39, %v17487_v49  ;;  %v12398_v54 = vpop.f32.mrb[159].mxu0  ;;  %v12460_v19 = vpop.f32.mrb[219].mxu1 }
 0x856   :  { %v7881_v38 = vadd.f32 %v18284_v5, %v7789_v47  ;;  %v7790_v45 = vmul.f32 %v18275_v35, %v12934_v8  ;;  %12566 = vmatmul.mubr.msk.bf16.gmra.mrb[68].mxu1 %vm687_vm3, %v8011_v3  ;;  %v19759_v8 = vld [vmem:[#allocation106_spill] sm:$0xff] }
 0x857   :  { %12569 = vmatprep.mubr.msk.bf16.mxu1 %vm14388_vm2, %v19480_v20 }
 0x858   :  { %v7882_v43 = vadd.f32 %v18284_v5, %v7790_v45  ;;  %v7966_v17 = vmax.f32 %v7881_v38, 0.0 }
 0x859   :  { %v7597_v36 = vpop.f32.mrb[160].mxu0  ;;  %v18417_v16 = vpop.f32.mrb[220].mxu1 }
 0x85a   :  { %v7967_v40 = vmax.f32 %v7882_v43, 0.0  ;;  %v12935_v49 = vadd.f32 %v7597_v36, %v19757_v48  ;;  %v12401_v6 = vpop.f32.mrb[161].mxu0  ;;  %v12463_v55 = vpop.f32.mrb[221].mxu1 }
 0x85b   :  { %v7600_v0 = vpop.f32.mrb[162].mxu0  ;;  %v18420_v41 = vpop.f32.mrb[222].mxu1 }
 0x85c   :  { %v8012_v13 = vpack.c.bf16 %v7967_v40, %v7966_v17  ;;  %v7791_v62 = vmul.f32 %v18275_v35, %v12935_v49  ;;  %v12936_v46 = vadd.f32 %v7600_v0, %v17497_v50  ;;  %v12402_v63 = vpop.f32.mrb[163].mxu0  ;;  %v12464_v23 = vpop.f32.mrb[223].mxu1 }
 0x85e   :  { %v7883_v14 = vadd.f32 %v18284_v5, %v7791_v62  ;;  %v7792_v29 = vmul.f32 %v18275_v35, %v12936_v46  ;;  %12570 = vmatmul.mubr.msk.bf16.gmra.mrb[72].mxu1 %vm687_vm3, %v8012_v13 }
 0x85f   :  { %12573 = vmatprep.mubr.msk.bf16.mxu1 %vm14388_vm2, %v19480_v20 }
 0x860   :  { %v7884_v30 = vadd.f32 %v18284_v5, %v7792_v29  ;;  %v7968_v33 = vmax.f32 %v7883_v14, 0.0 }
 0x861   :  { %v7605_v32 = vpop.f32.mrb[164].mxu0  ;;  %v18430_v25 = vpop.f32.mrb[224].mxu1 }
 0x862   :  { %v7969_v9 = vmax.f32 %v7884_v30, 0.0  ;;  %v12937_v50 = vadd.f32 %v7605_v32, %v19758_v18  ;;  %v12405_v52 = vpop.f32.mrb[165].mxu0  ;;  %v12467_v61 = vpop.f32.mrb[225].mxu1 }
 0x863   :  { %v7608_v4 = vpop.f32.mrb[166].mxu0  ;;  %v18433_v39 = vpop.f32.mrb[226].mxu1  ;;  %v19760_v61 = vld [vmem:[#allocation8_spill] sm:$0xff] }
 0x864   :  { %v8013_v3 = vpack.c.bf16 %v7969_v9, %v7968_v33  ;;  %v7793_v47 = vmul.f32 %v18275_v35, %v12937_v50  ;;  %v12938_v54 = vadd.f32 %v7608_v4, %v19759_v8  ;;  %v12406_v19 = vpop.f32.mrb[167].mxu0  ;;  %v12468_v38 = vpop.f32.mrb[227].mxu1 }
 0x866   :  { %v7885_v45 = vadd.f32 %v18284_v5, %v7793_v47  ;;  %v7794_v43 = vmul.f32 %v18275_v35, %v12938_v54  ;;  %12574 = vmatmul.mubr.msk.bf16.gmra.mrb[76].mxu1 %vm687_vm3, %v8013_v3  ;;  %v19761_v54 = vld [vmem:[#allocation9_spill] sm:$0xff] }
 0x867   :  { %12577 = vmatprep.mubr.msk.bf16.mxu1 %vm14388_vm2, %v19480_v20 }
 0x868   :  { %v7886_v36 = vadd.f32 %v18284_v5, %v7794_v43  ;;  %v7970_v48 = vmax.f32 %v7885_v45, 0.0 }
 0x869   :  { %v7613_v17 = vpop.f32.mrb[168].mxu0  ;;  %v18443_v40 = vpop.f32.mrb[228].mxu1 }
 0x86a   :  { %v7971_v49 = vmax.f32 %v7886_v36, 0.0  ;;  %v12939_v6 = vadd.f32 %v7613_v17, %v17511_v60  ;;  %v12409_v55 = vpop.f32.mrb[169].mxu0  ;;  %v12471_v0 = vpop.f32.mrb[229].mxu1  ;;  %v19762_v36 = vld [vmem:[#allocation10_spill] sm:$0xff] }
 0x86b   :  { %v7616_v13 = vpop.f32.mrb[170].mxu0  ;;  %v18446_v62 = vpop.f32.mrb[230].mxu1  ;;  %v19763_v55 = vld [vmem:[#allocation11_spill] sm:$0xff] }
 0x86c   :  { %v8014_v46 = vpack.c.bf16 %v7971_v49, %v7970_v48  ;;  %v7795_v63 = vmul.f32 %v18275_v35, %v12939_v6  ;;  %v12410_v23 = vpop.f32.mrb[171].mxu0  ;;  %v12472_v14 = vpop.f32.mrb[231].mxu1 }
 0x86d   :  { %v19764_v23 = vld [vmem:[#allocation12_spill] sm:$0xff] }
 0x86e   :  { %v7887_v29 = vadd.f32 %v18284_v5, %v7795_v63  ;;  %12578 = vmatmul.mubr.msk.bf16.gmra.mrb[80].mxu1 %vm687_vm3, %v8014_v46 }
 0x86f   :  { %12581 = vmatprep.mubr.msk.bf16.mxu1 %vm14388_vm2, %v19480_v20 }
 0x870   :  { %v7972_v30 = vmax.f32 %v7887_v29, 0.0 }
 0x871   :  { %v18453_v32 = vpop.f32.mrb[232].mxu1 }
 0x872   :  { %v12475_v60 = vpop.f32.mrb[233].mxu1  ;;  %v8015_v9 = vpack.c.bf16 %v7972_v30, %v7972_v30 }
 0x873   :  { %v18455_v33 = vpop.f32.mrb[234].mxu1 }
 0x874   :  { %v12476_v18 = vpop.f32.mrb[235].mxu1 }
 0x876   :  { %12582 = vmatmul.mubr.msk.bf16.gmra.mrb[84].mxu1 %vm687_vm3, %v8015_v9  ;;  %v19765_v9 = vld [vmem:[#allocation13_spill] sm:$0xff] }
 0x877   :  { %12587 = vmatprep.mubr.msk.bf16.mxu1 %vm14388_vm2, %v19480_v20 }
 0x879   :  { %v18460_v35 = vpop.f32.mrb[236].mxu1 }
 0x87a   :  { %v12479_v5 = vpop.f32.mrb[237].mxu1 }
 0x87b   :  { %v18462_v50 = vpop.f32.mrb[238].mxu1 }
 0x87c   :  { %v12480_v52 = vpop.f32.mrb[239].mxu1 }
 0x87e   :  { %12588 = vmatmul.mubr.msk.bf16.vlgmr.msra.gmra.mrb[88].mxu1 %vm687_vm3, %v19760_v61 }
 0x87f   :  { %12591 = vmatprep.mubr.msk.bf16.mxu1 %vm14388_vm2, %v19480_v20 }
 0x881   :  { %v18468_v4 = vpop.f32.mrb[240].mxu1 }
 0x882   :  { %v12483_v3 = vpop.f32.mrb[241].mxu1 }
 0x883   :  { %v18470_v47 = vpop.f32.mrb[242].mxu1  ;;  %v19767_v3 = vld [vmem:[#allocation14_spill] sm:$0xff] }
 0x884   :  { %v12484_v8 = vpop.f32.mrb[243].mxu1 }
 0x886   :  { %12592 = vmatmul.mubr.msk.bf16.gmra.mrb[92].mxu1 %vm687_vm3, %v19761_v54 }
 0x887   :  { %12595 = vmatprep.mubr.msk.bf16.mxu1 %vm14388_vm2, %v19480_v20 }
 0x889   :  { %v18476_v19 = vpop.f32.mrb[244].mxu1 }
 0x88a   :  { %v12487_v38 = vpop.f32.mrb[245].mxu1 }
 0x88b   :  { %v18478_v45 = vpop.f32.mrb[246].mxu1 }
 0x88c   :  { %v12488_v43 = vpop.f32.mrb[247].mxu1 }
 0x88e   :  { %12596 = vmatmul.mubr.msk.bf16.gmra.mrb[96].mxu1 %vm687_vm3, %v19762_v36  ;;  %v19770_v36 = vld [vmem:[#allocation15_spill] sm:$0xff] }
 0x88f   :  { %12599 = vmatprep.mubr.msk.bf16.mxu1 %vm14388_vm2, %v19480_v20 }
 0x891   :  { %v18484_v17 = vpop.f32.mrb[248].mxu1 }
 0x892   :  { %v12491_v48 = vpop.f32.mrb[249].mxu1 }
 0x893   :  { %v18486_v49 = vpop.f32.mrb[250].mxu1 }
 0x894   :  { %v12492_v6 = vpop.f32.mrb[251].mxu1 }
 0x896   :  { %12600 = vmatmul.mubr.msk.bf16.gmra.mrb[100].mxu1 %vm687_vm3, %v19763_v55 }
 0x897   :  { %12603 = vmatprep.mubr.msk.bf16.mxu1 %vm14388_vm2, %v19480_v20 }
 0x899   :  { %v18492_v0 = vpop.f32.mrb[252].mxu1 }
 0x89a   :  { %v12495_v13 = vpop.f32.mrb[253].mxu1 }
 0x89b   :  { %v18494_v46 = vpop.f32.mrb[254].mxu1 }
 0x89c   :  { %v12496_v63 = vpop.f32.mrb[255].mxu1 }
 0x89d   :  { %v19773_v63 = vld [vmem:[#allocation16_spill] sm:$0xff] }
 0x89e   :  { %12604 = vmatmul.mubr.msk.bf16.gmra.mrb[104].mxu1 %vm687_vm3, %v19764_v23 }
 0x89f   :  { %12607 = vmatprep.mubr.msk.bf16.mxu1 %vm14388_vm2, %v19480_v20 }
 0x8a1   :  { %v18500_v14 = vpop.f32.mrb[0].mxu1 }
 0x8a2   :  { %v12499_v29 = vpop.f32.mrb[1].mxu1 }
 0x8a3   :  { %v18502_v30 = vpop.f32.mrb[2].mxu1 }
 0x8a4   :  { %v12500_v60 = vpop.f32.mrb[3].mxu1 }
 0x8a6   :  { %12608 = vmatmul.mubr.msk.bf16.gmra.mrb[108].mxu1 %vm687_vm3, %v19765_v9 }
 0x8a7   :  { %12611 = vmatprep.mubr.msk.bf16.mxu1 %vm14388_vm2, %v19480_v20 }
 0x8a9   :  { %v18508_v18 = vpop.f32.mrb[4].mxu1 }
 0x8aa   :  { %v12503_v5 = vpop.f32.mrb[5].mxu1 }
 0x8ab   :  { %v18510_v52 = vpop.f32.mrb[6].mxu1  ;;  %v19776_v5 = vld [vmem:[#allocation18_spill] sm:$0xff] }
 0x8ac   :  { %19766 = vst [vmem:[#allocation3_spill] sm:$0xff] %v18510_v52  ;;  %v12504_v61 = vpop.f32.mrb[7].mxu1 }
 0x8ae   :  { %12612 = vmatmul.mubr.msk.bf16.gmra.mrb[112].mxu1 %vm687_vm3, %v19767_v3 }
 0x8af   :  { %12615 = vmatprep.mubr.msk.bf16.mxu1 %vm14388_vm2, %v19480_v20 }
 0x8b1   :  { %v18516_v8 = vpop.f32.mrb[8].mxu1 }
 0x8b2   :  { %19768 = vst [vmem:[#allocation17_spill] sm:$0xff] %v18516_v8  ;;  %v12507_v54 = vpop.f32.mrb[9].mxu1  ;;  %v19827_v8 = vld [vmem:[#allocation42_spill] sm:$0xff] }
 0x8b3   :  { %v18518_v38 = vpop.f32.mrb[10].mxu1 }
 0x8b4   :  { %19769 = vst [vmem:[#allocation19_spill] sm:$0xff] %v18518_v38  ;;  %v12508_v43 = vpop.f32.mrb[11].mxu1 }
 0x8b6   :  { %12616 = vmatmul.mubr.msk.bf16.gmra.mrb[116].mxu1 %vm687_vm3, %v19770_v36  ;;  %v19779_v36 = vld [vmem:[#allocation20_spill] sm:$0xff] }
 0x8b7   :  { %12619 = vmatprep.mubr.msk.bf16.mxu1 %vm14388_vm2, %v19480_v20 }
 0x8b9   :  { %v18524_v48 = vpop.f32.mrb[12].mxu1 }
 0x8ba   :  { %19771 = vst [vmem:[#allocation21_spill] sm:$0xff] %v18524_v48  ;;  %v12511_v6 = vpop.f32.mrb[13].mxu1 }
 0x8bb   :  { %v18526_v55 = vpop.f32.mrb[14].mxu1 }
 0x8bc   :  { %19772 = vst [vmem:[#allocation2_spill] sm:$0xff] %v18526_v55  ;;  %v12512_v13 = vpop.f32.mrb[15].mxu1 }
 0x8be   :  { %12620 = vmatmul.mubr.msk.bf16.gmra.mrb[120].mxu1 %vm687_vm3, %v19773_v63 }
 0x8bf   :  { %12623 = vmatprep.mubr.msk.bf16.mxu1 %vm14388_vm2, %v19480_v20 }
 0x8c1   :  { %v18532_v23 = vpop.f32.mrb[16].mxu1 }
 0x8c2   :  { %19774 = vst [vmem:[#allocation37_spill] sm:$0xff] %v18532_v23  ;;  %v12515_v29 = vpop.f32.mrb[17].mxu1 }
 0x8c3   :  { %v18534_v60 = vpop.f32.mrb[18].mxu1 }
 0x8c4   :  { %19775 = vst [vmem:[#allocation4_spill] sm:$0xff] %v18534_v60  ;;  %v12516_v9 = vpop.f32.mrb[19].mxu1 }
 0x8c5   :  { %v19782_v9 = vld [vmem:[#allocation22_spill] sm:$0xff] }
 0x8c6   :  { %12624 = vmatmul.mubr.msk.bf16.gmra.mrb[124].mxu1 %vm687_vm3, %v19776_v5 }
 0x8c7   :  { %12627 = vmatprep.mubr.msk.bf16.mxu1 %vm14388_vm2, %v19480_v20 }
 0x8c9   :  { %v18540_v61 = vpop.f32.mrb[20].mxu1 }
 0x8ca   :  { %19777 = vst [vmem:[#allocation39_spill] sm:$0xff] %v18540_v61  ;;  %v12519_v3 = vpop.f32.mrb[21].mxu1 }
 0x8cb   :  { %v18542_v54 = vpop.f32.mrb[22].mxu1 }
 0x8cc   :  { %19778 = vst [vmem:[#allocation5_spill] sm:$0xff] %v18542_v54  ;;  %v12520_v43 = vpop.f32.mrb[23].mxu1  ;;  %v19785_v54 = vld [vmem:[#allocation23_spill] sm:$0xff] }
 0x8ce   :  { %12628 = vmatmul.mubr.msk.bf16.gmra.mrb[128].mxu1 %vm687_vm3, %v19779_v36 }
 0x8cf   :  { %12631 = vmatprep.mubr.msk.bf16.mxu1 %vm14388_vm2, %v19480_v20 }
 0x8d1   :  { %v18548_v6 = vpop.f32.mrb[24].mxu1 }
 0x8d2   :  { %19780 = vst [vmem:[#allocation41_spill] sm:$0xff] %v18548_v6  ;;  %v12523_v13 = vpop.f32.mrb[25].mxu1  ;;  %v19788_v6 = vld [vmem:[#allocation25_spill] sm:$0xff] }
 0x8d3   :  { %v18550_v63 = vpop.f32.mrb[26].mxu1 }
 0x8d4   :  { %19781 = vst [vmem:[#allocation6_spill] sm:$0xff] %v18550_v63  ;;  %v12524_v29 = vpop.f32.mrb[27].mxu1 }
 0x8d6   :  { %12632 = vmatmul.mubr.msk.bf16.gmra.mrb[132].mxu1 %vm687_vm3, %v19782_v9 }
 0x8d7   :  { %12635 = vmatprep.mubr.msk.bf16.mxu1 %vm14388_vm2, %v19480_v20 }
 0x8d9   :  { %v18556_v5 = vpop.f32.mrb[28].mxu1 }
 0x8da   :  { %19783 = vst [vmem:[#allocation43_spill] sm:$0xff] %v18556_v5  ;;  %v12527_v3 = vpop.f32.mrb[29].mxu1  ;;  %v19791_v5 = vld [vmem:[#allocation26_spill] sm:$0xff] }
 0x8db   :  { %v18558_v43 = vpop.f32.mrb[30].mxu1 }
 0x8dc   :  { %19784 = vst [vmem:[#allocation48_spill] sm:$0xff] %v18558_v43  ;;  %v12528_v36 = vpop.f32.mrb[31].mxu1 }
 0x8de   :  { %12636 = vmatmul.mubr.msk.bf16.gmra.mrb[136].mxu1 %vm687_vm3, %v19785_v54 }
 0x8df   :  { %12639 = vmatprep.mubr.msk.bf16.mxu1 %vm14388_vm2, %v19480_v20 }
 0x8e1   :  { %v18564_v13 = vpop.f32.mrb[32].mxu1 }
 0x8e2   :  { %19786 = vst [vmem:[#allocation45_spill] sm:$0xff] %v18564_v13  ;;  %v12531_v29 = vpop.f32.mrb[33].mxu1  ;;  %v19794_v13 = vld [vmem:[#allocation27_spill] sm:$0xff] }
 0x8e3   :  { %v18566_v63 = vpop.f32.mrb[34].mxu1 }
 0x8e4   :  { %19787 = vst [vmem:[#allocation51_spill] sm:$0xff] %v18566_v63  ;;  %v12532_v9 = vpop.f32.mrb[35].mxu1 }
 0x8e6   :  { %12640 = vmatmul.mubr.msk.bf16.gmra.mrb[140].mxu1 %vm687_vm3, %v19788_v6 }
 0x8e7   :  { %12643 = vmatprep.mubr.msk.bf16.mxu1 %vm14388_vm2, %v19480_v20 }
 0x8e9   :  { %v18572_v3 = vpop.f32.mrb[36].mxu1 }
 0x8ea   :  { %19789 = vst [vmem:[#allocation47_spill] sm:$0xff] %v18572_v3  ;;  %v12535_v36 = vpop.f32.mrb[37].mxu1  ;;  %v19797_v3 = vld [vmem:[#allocation28_spill] sm:$0xff] }
 0x8eb   :  { %v18574_v43 = vpop.f32.mrb[38].mxu1 }
 0x8ec   :  { %19790 = vst [vmem:[#allocation54_spill] sm:$0xff] %v18574_v43  ;;  %v12536_v54 = vpop.f32.mrb[39].mxu1 }
 0x8ee   :  { %12644 = vmatmul.mubr.msk.bf16.gmra.mrb[144].mxu1 %vm687_vm3, %v19791_v5 }
 0x8ef   :  { %12647 = vmatprep.mubr.msk.bf16.mxu1 %vm14388_vm2, %v19480_v20 }
 0x8f1   :  { %v18580_v29 = vpop.f32.mrb[40].mxu1 }
 0x8f2   :  { %19792 = vst [vmem:[#allocation50_spill] sm:$0xff] %v18580_v29  ;;  %v12539_v9 = vpop.f32.mrb[41].mxu1  ;;  %v19800_v29 = vld [vmem:[#allocation29_spill] sm:$0xff] }
 0x8f3   :  { %v18582_v63 = vpop.f32.mrb[42].mxu1 }
 0x8f4   :  { %19793 = vst [vmem:[#allocation57_spill] sm:$0xff] %v18582_v63  ;;  %v12540_v6 = vpop.f32.mrb[43].mxu1 }
 0x8f6   :  { %12648 = vmatmul.mubr.msk.bf16.gmra.mrb[148].mxu1 %vm687_vm3, %v19794_v13 }
 0x8f7   :  { %12651 = vmatprep.mubr.msk.bf16.mxu1 %vm14388_vm2, %v19480_v20 }
 0x8f9   :  { %v18588_v36 = vpop.f32.mrb[44].mxu1 }
 0x8fa   :  { %19795 = vst [vmem:[#allocation53_spill] sm:$0xff] %v18588_v36  ;;  %v12543_v54 = vpop.f32.mrb[45].mxu1  ;;  %v19803_v36 = vld [vmem:[#allocation30_spill] sm:$0xff] }
 0x8fb   :  { %v18590_v43 = vpop.f32.mrb[46].mxu1 }
 0x8fc   :  { %19796 = vst [vmem:[#allocation56_spill] sm:$0xff] %v18590_v43  ;;  %v12544_v5 = vpop.f32.mrb[47].mxu1 }
 0x8fe   :  { %12652 = vmatmul.mubr.msk.bf16.gmra.mrb[152].mxu1 %vm687_vm3, %v19797_v3 }
 0x8ff   :  { %12655 = vmatprep.mubr.msk.bf16.mxu1 %vm14388_vm2, %v19480_v20 }
 0x901   :  { %v18596_v9 = vpop.f32.mrb[48].mxu1 }
 0x902   :  { %19798 = vst [vmem:[#allocation59_spill] sm:$0xff] %v18596_v9  ;;  %v12547_v6 = vpop.f32.mrb[49].mxu1  ;;  %v19806_v9 = vld [vmem:[#allocation31_spill] sm:$0xff] }
 0x903   :  { %v18598_v63 = vpop.f32.mrb[50].mxu1 }
 0x904   :  { %19799 = vst [vmem:[#allocation65_spill] sm:$0xff] %v18598_v63  ;;  %v12548_v13 = vpop.f32.mrb[51].mxu1 }
 0x906   :  { %12656 = vmatmul.mubr.msk.bf16.gmra.mrb[156].mxu1 %vm687_vm3, %v19800_v29 }
 0x907   :  { %12659 = vmatprep.mubr.msk.bf16.mxu1 %vm14388_vm2, %v19480_v20 }
 0x909   :  { %v18604_v54 = vpop.f32.mrb[52].mxu1 }
 0x90a   :  { %19801 = vst [vmem:[#allocation24_spill] sm:$0xff] %v18604_v54  ;;  %v12551_v5 = vpop.f32.mrb[53].mxu1  ;;  %v19809_v54 = vld [vmem:[#allocation32_spill] sm:$0xff] }
 0x90b   :  { %v18606_v43 = vpop.f32.mrb[54].mxu1 }
 0x90c   :  { %19802 = vst [vmem:[#allocation71_spill] sm:$0xff] %v18606_v43  ;;  %v12552_v3 = vpop.f32.mrb[55].mxu1 }
 0x90e   :  { %12660 = vmatmul.mubr.msk.bf16.gmra.mrb[160].mxu1 %vm687_vm3, %v19803_v36 }
 0x90f   :  { %12663 = vmatprep.mubr.msk.bf16.mxu1 %vm14388_vm2, %v19480_v20 }
 0x911   :  { %v18612_v6 = vpop.f32.mrb[56].mxu1 }
 0x912   :  { %19804 = vst [vmem:[#allocation72_spill] sm:$0xff] %v18612_v6  ;;  %v12555_v13 = vpop.f32.mrb[57].mxu1  ;;  %v19812_v6 = vld [vmem:[#allocation33_spill] sm:$0xff] }
 0x913   :  { %v18614_v63 = vpop.f32.mrb[58].mxu1 }
 0x914   :  { %19805 = vst [vmem:[#allocation73_spill] sm:$0xff] %v18614_v63  ;;  %v12556_v29 = vpop.f32.mrb[59].mxu1 }
 0x916   :  { %12664 = vmatmul.mubr.msk.bf16.gmra.mrb[164].mxu1 %vm687_vm3, %v19806_v9 }
 0x917   :  { %12667 = vmatprep.mubr.msk.bf16.mxu1 %vm14388_vm2, %v19480_v20 }
 0x919   :  { %v18620_v5 = vpop.f32.mrb[60].mxu1 }
 0x91a   :  { %19807 = vst [vmem:[#allocation7_spill] sm:$0xff] %v18620_v5  ;;  %v12559_v3 = vpop.f32.mrb[61].mxu1  ;;  %v19815_v5 = vld [vmem:[#allocation34_spill] sm:$0xff] }
 0x91b   :  { %v18622_v43 = vpop.f32.mrb[62].mxu1 }
 0x91c   :  { %19808 = vst [vmem:[#allocation74_spill] sm:$0xff] %v18622_v43  ;;  %v12560_v36 = vpop.f32.mrb[63].mxu1 }
 0x91e   :  { %12668 = vmatmul.mubr.msk.bf16.gmra.mrb[168].mxu1 %vm687_vm3, %v19809_v54 }
 0x91f   :  { %12671 = vmatprep.mubr.msk.bf16.mxu1 %vm14388_vm2, %v19480_v20 }
 0x921   :  { %v18628_v13 = vpop.f32.mrb[64].mxu1 }
 0x922   :  { %19810 = vst [vmem:[#allocation75_spill] sm:$0xff] %v18628_v13  ;;  %v12563_v29 = vpop.f32.mrb[65].mxu1  ;;  %v19818_v13 = vld [vmem:[#allocation35_spill] sm:$0xff] }
 0x923   :  { %v18630_v63 = vpop.f32.mrb[66].mxu1 }
 0x924   :  { %19811 = vst [vmem:[#allocation76_spill] sm:$0xff] %v18630_v63  ;;  %v12564_v9 = vpop.f32.mrb[67].mxu1 }
 0x926   :  { %12672 = vmatmul.mubr.msk.bf16.gmra.mrb[172].mxu1 %vm687_vm3, %v19812_v6 }
 0x927   :  { %12675 = vmatprep.mubr.msk.bf16.mxu1 %vm14388_vm2, %v19480_v20 }
 0x929   :  { %v18636_v3 = vpop.f32.mrb[68].mxu1 }
 0x92a   :  { %19813 = vst [vmem:[#allocation77_spill] sm:$0xff] %v18636_v3  ;;  %v12567_v36 = vpop.f32.mrb[69].mxu1  ;;  %v19821_v3 = vld [vmem:[#allocation36_spill] sm:$0xff] }
 0x92b   :  { %v18638_v43 = vpop.f32.mrb[70].mxu1 }
 0x92c   :  { %19814 = vst [vmem:[#allocation78_spill] sm:$0xff] %v18638_v43  ;;  %v12568_v54 = vpop.f32.mrb[71].mxu1 }
 0x92e   :  { %12676 = vmatmul.mubr.msk.bf16.gmra.mrb[176].mxu1 %vm687_vm3, %v19815_v5 }
 0x92f   :  { %12679 = vmatprep.mubr.msk.bf16.mxu1 %vm14388_vm2, %v19480_v20 }
 0x931   :  { %v18644_v29 = vpop.f32.mrb[72].mxu1 }
 0x932   :  { %19816 = vst [vmem:[#allocation79_spill] sm:$0xff] %v18644_v29  ;;  %v12571_v9 = vpop.f32.mrb[73].mxu1  ;;  %v19824_v29 = vld [vmem:[#allocation38_spill] sm:$0xff] }
 0x933   :  { %v18646_v63 = vpop.f32.mrb[74].mxu1 }
 0x934   :  { %19817 = vst [vmem:[#allocation80_spill] sm:$0xff] %v18646_v63  ;;  %v12572_v6 = vpop.f32.mrb[75].mxu1 }
 0x936   :  { %12680 = vmatmul.mubr.msk.bf16.gmra.mrb[180].mxu1 %vm687_vm3, %v19818_v13 }
 0x937   :  { %12683 = vmatprep.mubr.msk.bf16.mxu1 %vm14388_vm2, %v19480_v20 }
 0x939   :  { %v18652_v36 = vpop.f32.mrb[76].mxu1 }
 0x93a   :  { %19819 = vst [vmem:[#allocation81_spill] sm:$0xff] %v18652_v36  ;;  %v12575_v54 = vpop.f32.mrb[77].mxu1  ;;  %v18673_v36 = vld [vmem:[%s19287_s8] ss:$0 sm:$0xff] }
 0x93b   :  { %v18654_v43 = vpop.f32.mrb[78].mxu1 }
 0x93c   :  { %19820 = vst [vmem:[#allocation82_spill] sm:$0xff] %v18654_v43  ;;  %v12576_v5 = vpop.f32.mrb[79].mxu1 }
 0x93e   :  { %12684 = vmatmul.mubr.msk.bf16.gmra.mrb[184].mxu1 %vm687_vm3, %v19821_v3 }
 0x93f   :  { %12687 = vmatprep.mubr.msk.bf16.mxu1 %vm14388_vm2, %v19480_v20 }
 0x941   :  { %v18660_v9 = vpop.f32.mrb[80].mxu1 }
 0x942   :  { %19822 = vst [vmem:[#allocation83_spill] sm:$0xff] %v18660_v9  ;;  %v12579_v6 = vpop.f32.mrb[81].mxu1 }
 0x943   :  { %v18662_v63 = vpop.f32.mrb[82].mxu1  ;;  %v19826_v6 = vld [vmem:[#allocation40_spill] sm:$0xff] }
 0x944   :  { %19823 = vst [vmem:[#allocation84_spill] sm:$0xff] %v18662_v63  ;;  %v12580_v13 = vpop.f32.mrb[83].mxu1 }
 0x945   :  { %v18689_v13 = vld [vmem:[%s19289_s9] ss:$0 sm:$0xff] }
 0x946   :  { %12688 = vmatmul.mubr.msk.bf16.gmra.mrb[188].mxu1 %vm687_vm3, %v19824_v29  ;;  %v18680_v29 = vld [vmem:[%s19288_s6] ss:$0 sm:$0xff] }
 0x947   :  { %12691 = vmatprep.mubr.msk.bf16.mxu1 %vm14388_vm2, %v19480_v20 }
 0x949   :  { %v18668_v54 = vpop.f32.mrb[84].mxu1 }
 0x94a   :  { %19825 = vst [vmem:[#allocation85_spill] sm:$0xff] %v18668_v54  ;;  %v12583_v5 = vpop.f32.mrb[85].mxu1 }
 0x94b   :  { %v8522_v43 = vpop.f32.mrb[86].mxu1 }
 0x94c   :  { %v12584_v3 = vpop.f32.mrb[87].mxu1  ;;  %v8532_v43 = vmul.f32 %v18673_v36, %v18251_v44 }
 0x94d   :  { %v18694_v3 = vld [vmem:[%s19290_s7] ss:$0 sm:$0xff] }
 0x94e   :  { %12692 = vmatmul.mubr.msk.bf16.gmra.mrb[192].mxu1 %vm687_vm3, %v19826_v6  ;;  %v8533_v6 = vmul.f32 %v18673_v36, %v18254_v1  ;;  %v8624_v44 = vadd.f32 %v18689_v13, %v8532_v43  ;;  %v8534_v1 = vmul.f32 %v18673_v36, %v18264_v2 }
 0x94f   :  { %12695 = vmatprep.mubr.msk.bf16.mxu1 %vm14388_vm2, %v19480_v20 }
 0x950   :  { %v8625_v55 = vadd.f32 %v18689_v13, %v8533_v6  ;;  %v8626_v6 = vadd.f32 %v18689_v13, %v8534_v1  ;;  %v8536_v1 = vmul.f32 %v18673_v36, %v18287_v58 }
 0x951   :  { %v8747_v5 = vpop.f32.mrb[88].mxu1 }
 0x952   :  { %v9096_v54 = vmul.f32 %v18680_v29, %v8747_v5  ;;  %v12589_v63 = vpop.f32.mrb[89].mxu1 }
 0x953   :  { %v8750_v9 = vpop.f32.mrb[90].mxu1 }
 0x954   :  { %v9188_v61 = vadd.f32 %v18694_v3, %v9096_v54  ;;  %v9097_v60 = vmul.f32 %v18680_v29, %v8750_v9  ;;  %v12590_v23 = vpop.f32.mrb[91].mxu1  ;;  %v8535_v9 = vmul.f32 %v18673_v36, %v18267_v26 }
 0x956   :  { %v9273_v48 = vadd.f32 %v9188_v61, %v8624_v44  ;;  %v9189_v38 = vadd.f32 %v18694_v3, %v9097_v60  ;;  %12696 = vmatmul.mubr.msk.bf16.gmra.mrb[196].mxu1 %vm687_vm3, %v19827_v8 }
 0x957   :  { %12699 = vmatprep.mubr.msk.bf16.mxu1 %vm14388_vm2, %v19480_v20 }
 0x958   :  { %v9274_v63 = vadd.f32 %v9189_v38, %v8625_v55  ;;  %v9358_v23 = vmax.f32 %v9273_v48, 0.0  ;;  %v8627_v38 = vadd.f32 %v18689_v13, %v8535_v9  ;;  %v19828_v48 = vld [vmem:[#allocation44_spill] sm:$0xff] }
 0x959   :  { %v8755_v43 = vpop.f32.mrb[92].mxu1 }
 0x95a   :  { %v9359_v54 = vmax.f32 %v9274_v63, 0.0  ;;  %v9098_v61 = vmul.f32 %v18680_v29, %v8755_v43  ;;  %v12593_v5 = vpop.f32.mrb[93].mxu1 }
 0x95b   :  { %v8758_v60 = vpop.f32.mrb[94].mxu1 }
 0x95c   :  { %v18714_v8 = vpack.c.bf16 %v9359_v54, %v9358_v23  ;;  %v9190_v44 = vadd.f32 %v18694_v3, %v9098_v61  ;;  %v9099_v52 = vmul.f32 %v18680_v29, %v8758_v60  ;;  %v12594_v2 = vpop.f32.mrb[95].mxu1  ;;  %v8537_v23 = vmul.f32 %v18673_v36, %v18290_v21 }
 0x95d   :  { %v8628_v60 = vadd.f32 %v18689_v13, %v8536_v1 }
 0x95e   :  { %v9275_v55 = vadd.f32 %v9190_v44, %v8626_v6  ;;  %v9191_v26 = vadd.f32 %v18694_v3, %v9099_v52  ;;  %12700 = vmatmul.mubr.msk.bf16.gmra.mrb[200].mxu1 %vm687_vm3, %v19828_v48  ;;  %v8538_v48 = vmul.f32 %v18673_v36, %v18300_v34 }
 0x95f   :  { %12703 = vmatprep.mubr.msk.bf16.mxu1 %vm14388_vm2, %v19480_v20 }
 0x960   :  { %v9276_v63 = vadd.f32 %v9191_v26, %v8627_v38  ;;  %v9360_v54 = vmax.f32 %v9275_v55, 0.0  ;;  %v8629_v38 = vadd.f32 %v18689_v13, %v8537_v23  ;;  %v19829_v55 = vld [vmem:[#allocation46_spill] sm:$0xff] }
 0x961   :  { %v8763_v43 = vpop.f32.mrb[96].mxu1 }
 0x962   :  { %v9361_v61 = vmax.f32 %v9276_v63, 0.0  ;;  %v9100_v9 = vmul.f32 %v18680_v29, %v8763_v43  ;;  %v12597_v5 = vpop.f32.mrb[97].mxu1  ;;  %v8539_v43 = vmul.f32 %v18673_v36, %v18303_v24 }
 0x963   :  { %v8766_v52 = vpop.f32.mrb[98].mxu1 }
 0x964   :  { %v18730_v6 = vpack.c.bf16 %v9361_v61, %v9360_v54  ;;  %v9192_v44 = vadd.f32 %v18694_v3, %v9100_v9  ;;  %v9101_v2 = vmul.f32 %v18680_v29, %v8766_v52  ;;  %v12598_v58 = vpop.f32.mrb[99].mxu1  ;;  %v8630_v52 = vadd.f32 %v18689_v13, %v8538_v48 }
 0x965   :  { %v8631_v58 = vadd.f32 %v18689_v13, %v8539_v43 }
 0x966   :  { %v9277_v26 = vadd.f32 %v9192_v44, %v8628_v60  ;;  %v9193_v21 = vadd.f32 %v18694_v3, %v9101_v2  ;;  %12704 = vmatmul.mubr.msk.bf16.gmra.mrb[204].mxu1 %vm687_vm3, %v19829_v55 }
 0x967   :  { %12707 = vmatprep.mubr.msk.bf16.mxu1 %vm14388_vm2, %v19480_v20 }
 0x968   :  { %v9278_v1 = vadd.f32 %v9193_v21, %v8629_v38  ;;  %v9362_v54 = vmax.f32 %v9277_v26, 0.0  ;;  %v19830_v26 = vld [vmem:[#allocation49_spill] sm:$0xff]  ;;  %v8540_v21 = vmul.f32 %v18673_v36, %v18313_v22 }
 0x969   :  { %v8771_v63 = vpop.f32.mrb[100].mxu1 }
 0x96a   :  { %v9363_v61 = vmax.f32 %v9278_v1, 0.0  ;;  %v9102_v23 = vmul.f32 %v18680_v29, %v8771_v63  ;;  %v12601_v9 = vpop.f32.mrb[101].mxu1  ;;  %v8541_v1 = vmul.f32 %v18673_v36, %v18316_v57 }
 0x96b   :  { %v8774_v5 = vpop.f32.mrb[102].mxu1  ;;  %v8632_v9 = vadd.f32 %v18689_v13, %v8540_v21  ;;  %v8543_v21 = vmul.f32 %v18673_v36, %v18329_v7 }
 0x96c   :  { %v18746_v60 = vpack.c.bf16 %v9363_v61, %v9362_v54  ;;  %v9194_v44 = vadd.f32 %v18694_v3, %v9102_v23  ;;  %v9103_v2 = vmul.f32 %v18680_v29, %v8774_v5  ;;  %v12602_v34 = vpop.f32.mrb[103].mxu1 }
 0x96e   :  { %v9279_v38 = vadd.f32 %v9194_v44, %v8630_v52  ;;  %v9195_v24 = vadd.f32 %v18694_v3, %v9103_v2  ;;  %12708 = vmatmul.mubr.msk.bf16.gmra.mrb[208].mxu1 %vm687_vm3, %v19830_v26  ;;  %v8633_v2 = vadd.f32 %v18689_v13, %v8541_v1 }
 0x96f   :  { %12711 = vmatprep.mubr.msk.bf16.mxu1 %vm14388_vm2, %v19480_v20 }
 0x970   :  { %v9280_v55 = vadd.f32 %v9195_v24, %v8631_v58  ;;  %v9364_v63 = vmax.f32 %v9279_v38, 0.0  ;;  %v19831_v58 = vld [vmem:[#allocation52_spill] sm:$0xff]  ;;  %v8542_v38 = vmul.f32 %v18673_v36, %v18326_v51 }
 0x971   :  { %v8779_v48 = vpop.f32.mrb[104].mxu1 }
 0x972   :  { %v9365_v54 = vmax.f32 %v9280_v55, 0.0  ;;  %v9104_v43 = vmul.f32 %v18680_v29, %v8779_v48  ;;  %v12605_v61 = vpop.f32.mrb[105].mxu1 }
 0x973   :  { %v8782_v23 = vpop.f32.mrb[106].mxu1 }
 0x974   :  { %v18762_v5 = vpack.c.bf16 %v9365_v54, %v9364_v63  ;;  %v9196_v52 = vadd.f32 %v18694_v3, %v9104_v43  ;;  %v9105_v44 = vmul.f32 %v18680_v29, %v8782_v23  ;;  %v12606_v22 = vpop.f32.mrb[107].mxu1  ;;  %v8634_v43 = vadd.f32 %v18689_v13, %v8542_v38 }
 0x975   :  { %v19832_v22 = vld [vmem:[#allocation55_spill] sm:$0xff] }
 0x976   :  { %v9281_v34 = vadd.f32 %v9196_v52, %v8632_v9  ;;  %v9197_v57 = vadd.f32 %v18694_v3, %v9105_v44  ;;  %12712 = vmatmul.mubr.msk.bf16.gmra.mrb[212].mxu1 %vm687_vm3, %v19831_v58  ;;  %v8635_v52 = vadd.f32 %v18689_v13, %v8543_v21  ;;  %v8545_v58 = vmul.f32 %v18673_v36, %v18342_v53 }
 0x977   :  { %12715 = vmatprep.mubr.msk.bf16.mxu1 %vm14388_vm2, %v19480_v20 }
 0x978   :  { %v9282_v24 = vadd.f32 %v9197_v57, %v8633_v2  ;;  %v9366_v55 = vmax.f32 %v9281_v34, 0.0  ;;  %v8544_v2 = vmul.f32 %v18673_v36, %v18339_v37 }
 0x979   :  { %v8787_v26 = vpop.f32.mrb[108].mxu1 }
 0x97a   :  { %v9367_v48 = vmax.f32 %v9282_v24, 0.0  ;;  %v9106_v1 = vmul.f32 %v18680_v29, %v8787_v26  ;;  %v12609_v63 = vpop.f32.mrb[109].mxu1 }
 0x97b   :  { %v8790_v54 = vpop.f32.mrb[110].mxu1 }
 0x97c   :  { %v18778_v61 = vpack.c.bf16 %v9367_v48, %v9366_v55  ;;  %v9198_v23 = vadd.f32 %v18694_v3, %v9106_v1  ;;  %v9107_v9 = vmul.f32 %v18680_v29, %v8790_v54  ;;  %v12610_v51 = vpop.f32.mrb[111].mxu1  ;;  %v8636_v48 = vadd.f32 %v18689_v13, %v8544_v2 }
 0x97d   :  { %v8546_v51 = vmul.f32 %v18673_v36, %v18352_v10 }
 0x97e   :  { %v9283_v44 = vadd.f32 %v9198_v23, %v8634_v43  ;;  %v9199_v7 = vadd.f32 %v18694_v3, %v9107_v9  ;;  %12716 = vmatmul.mubr.msk.bf16.gmra.mrb[216].mxu1 %vm687_vm3, %v19832_v22  ;;  %v8637_v43 = vadd.f32 %v18689_v13, %v8545_v58  ;;  %v19833_v9 = vld [vmem:[#allocation58_spill] sm:$0xff] }
 0x97f   :  { %12719 = vmatprep.mubr.msk.bf16.mxu1 %vm14388_vm2, %v19480_v20 }
 0x980   :  { %v9284_v34 = vadd.f32 %v9199_v7, %v8635_v52  ;;  %v9368_v38 = vmax.f32 %v9283_v44, 0.0  ;;  %v8547_v7 = vmul.f32 %v18673_v36, %v18355_v31 }
 0x981   :  { %v8795_v57 = vpop.f32.mrb[112].mxu1 }
 0x982   :  { %v9369_v24 = vmax.f32 %v9284_v34, 0.0  ;;  %v9108_v26 = vmul.f32 %v18680_v29, %v8795_v57  ;;  %v12613_v21 = vpop.f32.mrb[113].mxu1 }
 0x983   :  { %v8798_v55 = vpop.f32.mrb[114].mxu1 }
 0x984   :  { %v18794_v1 = vpack.c.bf16 %v9369_v24, %v9368_v38  ;;  %v9200_v63 = vadd.f32 %v18694_v3, %v9108_v26  ;;  %v9109_v54 = vmul.f32 %v18680_v29, %v8798_v55  ;;  %v12614_v37 = vpop.f32.mrb[115].mxu1  ;;  %v8638_v38 = vadd.f32 %v18689_v13, %v8546_v51 }
 0x985   :  { %v8639_v55 = vadd.f32 %v18689_v13, %v8547_v7 }
 0x986   :  { %v9285_v23 = vadd.f32 %v9200_v63, %v8636_v48  ;;  %v9201_v53 = vadd.f32 %v18694_v3, %v9109_v54  ;;  %12720 = vmatmul.mubr.msk.bf16.gmra.mrb[220].mxu1 %vm687_vm3, %v19833_v9  ;;  %v19834_v63 = vld [vmem:[#allocation60_spill] sm:$0xff]  ;;  %v8548_v54 = vmul.f32 %v18673_v36, %v18365_v12 }
 0x987   :  { %12723 = vmatprep.mubr.msk.bf16.mxu1 %vm14388_vm2, %v19480_v20 }
 0x988   :  { %v9286_v52 = vadd.f32 %v9201_v53, %v8637_v43  ;;  %v9370_v22 = vmax.f32 %v9285_v23, 0.0  ;;  %v8549_v23 = vmul.f32 %v18673_v36, %v18368_v27  ;;  %v8640_v7 = vadd.f32 %v18689_v13, %v8548_v54 }
 0x989   :  { %v8803_v44 = vpop.f32.mrb[116].mxu1 }
 0x98a   :  { %v9371_v2 = vmax.f32 %v9286_v52, 0.0  ;;  %v9110_v34 = vmul.f32 %v18680_v29, %v8803_v44  ;;  %v12617_v57 = vpop.f32.mrb[117].mxu1 }
 0x98b   :  { %v8806_v58 = vpop.f32.mrb[118].mxu1  ;;  %v8641_v57 = vadd.f32 %v18689_v13, %v8549_v23 }
 0x98c   :  { %v18810_v24 = vpack.c.bf16 %v9371_v2, %v9370_v22  ;;  %v9202_v26 = vadd.f32 %v18694_v3, %v9110_v34  ;;  %v9111_v21 = vmul.f32 %v18680_v29, %v8806_v58  ;;  %v12618_v10 = vpop.f32.mrb[119].mxu1 }
 0x98e   :  { %v9287_v48 = vadd.f32 %v9202_v26, %v8638_v38  ;;  %v9203_v31 = vadd.f32 %v18694_v3, %v9111_v21  ;;  %12724 = vmatmul.mubr.msk.bf16.gmra.mrb[224].mxu1 %vm687_vm3, %v19834_v63  ;;  %v19835_v38 = vld [vmem:[#allocation61_spill] sm:$0xff]  ;;  %v8550_v26 = vmul.f32 %v18673_v36, %v18378_v59 }
 0x98f   :  { %12727 = vmatprep.mubr.msk.bf16.mxu1 %vm14388_vm2, %v19480_v20 }
 0x990   :  { %v9288_v37 = vadd.f32 %v9203_v31, %v8639_v55  ;;  %v9372_v53 = vmax.f32 %v9287_v48, 0.0  ;;  %v8551_v55 = vmul.f32 %v18673_v36, %v18381_v42  ;;  %v19836_v42 = vld [vmem:[#allocation62_spill] sm:$0xff] }
 0x991   :  { %v8811_v43 = vpop.f32.mrb[120].mxu1 }
 0x992   :  { %v9373_v9 = vmax.f32 %v9288_v37, 0.0  ;;  %v9112_v51 = vmul.f32 %v18680_v29, %v8811_v43  ;;  %v12621_v52 = vpop.f32.mrb[121].mxu1  ;;  %v8642_v43 = vadd.f32 %v18689_v13, %v8550_v26  ;;  %v8643_v59 = vadd.f32 %v18689_v13, %v8551_v55 }
 0x993   :  { %v8814_v44 = vpop.f32.mrb[122].mxu1 }
 0x994   :  { %v18826_v22 = vpack.c.bf16 %v9373_v9, %v9372_v53  ;;  %v9204_v2 = vadd.f32 %v18694_v3, %v9112_v51  ;;  %v9113_v34 = vmul.f32 %v18680_v29, %v8814_v44  ;;  %v12622_v12 = vpop.f32.mrb[123].mxu1 }
 0x995   :  { %v8553_v12 = vmul.f32 %v18673_v36, %v18394_v15  ;;  %v19837_v15 = vld [vmem:[#allocation63_spill] sm:$0xff] }
 0x996   :  { %v9289_v58 = vadd.f32 %v9204_v2, %v8640_v7  ;;  %v9205_v27 = vadd.f32 %v18694_v3, %v9113_v34  ;;  %12728 = vmatmul.mubr.msk.bf16.gmra.mrb[228].mxu1 %vm687_vm3, %v19835_v38  ;;  %v8552_v7 = vmul.f32 %v18673_v36, %v18391_v28 }
 0x997   :  { %12731 = vmatprep.mubr.msk.bf16.mxu1 %vm14388_vm2, %v19480_v20  ;;  %v8645_v28 = vadd.f32 %v18689_v13, %v8553_v12 }
 0x998   :  { %v9290_v21 = vadd.f32 %v9205_v27, %v8641_v57  ;;  %v9374_v48 = vmax.f32 %v9289_v58, 0.0 }
 0x999   :  { %v8819_v10 = vpop.f32.mrb[124].mxu1 }
 0x99a   :  { %v9375_v31 = vmax.f32 %v9290_v21, 0.0  ;;  %v9114_v63 = vmul.f32 %v18680_v29, %v8819_v10  ;;  %v12625_v54 = vpop.f32.mrb[125].mxu1  ;;  %v8644_v21 = vadd.f32 %v18689_v13, %v8552_v7 }
 0x99b   :  { %v8822_v37 = vpop.f32.mrb[126].mxu1  ;;  %v8554_v54 = vmul.f32 %v18673_v36, %v18404_v11 }
 0x99c   :  { %v9206_v23 = vadd.f32 %v18694_v3, %v9114_v63  ;;  %v9115_v53 = vmul.f32 %v18680_v29, %v8822_v37  ;;  %v12759_v9 = vpack.c.bf16 %v9375_v31, %v9374_v48  ;;  %v12626_v51 = vpop.f32.mrb[127].mxu1 }
 0x99e   :  { %v9291_v52 = vadd.f32 %v9206_v23, %v8642_v43  ;;  %v9207_v44 = vadd.f32 %v18694_v3, %v9115_v53  ;;  %12732 = vmatmul.mubr.msk.bf16.gmra.mrb[232].mxu1 %vm687_vm3, %v19836_v42  ;;  %12760 = vmatprep.subr.bf16.mxu1 %v12759_v9  ;;  %v8555_v23 = vmul.f32 %v18673_v36, %v18407_v56  ;;  %v19838_v56 = vld [vmem:[#allocation64_spill] sm:$0xff] }
 0x99f   :  { %12762 = vmatpush3.bf16.msra.mxu1 %v18714_v8  ;;  %12735 = vmatprep.mubr.msk.bf16.mxu1 %vm14388_vm2, %v19480_v20 }
 0x9a0   :  { %v9292_v2 = vadd.f32 %v9207_v44, %v8643_v59  ;;  %v9376_v57 = vmax.f32 %v9291_v52, 0.0  ;;  %v8646_v44 = vadd.f32 %v18689_v13, %v8554_v54  ;;  %v8647_v11 = vadd.f32 %v18689_v13, %v8555_v23 }
 0x9a1   :  { %v8827_v34 = vpop.f32.mrb[128].mxu1 }
 0x9a2   :  { %v9377_v58 = vmax.f32 %v9292_v2, 0.0  ;;  %v9116_v27 = vmul.f32 %v18680_v29, %v8827_v34  ;;  %v12629_v38 = vpop.f32.mrb[129].mxu1 }
 0x9a3   :  { %v8830_v26 = vpop.f32.mrb[130].mxu1  ;;  %v8557_v38 = vmul.f32 %v18673_v36, %v18420_v41  ;;  %v19839_v41 = vld [vmem:[#allocation66_spill] sm:$0xff] }
 0x9a4   :  { %v9208_v8 = vadd.f32 %v18694_v3, %v9116_v27  ;;  %v9117_v10 = vmul.f32 %v18680_v29, %v8830_v26  ;;  %v12763_v55 = vpack.c.bf16 %v9377_v58, %v9376_v57  ;;  %v12630_v48 = vpop.f32.mrb[131].mxu1  ;;  %v8556_v57 = vmul.f32 %v18673_v36, %v18417_v16 }
 0x9a5   :  { %v8649_v16 = vadd.f32 %v18689_v13, %v8557_v38 }
 0x9a6   :  { %v9293_v31 = vadd.f32 %v9208_v8, %v8644_v21  ;;  %v9209_v63 = vadd.f32 %v18694_v3, %v9117_v10  ;;  %12736 = vmatmul.mubr.msk.bf16.gmra.mrb[236].mxu1 %vm687_vm3, %v19837_v15  ;;  %12764 = vmatprep.subr.bf16.mxu1 %v12763_v55  ;;  %v8648_v48 = vadd.f32 %v18689_v13, %v8556_v57 }
 0x9a7   :  { %12766 = vmatpush3.bf16.msra.mxu1 %v18730_v6  ;;  %12739 = vmatprep.mubr.msk.bf16.mxu1 %vm14388_vm2, %v19480_v20 }
 0x9a8   :  { %v9294_v37 = vadd.f32 %v9209_v63, %v8645_v28  ;;  %v9378_v53 = vmax.f32 %v9293_v31, 0.0 }
 0x9a9   :  { %v8835_v43 = vpop.f32.mrb[132].mxu1 }
 0x9aa   :  { %v9379_v9 = vmax.f32 %v9294_v37, 0.0  ;;  %v9118_v51 = vmul.f32 %v18680_v29, %v8835_v43  ;;  %v12633_v59 = vpop.f32.mrb[133].mxu1  ;;  %v8558_v37 = vmul.f32 %v18673_v36, %v18430_v25 }
 0x9ab   :  { %v8838_v52 = vpop.f32.mrb[134].mxu1 }
 0x9ac   :  { %v9210_v6 = vadd.f32 %v18694_v3, %v9118_v51  ;;  %v9119_v42 = vmul.f32 %v18680_v29, %v8838_v52  ;;  %v12767_v7 = vpack.c.bf16 %v9379_v9, %v9378_v53  ;;  %v12634_v2 = vpop.f32.mrb[135].mxu1  ;;  %v8559_v53 = vmul.f32 %v18673_v36, %v18433_v39  ;;  %v19840_v39 = vld [vmem:[#allocation67_spill] sm:$0xff] }
 0x9ae   :  { %v9295_v34 = vadd.f32 %v9210_v6, %v8646_v44  ;;  %v9211_v12 = vadd.f32 %v18694_v3, %v9119_v42  ;;  %12740 = vmatmul.mubr.msk.bf16.gmra.mrb[240].mxu1 %vm687_vm3, %v19838_v56  ;;  %12768 = vmatprep.subr.bf16.mxu1 %v12767_v7  ;;  %v8650_v6 = vadd.f32 %v18689_v13, %v8558_v37 }
 0x9af   :  { %12770 = vmatpush3.bf16.msra.mxu1 %v18746_v60  ;;  %12743 = vmatprep.mubr.msk.bf16.mxu1 %vm14388_vm2, %v19480_v20  ;;  %v8651_v25 = vadd.f32 %v18689_v13, %v8559_v53 }
 0x9b0   :  { %v9296_v58 = vadd.f32 %v9211_v12, %v8647_v11  ;;  %v9380_v26 = vmax.f32 %v9295_v34, 0.0  ;;  %v8560_v12 = vmul.f32 %v18673_v36, %v18443_v40 }
 0x9b1   :  { %v8843_v27 = vpop.f32.mrb[136].mxu1 }
 0x9b2   :  { %v9381_v21 = vmax.f32 %v9296_v58, 0.0  ;;  %v9120_v8 = vmul.f32 %v18680_v29, %v8843_v27  ;;  %v12637_v10 = vpop.f32.mrb[137].mxu1  ;;  %v8561_v58 = vmul.f32 %v18673_v36, %v18446_v62  ;;  %v19841_v62 = vld [vmem:[#allocation70_spill] sm:$0xff] }
 0x9b3   :  { %v8846_v55 = vpop.f32.mrb[138].mxu1  ;;  %v8652_v10 = vadd.f32 %v18689_v13, %v8560_v12 }
 0x9b4   :  { %v9212_v60 = vadd.f32 %v18694_v3, %v9120_v8  ;;  %v9121_v28 = vmul.f32 %v18680_v29, %v8846_v55  ;;  %v12771_v31 = vpack.c.bf16 %v9381_v21, %v9380_v26  ;;  %v12638_v63 = vpop.f32.mrb[139].mxu1  ;;  %v8653_v40 = vadd.f32 %v18689_v13, %v8561_v58 }
 0x9b5   :  { %v8562_v63 = vmul.f32 %v18673_v36, %v18453_v32  ;;  %v9444_v32 = vld [vmem:[%s19291_s10 + $0x8] sm:$0xff] }
 0x9b6   :  { %v9297_v15 = vadd.f32 %v9212_v60, %v8648_v48  ;;  %v9213_v54 = vadd.f32 %v18694_v3, %v9121_v28  ;;  %12744 = vmatmul.mubr.msk.bf16.gmra.mrb[244].mxu1 %vm687_vm3, %v19839_v41  ;;  %12772 = vmatprep.subr.bf16.mxu1 %v12771_v31 }
 0x9b7   :  { %12774 = vmatpush3.bf16.msra.mxu1 %v18762_v5  ;;  %12747 = vmatprep.mubr.msk.bf16.mxu1 %vm14388_vm2, %v19480_v20 }
 0x9b8   :  { %v9298_v43 = vadd.f32 %v9213_v54, %v8649_v16  ;;  %v9382_v9 = vmax.f32 %v9297_v15, 0.0  ;;  %v8563_v54 = vmul.f32 %v18673_v36, %v18455_v33 }
 0x9b9   :  { %v8851_v23 = vpop.f32.mrb[140].mxu1 }
 0x9ba   :  { %v9383_v51 = vmax.f32 %v9298_v43, 0.0  ;;  %v9122_v59 = vmul.f32 %v18680_v29, %v8851_v23  ;;  %v12641_v52 = vpop.f32.mrb[141].mxu1  ;;  %v8655_v33 = vadd.f32 %v18689_v13, %v8563_v54 }
 0x9bb   :  { %v8854_v44 = vpop.f32.mrb[142].mxu1 }
 0x9bc   :  { %v9214_v5 = vadd.f32 %v18694_v3, %v9122_v59  ;;  %v9123_v42 = vmul.f32 %v18680_v29, %v8854_v44  ;;  %v12775_v7 = vpack.c.bf16 %v9383_v51, %v9382_v9  ;;  %v12642_v2 = vpop.f32.mrb[143].mxu1  ;;  %v8654_v9 = vadd.f32 %v18689_v13, %v8562_v63 }
 0x9be   :  { %v9299_v11 = vadd.f32 %v9214_v5, %v8650_v6  ;;  %v9215_v34 = vadd.f32 %v18694_v3, %v9123_v42  ;;  %12748 = vmatmul.mubr.msk.bf16.gmra.mrb[248].mxu1 %vm687_vm3, %v19840_v39  ;;  %12776 = vmatprep.subr.bf16.mxu1 %v12775_v7  ;;  %v19842_v5 = vld [vmem:[#allocation69_spill] sm:$0xff]  ;;  %v8564_v42 = vmul.f32 %v18673_v36, %v18460_v35 }
 0x9bf   :  { %12778 = vmatpush3.bf16.msra.mxu1 %v18778_v61  ;;  %12751 = vmatprep.mubr.msk.bf16.mxu1 %vm14388_vm2, %v19480_v20 }
 0x9c0   :  { %v9300_v56 = vadd.f32 %v9215_v34, %v8651_v25  ;;  %v9384_v27 = vmax.f32 %v9299_v11, 0.0  ;;  %v8565_v25 = vmul.f32 %v18673_v36, %v18462_v50  ;;  %v9443_v50 = vld [vmem:[%s19291_s10] sm:$0xff] }
 0x9c1   :  { %v8859_v57 = vpop.f32.mrb[144].mxu1 }
 0x9c2   :  { %v9385_v38 = vmax.f32 %v9300_v56, 0.0  ;;  %v9124_v26 = vmul.f32 %v18680_v29, %v8859_v57  ;;  %v12645_v21 = vpop.f32.mrb[145].mxu1  ;;  %v8656_v57 = vadd.f32 %v18689_v13, %v8564_v42  ;;  %v8657_v35 = vadd.f32 %v18689_v13, %v8565_v25 }
 0x9c3   :  { %v8862_v8 = vpop.f32.mrb[146].mxu1 }
 0x9c4   :  { %v9216_v61 = vadd.f32 %v18694_v3, %v9124_v26  ;;  %v9125_v55 = vmul.f32 %v18680_v29, %v8862_v8  ;;  %v12779_v48 = vpack.c.bf16 %v9385_v38, %v9384_v27  ;;  %v12646_v60 = vpop.f32.mrb[147].mxu1  ;;  %v8566_v8 = vmul.f32 %v18673_v36, %v18468_v4 }
 0x9c6   :  { %v9301_v28 = vadd.f32 %v9216_v61, %v8652_v10  ;;  %v9217_v31 = vadd.f32 %v18694_v3, %v9125_v55  ;;  %12752 = vmatmul.mubr.msk.bf16.gmra.mrb[252].mxu1 %vm687_vm3, %v19841_v62  ;;  %12780 = vmatprep.subr.bf16.mxu1 %v12779_v48  ;;  %v8567_v55 = vmul.f32 %v18673_v36, %v18470_v47  ;;  %v9446_v47 = vld [vmem:[%s19291_s10 + $0x18] sm:$0xff] }
 0x9c7   :  { %12782 = vmatpush3.bf16.msra.mxu1 %v18794_v1  ;;  %12755 = vmatprep.mubr.msk.bf16.mxu1 %vm14388_vm2, %v19480_v20 }
 0x9c8   :  { %v9302_v16 = vadd.f32 %v9217_v31, %v8653_v40  ;;  %v9386_v41 = vmax.f32 %v9301_v28, 0.0 }
 0x9c9   :  { %v8867_v15 = vpop.f32.mrb[148].mxu1 }
 0x9ca   :  { %v9387_v37 = vmax.f32 %v9302_v16, 0.0  ;;  %v9126_v43 = vmul.f32 %v18680_v29, %v8867_v15  ;;  %v12649_v23 = vpop.f32.mrb[149].mxu1  ;;  %v8659_v15 = vadd.f32 %v18689_v13, %v8567_v55 }
 0x9cb   :  { %v8870_v53 = vpop.f32.mrb[150].mxu1 }
 0x9cc   :  { %v9218_v1 = vadd.f32 %v18694_v3, %v9126_v43  ;;  %v9127_v51 = vmul.f32 %v18680_v29, %v8870_v53  ;;  %v12783_v59 = vpack.c.bf16 %v9387_v37, %v9386_v41  ;;  %v12650_v52 = vpop.f32.mrb[151].mxu1  ;;  %v8568_v37 = vmul.f32 %v18673_v36, %v18476_v19 }
 0x9cd   :  { %v8569_v53 = vmul.f32 %v18673_v36, %v18478_v45 }
 0x9ce   :  { %v9303_v44 = vadd.f32 %v9218_v1, %v8654_v9  ;;  %v9219_v6 = vadd.f32 %v18694_v3, %v9127_v51  ;;  %12756 = vmatmul.mubr.msk.bf16.gmra.mrb[0].mxu1 %vm687_vm3, %v19842_v5  ;;  %12784 = vmatprep.subr.bf16.mxu1 %v12783_v59 }
 0x9cf   :  { %12786 = vmatpush3.bf16.msra.mxu1 %v18810_v24  ;;  %9517 = vmatprep.mubr.f32.mxu1 %v9444_v32  ;;  %v8660_v32 = vadd.f32 %v18689_v13, %v8568_v37  ;;  %v8661_v5 = vadd.f32 %v18689_v13, %v8569_v53 }
 0x9d0   :  { %v9304_v7 = vadd.f32 %v9219_v6, %v8655_v33  ;;  %v9388_v11 = vmax.f32 %v9303_v44, 0.0 }
 0x9d1   :  { %v8875_v2 = vpop.f32.mrb[152].mxu1 }
 0x9d2   :  { %v9389_v34 = vmax.f32 %v9304_v7, 0.0  ;;  %v9128_v39 = vmul.f32 %v18680_v29, %v8875_v2  ;;  %v12653_v12 = vpop.f32.mrb[153].mxu1  ;;  %v8570_v7 = vmul.f32 %v18673_v36, %v18484_v17 }
 0x9d3   :  { %v8878_v56 = vpop.f32.mrb[154].mxu1 }
 0x9d4   :  { %v9220_v58 = vadd.f32 %v18694_v3, %v9128_v39  ;;  %v9129_v24 = vmul.f32 %v18680_v29, %v8878_v56  ;;  %v12787_v27 = vpack.c.bf16 %v9389_v34, %v9388_v11  ;;  %v12654_v38 = vpop.f32.mrb[155].mxu1  ;;  %v8571_v11 = vmul.f32 %v18673_v36, %v18486_v49 }
 0x9d6   :  { %v9305_v26 = vadd.f32 %v9220_v58, %v8656_v57  ;;  %v9221_v21 = vadd.f32 %v18694_v3, %v9129_v24  ;;  %12788 = vmatprep.subr.bf16.mxu1 %v12787_v27  ;;  %v8662_v58 = vadd.f32 %v18689_v13, %v8570_v7 }
 0x9d7   :  { %12790 = vmatpush3.bf16.msra.mxu1 %v18826_v22  ;;  %v8658_v22 = vadd.f32 %v18689_v13, %v8566_v8 }
 0x9d8   :  { %v9306_v10 = vadd.f32 %v9221_v21, %v8657_v35  ;;  %v9390_v48 = vmax.f32 %v9305_v26, 0.0  ;;  %v8663_v35 = vadd.f32 %v18689_v13, %v8571_v11  ;;  %v8572_v21 = vmul.f32 %v18673_v36, %v18492_v0 }
 0x9d9   :  { %v8883_v61 = vpop.f32.mrb[156].mxu1 }
 0x9da   :  { %v9391_v60 = vmax.f32 %v9306_v10, 0.0  ;;  %v9130_v40 = vmul.f32 %v18680_v29, %v8883_v61  ;;  %v12657_v28 = vpop.f32.mrb[157].mxu1  ;;  %9518 = vmatmul.mubr.f32.vlgmr.msra.gmra.mrb[4].mxu1 %v9443_v50  ;;  %v8573_v10 = vmul.f32 %v18673_v36, %v18494_v46 }
 0x9db   :  { %v8886_v31 = vpop.f32.mrb[158].mxu1  ;;  %9587 = vmatprep.mubr.f32.mxu1 %v9446_v47  ;;  %v8664_v28 = vadd.f32 %v18689_v13, %v8572_v21  ;;  %v8574_v47 = vmul.f32 %v18673_v36, %v18500_v14  ;;  %v19845_v21 = vld [vmem:[#allocation19_spill] sm:$0xff] }
 0x9dc   :  { %v18962_v62 = vpack.c.bf16 %v9391_v60, %v9390_v48  ;;  %v9222_v63 = vadd.f32 %v18694_v3, %v9130_v40  ;;  %v9131_v4 = vmul.f32 %v18680_v29, %v8886_v31  ;;  %v12658_v16 = vpop.f32.mrb[159].mxu1 }
 0x9de   :  { %v9307_v54 = vadd.f32 %v9222_v63, %v8658_v22  ;;  %v9223_v41 = vadd.f32 %v18694_v3, %v9131_v4  ;;  %v8665_v4 = vadd.f32 %v18689_v13, %v8573_v10 }
 0x9e0   :  { %v9308_v43 = vadd.f32 %v9223_v41, %v8659_v15  ;;  %v9392_v9 = vmax.f32 %v9307_v54, 0.0  ;;  %v8575_v41 = vmul.f32 %v18673_v36, %v18502_v30 }
 0x9e1   :  { %v8891_v23 = vpop.f32.mrb[160].mxu1 }
 0x9e2   :  { %v9393_v1 = vmax.f32 %v9308_v43, 0.0  ;;  %v9132_v51 = vmul.f32 %v18680_v29, %v8891_v23  ;;  %v12661_v59 = vpop.f32.mrb[161].mxu1 }
 0x9e3   :  { %v8894_v52 = vpop.f32.mrb[162].mxu1 }
 0x9e4   :  { %v18977_v33 = vpack.c.bf16 %v9393_v1, %v9392_v9  ;;  %v9224_v44 = vadd.f32 %v18694_v3, %v9132_v51  ;;  %v9133_v6 = vmul.f32 %v18680_v29, %v8894_v52  ;;  %v12662_v19 = vpop.f32.mrb[163].mxu1  ;;  %v8666_v1 = vadd.f32 %v18689_v13, %v8574_v47 }
 0x9e6   :  { %v9309_v42 = vadd.f32 %v9224_v44, %v8660_v32  ;;  %v9225_v45 = vadd.f32 %v18694_v3, %v9133_v6  ;;  %v8667_v32 = vadd.f32 %v18689_v13, %v8575_v41  ;;  %v8576_v6 = vmul.f32 %v18673_v36, %v18508_v18  ;;  %v19847_v41 = vld [vmem:[#allocation2_spill] sm:$0xff] }
 0x9e8   :  { %v9310_v2 = vadd.f32 %v9225_v45, %v8661_v5  ;;  %v9394_v34 = vmax.f32 %v9309_v42, 0.0  ;;  %v19843_v42 = vld [vmem:[#allocation3_spill] sm:$0xff] }
 0x9e9   :  { %v8899_v25 = vpop.f32.mrb[164].mxu1  ;;  %v8577_v45 = vmul.f32 %v18673_v36, %v19843_v42 }
 0x9ea   :  { %v9395_v39 = vmax.f32 %v9310_v2, 0.0  ;;  %v9134_v12 = vmul.f32 %v18680_v29, %v8899_v25  ;;  %v12665_v56 = vpop.f32.mrb[165].mxu1 }
 0x9eb   :  { %v8902_v57 = vpop.f32.mrb[166].mxu1 }
 0x9ec   :  { %v18989_v24 = vpack.c.bf16 %v9395_v39, %v9394_v34  ;;  %v9226_v27 = vadd.f32 %v18694_v3, %v9134_v12  ;;  %v9135_v38 = vmul.f32 %v18680_v29, %v8902_v57  ;;  %v12666_v17 = vpop.f32.mrb[167].mxu1  ;;  %v8668_v39 = vadd.f32 %v18689_v13, %v8576_v6 }
 0x9ed   :  { %v19844_v17 = vld [vmem:[#allocation17_spill] sm:$0xff] }
 0x9ee   :  { %v9311_v26 = vadd.f32 %v9226_v27, %v8662_v58  ;;  %v9227_v49 = vadd.f32 %v18694_v3, %v9135_v38  ;;  %v8669_v58 = vadd.f32 %v18689_v13, %v8577_v45 }
 0x9f0   :  { %v9312_v50 = vadd.f32 %v9227_v49, %v8663_v35  ;;  %v9396_v61 = vmax.f32 %v9311_v26, 0.0  ;;  %v8578_v35 = vmul.f32 %v18673_v36, %v19844_v17 }
 0x9f1   :  { %v8907_v8 = vpop.f32.mrb[168].mxu1 }
 0x9f2   :  { %v9397_v55 = vmax.f32 %v9312_v50, 0.0  ;;  %v9136_v48 = vmul.f32 %v18680_v29, %v8907_v8  ;;  %v12669_v60 = vpop.f32.mrb[169].mxu1  ;;  %v8579_v50 = vmul.f32 %v18673_v36, %v19845_v21  ;;  %v19850_v21 = vld [vmem:[#allocation39_spill] sm:$0xff] }
 0x9f3   :  { %v8910_v40 = vpop.f32.mrb[170].mxu1  ;;  %v8670_v60 = vadd.f32 %v18689_v13, %v8578_v35 }
 0x9f4   :  { %v19001_v31 = vpack.c.bf16 %v9397_v55, %v9396_v61  ;;  %v9228_v22 = vadd.f32 %v18694_v3, %v9136_v48  ;;  %v9137_v63 = vmul.f32 %v18680_v29, %v8910_v40  ;;  %v12670_v0 = vpop.f32.mrb[171].mxu1 }
 0x9f5   :  { %v8671_v0 = vadd.f32 %v18689_v13, %v8579_v50  ;;  %v8584_v50 = vmul.f32 %v18673_v36, %v19850_v21 }
 0x9f6   :  { %v9313_v16 = vadd.f32 %v9228_v22, %v8664_v28  ;;  %v9229_v46 = vadd.f32 %v18694_v3, %v9137_v63 }
 0x9f8   :  { %v9314_v15 = vadd.f32 %v9229_v46, %v8665_v4  ;;  %v9398_v37 = vmax.f32 %v9313_v16, 0.0  ;;  %v19846_v46 = vld [vmem:[#allocation21_spill] sm:$0xff] }
 0x9f9   :  { %v8915_v54 = vpop.f32.mrb[172].mxu1  ;;  %v8580_v47 = vmul.f32 %v18673_v36, %v19846_v46 }
 0x9fa   :  { %v9399_v43 = vmax.f32 %v9314_v15, 0.0  ;;  %v9138_v23 = vmul.f32 %v18680_v29, %v8915_v54  ;;  %v12673_v53 = vpop.f32.mrb[173].mxu1 }
 0x9fb   :  { %v8918_v9 = vpop.f32.mrb[174].mxu1 }
 0x9fc   :  { %v19013_v51 = vpack.c.bf16 %v9399_v43, %v9398_v37  ;;  %v9230_v59 = vadd.f32 %v18694_v3, %v9138_v23  ;;  %v9139_v52 = vmul.f32 %v18680_v29, %v8918_v9  ;;  %v12674_v14 = vpop.f32.mrb[175].mxu1  ;;  %v8581_v37 = vmul.f32 %v18673_v36, %v19847_v41  ;;  %v19852_v41 = vld [vmem:[#allocation41_spill] sm:$0xff] }
 0x9fe   :  { %v9315_v44 = vadd.f32 %v9230_v59, %v8666_v1  ;;  %v9231_v30 = vadd.f32 %v18694_v3, %v9139_v52  ;;  %v8672_v59 = vadd.f32 %v18689_v13, %v8580_v47 }
 0xa00   :  { %v9316_v19 = vadd.f32 %v9231_v30, %v8667_v32  ;;  %v9400_v7 = vmax.f32 %v9315_v44, 0.0  ;;  %v8673_v30 = vadd.f32 %v18689_v13, %v8581_v37 }
 0xa01   :  { %v8923_v5 = vpop.f32.mrb[176].mxu1 }
 0xa02   :  { %v9401_v2 = vmax.f32 %v9316_v19, 0.0  ;;  %v9140_v25 = vmul.f32 %v18680_v29, %v8923_v5  ;;  %v12677_v11 = vpop.f32.mrb[177].mxu1  ;;  %v19848_v5 = vld [vmem:[#allocation37_spill] sm:$0xff] }
 0xa03   :  { %v8926_v34 = vpop.f32.mrb[178].mxu1  ;;  %v8582_v42 = vmul.f32 %v18673_v36, %v19848_v5 }
 0xa04   :  { %v19025_v12 = vpack.c.bf16 %v9401_v2, %v9400_v7  ;;  %v9232_v56 = vadd.f32 %v18694_v3, %v9140_v25  ;;  %v9141_v57 = vmul.f32 %v18680_v29, %v8926_v34  ;;  %v12678_v18 = vpop.f32.mrb[179].mxu1  ;;  %v19849_v2 = vld [vmem:[#allocation4_spill] sm:$0xff] }
 0xa05   :  { %v8583_v25 = vmul.f32 %v18673_v36, %v19849_v2  ;;  %v8674_v18 = vadd.f32 %v18689_v13, %v8582_v42  ;;  %v19854_v2 = vld [vmem:[#allocation43_spill] sm:$0xff] }
 0xa06   :  { %v9317_v27 = vadd.f32 %v9232_v56, %v8668_v39  ;;  %v9233_v38 = vadd.f32 %v18694_v3, %v9141_v57 }
 0xa07   :  { %v8675_v35 = vadd.f32 %v18689_v13, %v8583_v25 }
 0xa08   :  { %v9318_v26 = vadd.f32 %v9233_v38, %v8669_v58  ;;  %v9402_v8 = vmax.f32 %v9317_v27, 0.0 }
 0xa09   :  { %v8931_v49 = vpop.f32.mrb[180].mxu1 }
 0xa0a   :  { %v9403_v10 = vmax.f32 %v9318_v26, 0.0  ;;  %v9142_v61 = vmul.f32 %v18680_v29, %v8931_v49  ;;  %v12681_v55 = vpop.f32.mrb[181].mxu1 }
 0xa0b   :  { %v8934_v48 = vpop.f32.mrb[182].mxu1 }
 0xa0c   :  { %v19037_v40 = vpack.c.bf16 %v9403_v10, %v9402_v8  ;;  %v9234_v28 = vadd.f32 %v18694_v3, %v9142_v61  ;;  %v9143_v22 = vmul.f32 %v18680_v29, %v8934_v48  ;;  %v12682_v63 = vpop.f32.mrb[183].mxu1  ;;  %v19851_v61 = vld [vmem:[#allocation5_spill] sm:$0xff] }
 0xa0d   :  { %v8585_v55 = vmul.f32 %v18673_v36, %v19851_v61  ;;  %v19080_v36 = vld [vmem:[%s19287_s8] ss:$0 sm:$0xff] }
 0xa0e   :  { %v9319_v4 = vadd.f32 %v9234_v28, %v8670_v60  ;;  %v9235_v16 = vadd.f32 %v18694_v3, %v9143_v22  ;;  %v8586_v37 = vmul.f32 %v19080_v36, %v19852_v41  ;;  %v8588_v25 = vmul.f32 %v19080_v36, %v19854_v2 }
 0xa0f   :  { %v8677_v47 = vadd.f32 %v18689_v13, %v8585_v55 }
 0xa10   :  { %v9320_v15 = vadd.f32 %v9235_v16, %v8671_v0  ;;  %v9404_v43 = vmax.f32 %v9319_v4, 0.0  ;;  %v8676_v0 = vadd.f32 %v18689_v13, %v8584_v50 }
 0xa11   :  { %v8939_v54 = vpop.f32.mrb[184].mxu1 }
 0xa12   :  { %v9405_v23 = vmax.f32 %v9320_v15, 0.0  ;;  %v9144_v53 = vmul.f32 %v18680_v29, %v8939_v54  ;;  %v12685_v9 = vpop.f32.mrb[185].mxu1 }
 0xa13   :  { %v8942_v1 = vpop.f32.mrb[186].mxu1 }
 0xa14   :  { %v19049_v52 = vpack.c.bf16 %v9405_v23, %v9404_v43  ;;  %v9236_v14 = vadd.f32 %v18694_v3, %v9144_v53  ;;  %v9145_v32 = vmul.f32 %v18680_v29, %v8942_v1  ;;  %v12686_v44 = vpop.f32.mrb[187].mxu1  ;;  %v19853_v23 = vld [vmem:[#allocation6_spill] sm:$0xff] }
 0xa15   :  { %v8587_v53 = vmul.f32 %v19080_v36, %v19853_v23  ;;  %v19101_v44 = vld [vmem:[%s19290_s7] ss:$0 sm:$0xff] }
 0xa16   :  { %v9321_v6 = vadd.f32 %v9236_v14, %v8672_v59  ;;  %v9237_v19 = vadd.f32 %v18694_v3, %v9145_v32  ;;  %v19095_v14 = vld [vmem:[%s19289_s9] ss:$0 sm:$0xff] }
 0xa17   :  { %v8678_v32 = vadd.f32 %v19095_v14, %v8586_v37  ;;  %v8679_v42 = vadd.f32 %v19095_v14, %v8587_v53 }
 0xa18   :  { %v9322_v45 = vadd.f32 %v9237_v19, %v8673_v30  ;;  %v9406_v11 = vmax.f32 %v9321_v6, 0.0 }
 0xa19   :  { %v8947_v7 = vpop.f32.mrb[188].mxu1 }
 0xa1a   :  { %v9407_v34 = vmax.f32 %v9322_v45, 0.0  ;;  %v9146_v39 = vmul.f32 %v18680_v29, %v8947_v7  ;;  %v12689_v56 = vpop.f32.mrb[189].mxu1 }
 0xa1b   :  { %v8950_v57 = vpop.f32.mrb[190].mxu1 }
 0xa1c   :  { %v9238_v58 = vadd.f32 %v18694_v3, %v9146_v39  ;;  %v9147_v27 = vmul.f32 %v18680_v29, %v8950_v57  ;;  %v12791_v38 = vpack.c.bf16 %v9407_v34, %v9406_v11  ;;  %v12690_v17 = vpop.f32.mrb[191].mxu1  ;;  %v19855_v39 = vld [vmem:[#allocation48_spill] sm:$0xff] }
 0xa1d   :  { %v8589_v56 = vmul.f32 %v19080_v36, %v19855_v39  ;;  %v8680_v17 = vadd.f32 %v19095_v14, %v8588_v25  ;;  %v19860_v25 = vld [vmem:[#allocation50_spill] sm:$0xff] }
 0xa1e   :  { %v9323_v26 = vadd.f32 %v9238_v58, %v8674_v18  ;;  %v9239_v49 = vadd.f32 %v18694_v3, %v9147_v27  ;;  %12792 = vmatprep.subr.bf16.mxu1 %v12791_v38 }
 0xa1f   :  { %12794 = vmatpush3.bf16.msra.mxu1 %v18962_v62  ;;  %v8681_v21 = vadd.f32 %v19095_v14, %v8589_v56  ;;  %v19861_v56 = vld [vmem:[#allocation57_spill] sm:$0xff] }
 0xa20   :  { %v9324_v8 = vadd.f32 %v9239_v49, %v8675_v35  ;;  %v9408_v48 = vmax.f32 %v9323_v26, 0.0 }
 0xa21   :  { %v8955_v10 = vpop.f32.mrb[192].mxu1 }
 0xa22   :  { %v9409_v60 = vmax.f32 %v9324_v8, 0.0  ;;  %v9148_v28 = vmul.f32 %v18680_v29, %v8955_v10  ;;  %v12693_v22 = vpop.f32.mrb[193].mxu1  ;;  %v19856_v10 = vld [vmem:[#allocation45_spill] sm:$0xff] }
 0xa23   :  { %v8958_v63 = vpop.f32.mrb[194].mxu1  ;;  %v8590_v61 = vmul.f32 %v19080_v36, %v19856_v10  ;;  %v19862_v10 = vld [vmem:[#allocation53_spill] sm:$0xff] }
 0xa24   :  { %v9240_v4 = vadd.f32 %v18694_v3, %v9148_v28  ;;  %v9149_v62 = vmul.f32 %v18680_v29, %v8958_v63  ;;  %v12795_v16 = vpack.c.bf16 %v9409_v60, %v9408_v48  ;;  %v12694_v46 = vpop.f32.mrb[195].mxu1  ;;  %v19857_v60 = vld [vmem:[#allocation51_spill] sm:$0xff] }
 0xa25   :  { %v8591_v28 = vmul.f32 %v19080_v36, %v19857_v60  ;;  %v19863_v60 = vld [vmem:[#allocation56_spill] sm:$0xff] }
 0xa26   :  { %v9325_v15 = vadd.f32 %v9240_v4, %v8676_v0  ;;  %v9241_v54 = vadd.f32 %v18694_v3, %v9149_v62  ;;  %12796 = vmatprep.subr.bf16.mxu1 %v12795_v16  ;;  %v19089_v3 = vld [vmem:[%s19288_s6] ss:$0 sm:$0xff]  ;;  %v8682_v16 = vadd.f32 %v19095_v14, %v8590_v61  ;;  %v8596_v61 = vmul.f32 %v19080_v36, %v19862_v10 }
 0xa27   :  { %12798 = vmatpush3.bf16.msra.mxu1 %v18977_v33 }
 0xa28   :  { %v9326_v43 = vadd.f32 %v9241_v54, %v8677_v47  ;;  %v9410_v13 = vmax.f32 %v9325_v15, 0.0  ;;  %v8683_v54 = vadd.f32 %v19095_v14, %v8591_v28  ;;  %v8597_v28 = vmul.f32 %v19080_v36, %v19863_v60 }
 0xa29   :  { %v8963_v29 = vpop.f32.mrb[196].mxu1 }
 0xa2a   :  { %v9411_v9 = vmax.f32 %v9326_v43, 0.0  ;;  %v9150_v33 = vmul.f32 %v19089_v3, %v8963_v29  ;;  %v12697_v1 = vpop.f32.mrb[197].mxu1  ;;  %v19858_v43 = vld [vmem:[#allocation47_spill] sm:$0xff] }
 0xa2b   :  { %v8966_v59 = vpop.f32.mrb[198].mxu1  ;;  %v8592_v29 = vmul.f32 %v19080_v36, %v19858_v43  ;;  %v19864_v43 = vld [vmem:[#allocation59_spill] sm:$0xff] }
 0xa2c   :  { %v9242_v30 = vadd.f32 %v19101_v44, %v9150_v33  ;;  %v9151_v6 = vmul.f32 %v19089_v3, %v8966_v59  ;;  %v12799_v19 = vpack.c.bf16 %v9411_v9, %v9410_v13  ;;  %v12698_v5 = vpop.f32.mrb[199].mxu1  ;;  %v19859_v13 = vld [vmem:[#allocation54_spill] sm:$0xff] }
 0xa2d   :  { %v8593_v9 = vmul.f32 %v19080_v36, %v19859_v13  ;;  %v9448_v13 = vld [vmem:[%s19291_s10 + $0x28] sm:$0xff] }
 0xa2e   :  { %v9327_v45 = vadd.f32 %v9242_v30, %v8678_v32  ;;  %v9243_v7 = vadd.f32 %v19101_v44, %v9151_v6  ;;  %12800 = vmatprep.subr.bf16.mxu1 %v12799_v19  ;;  %v8684_v6 = vadd.f32 %v19095_v14, %v8592_v29  ;;  %v8598_v29 = vmul.f32 %v19080_v36, %v19864_v43  ;;  %v19870_v43 = vld [vmem:[#allocation7_spill] sm:$0xff] }
 0xa2f   :  { %12802 = vmatpush3.bf16.msra.mxu1 %v18989_v24 }
 0xa30   :  { %v9328_v11 = vadd.f32 %v9243_v7, %v8679_v42  ;;  %v9412_v57 = vmax.f32 %v9327_v45, 0.0  ;;  %v8685_v45 = vadd.f32 %v19095_v14, %v8593_v9 }
 0xa31   :  { %v8971_v34 = vpop.f32.mrb[200].mxu1 }
 0xa32   :  { %v9413_v18 = vmax.f32 %v9328_v11, 0.0  ;;  %v9152_v58 = vmul.f32 %v19089_v3, %v8971_v34  ;;  %v12701_v27 = vpop.f32.mrb[201].mxu1  ;;  %v8594_v11 = vmul.f32 %v19080_v36, %v19860_v25 }
 0xa33   :  { %v8974_v38 = vpop.f32.mrb[202].mxu1 }
 0xa34   :  { %v9244_v35 = vadd.f32 %v19101_v44, %v9152_v58  ;;  %v9153_v24 = vmul.f32 %v19089_v3, %v8974_v38  ;;  %v12803_v26 = vpack.c.bf16 %v9413_v18, %v9412_v57  ;;  %v12702_v49 = vpop.f32.mrb[203].mxu1  ;;  %v8595_v57 = vmul.f32 %v19080_v36, %v19861_v56 }
 0xa36   :  { %v9329_v50 = vadd.f32 %v9244_v35, %v8680_v17  ;;  %v9245_v8 = vadd.f32 %v19101_v44, %v9153_v24  ;;  %12804 = vmatprep.subr.bf16.mxu1 %v12803_v26  ;;  %v8686_v35 = vadd.f32 %v19095_v14, %v8594_v11  ;;  %v19866_v11 = vld [vmem:[#allocation24_spill] sm:$0xff] }
 0xa37   :  { %12806 = vmatpush3.bf16.msra.mxu1 %v19001_v31 }
 0xa38   :  { %v9330_v55 = vadd.f32 %v9245_v8, %v8681_v21  ;;  %v9414_v22 = vmax.f32 %v9329_v50, 0.0  ;;  %v8687_v21 = vadd.f32 %v19095_v14, %v8595_v57  ;;  %v19867_v57 = vld [vmem:[#allocation71_spill] sm:$0xff] }
 0xa39   :  { %v8979_v48 = vpop.f32.mrb[204].mxu1 }
 0xa3a   :  { %v9415_v63 = vmax.f32 %v9330_v55, 0.0  ;;  %v9154_v0 = vmul.f32 %v19089_v3, %v8979_v48  ;;  %v12705_v4 = vpop.f32.mrb[205].mxu1 }
 0xa3b   :  { %v8982_v62 = vpop.f32.mrb[206].mxu1 }
 0xa3c   :  { %v9246_v46 = vadd.f32 %v19101_v44, %v9154_v0  ;;  %v9155_v31 = vmul.f32 %v19089_v3, %v8982_v62  ;;  %v12807_v47 = vpack.c.bf16 %v9415_v63, %v9414_v22  ;;  %v12706_v15 = vpop.f32.mrb[207].mxu1 }
 0xa3d   :  { %v8689_v15 = vadd.f32 %v19095_v14, %v8597_v28  ;;  %v19869_v28 = vld [vmem:[#allocation73_spill] sm:$0xff] }
 0xa3e   :  { %v9331_v41 = vadd.f32 %v9246_v46, %v8682_v16  ;;  %v9247_v37 = vadd.f32 %v19101_v44, %v9155_v31  ;;  %12808 = vmatprep.subr.bf16.mxu1 %v12807_v47  ;;  %v8688_v16 = vadd.f32 %v19095_v14, %v8596_v61  ;;  %v19868_v61 = vld [vmem:[#allocation72_spill] sm:$0xff] }
 0xa3f   :  { %12810 = vmatpush3.bf16.msra.mxu1 %v19013_v51 }
 0xa40   :  { %v9332_v23 = vadd.f32 %v9247_v37, %v8683_v54  ;;  %v9416_v33 = vmax.f32 %v9331_v41, 0.0  ;;  %v9445_v37 = vld [vmem:[%s19291_s10 + $0x10] sm:$0xff] }
 0xa41   :  { %v8987_v53 = vpop.f32.mrb[208].mxu1 }
 0xa42   :  { %v9417_v1 = vmax.f32 %v9332_v23, 0.0  ;;  %v9156_v59 = vmul.f32 %v19089_v3, %v8987_v53  ;;  %v12709_v32 = vpop.f32.mrb[209].mxu1  ;;  %v14389_v53 = vmov 0.0|0.0  }
 0xa43   :  { %v8990_v30 = vpop.f32.mrb[210].mxu1 }
 0xa44   :  { %v9248_v19 = vadd.f32 %v19101_v44, %v9156_v59  ;;  %v9157_v51 = vmul.f32 %v19089_v3, %v8990_v30  ;;  %v12811_v5 = vpack.c.bf16 %v9417_v1, %v9416_v33  ;;  %v12710_v42 = vpop.f32.mrb[211].mxu1  ;;  %v19865_v33 = vld [vmem:[#allocation65_spill] sm:$0xff] }
 0xa46   :  { %v9333_v7 = vadd.f32 %v9248_v19, %v8684_v6  ;;  %v9249_v2 = vadd.f32 %v19101_v44, %v9157_v51  ;;  %12812 = vmatprep.subr.bf16.mxu1 %v12811_v5  ;;  %v8690_v19 = vadd.f32 %v19095_v14, %v8598_v29  ;;  %v8604_v29 = vmul.f32 %v19080_v36, %v19870_v43 }
 0xa47   :  { %12814 = vmatpush3.bf16.msra.mxu1 %v19025_v12 }
 0xa48   :  { %v9334_v34 = vadd.f32 %v9249_v2, %v8685_v45  ;;  %v9418_v18 = vmax.f32 %v9333_v7, 0.0 }
 0xa49   :  { %v8995_v39 = vpop.f32.mrb[212].mxu1 }
 0xa4a   :  { %v9419_v58 = vmax.f32 %v9334_v34, 0.0  ;;  %v9158_v27 = vmul.f32 %v19089_v3, %v8995_v39  ;;  %v12713_v38 = vpop.f32.mrb[213].mxu1  ;;  %v8600_v34 = vmul.f32 %v19080_v36, %v19866_v11 }
 0xa4b   :  { %v8998_v17 = vpop.f32.mrb[214].mxu1 }
 0xa4c   :  { %v9250_v24 = vadd.f32 %v19101_v44, %v9158_v27  ;;  %v9159_v12 = vmul.f32 %v19089_v3, %v8998_v17  ;;  %v12815_v26 = vpack.c.bf16 %v9419_v58, %v9418_v18  ;;  %v12714_v49 = vpop.f32.mrb[215].mxu1  ;;  %v8601_v18 = vmul.f32 %v19080_v36, %v19867_v57 }
 0xa4e   :  { %v9335_v50 = vadd.f32 %v9250_v24, %v8686_v35  ;;  %v9251_v8 = vadd.f32 %v19101_v44, %v9159_v12  ;;  %12816 = vmatprep.subr.bf16.mxu1 %v12815_v26  ;;  %v8692_v24 = vadd.f32 %v19095_v14, %v8600_v34 }
 0xa4f   :  { %12818 = vmatpush3.bf16.msra.mxu1 %v19037_v40 }
 0xa50   :  { %v9336_v55 = vadd.f32 %v9251_v8, %v8687_v21  ;;  %v9420_v22 = vmax.f32 %v9335_v50, 0.0  ;;  %v8693_v50 = vadd.f32 %v19095_v14, %v8601_v18 }
 0xa51   :  { %v9003_v48 = vpop.f32.mrb[216].mxu1 }
 0xa52   :  { %v9421_v63 = vmax.f32 %v9336_v55, 0.0  ;;  %v9160_v0 = vmul.f32 %v19089_v3, %v9003_v48  ;;  %v12717_v4 = vpop.f32.mrb[217].mxu1  ;;  %v8602_v55 = vmul.f32 %v19080_v36, %v19868_v61 }
 0xa53   :  { %v9006_v62 = vpop.f32.mrb[218].mxu1 }
 0xa54   :  { %v9252_v46 = vadd.f32 %v19101_v44, %v9160_v0  ;;  %v9161_v40 = vmul.f32 %v19089_v3, %v9006_v62  ;;  %v12819_v31 = vpack.c.bf16 %v9421_v63, %v9420_v22  ;;  %v12718_v47 = vpop.f32.mrb[219].mxu1  ;;  %v8603_v22 = vmul.f32 %v19080_v36, %v19869_v28 }
 0xa56   :  { %v9337_v54 = vadd.f32 %v9252_v46, %v8688_v16  ;;  %v9253_v41 = vadd.f32 %v19101_v44, %v9161_v40  ;;  %12820 = vmatprep.subr.bf16.mxu1 %v12819_v31  ;;  %v8694_v46 = vadd.f32 %v19095_v14, %v8602_v55 }
 0xa57   :  { %12822 = vmatpush3.bf16.msra.mxu1 %v19049_v52  ;;  %v8599_v52 = vmul.f32 %v19080_v36, %v19865_v33 }
 0xa58   :  { %v9338_v23 = vadd.f32 %v9253_v41, %v8689_v15  ;;  %12823 = vmatprep.subr.bf16.mxu1 %v14389_v53  ;;  %v9422_v1 = vmax.f32 %v9337_v54, 0.0  ;;  %v8695_v54 = vadd.f32 %v19095_v14, %v8603_v22 }
 0xa59   :  { %v9011_v9 = vpop.f32.mrb[220].mxu1  ;;  %v8691_v7 = vadd.f32 %v19095_v14, %v8599_v52 }
 0xa5a   :  { %v9423_v59 = vmax.f32 %v9338_v23, 0.0  ;;  %v9162_v32 = vmul.f32 %v19089_v3, %v9011_v9  ;;  %v12721_v30 = vpop.f32.mrb[221].mxu1  ;;  %9588 = vmatmul.mubr.f32.vlgmr.msra.gmra.mrb[6].mxu1 %v9445_v37  ;;  %v19871_v9 = vld [vmem:[#allocation74_spill] sm:$0xff] }
 0xa5b   :  { %v9014_v6 = vpop.f32.mrb[222].mxu1  ;;  %10290 = vmatprep.mubr.msk.f32.mxu1 %vm9449_vm7, %v9448_v13  ;;  %v8605_v33 = vmul.f32 %v19080_v36, %v19871_v9 }
 0xa5c   :  { %v12824_v51 = vpack.c.bf16 %v9423_v59, %v9422_v1  ;;  %v9254_v5 = vadd.f32 %v19101_v44, %v9162_v32  ;;  %v9163_v42 = vmul.f32 %v19089_v3, %v9014_v6  ;;  %v12722_v45 = vpop.f32.mrb[223].mxu1  ;;  %v8696_v6 = vadd.f32 %v19095_v14, %v8604_v29 }
 0xa5d   :  { %v8697_v45 = vadd.f32 %v19095_v14, %v8605_v33 }
 0xa5e   :  { %v9339_v2 = vadd.f32 %v9254_v5, %v8690_v19  ;;  %v9255_v25 = vadd.f32 %v19101_v44, %v9163_v42  ;;  %12825 = vmatpush1.bf16.msra.mxu1 %v12824_v51 }
 0xa5f   :  { %12826 = vmatprep.subr.bf16.mxu1 %v14389_v53 }
 0xa60   :  { %v9340_v39 = vadd.f32 %v9255_v25, %v8691_v7  ;;  %v9424_v58 = vmax.f32 %v9339_v2, 0.0  ;;  %v19872_v25 = vld [vmem:[#allocation75_spill] sm:$0xff] }
 0xa61   :  { %v9019_v56 = vpop.f32.mrb[224].mxu1  ;;  %v8606_v11 = vmul.f32 %v19080_v36, %v19872_v25 }
 0xa62   :  { %v9425_v27 = vmax.f32 %v9340_v39, 0.0  ;;  %v9164_v38 = vmul.f32 %v19089_v3, %v9019_v56  ;;  %v12725_v17 = vpop.f32.mrb[225].mxu1  ;;  %v19873_v56 = vld [vmem:[#allocation76_spill] sm:$0xff] }
 0xa63   :  { %v9022_v35 = vpop.f32.mrb[226].mxu1  ;;  %v8607_v57 = vmul.f32 %v19080_v36, %v19873_v56 }
 0xa64   :  { %v12827_v12 = vpack.c.bf16 %v9425_v27, %v9424_v58  ;;  %v9256_v26 = vadd.f32 %v19101_v44, %v9164_v38  ;;  %v9165_v49 = vmul.f32 %v19089_v3, %v9022_v35  ;;  %v12726_v21 = vpop.f32.mrb[227].mxu1  ;;  %v8698_v35 = vadd.f32 %v19095_v14, %v8606_v11 }
 0xa65   :  { %v8699_v21 = vadd.f32 %v19095_v14, %v8607_v57 }
 0xa66   :  { %v9341_v8 = vadd.f32 %v9256_v26, %v8692_v24  ;;  %v9257_v10 = vadd.f32 %v19101_v44, %v9165_v49  ;;  %12828 = vmatpush1.bf16.msra.mxu1 %v12827_v12 }
 0xa67   :  { %12829 = vmatprep.subr.bf16.mxu1 %v14389_v53 }
 0xa68   :  { %v9342_v48 = vadd.f32 %v9257_v10, %v8693_v50  ;;  %v9426_v63 = vmax.f32 %v9341_v8, 0.0  ;;  %v19874_v10 = vld [vmem:[#allocation77_spill] sm:$0xff] }
 0xa69   :  { %v9027_v60 = vpop.f32.mrb[228].mxu1  ;;  %v8608_v61 = vmul.f32 %v19080_v36, %v19874_v10 }
 0xa6a   :  { %v9427_v0 = vmax.f32 %v9342_v48, 0.0  ;;  %v9166_v4 = vmul.f32 %v19089_v3, %v9027_v60  ;;  %v12729_v62 = vpop.f32.mrb[229].mxu1  ;;  %v19875_v60 = vld [vmem:[#allocation78_spill] sm:$0xff] }
 0xa6b   :  { %v9030_v16 = vpop.f32.mrb[230].mxu1  ;;  %v8609_v28 = vmul.f32 %v19080_v36, %v19875_v60 }
 0xa6c   :  { %v12830_v40 = vpack.c.bf16 %v9427_v0, %v9426_v63  ;;  %v9258_v31 = vadd.f32 %v19101_v44, %v9166_v4  ;;  %v9167_v47 = vmul.f32 %v19089_v3, %v9030_v16  ;;  %v12730_v15 = vpop.f32.mrb[231].mxu1  ;;  %v8700_v16 = vadd.f32 %v19095_v14, %v8608_v61 }
 0xa6d   :  { %v8701_v15 = vadd.f32 %v19095_v14, %v8609_v28 }
 0xa6e   :  { %v9343_v41 = vadd.f32 %v9258_v31, %v8694_v46  ;;  %v9259_v37 = vadd.f32 %v19101_v44, %v9167_v47  ;;  %12831 = vmatpush1.bf16.msra.mxu1 %v12830_v40 }
 0xa6f   :  { %12832 = vmatprep.subr.bf16.mxu1 %v14389_v53 }
 0xa70   :  { %v9344_v23 = vadd.f32 %v9259_v37, %v8695_v54  ;;  %v9428_v52 = vmax.f32 %v9343_v41, 0.0  ;;  %v19876_v37 = vld [vmem:[#allocation79_spill] sm:$0xff] }
 0xa71   :  { %v9035_v13 = vpop.f32.mrb[232].mxu1  ;;  %v8610_v43 = vmul.f32 %v19080_v36, %v19876_v37 }
 0xa72   :  { %v9429_v1 = vmax.f32 %v9344_v23, 0.0  ;;  %v9168_v59 = vmul.f32 %v19089_v3, %v9035_v13  ;;  %v12733_v32 = vpop.f32.mrb[233].mxu1  ;;  %v19877_v13 = vld [vmem:[#allocation80_spill] sm:$0xff] }
 0xa73   :  { %v9038_v30 = vpop.f32.mrb[234].mxu1  ;;  %v8611_v9 = vmul.f32 %v19080_v36, %v19877_v13 }
 0xa74   :  { %v12833_v19 = vpack.c.bf16 %v9429_v1, %v9428_v52  ;;  %v9260_v51 = vadd.f32 %v19101_v44, %v9168_v59  ;;  %v9169_v5 = vmul.f32 %v19089_v3, %v9038_v30  ;;  %v12734_v42 = vpop.f32.mrb[235].mxu1  ;;  %v8702_v30 = vadd.f32 %v19095_v14, %v8610_v43 }
 0xa75   :  { %v8703_v42 = vadd.f32 %v19095_v14, %v8611_v9 }
 0xa76   :  { %v9345_v7 = vadd.f32 %v9260_v51, %v8696_v6  ;;  %v9261_v2 = vadd.f32 %v19101_v44, %v9169_v5  ;;  %12834 = vmatpush1.bf16.msra.mxu1 %v12833_v19 }
 0xa77   :  { %12835 = vmatprep.subr.bf16.mxu1 %v14389_v53 }
 0xa78   :  { %v9346_v34 = vadd.f32 %v9261_v2, %v8697_v45  ;;  %v9430_v18 = vmax.f32 %v9345_v7, 0.0  ;;  %v19878_v2 = vld [vmem:[#allocation81_spill] sm:$0xff] }
 0xa79   :  { %v9043_v39 = vpop.f32.mrb[236].mxu1  ;;  %v8612_v25 = vmul.f32 %v19080_v36, %v19878_v2 }
 0xa7a   :  { %v9431_v58 = vmax.f32 %v9346_v34, 0.0  ;;  %v9170_v27 = vmul.f32 %v19089_v3, %v9043_v39  ;;  %v12737_v38 = vpop.f32.mrb[237].mxu1  ;;  %v19879_v39 = vld [vmem:[#allocation82_spill] sm:$0xff] }
 0xa7b   :  { %v9046_v17 = vpop.f32.mrb[238].mxu1  ;;  %v8613_v56 = vmul.f32 %v19080_v36, %v19879_v39 }
 0xa7c   :  { %v12836_v24 = vpack.c.bf16 %v9431_v58, %v9430_v18  ;;  %v9262_v12 = vadd.f32 %v19101_v44, %v9170_v27  ;;  %v9171_v26 = vmul.f32 %v19089_v3, %v9046_v17  ;;  %v12738_v49 = vpop.f32.mrb[239].mxu1  ;;  %v8704_v17 = vadd.f32 %v19095_v14, %v8612_v25 }
 0xa7d   :  { %v8705_v49 = vadd.f32 %v19095_v14, %v8613_v56 }
 0xa7e   :  { %v9347_v50 = vadd.f32 %v9262_v12, %v8698_v35  ;;  %v9263_v8 = vadd.f32 %v19101_v44, %v9171_v26  ;;  %12837 = vmatpush1.bf16.msra.mxu1 %v12836_v24 }
 0xa7f   :  { %12838 = vmatprep.subr.bf16.mxu1 %v14389_v53 }
 0xa80   :  { %v9348_v55 = vadd.f32 %v9263_v8, %v8699_v21  ;;  %v9432_v22 = vmax.f32 %v9347_v50, 0.0  ;;  %v19880_v8 = vld [vmem:[#allocation83_spill] sm:$0xff] }
 0xa81   :  { %v9051_v48 = vpop.f32.mrb[240].mxu1  ;;  %v8614_v10 = vmul.f32 %v19080_v36, %v19880_v8 }
 0xa82   :  { %v9433_v63 = vmax.f32 %v9348_v55, 0.0  ;;  %v9172_v0 = vmul.f32 %v19089_v3, %v9051_v48  ;;  %v12741_v4 = vpop.f32.mrb[241].mxu1  ;;  %v19881_v48 = vld [vmem:[#allocation84_spill] sm:$0xff] }
 0xa83   :  { %v9054_v62 = vpop.f32.mrb[242].mxu1  ;;  %v8615_v60 = vmul.f32 %v19080_v36, %v19881_v48 }
 0xa84   :  { %v12839_v46 = vpack.c.bf16 %v9433_v63, %v9432_v22  ;;  %v9264_v40 = vadd.f32 %v19101_v44, %v9172_v0  ;;  %v9173_v31 = vmul.f32 %v19089_v3, %v9054_v62  ;;  %v12742_v47 = vpop.f32.mrb[243].mxu1  ;;  %v8706_v62 = vadd.f32 %v19095_v14, %v8614_v10 }
 0xa85   :  { %v8707_v47 = vadd.f32 %v19095_v14, %v8615_v60 }
 0xa86   :  { %v9349_v54 = vadd.f32 %v9264_v40, %v8700_v16  ;;  %v9265_v41 = vadd.f32 %v19101_v44, %v9173_v31  ;;  %12840 = vmatpush1.bf16.msra.mxu1 %v12839_v46 }
 0xa87   :  { %12841 = vmatprep.subr.bf16.mxu1 %v14389_v53 }
 0xa88   :  { %v9350_v29 = vadd.f32 %v9265_v41, %v8701_v15  ;;  %v9434_v33 = vmax.f32 %v9349_v54, 0.0  ;;  %v19882_v41 = vld [vmem:[#allocation85_spill] sm:$0xff] }
 0xa89   :  { %v9059_v23 = vpop.f32.mrb[244].mxu1  ;;  %v8616_v37 = vmul.f32 %v19080_v36, %v19882_v41  ;;  %v9447_v36 = vld [vmem:[%s19291_s10 + $0x20] sm:$0xff] }
 0xa8a   :  { %v9435_v52 = vmax.f32 %v9350_v29, 0.0  ;;  %v9174_v1 = vmul.f32 %v19089_v3, %v9059_v23  ;;  %v12745_v59 = vpop.f32.mrb[245].mxu1 }
 0xa8b   :  { %v9062_v32 = vpop.f32.mrb[246].mxu1 }
 0xa8c   :  { %v12842_v6 = vpack.c.bf16 %v9435_v52, %v9434_v33  ;;  %v9266_v19 = vadd.f32 %v19101_v44, %v9174_v1  ;;  %v9175_v51 = vmul.f32 %v19089_v3, %v9062_v32  ;;  %v12746_v5 = vpop.f32.mrb[247].mxu1  ;;  %v8708_v1 = vadd.f32 %v19095_v14, %v8616_v37 }
 0xa8e   :  { %v9351_v45 = vadd.f32 %v9266_v19, %v8702_v30  ;;  %v9267_v7 = vadd.f32 %v19101_v44, %v9175_v51  ;;  %12843 = vmatpush1.bf16.msra.mxu1 %v12842_v6 }
 0xa8f   :  { %12844 = vmatprep.subr.bf16.mxu1 %v14389_v53 }
 0xa90   :  { %v9352_v11 = vadd.f32 %v9267_v7, %v8703_v42  ;;  %v9436_v57 = vmax.f32 %v9351_v45, 0.0 }
 0xa91   :  { %v9067_v34 = vpop.f32.mrb[248].mxu1 }
 0xa92   :  { %v9437_v18 = vmax.f32 %v9352_v11, 0.0  ;;  %v9176_v58 = vmul.f32 %v19089_v3, %v9067_v34  ;;  %v12749_v27 = vpop.f32.mrb[249].mxu1 }
 0xa93   :  { %v9070_v38 = vpop.f32.mrb[250].mxu1 }
 0xa94   :  { %v12845_v35 = vpack.c.bf16 %v9437_v18, %v9436_v57  ;;  %v9268_v24 = vadd.f32 %v19101_v44, %v9176_v58  ;;  %v9177_v12 = vmul.f32 %v19089_v3, %v9070_v38  ;;  %v12750_v26 = vpop.f32.mrb[251].mxu1 }
 0xa96   :  { %v9353_v21 = vadd.f32 %v9268_v24, %v8704_v17  ;;  %v9269_v50 = vadd.f32 %v19101_v44, %v9177_v12  ;;  %12846 = vmatpush1.bf16.msra.mxu1 %v12845_v35 }
 0xa97   :  { %12847 = vmatprep.subr.bf16.mxu1 %v14389_v53 }
 0xa98   :  { %v9354_v61 = vadd.f32 %v9269_v50, %v8705_v49  ;;  %v9438_v28 = vmax.f32 %v9353_v21, 0.0 }
 0xa99   :  { %v9075_v55 = vpop.f32.mrb[252].mxu1 }
 0xa9a   :  { %v9439_v22 = vmax.f32 %v9354_v61, 0.0  ;;  %v9178_v63 = vmul.f32 %v19089_v3, %v9075_v55  ;;  %v12753_v0 = vpop.f32.mrb[253].mxu1 }
 0xa9b   :  { %v9078_v4 = vpop.f32.mrb[254].mxu1 }
 0xa9c   :  { %v12848_v16 = vpack.c.bf16 %v9439_v22, %v9438_v28  ;;  %v9270_v46 = vadd.f32 %v19101_v44, %v9178_v63  ;;  %v9179_v40 = vmul.f32 %v19089_v3, %v9078_v4  ;;  %v12754_v31 = vpop.f32.mrb[255].mxu1 }
 0xa9e   :  { %v9355_v15 = vadd.f32 %v9270_v46, %v8706_v62  ;;  %v9271_v54 = vadd.f32 %v19101_v44, %v9179_v40  ;;  %12849 = vmatpush1.bf16.msra.mxu1 %v12848_v16 }
 0xa9f   :  { %12850 = vmatprep.subr.bf16.mxu1 %v14389_v53 }
 0xaa0   :  { %v9356_v43 = vadd.f32 %v9271_v54, %v8707_v47  ;;  %v9440_v23 = vmax.f32 %v9355_v15, 0.0 }
 0xaa1   :  { %v9083_v29 = vpop.f32.mrb[0].mxu1 }
 0xaa2   :  { %v9441_v13 = vmax.f32 %v9356_v43, 0.0  ;;  %v9180_v9 = vmul.f32 %v19089_v3, %v9083_v29  ;;  %v12757_v33 = vpop.f32.mrb[1].mxu1 }
 0xaa3   :  { %v9086_v52 = vpop.f32.mrb[2].mxu1 }
 0xaa4   :  { %v12851_v59 = vpack.c.bf16 %v9441_v13, %v9440_v23  ;;  %v9272_v32 = vadd.f32 %v19101_v44, %v9180_v9  ;;  %v12758_v30 = vpop.f32.mrb[3].mxu1 }
 0xaa6   :  { %v9357_v6 = vadd.f32 %v9272_v32, %v8708_v1  ;;  %12852 = vmatpush1.bf16.msra.mxu1 %v12851_v59 }
 0xaa7   :  { %9633 = vmatprep.subr.mxu1 %v19480_v20 }
 0xaa8   :  { %v9442_v53 = vmax.f32 %v9357_v6, 0.0 }
 0xaaa   :  { %9634 = vmatpush1.msra.mxu1 %v9442_v53 }
 0xaab   :  { %9658 = vmatmul.mubr.f32.vlgmr.msra.gmra.mrb[8].mxu1 %v9447_v36 }
 0xaad   :  { %v10807_v3 = vpop.f32.mrb[4].mxu1 }
 0xaae   :  { %v10808_v19 = vpop.f32.mrb[5].mxu1 }
 0xaaf   :  { %v10809_v51 = vadd.f32 %v10808_v19, %v10807_v3 }
 0xb2d   :  { %v10842_v5 = vpop.f32.mrb[6].mxu1 }
 0xb2e   :  { %v10843_v14 = vpop.f32.mrb[7].mxu1 }
 0xb2f   :  { %v10844_v42 = vadd.f32 %v10843_v14, %v10842_v5 }
 0xb31   :  { %v9590_v45 = vadd.f32 %v10844_v42, %v10809_v51 }
 0xb7e   :  { %v9659_v44 = vpop.f32.mrb[8].mxu1 }
 0xb7f   :  { %v9660_v7 = vadd.f32 %v9659_v44, %v9590_v45  ;;  %v9661_v2 = vpop.f32.mrb[9].mxu1 }
 0xb81   :  { %9663 = vst [vmem:[%s19292_s11] sm:$0xff] %v9660_v7 }

</bundles_post_ra>
